<compile_context>
chip_gen: v5e
topology: v5e:2x2
jax: 0.10.0
libtpu: 0.0.40
codegen_flags: <defaults>
</compile_context>

<pallas_src>
import functools

import jax
import jax.numpy as jnp
import numpy as np
from jax.experimental import pallas as pl
from jax.experimental.pallas import tpu as pltpu


# --------------------------------------------------------------------------
# One-time probe: does pltpu.roll lower correctly for a non-128-multiple lane
# width with jnp.roll(x, -1) semantics?  If not, fall back to dual selection
# matmuls for the column pooling.
# --------------------------------------------------------------------------
@functools.lru_cache(maxsize=1)
def _roll_pool_ok():
    def kern(x_ref, o_ref):
        x = x_ref[...]
        o_ref[...] = jnp.maximum(x, pltpu.roll(x, shift=x.shape[-1] - 1, axis=1))

    try:
        x = jnp.arange(8 * 224, dtype=jnp.float32).reshape(8, 224)
        got = pl.pallas_call(
            kern, out_shape=jax.ShapeDtypeStruct((8, 224), jnp.float32))(x)
        want = jnp.maximum(x, jnp.roll(x, -1, axis=1))
        return bool(jnp.array_equal(got, want))
    except Exception:
        return False


# --------------------------------------------------------------------------
# Fused conv3x3(pad=1, stride=1) + bias + ReLU + maxpool2x2 kernel
# --------------------------------------------------------------------------
def _conv_relu_pool_kernel(x_ref, w_ref, b_ref, se_ref, so_ref, o_ref, *, use_roll):
    # x_ref : ((H+2)*Cpad, W+2)  padded input image (row-major: padded row, channel)
    # w_ref : (3, Cout, 3*Cpad)  w_ref[dx, co, dy*Cpad+ci] = weight[co, ci, dy, dx]
    # b_ref : (Cout, 1)
    # se_ref: (W, W//2)          se[w, j] = 1 iff w == 2j     (even-column select)
    # so_ref: (W, W//2)          so[w, j] = 1 iff w == 2j + 1 (only used w/o roll)
    # o_ref : (RB, Cout, W//2)   pooled rows [j*RB, (j+1)*RB)
    _, wp2 = x_ref.shape
    rb, cout, wh = o_ref.shape
    w_out = wp2 - 2
    kdim = w_ref.shape[2]          # 3 * Cpad
    cpad = kdim // 3

    # Hoist loop-invariant loads (weights / bias / selectors) out of the row loop.
    w_taps = [w_ref[dx] for dx in range(3)]        # each (Cout, 3*Cpad)
    bias = b_ref[...]
    sel_e = se_ref[...]
    sel_o = None if use_roll else so_ref[...]

    ph_base = pl.program_id(1) * rb

    def body(rr, carry):
        top = 2 * (ph_base + rr)                   # first padded row of the pool window
        row_max = None
        for r in range(2):                         # the two conv rows feeding pooled row
            start = pl.multiple_of((top + r) * cpad, cpad)
            acc = jnp.zeros((cout, w_out), jnp.float32)
            for dx in range(3):
                # 3 consecutive padded rows, all channels, shifted by dx columns:
                # (3*Cpad, W) patch -> K = 3*Cin contraction on the MXU.
                patch = x_ref[pl.ds(start, kdim), pl.ds(dx, w_out)]
                acc = acc + jnp.dot(w_taps[dx], patch,
                                    preferred_element_type=jnp.float32)
            y = jnp.maximum(acc + bias, 0.0)                             # bias + ReLU
            row_max = y if row_max is None else jnp.maximum(row_max, y)  # pool over rows

        if use_roll:
            # pairwise column max via lane roll (XLU), then ONE even-column select.
            pm = jnp.maximum(row_max,
                             pltpu.roll(row_max, shift=w_out - 1, axis=1))
            pooled = jnp.dot(pm, sel_e, preferred_element_type=jnp.float32)
        else:
            pooled = jnp.maximum(
                jnp.dot(row_max, sel_e, preferred_element_type=jnp.float32),
                jnp.dot(row_max, sel_o, preferred_element_type=jnp.float32))

        o_ref[rr] = pooled.astype(o_ref.dtype)
        return carry

    jax.lax.fori_loop(0, rb, body, 0)


def _pool_select_mats(w_len):
    wh = w_len // 2
    rows = np.arange(w_len)[:, None]
    cols = np.arange(wh)[None, :]
    sel_e = jnp.asarray(rows == 2 * cols, jnp.float32)
    sel_o = jnp.asarray(rows == 2 * cols + 1, jnp.float32)
    return sel_e, sel_o


def conv_relu_pool(x_nhcw, w_oihw, b):
    """x_nhcw: (N, H, Cin, W); w_oihw: (Cout, Cin, 3, 3); b: (Cout,)
       -> (N, H//2, Cout, W//2)  (same NHCW ordering)."""
    n, h, cin, w = x_nhcw.shape
    cout = w_oihw.shape[0]
    hh, wh = h // 2, w // 2
    cpad = ((cin + 7) // 8) * 8           # pad channels to a sublane multiple

    # Glue: spatial zero-pad + channel pad, flatten (row, channel), repack weights.
    xp = jnp.pad(x_nhcw, ((0, 0), (1, 1), (0, cpad - cin), (1, 1)))
    xp = xp.reshape(n, (h + 2) * cpad, w + 2)
    wp = jnp.pad(w_oihw, ((0, 0), (0, cpad - cin), (0, 0), (0, 0)))
    wt = jnp.transpose(wp, (3, 0, 2, 1)).reshape(3, cout, 3 * cpad)   # (dx, co, dy*Cpad+ci)
    b2 = b.reshape(cout, 1)
    sel_e, sel_o = _pool_select_mats(w)

    rb = 1
    for cand in (14, 16, 8, 7, 4, 2, 1):   # pooled rows per grid step
        if hh % cand == 0:
            rb = cand
            break

    use_roll = _roll_pool_ok()

    out = pl.pallas_call(
        functools.partial(_conv_relu_pool_kernel, use_roll=use_roll),
        out_shape=jax.ShapeDtypeStruct((n, hh, cout, wh), jnp.float32),
        grid=(n, hh // rb),
        in_specs=[
            pl.BlockSpec((None, (h + 2) * cpad, w + 2), lambda i, j: (i, 0, 0)),
            pl.BlockSpec((3, cout, 3 * cpad), lambda i, j: (0, 0, 0)),
            pl.BlockSpec((cout, 1), lambda i, j: (0, 0)),
            pl.BlockSpec((w, wh), lambda i, j: (0, 0)),
            pl.BlockSpec((w, wh), lambda i, j: (0, 0)),
        ],
        out_specs=pl.BlockSpec((None, rb, cout, wh), lambda i, j: (i, j, 0, 0)),
        compiler_params=pltpu.CompilerParams(
            dimension_semantics=("parallel", "parallel")),
    )(xp, wt, b2, sel_e, sel_o)
    return out                                  # (N, H//2, Cout, W//2)


# --------------------------------------------------------------------------
# Fully-connected (Linear [+ ReLU]) kernel: (F-parallel, K-reduction) grid
# --------------------------------------------------------------------------
def _fc_kernel(x_ref, w_ref, b_ref, o_ref, acc_ref, *, apply_relu):
    kk = pl.program_id(1)

    @pl.when(kk == 0)
    def _():
        acc_ref[...] = jnp.zeros_like(acc_ref)

    acc_ref[...] += jnp.dot(x_ref[...], w_ref[...],
                            preferred_element_type=jnp.float32)

    @pl.when(kk == pl.num_programs(1) - 1)
    def _():
        y = acc_ref[...] + b_ref[...]
        if apply_relu:
            y = jnp.maximum(y, 0.0)
        o_ref[...] = y.astype(o_ref.dtype)


def linear(x, w, b, apply_relu):
    """x: (N, K); w: (K, F); b: (F,) -> (N, F)."""
    n, k_dim = x.shape
    f = w.shape[1]

    tk = k_dim
    for cand in (3584, 2048, 1024, 512, 256, 128):   # 3584 divides 128*28*28
        if k_dim % cand == 0:
            tk = cand
            break
    tf = 256 if (f % 256 == 0 and f > 256) else f

    return pl.pallas_call(
        functools.partial(_fc_kernel, apply_relu=apply_relu),
        out_shape=jax.ShapeDtypeStruct((n, f), jnp.float32),
        grid=(f // tf, k_dim // tk),
        in_specs=[
            pl.BlockSpec((n, tk), lambda ff, kk: (0, kk)),
            pl.BlockSpec((tk, tf), lambda ff, kk: (kk, ff)),
            pl.BlockSpec((1, tf), lambda ff, kk: (0, ff)),
        ],
        out_specs=pl.BlockSpec((n, tf), lambda ff, kk: (0, ff)),
        scratch_shapes=[pltpu.VMEM((n, tf), jnp.float32)],
        compiler_params=pltpu.CompilerParams(
            dimension_semantics=("parallel", "arbitrary"),
            vmem_limit_bytes=32 * 1024 * 1024),
    )(x, w, b.reshape(1, f))


# --------------------------------------------------------------------------
# Full CNNModel forward
# --------------------------------------------------------------------------
def cnn_forward(x_nchw, params):
    x = jnp.transpose(x_nchw, (0, 2, 1, 3))                            # NCHW -> (N,H,C,W)
    x = conv_relu_pool(x, params["conv1_w"], params["conv1_b"])        # (N, 112, 32, 112)
    x = conv_relu_pool(x, params["conv2_w"], params["conv2_b"])        # (N, 56, 64, 56)
    x = conv_relu_pool(x, params["conv3_w"], params["conv3_b"])        # (N, 28, 128, 28)
    n = x.shape[0]
    x = jnp.transpose(x, (0, 2, 1, 3)).reshape(n, 128 * 28 * 28)       # NCHW flatten (== torch .view)
    x = linear(x, params["fc1_w"], params["fc1_b"], apply_relu=True)   # (N, 512)
    x = linear(x, params["fc2_w"], params["fc2_b"], apply_relu=False)  # (N, num_classes)
    return x


# --------------------------------------------------------------------------
# Pure-JAX reference (for an end-to-end numerical check)
# --------------------------------------------------------------------------
def _reference_forward(x_nchw, params):
    hp = jax.lax.Precision.HIGHEST

    def conv_block(x, w, b):
        y = jax.lax.conv_general_dilated(
            x, w, window_strides=(1, 1), padding=((1, 1), (1, 1)),
            dimension_numbers=("NCHW", "OIHW", "NCHW"), precision=hp)
        y = jnp.maximum(y + b[None, :, None, None], 0.0)
        return jax.lax.reduce_window(y, -jnp.inf, jax.lax.max,
                                     (1, 1, 2, 2), (1, 1, 2, 2), "VALID")

    x = conv_block(x_nchw, params["conv1_w"], params["conv1_b"])
    x = conv_block(x, params["conv2_w"], params["conv2_b"])
    x = conv_block(x, params["conv3_w"], params["conv3_b"])
    x = x.reshape(x.shape[0], -1)
    x = jnp.maximum(jnp.dot(x, params["fc1_w"], precision=hp) + params["fc1_b"], 0.0)
    return jnp.dot(x, params["fc2_w"], precision=hp) + params["fc2_b"]


# --------------------------------------------------------------------------
# Deterministic synthetic parameters
# --------------------------------------------------------------------------
def init_params(key, num_classes):
    ks = jax.random.split(key, 10)

    def conv_p(kw, kb, cout, cin):
        scale = 1.0 / np.sqrt(cin * 9)
        w = jax.random.normal(kw, (cout, cin, 3, 3), jnp.float32) * scale
        b = jax.random.normal(kb, (cout,), jnp.float32) * 0.01
        return w, b

    def fc_p(kw, kb, fin, fout):
        scale = 1.0 / np.sqrt(fin)
        w = jax.random.normal(kw, (fin, fout), jnp.float32) * scale
        b = jax.random.normal(kb, (fout,), jnp.float32) * 0.01
        return w, b

    p = {}
    p["conv1_w"], p["conv1_b"] = conv_p(ks[0], ks[1], 32, 3)
    p["conv2_w"], p["conv2_b"] = conv_p(ks[2], ks[3], 64, 32)
    p["conv3_w"], p["conv3_b"] = conv_p(ks[4], ks[5], 128, 64)
    p["fc1_w"], p["fc1_b"] = fc_p(ks[6], ks[7], 128 * 28 * 28, 512)
    p["fc2_w"], p["fc2_b"] = fc_p(ks[8], ks[9], 512, num_classes)
    return p


if __name__ == "__main__":
    num_classes = 10
    batch = 2
    key = jax.random.PRNGKey(0)
    kx, kp = jax.random.split(key)

    # Input spatial size is fixed to 224x224 by fc1's 128*28*28 flatten.
    x = jax.random.normal(kx, (batch, 3, 224, 224), jnp.float32)
    params = init_params(kp, num_classes)

    _roll_pool_ok()                                   # warm the capability probe

    fwd = jax.jit(cnn_forward)
    out = jax.block_until_ready(fwd(x, params))
    assert out.shape == (batch, num_classes)
    assert bool(jnp.all(jnp.isfinite(out)))

    ref = jax.block_until_ready(jax.jit(_reference_forward)(x, params))
    err = float(jnp.max(jnp.abs(out - ref)))
    scale = float(jnp.max(jnp.abs(ref)))
    assert err <= 5e-2 * max(1.0, scale), f"mismatch vs reference: {err} (scale {scale})"

    print("KERNEL_OK")
</pallas_src>

<mosaic_0001>
module attributes {stable_mosaic.version = 11 : i64} {
  func.func @kern(%arg0: memref<8x224xf32, #tpu.memory_space<vmem>>, %arg1: memref<8x224xf32, #tpu.memory_space<vmem>>) attributes {dimension_semantics = [], scalar_prefetch = 0 : i64, scratch_operands = 0 : i64, tpu.core_type = #tpu.core_type<tc>} {
    %c0 = arith.constant 0 : index
    %c0_0 = arith.constant 0 : index
    %0 = vector.load %arg0[%c0, %c0_0] : memref<8x224xf32, #tpu.memory_space<vmem>>, vector<8x224xf32>
    %c223_i32 = arith.constant 223 : i32
    %1 = tpu.dynamic_rotate %0 by %c223_i32 dim 1 : vector<8x224xf32>, i32 -> vector<8x224xf32>
    %2 = arith.maximumf %0, %1 : vector<8x224xf32>
    %c0_1 = arith.constant 0 : index
    %c0_2 = arith.constant 0 : index
    %3 = vector.load %arg1[%c0_1, %c0_2] : memref<8x224xf32, #tpu.memory_space<vmem>>, vector<8x224xf32>
    tpu.vector_store %arg1[%c0_1, %c0_2], %2 {strides = array<i32>} : memref<8x224xf32, #tpu.memory_space<vmem>>, vector<8x224xf32>,
    return
  }
}

module attributes {stable_mosaic.version = 11 : i64} {
  func.func @_conv_relu_pool_kernel(%arg0: i32, %arg1: i32, %arg2: memref<1x1808x226xf32, #tpu.memory_space<vmem>>, %arg3: memref<3x32x24xf32, #tpu.memory_space<vmem>>, %arg4: memref<32x1xf32, #tpu.memory_space<vmem>>, %arg5: memref<224x112xf32, #tpu.memory_space<vmem>>, %arg6: memref<224x112xf32, #tpu.memory_space<vmem>>, %arg7: memref<1x14x32x112xf32, #tpu.memory_space<vmem>>) attributes {dimension_semantics = [#tpu.dimension_semantics<parallel>, #tpu.dimension_semantics<parallel>], iteration_bounds = array<i64: 2, 8>, scalar_prefetch = 0 : i64, scratch_operands = 0 : i64, tpu.core_type = #tpu.core_type<tc>, window_params = [{transform_indices = @transform_0, window_bounds = array<i64: 1, 1808, 226>}, {pipeline_mode = #tpu.pipeline_mode<synchronous>, transform_indices = @transform_1, window_bounds = array<i64: 3, 32, 24>}, {pipeline_mode = #tpu.pipeline_mode<synchronous>, transform_indices = @transform_2, window_bounds = array<i64: 32, 1>}, {pipeline_mode = #tpu.pipeline_mode<synchronous>, transform_indices = @transform_3, window_bounds = array<i64: 224, 112>}, {pipeline_mode = #tpu.pipeline_mode<synchronous>, transform_indices = @transform_4, window_bounds = array<i64: 224, 112>}, {transform_indices = @transform_5, window_bounds = array<i64: 1, 14, 32, 112>}]} {
    %c0 = arith.constant 0 : index
    %c0_0 = arith.constant 0 : index
    %c0_1 = arith.constant 0 : index
    %0 = vector.load %arg3[%c0, %c0_0, %c0_1] : memref<3x32x24xf32, #tpu.memory_space<vmem>>, vector<1x32x24xf32>
    %1 = vector.shape_cast %0 : vector<1x32x24xf32> to vector<32x24xf32>
    %c1 = arith.constant 1 : index
    %c0_2 = arith.constant 0 : index
    %c0_3 = arith.constant 0 : index
    %2 = vector.load %arg3[%c1, %c0_2, %c0_3] : memref<3x32x24xf32, #tpu.memory_space<vmem>>, vector<1x32x24xf32>
    %3 = vector.shape_cast %2 : vector<1x32x24xf32> to vector<32x24xf32>
    %c2 = arith.constant 2 : index
    %c0_4 = arith.constant 0 : index
    %c0_5 = arith.constant 0 : index
    %4 = vector.load %arg3[%c2, %c0_4, %c0_5] : memref<3x32x24xf32, #tpu.memory_space<vmem>>, vector<1x32x24xf32>
    %5 = vector.shape_cast %4 : vector<1x32x24xf32> to vector<32x24xf32>
    %c0_6 = arith.constant 0 : index
    %c0_7 = arith.constant 0 : index
    %6 = vector.load %arg4[%c0_6, %c0_7] : memref<32x1xf32, #tpu.memory_space<vmem>>, vector<32x1xf32>
    %c0_8 = arith.constant 0 : index
    %c0_9 = arith.constant 0 : index
    %7 = vector.load %arg5[%c0_8, %c0_9] : memref<224x112xf32, #tpu.memory_space<vmem>>, vector<224x112xf32>
    %c0_10 = arith.constant 0 : index
    %c0_11 = arith.constant 0 : index
    %8 = vector.load %arg6[%c0_10, %c0_11] : memref<224x112xf32, #tpu.memory_space<vmem>>, vector<224x112xf32>
    %c14_i32 = arith.constant 14 : i32
    %9 = arith.muli %arg1, %c14_i32 : i32
    %c0_i32 = arith.constant 0 : i32
    %c14_i32_12 = arith.constant 14 : i32
    %10 = arith.addi %c0_i32, %c14_i32_12 : i32
    %c1_i32 = arith.constant 1 : i32
    scf.for %arg8 = %c0_i32 to %10 step %c1_i32  : i32 {
      %11 = arith.addi %9, %arg8 : i32
      %c2_i32 = arith.constant 2 : i32
      %12 = arith.muli %c2_i32, %11 : i32
      %c0_i32_14 = arith.constant 0 : i32
      %13 = arith.addi %12, %c0_i32_14 : i32
      %c8_i32 = arith.constant 8 : i32
      %14 = arith.muli %13, %c8_i32 : i32
      %15 = tpu.assume_multiple %14, 8 : i32
      %cst = arith.constant 0.000000e+00 : f32
      %16 = vector.broadcast %cst : f32 to vector<32x224xf32>
      %c0_15 = arith.constant 0 : index
      %17 = arith.index_cast %15 : i32 to index
      %c0_16 = arith.constant 0 : index
      %18 = vector.load %arg2[%c0_15, %17, %c0_16] : memref<1x1808x226xf32, #tpu.memory_space<vmem>>, vector<1x24x224xf32>
      %19 = vector.shape_cast %18 : vector<1x24x224xf32> to vector<24x224xf32>
      %cst_17 = arith.constant dense<0.000000e+00> : vector<32x224xf32>
      %20 = tpu.matmul %1, %19, %cst_17 {dimension_numbers = #tpu.dot_dimension_numbers<[1], [0], [0], [1], [0, 0, 1, 1], [], []>} : vector<32x24xf32>, vector<24x224xf32>, vector<32x224xf32> -> vector<32x224xf32>
      %21 = arith.addf %16, %20 : vector<32x224xf32>
      %c0_18 = arith.constant 0 : index
      %22 = arith.index_cast %15 : i32 to index
      %c1_19 = arith.constant 1 : index
      %23 = vector.load %arg2[%c0_18, %22, %c1_19] : memref<1x1808x226xf32, #tpu.memory_space<vmem>>, vector<1x24x224xf32>
      %24 = vector.shape_cast %23 : vector<1x24x224xf32> to vector<24x224xf32>
      %cst_20 = arith.constant dense<0.000000e+00> : vector<32x224xf32>
      %25 = tpu.matmul %3, %24, %cst_20 {dimension_numbers = #tpu.dot_dimension_numbers<[1], [0], [0], [1], [0, 0, 1, 1], [], []>} : vector<32x24xf32>, vector<24x224xf32>, vector<32x224xf32> -> vector<32x224xf32>
      %26 = arith.addf %21, %25 : vector<32x224xf32>
      %c0_21 = arith.constant 0 : index
      %27 = arith.index_cast %15 : i32 to index
      %c2_22 = arith.constant 2 : index
      %28 = vector.load %arg2[%c0_21, %27, %c2_22] : memref<1x1808x226xf32, #tpu.memory_space<vmem>>, vector<1x24x224xf32>
      %29 = vector.shape_cast %28 : vector<1x24x224xf32> to vector<24x224xf32>
      %cst_23 = arith.constant dense<0.000000e+00> : vector<32x224xf32>
      %30 = tpu.matmul %5, %29, %cst_23 {dimension_numbers = #tpu.dot_dimension_numbers<[1], [0], [0], [1], [0, 0, 1, 1], [], []>} : vector<32x24xf32>, vector<24x224xf32>, vector<32x224xf32> -> vector<32x224xf32>
      %31 = arith.addf %26, %30 : vector<32x224xf32>
      %32 = vector.broadcast %6 : vector<32x1xf32> to vector<32x224xf32>
      %33 = arith.addf %31, %32 : vector<32x224xf32>
      %cst_24 = arith.constant 0.000000e+00 : f32
      %34 = vector.broadcast %cst_24 : f32 to vector<32x224xf32>
      %35 = arith.maximumf %33, %34 : vector<32x224xf32>
      %c1_i32_25 = arith.constant 1 : i32
      %36 = arith.addi %12, %c1_i32_25 : i32
      %c8_i32_26 = arith.constant 8 : i32
      %37 = arith.muli %36, %c8_i32_26 : i32
      %38 = tpu.assume_multiple %37, 8 : i32
      %cst_27 = arith.constant 0.000000e+00 : f32
      %39 = vector.broadcast %cst_27 : f32 to vector<32x224xf32>
      %c0_28 = arith.constant 0 : index
      %40 = arith.index_cast %38 : i32 to index
      %c0_29 = arith.constant 0 : index
      %41 = vector.load %arg2[%c0_28, %40, %c0_29] : memref<1x1808x226xf32, #tpu.memory_space<vmem>>, vector<1x24x224xf32>
      %42 = vector.shape_cast %41 : vector<1x24x224xf32> to vector<24x224xf32>
      %cst_30 = arith.constant dense<0.000000e+00> : vector<32x224xf32>
      %43 = tpu.matmul %1, %42, %cst_30 {dimension_numbers = #tpu.dot_dimension_numbers<[1], [0], [0], [1], [0, 0, 1, 1], [], []>} : vector<32x24xf32>, vector<24x224xf32>, vector<32x224xf32> -> vector<32x224xf32>
      %44 = arith.addf %39, %43 : vector<32x224xf32>
      %c0_31 = arith.constant 0 : index
      %45 = arith.index_cast %38 : i32 to index
      %c1_32 = arith.constant 1 : index
      %46 = vector.load %arg2[%c0_31, %45, %c1_32] : memref<1x1808x226xf32, #tpu.memory_space<vmem>>, vector<1x24x224xf32>
      %47 = vector.shape_cast %46 : vector<1x24x224xf32> to vector<24x224xf32>
      %cst_33 = arith.constant dense<0.000000e+00> : vector<32x224xf32>
      %48 = tpu.matmul %3, %47, %cst_33 {dimension_numbers = #tpu.dot_dimension_numbers<[1], [0], [0], [1], [0, 0, 1, 1], [], []>} : vector<32x24xf32>, vector<24x224xf32>, vector<32x224xf32> -> vector<32x224xf32>
      %49 = arith.addf %44, %48 : vector<32x224xf32>
      %c0_34 = arith.constant 0 : index
      %50 = arith.index_cast %38 : i32 to index
      %c2_35 = arith.constant 2 : index
      %51 = vector.load %arg2[%c0_34, %50, %c2_35] : memref<1x1808x226xf32, #tpu.memory_space<vmem>>, vector<1x24x224xf32>
      %52 = vector.shape_cast %51 : vector<1x24x224xf32> to vector<24x224xf32>
      %cst_36 = arith.constant dense<0.000000e+00> : vector<32x224xf32>
      %53 = tpu.matmul %5, %52, %cst_36 {dimension_numbers = #tpu.dot_dimension_numbers<[1], [0], [0], [1], [0, 0, 1, 1], [], []>} : vector<32x24xf32>, vector<24x224xf32>, vector<32x224xf32> -> vector<32x224xf32>
      %54 = arith.addf %49, %53 : vector<32x224xf32>
      %55 = vector.broadcast %6 : vector<32x1xf32> to vector<32x224xf32>
      %56 = arith.addf %54, %55 : vector<32x224xf32>
      %cst_37 = arith.constant 0.000000e+00 : f32
      %57 = vector.broadcast %cst_37 : f32 to vector<32x224xf32>
      %58 = arith.maximumf %56, %57 : vector<32x224xf32>
      %59 = arith.maximumf %35, %58 : vector<32x224xf32>
      %cst_38 = arith.constant dense<0.000000e+00> : vector<32x112xf32>
      %60 = tpu.matmul %59, %7, %cst_38 {dimension_numbers = #tpu.dot_dimension_numbers<[1], [0], [0], [1], [0, 0, 1, 1], [], []>} : vector<32x224xf32>, vector<224x112xf32>, vector<32x112xf32> -> vector<32x112xf32>
      %cst_39 = arith.constant dense<0.000000e+00> : vector<32x112xf32>
      %61 = tpu.matmul %59, %8, %cst_39 {dimension_numbers = #tpu.dot_dimension_numbers<[1], [0], [0], [1], [0, 0, 1, 1], [], []>} : vector<32x224xf32>, vector<224x112xf32>, vector<32x112xf32> -> vector<32x112xf32>
      %62 = arith.maximumf %60, %61 : vector<32x112xf32>
      %c0_40 = arith.constant 0 : index
      %63 = arith.index_cast %arg8 : i32 to index
      %c0_41 = arith.constant 0 : index
      %c0_42 = arith.constant 0 : index
      %64 = vector.load %arg7[%c0_40, %63, %c0_41, %c0_42] : memref<1x14x32x112xf32, #tpu.memory_space<vmem>>, vector<1x1x32x112xf32>
      %65 = vector.shape_cast %64 : vector<1x1x32x112xf32> to vector<32x112xf32>
      %66 = vector.shape_cast %62 : vector<32x112xf32> to vector<1x1x32x112xf32>
      tpu.vector_store %arg7[%c0_40, %63, %c0_41, %c0_42], %66 {strides = array<i32>} : memref<1x14x32x112xf32, #tpu.memory_space<vmem>>, vector<1x1x32x112xf32>,
    }
    %c14_i32_13 = arith.constant 14 : i32
    return
  }
  func.func @transform_0(%arg0: i32, %arg1: i32) -> (i32, i32, i32) {
    %c0_i32 = arith.constant 0 : i32
    %c0_i32_0 = arith.constant 0 : i32
    %c0_i32_1 = arith.constant 0 : i32
    return %arg0, %c0_i32, %c0_i32_0 : i32, i32, i32
  }
  func.func @transform_1(%arg0: i32, %arg1: i32) -> (i32, i32, i32) {
    %c0_i32 = arith.constant 0 : i32
    %c0_i32_0 = arith.constant 0 : i32
    %c0_i32_1 = arith.constant 0 : i32
    %c0_i32_2 = arith.constant 0 : i32
    return %c0_i32, %c0_i32_0, %c0_i32_1 : i32, i32, i32
  }
  func.func @transform_2(%arg0: i32, %arg1: i32) -> (i32, i32) {
    %c0_i32 = arith.constant 0 : i32
    %c0_i32_0 = arith.constant 0 : i32
    %c0_i32_1 = arith.constant 0 : i32
    return %c0_i32, %c0_i32_0 : i32, i32
  }
  func.func @transform_3(%arg0: i32, %arg1: i32) -> (i32, i32) {
    %c0_i32 = arith.constant 0 : i32
    %c0_i32_0 = arith.constant 0 : i32
    %c0_i32_1 = arith.constant 0 : i32
    return %c0_i32, %c0_i32_0 : i32, i32
  }
  func.func @transform_4(%arg0: i32, %arg1: i32) -> (i32, i32) {
    %c0_i32 = arith.constant 0 : i32
    %c0_i32_0 = arith.constant 0 : i32
    %c0_i32_1 = arith.constant 0 : i32
    return %c0_i32, %c0_i32_0 : i32, i32
  }
  func.func @transform_5(%arg0: i32, %arg1: i32) -> (i32, i32, i32, i32) {
    %c0_i32 = arith.constant 0 : i32
    %c0_i32_0 = arith.constant 0 : i32
    %c0_i32_1 = arith.constant 0 : i32
    return %arg0, %arg1, %c0_i32, %c0_i32_0 : i32, i32, i32, i32
  }
}

module attributes {stable_mosaic.version = 11 : i64} {
  func.func @_conv_relu_pool_kernel(%arg0: i32, %arg1: i32, %arg2: memref<1x3648x114xf32, #tpu.memory_space<vmem>>, %arg3: memref<3x64x96xf32, #tpu.memory_space<vmem>>, %arg4: memref<64x1xf32, #tpu.memory_space<vmem>>, %arg5: memref<112x56xf32, #tpu.memory_space<vmem>>, %arg6: memref<112x56xf32, #tpu.memory_space<vmem>>, %arg7: memref<1x14x64x56xf32, #tpu.memory_space<vmem>>) attributes {dimension_semantics = [#tpu.dimension_semantics<parallel>, #tpu.dimension_semantics<parallel>], iteration_bounds = array<i64: 2, 4>, scalar_prefetch = 0 : i64, scratch_operands = 0 : i64, tpu.core_type = #tpu.core_type<tc>, window_params = [{transform_indices = @transform_0, window_bounds = array<i64: 1, 3648, 114>}, {pipeline_mode = #tpu.pipeline_mode<synchronous>, transform_indices = @transform_1, window_bounds = array<i64: 3, 64, 96>}, {pipeline_mode = #tpu.pipeline_mode<synchronous>, transform_indices = @transform_2, window_bounds = array<i64: 64, 1>}, {pipeline_mode = #tpu.pipeline_mode<synchronous>, transform_indices = @transform_3, window_bounds = array<i64: 112, 56>}, {pipeline_mode = #tpu.pipeline_mode<synchronous>, transform_indices = @transform_4, window_bounds = array<i64: 112, 56>}, {transform_indices = @transform_5, window_bounds = array<i64: 1, 14, 64, 56>}]} {
    %c0 = arith.constant 0 : index
    %c0_0 = arith.constant 0 : index
    %c0_1 = arith.constant 0 : index
    %0 = vector.load %arg3[%c0, %c0_0, %c0_1] : memref<3x64x96xf32, #tpu.memory_space<vmem>>, vector<1x64x96xf32>
    %1 = vector.shape_cast %0 : vector<1x64x96xf32> to vector<64x96xf32>
    %c1 = arith.constant 1 : index
    %c0_2 = arith.constant 0 : index
    %c0_3 = arith.constant 0 : index
    %2 = vector.load %arg3[%c1, %c0_2, %c0_3] : memref<3x64x96xf32, #tpu.memory_space<vmem>>, vector<1x64x96xf32>
    %3 = vector.shape_cast %2 : vector<1x64x96xf32> to vector<64x96xf32>
    %c2 = arith.constant 2 : index
    %c0_4 = arith.constant 0 : index
    %c0_5 = arith.constant 0 : index
    %4 = vector.load %arg3[%c2, %c0_4, %c0_5] : memref<3x64x96xf32, #tpu.memory_space<vmem>>, vector<1x64x96xf32>
    %5 = vector.shape_cast %4 : vector<1x64x96xf32> to vector<64x96xf32>
    %c0_6 = arith.constant 0 : index
    %c0_7 = arith.constant 0 : index
    %6 = vector.load %arg4[%c0_6, %c0_7] : memref<64x1xf32, #tpu.memory_space<vmem>>, vector<64x1xf32>
    %c0_8 = arith.constant 0 : index
    %c0_9 = arith.constant 0 : index
    %7 = vector.load %arg5[%c0_8, %c0_9] : memref<112x56xf32, #tpu.memory_space<vmem>>, vector<112x56xf32>
    %c0_10 = arith.constant 0 : index
    %c0_11 = arith.constant 0 : index
    %8 = vector.load %arg6[%c0_10, %c0_11] : memref<112x56xf32, #tpu.memory_space<vmem>>, vector<112x56xf32>
    %c14_i32 = arith.constant 14 : i32
    %9 = arith.muli %arg1, %c14_i32 : i32
    %c0_i32 = arith.constant 0 : i32
    %c14_i32_12 = arith.constant 14 : i32
    %10 = arith.addi %c0_i32, %c14_i32_12 : i32
    %c1_i32 = arith.constant 1 : i32
    scf.for %arg8 = %c0_i32 to %10 step %c1_i32  : i32 {
      %11 = arith.addi %9, %arg8 : i32
      %c2_i32 = arith.constant 2 : i32
      %12 = arith.muli %c2_i32, %11 : i32
      %c0_i32_14 = arith.constant 0 : i32
      %13 = arith.addi %12, %c0_i32_14 : i32
      %c32_i32 = arith.constant 32 : i32
      %14 = arith.muli %13, %c32_i32 : i32
      %15 = tpu.assume_multiple %14, 32 : i32
      %cst = arith.constant 0.000000e+00 : f32
      %16 = vector.broadcast %cst : f32 to vector<64x112xf32>
      %c0_15 = arith.constant 0 : index
      %17 = arith.index_cast %15 : i32 to index
      %c0_16 = arith.constant 0 : index
      %18 = vector.load %arg2[%c0_15, %17, %c0_16] : memref<1x3648x114xf32, #tpu.memory_space<vmem>>, vector<1x96x112xf32>
      %19 = vector.shape_cast %18 : vector<1x96x112xf32> to vector<96x112xf32>
      %cst_17 = arith.constant dense<0.000000e+00> : vector<64x112xf32>
      %20 = tpu.matmul %1, %19, %cst_17 {dimension_numbers = #tpu.dot_dimension_numbers<[1], [0], [0], [1], [0, 0, 1, 1], [], []>} : vector<64x96xf32>, vector<96x112xf32>, vector<64x112xf32> -> vector<64x112xf32>
      %21 = arith.addf %16, %20 : vector<64x112xf32>
      %c0_18 = arith.constant 0 : index
      %22 = arith.index_cast %15 : i32 to index
      %c1_19 = arith.constant 1 : index
      %23 = vector.load %arg2[%c0_18, %22, %c1_19] : memref<1x3648x114xf32, #tpu.memory_space<vmem>>, vector<1x96x112xf32>
      %24 = vector.shape_cast %23 : vector<1x96x112xf32> to vector<96x112xf32>
      %cst_20 = arith.constant dense<0.000000e+00> : vector<64x112xf32>
      %25 = tpu.matmul %3, %24, %cst_20 {dimension_numbers = #tpu.dot_dimension_numbers<[1], [0], [0], [1], [0, 0, 1, 1], [], []>} : vector<64x96xf32>, vector<96x112xf32>, vector<64x112xf32> -> vector<64x112xf32>
      %26 = arith.addf %21, %25 : vector<64x112xf32>
      %c0_21 = arith.constant 0 : index
      %27 = arith.index_cast %15 : i32 to index
      %c2_22 = arith.constant 2 : index
      %28 = vector.load %arg2[%c0_21, %27, %c2_22] : memref<1x3648x114xf32, #tpu.memory_space<vmem>>, vector<1x96x112xf32>
      %29 = vector.shape_cast %28 : vector<1x96x112xf32> to vector<96x112xf32>
      %cst_23 = arith.constant dense<0.000000e+00> : vector<64x112xf32>
      %30 = tpu.matmul %5, %29, %cst_23 {dimension_numbers = #tpu.dot_dimension_numbers<[1], [0], [0], [1], [0, 0, 1, 1], [], []>} : vector<64x96xf32>, vector<96x112xf32>, vector<64x112xf32> -> vector<64x112xf32>
      %31 = arith.addf %26, %30 : vector<64x112xf32>
      %32 = vector.broadcast %6 : vector<64x1xf32> to vector<64x112xf32>
      %33 = arith.addf %31, %32 : vector<64x112xf32>
      %cst_24 = arith.constant 0.000000e+00 : f32
      %34 = vector.broadcast %cst_24 : f32 to vector<64x112xf32>
      %35 = arith.maximumf %33, %34 : vector<64x112xf32>
      %c1_i32_25 = arith.constant 1 : i32
      %36 = arith.addi %12, %c1_i32_25 : i32
      %c32_i32_26 = arith.constant 32 : i32
      %37 = arith.muli %36, %c32_i32_26 : i32
      %38 = tpu.assume_multiple %37, 32 : i32
      %cst_27 = arith.constant 0.000000e+00 : f32
      %39 = vector.broadcast %cst_27 : f32 to vector<64x112xf32>
      %c0_28 = arith.constant 0 : index
      %40 = arith.index_cast %38 : i32 to index
      %c0_29 = arith.constant 0 : index
      %41 = vector.load %arg2[%c0_28, %40, %c0_29] : memref<1x3648x114xf32, #tpu.memory_space<vmem>>, vector<1x96x112xf32>
      %42 = vector.shape_cast %41 : vector<1x96x112xf32> to vector<96x112xf32>
      %cst_30 = arith.constant dense<0.000000e+00> : vector<64x112xf32>
      %43 = tpu.matmul %1, %42, %cst_30 {dimension_numbers = #tpu.dot_dimension_numbers<[1], [0], [0], [1], [0, 0, 1, 1], [], []>} : vector<64x96xf32>, vector<96x112xf32>, vector<64x112xf32> -> vector<64x112xf32>
      %44 = arith.addf %39, %43 : vector<64x112xf32>
      %c0_31 = arith.constant 0 : index
      %45 = arith.index_cast %38 : i32 to index
      %c1_32 = arith.constant 1 : index
      %46 = vector.load %arg2[%c0_31, %45, %c1_32] : memref<1x3648x114xf32, #tpu.memory_space<vmem>>, vector<1x96x112xf32>
      %47 = vector.shape_cast %46 : vector<1x96x112xf32> to vector<96x112xf32>
      %cst_33 = arith.constant dense<0.000000e+00> : vector<64x112xf32>
      %48 = tpu.matmul %3, %47, %cst_33 {dimension_numbers = #tpu.dot_dimension_numbers<[1], [0], [0], [1], [0, 0, 1, 1], [], []>} : vector<64x96xf32>, vector<96x112xf32>, vector<64x112xf32> -> vector<64x112xf32>
      %49 = arith.addf %44, %48 : vector<64x112xf32>
      %c0_34 = arith.constant 0 : index
      %50 = arith.index_cast %38 : i32 to index
      %c2_35 = arith.constant 2 : index
      %51 = vector.load %arg2[%c0_34, %50, %c2_35] : memref<1x3648x114xf32, #tpu.memory_space<vmem>>, vector<1x96x112xf32>
      %52 = vector.shape_cast %51 : vector<1x96x112xf32> to vector<96x112xf32>
      %cst_36 = arith.constant dense<0.000000e+00> : vector<64x112xf32>
      %53 = tpu.matmul %5, %52, %cst_36 {dimension_numbers = #tpu.dot_dimension_numbers<[1], [0], [0], [1], [0, 0, 1, 1], [], []>} : vector<64x96xf32>, vector<96x112xf32>, vector<64x112xf32> -> vector<64x112xf32>
      %54 = arith.addf %49, %53 : vector<64x112xf32>
      %55 = vector.broadcast %6 : vector<64x1xf32> to vector<64x112xf32>
      %56 = arith.addf %54, %55 : vector<64x112xf32>
      %cst_37 = arith.constant 0.000000e+00 : f32
      %57 = vector.broadcast %cst_37 : f32 to vector<64x112xf32>
      %58 = arith.maximumf %56, %57 : vector<64x112xf32>
      %59 = arith.maximumf %35, %58 : vector<64x112xf32>
      %cst_38 = arith.constant dense<0.000000e+00> : vector<64x56xf32>
      %60 = tpu.matmul %59, %7, %cst_38 {dimension_numbers = #tpu.dot_dimension_numbers<[1], [0], [0], [1], [0, 0, 1, 1], [], []>} : vector<64x112xf32>, vector<112x56xf32>, vector<64x56xf32> -> vector<64x56xf32>
      %cst_39 = arith.constant dense<0.000000e+00> : vector<64x56xf32>
      %61 = tpu.matmul %59, %8, %cst_39 {dimension_numbers = #tpu.dot_dimension_numbers<[1], [0], [0], [1], [0, 0, 1, 1], [], []>} : vector<64x112xf32>, vector<112x56xf32>, vector<64x56xf32> -> vector<64x56xf32>
      %62 = arith.maximumf %60, %61 : vector<64x56xf32>
      %c0_40 = arith.constant 0 : index
      %63 = arith.index_cast %arg8 : i32 to index
      %c0_41 = arith.constant 0 : index
      %c0_42 = arith.constant 0 : index
      %64 = vector.load %arg7[%c0_40, %63, %c0_41, %c0_42] : memref<1x14x64x56xf32, #tpu.memory_space<vmem>>, vector<1x1x64x56xf32>
      %65 = vector.shape_cast %64 : vector<1x1x64x56xf32> to vector<64x56xf32>
      %66 = vector.shape_cast %62 : vector<64x56xf32> to vector<1x1x64x56xf32>
      tpu.vector_store %arg7[%c0_40, %63, %c0_41, %c0_42], %66 {strides = array<i32>} : memref<1x14x64x56xf32, #tpu.memory_space<vmem>>, vector<1x1x64x56xf32>,
    }
    %c14_i32_13 = arith.constant 14 : i32
    return
  }
  func.func @transform_0(%arg0: i32, %arg1: i32) -> (i32, i32, i32) {
    %c0_i32 = arith.constant 0 : i32
    %c0_i32_0 = arith.constant 0 : i32
    %c0_i32_1 = arith.constant 0 : i32
    return %arg0, %c0_i32, %c0_i32_0 : i32, i32, i32
  }
  func.func @transform_1(%arg0: i32, %arg1: i32) -> (i32, i32, i32) {
    %c0_i32 = arith.constant 0 : i32
    %c0_i32_0 = arith.constant 0 : i32
    %c0_i32_1 = arith.constant 0 : i32
    %c0_i32_2 = arith.constant 0 : i32
    return %c0_i32, %c0_i32_0, %c0_i32_1 : i32, i32, i32
  }
  func.func @transform_2(%arg0: i32, %arg1: i32) -> (i32, i32) {
    %c0_i32 = arith.constant 0 : i32
    %c0_i32_0 = arith.constant 0 : i32
    %c0_i32_1 = arith.constant 0 : i32
    return %c0_i32, %c0_i32_0 : i32, i32
  }
  func.func @transform_3(%arg0: i32, %arg1: i32) -> (i32, i32) {
    %c0_i32 = arith.constant 0 : i32
    %c0_i32_0 = arith.constant 0 : i32
    %c0_i32_1 = arith.constant 0 : i32
    return %c0_i32, %c0_i32_0 : i32, i32
  }
  func.func @transform_4(%arg0: i32, %arg1: i32) -> (i32, i32) {
    %c0_i32 = arith.constant 0 : i32
    %c0_i32_0 = arith.constant 0 : i32
    %c0_i32_1 = arith.constant 0 : i32
    return %c0_i32, %c0_i32_0 : i32, i32
  }
  func.func @transform_5(%arg0: i32, %arg1: i32) -> (i32, i32, i32, i32) {
    %c0_i32 = arith.constant 0 : i32
    %c0_i32_0 = arith.constant 0 : i32
    %c0_i32_1 = arith.constant 0 : i32
    return %arg0, %arg1, %c0_i32, %c0_i32_0 : i32, i32, i32, i32
  }
}

module attributes {stable_mosaic.version = 11 : i64} {
  func.func @_conv_relu_pool_kernel(%arg0: i32, %arg1: i32, %arg2: memref<1x3712x58xf32, #tpu.memory_space<vmem>>, %arg3: memref<3x128x192xf32, #tpu.memory_space<vmem>>, %arg4: memref<128x1xf32, #tpu.memory_space<vmem>>, %arg5: memref<56x28xf32, #tpu.memory_space<vmem>>, %arg6: memref<56x28xf32, #tpu.memory_space<vmem>>, %arg7: memref<1x14x128x28xf32, #tpu.memory_space<vmem>>) attributes {dimension_semantics = [#tpu.dimension_semantics<parallel>, #tpu.dimension_semantics<parallel>], iteration_bounds = array<i64: 2, 2>, scalar_prefetch = 0 : i64, scratch_operands = 0 : i64, tpu.core_type = #tpu.core_type<tc>, window_params = [{transform_indices = @transform_0, window_bounds = array<i64: 1, 3712, 58>}, {pipeline_mode = #tpu.pipeline_mode<synchronous>, transform_indices = @transform_1, window_bounds = array<i64: 3, 128, 192>}, {pipeline_mode = #tpu.pipeline_mode<synchronous>, transform_indices = @transform_2, window_bounds = array<i64: 128, 1>}, {pipeline_mode = #tpu.pipeline_mode<synchronous>, transform_indices = @transform_3, window_bounds = array<i64: 56, 28>}, {pipeline_mode = #tpu.pipeline_mode<synchronous>, transform_indices = @transform_4, window_bounds = array<i64: 56, 28>}, {transform_indices = @transform_5, window_bounds = array<i64: 1, 14, 128, 28>}]} {
    %c0 = arith.constant 0 : index
    %c0_0 = arith.constant 0 : index
    %c0_1 = arith.constant 0 : index
    %0 = vector.load %arg3[%c0, %c0_0, %c0_1] : memref<3x128x192xf32, #tpu.memory_space<vmem>>, vector<1x128x192xf32>
    %1 = vector.shape_cast %0 : vector<1x128x192xf32> to vector<128x192xf32>
    %c1 = arith.constant 1 : index
    %c0_2 = arith.constant 0 : index
    %c0_3 = arith.constant 0 : index
    %2 = vector.load %arg3[%c1, %c0_2, %c0_3] : memref<3x128x192xf32, #tpu.memory_space<vmem>>, vector<1x128x192xf32>
    %3 = vector.shape_cast %2 : vector<1x128x192xf32> to vector<128x192xf32>
    %c2 = arith.constant 2 : index
    %c0_4 = arith.constant 0 : index
    %c0_5 = arith.constant 0 : index
    %4 = vector.load %arg3[%c2, %c0_4, %c0_5] : memref<3x128x192xf32, #tpu.memory_space<vmem>>, vector<1x128x192xf32>
    %5 = vector.shape_cast %4 : vector<1x128x192xf32> to vector<128x192xf32>
    %c0_6 = arith.constant 0 : index
    %c0_7 = arith.constant 0 : index
    %6 = vector.load %arg4[%c0_6, %c0_7] : memref<128x1xf32, #tpu.memory_space<vmem>>, vector<128x1xf32>
    %c0_8 = arith.constant 0 : index
    %c0_9 = arith.constant 0 : index
    %7 = vector.load %arg5[%c0_8, %c0_9] : memref<56x28xf32, #tpu.memory_space<vmem>>, vector<56x28xf32>
    %c0_10 = arith.constant 0 : index
    %c0_11 = arith.constant 0 : index
    %8 = vector.load %arg6[%c0_10, %c0_11] : memref<56x28xf32, #tpu.memory_space<vmem>>, vector<56x28xf32>
    %c14_i32 = arith.constant 14 : i32
    %9 = arith.muli %arg1, %c14_i32 : i32
    %c0_i32 = arith.constant 0 : i32
    %c14_i32_12 = arith.constant 14 : i32
    %10 = arith.addi %c0_i32, %c14_i32_12 : i32
    %c1_i32 = arith.constant 1 : i32
    scf.for %arg8 = %c0_i32 to %10 step %c1_i32  : i32 {
      %11 = arith.addi %9, %arg8 : i32
      %c2_i32 = arith.constant 2 : i32
      %12 = arith.muli %c2_i32, %11 : i32
      %c0_i32_14 = arith.constant 0 : i32
      %13 = arith.addi %12, %c0_i32_14 : i32
      %c64_i32 = arith.constant 64 : i32
      %14 = arith.muli %13, %c64_i32 : i32
      %15 = tpu.assume_multiple %14, 64 : i32
      %cst = arith.constant 0.000000e+00 : f32
      %16 = vector.broadcast %cst : f32 to vector<128x56xf32>
      %c0_15 = arith.constant 0 : index
      %17 = arith.index_cast %15 : i32 to index
      %c0_16 = arith.constant 0 : index
      %18 = vector.load %arg2[%c0_15, %17, %c0_16] : memref<1x3712x58xf32, #tpu.memory_space<vmem>>, vector<1x192x56xf32>
      %19 = vector.shape_cast %18 : vector<1x192x56xf32> to vector<192x56xf32>
      %cst_17 = arith.constant dense<0.000000e+00> : vector<128x56xf32>
      %20 = tpu.matmul %1, %19, %cst_17 {dimension_numbers = #tpu.dot_dimension_numbers<[1], [0], [0], [1], [0, 0, 1, 1], [], []>} : vector<128x192xf32>, vector<192x56xf32>, vector<128x56xf32> -> vector<128x56xf32>
      %21 = arith.addf %16, %20 : vector<128x56xf32>
      %c0_18 = arith.constant 0 : index
      %22 = arith.index_cast %15 : i32 to index
      %c1_19 = arith.constant 1 : index
      %23 = vector.load %arg2[%c0_18, %22, %c1_19] : memref<1x3712x58xf32, #tpu.memory_space<vmem>>, vector<1x192x56xf32>
      %24 = vector.shape_cast %23 : vector<1x192x56xf32> to vector<192x56xf32>
      %cst_20 = arith.constant dense<0.000000e+00> : vector<128x56xf32>
      %25 = tpu.matmul %3, %24, %cst_20 {dimension_numbers = #tpu.dot_dimension_numbers<[1], [0], [0], [1], [0, 0, 1, 1], [], []>} : vector<128x192xf32>, vector<192x56xf32>, vector<128x56xf32> -> vector<128x56xf32>
      %26 = arith.addf %21, %25 : vector<128x56xf32>
      %c0_21 = arith.constant 0 : index
      %27 = arith.index_cast %15 : i32 to index
      %c2_22 = arith.constant 2 : index
      %28 = vector.load %arg2[%c0_21, %27, %c2_22] : memref<1x3712x58xf32, #tpu.memory_space<vmem>>, vector<1x192x56xf32>
      %29 = vector.shape_cast %28 : vector<1x192x56xf32> to vector<192x56xf32>
      %cst_23 = arith.constant dense<0.000000e+00> : vector<128x56xf32>
      %30 = tpu.matmul %5, %29, %cst_23 {dimension_numbers = #tpu.dot_dimension_numbers<[1], [0], [0], [1], [0, 0, 1, 1], [], []>} : vector<128x192xf32>, vector<192x56xf32>, vector<128x56xf32> -> vector<128x56xf32>
      %31 = arith.addf %26, %30 : vector<128x56xf32>
      %32 = vector.broadcast %6 : vector<128x1xf32> to vector<128x56xf32>
      %33 = arith.addf %31, %32 : vector<128x56xf32>
      %cst_24 = arith.constant 0.000000e+00 : f32
      %34 = vector.broadcast %cst_24 : f32 to vector<128x56xf32>
      %35 = arith.maximumf %33, %34 : vector<128x56xf32>
      %c1_i32_25 = arith.constant 1 : i32
      %36 = arith.addi %12, %c1_i32_25 : i32
      %c64_i32_26 = arith.constant 64 : i32
      %37 = arith.muli %36, %c64_i32_26 : i32
      %38 = tpu.assume_multiple %37, 64 : i32
      %cst_27 = arith.constant 0.000000e+00 : f32
      %39 = vector.broadcast %cst_27 : f32 to vector<128x56xf32>
      %c0_28 = arith.constant 0 : index
      %40 = arith.index_cast %38 : i32 to index
      %c0_29 = arith.constant 0 : index
      %41 = vector.load %arg2[%c0_28, %40, %c0_29] : memref<1x3712x58xf32, #tpu.memory_space<vmem>>, vector<1x192x56xf32>
      %42 = vector.shape_cast %41 : vector<1x192x56xf32> to vector<192x56xf32>
      %cst_30 = arith.constant dense<0.000000e+00> : vector<128x56xf32>
      %43 = tpu.matmul %1, %42, %cst_30 {dimension_numbers = #tpu.dot_dimension_numbers<[1], [0], [0], [1], [0, 0, 1, 1], [], []>} : vector<128x192xf32>, vector<192x56xf32>, vector<128x56xf32> -> vector<128x56xf32>
      %44 = arith.addf %39, %43 : vector<128x56xf32>
      %c0_31 = arith.constant 0 : index
      %45 = arith.index_cast %38 : i32 to index
      %c1_32 = arith.constant 1 : index
      %46 = vector.load %arg2[%c0_31, %45, %c1_32] : memref<1x3712x58xf32, #tpu.memory_space<vmem>>, vector<1x192x56xf32>
      %47 = vector.shape_cast %46 : vector<1x192x56xf32> to vector<192x56xf32>
      %cst_33 = arith.constant dense<0.000000e+00> : vector<128x56xf32>
      %48 = tpu.matmul %3, %47, %cst_33 {dimension_numbers = #tpu.dot_dimension_numbers<[1], [0], [0], [1], [0, 0, 1, 1], [], []>} : vector<128x192xf32>, vector<192x56xf32>, vector<128x56xf32> -> vector<128x56xf32>
      %49 = arith.addf %44, %48 : vector<128x56xf32>
      %c0_34 = arith.constant 0 : index
      %50 = arith.index_cast %38 : i32 to index
      %c2_35 = arith.constant 2 : index
      %51 = vector.load %arg2[%c0_34, %50, %c2_35] : memref<1x3712x58xf32, #tpu.memory_space<vmem>>, vector<1x192x56xf32>
      %52 = vector.shape_cast %51 : vector<1x192x56xf32> to vector<192x56xf32>
      %cst_36 = arith.constant dense<0.000000e+00> : vector<128x56xf32>
      %53 = tpu.matmul %5, %52, %cst_36 {dimension_numbers = #tpu.dot_dimension_numbers<[1], [0], [0], [1], [0, 0, 1, 1], [], []>} : vector<128x192xf32>, vector<192x56xf32>, vector<128x56xf32> -> vector<128x56xf32>
      %54 = arith.addf %49, %53 : vector<128x56xf32>
      %55 = vector.broadcast %6 : vector<128x1xf32> to vector<128x56xf32>
      %56 = arith.addf %54, %55 : vector<128x56xf32>
      %cst_37 = arith.constant 0.000000e+00 : f32
      %57 = vector.broadcast %cst_37 : f32 to vector<128x56xf32>
      %58 = arith.maximumf %56, %57 : vector<128x56xf32>
      %59 = arith.maximumf %35, %58 : vector<128x56xf32>
      %cst_38 = arith.constant dense<0.000000e+00> : vector<128x28xf32>
      %60 = tpu.matmul %59, %7, %cst_38 {dimension_numbers = #tpu.dot_dimension_numbers<[1], [0], [0], [1], [0, 0, 1, 1], [], []>} : vector<128x56xf32>, vector<56x28xf32>, vector<128x28xf32> -> vector<128x28xf32>
      %cst_39 = arith.constant dense<0.000000e+00> : vector<128x28xf32>
      %61 = tpu.matmul %59, %8, %cst_39 {dimension_numbers = #tpu.dot_dimension_numbers<[1], [0], [0], [1], [0, 0, 1, 1], [], []>} : vector<128x56xf32>, vector<56x28xf32>, vector<128x28xf32> -> vector<128x28xf32>
      %62 = arith.maximumf %60, %61 : vector<128x28xf32>
      %c0_40 = arith.constant 0 : index
      %63 = arith.index_cast %arg8 : i32 to index
      %c0_41 = arith.constant 0 : index
      %c0_42 = arith.constant 0 : index
      %64 = vector.load %arg7[%c0_40, %63, %c0_41, %c0_42] : memref<1x14x128x28xf32, #tpu.memory_space<vmem>>, vector<1x1x128x28xf32>
      %65 = vector.shape_cast %64 : vector<1x1x128x28xf32> to vector<128x28xf32>
      %66 = vector.shape_cast %62 : vector<128x28xf32> to vector<1x1x128x28xf32>
      tpu.vector_store %arg7[%c0_40, %63, %c0_41, %c0_42], %66 {strides = array<i32>} : memref<1x14x128x28xf32, #tpu.memory_space<vmem>>, vector<1x1x128x28xf32>,
    }
    %c14_i32_13 = arith.constant 14 : i32
    return
  }
  func.func @transform_0(%arg0: i32, %arg1: i32) -> (i32, i32, i32) {
    %c0_i32 = arith.constant 0 : i32
    %c0_i32_0 = arith.constant 0 : i32
    %c0_i32_1 = arith.constant 0 : i32
    return %arg0, %c0_i32, %c0_i32_0 : i32, i32, i32
  }
  func.func @transform_1(%arg0: i32, %arg1: i32) -> (i32, i32, i32) {
    %c0_i32 = arith.constant 0 : i32
    %c0_i32_0 = arith.constant 0 : i32
    %c0_i32_1 = arith.constant 0 : i32
    %c0_i32_2 = arith.constant 0 : i32
    return %c0_i32, %c0_i32_0, %c0_i32_1 : i32, i32, i32
  }
  func.func @transform_2(%arg0: i32, %arg1: i32) -> (i32, i32) {
    %c0_i32 = arith.constant 0 : i32
    %c0_i32_0 = arith.constant 0 : i32
    %c0_i32_1 = arith.constant 0 : i32
    return %c0_i32, %c0_i32_0 : i32, i32
  }
  func.func @transform_3(%arg0: i32, %arg1: i32) -> (i32, i32) {
    %c0_i32 = arith.constant 0 : i32
    %c0_i32_0 = arith.constant 0 : i32
    %c0_i32_1 = arith.constant 0 : i32
    return %c0_i32, %c0_i32_0 : i32, i32
  }
  func.func @transform_4(%arg0: i32, %arg1: i32) -> (i32, i32) {
    %c0_i32 = arith.constant 0 : i32
    %c0_i32_0 = arith.constant 0 : i32
    %c0_i32_1 = arith.constant 0 : i32
    return %c0_i32, %c0_i32_0 : i32, i32
  }
  func.func @transform_5(%arg0: i32, %arg1: i32) -> (i32, i32, i32, i32) {
    %c0_i32 = arith.constant 0 : i32
    %c0_i32_0 = arith.constant 0 : i32
    %c0_i32_1 = arith.constant 0 : i32
    return %arg0, %arg1, %c0_i32, %c0_i32_0 : i32, i32, i32, i32
  }
}

module attributes {stable_mosaic.version = 11 : i64} {
  func.func @_fc_kernel(%arg0: i32, %arg1: i32, %arg2: memref<2x3584xf32, #tpu.memory_space<vmem>>, %arg3: memref<3584x256xf32, #tpu.memory_space<vmem>>, %arg4: memref<1x256xf32, #tpu.memory_space<vmem>>, %arg5: memref<2x256xf32, #tpu.memory_space<vmem>>, %arg6: memref<2x256xf32, #tpu.memory_space<vmem>>) attributes {dimension_semantics = [#tpu.dimension_semantics<parallel>, #tpu.dimension_semantics<arbitrary>], iteration_bounds = array<i64: 2, 28>, scalar_prefetch = 0 : i64, scratch_operands = 1 : i64, tpu.core_type = #tpu.core_type<tc>, window_params = [{transform_indices = @transform_0, window_bounds = array<i64: 2, 3584>}, {transform_indices = @transform_1, window_bounds = array<i64: 3584, 256>}, {transform_indices = @transform_2, window_bounds = array<i64: 1, 256>}, {transform_indices = @transform_3, window_bounds = array<i64: 2, 256>}]} {
    %c0_i32 = arith.constant 0 : i32
    %0 = arith.cmpi eq, %arg1, %c0_i32 : i32
    %1 = arith.extui %0 : i1 to i32
    %c0_i32_0 = arith.constant 0 : i32
    %2 = arith.cmpi ne, %1, %c0_i32_0 : i32
    scf.if %2 {
      %cst_9 = arith.constant 0.000000e+00 : f32
      %12 = vector.broadcast %cst_9 : f32 to vector<2x256xf32>
      %c0_10 = arith.constant 0 : index
      %c0_11 = arith.constant 0 : index
      %13 = vector.load %arg6[%c0_10, %c0_11] : memref<2x256xf32, #tpu.memory_space<vmem>>, vector<2x256xf32>
      tpu.vector_store %arg6[%c0_10, %c0_11], %12 {strides = array<i32>} : memref<2x256xf32, #tpu.memory_space<vmem>>, vector<2x256xf32>,
    } else {
    }
    %c0 = arith.constant 0 : index
    %c0_1 = arith.constant 0 : index
    %3 = vector.load %arg6[%c0, %c0_1] : memref<2x256xf32, #tpu.memory_space<vmem>>, vector<2x256xf32>
    %c0_2 = arith.constant 0 : index
    %c0_3 = arith.constant 0 : index
    %4 = vector.load %arg2[%c0_2, %c0_3] : memref<2x3584xf32, #tpu.memory_space<vmem>>, vector<2x3584xf32>
    %c0_4 = arith.constant 0 : index
    %c0_5 = arith.constant 0 : index
    %5 = vector.load %arg3[%c0_4, %c0_5] : memref<3584x256xf32, #tpu.memory_space<vmem>>, vector<3584x256xf32>
    %cst = arith.constant dense<0.000000e+00> : vector<2x256xf32>
    %6 = tpu.matmul %4, %5, %cst {dimension_numbers = #tpu.dot_dimension_numbers<[1], [0], [0], [1], [0, 0, 1, 1], [], []>} : vector<2x3584xf32>, vector<3584x256xf32>, vector<2x256xf32> -> vector<2x256xf32>
    %7 = arith.addf %3, %6 : vector<2x256xf32>
    %c0_6 = arith.constant 0 : index
    %c0_7 = arith.constant 0 : index
    %8 = vector.load %arg6[%c0_6, %c0_7] : memref<2x256xf32, #tpu.memory_space<vmem>>, vector<2x256xf32>
    tpu.vector_store %arg6[%c0_6, %c0_7], %7 {strides = array<i32>} : memref<2x256xf32, #tpu.memory_space<vmem>>, vector<2x256xf32>,
    %c27_i32 = arith.constant 27 : i32
    %9 = arith.cmpi eq, %arg1, %c27_i32 : i32
    %10 = arith.extui %9 : i1 to i32
    %c0_i32_8 = arith.constant 0 : i32
    %11 = arith.cmpi ne, %10, %c0_i32_8 : i32
    scf.if %11 {
      %c0_9 = arith.constant 0 : index
      %c0_10 = arith.constant 0 : index
      %12 = vector.load %arg6[%c0_9, %c0_10] : memref<2x256xf32, #tpu.memory_space<vmem>>, vector<2x256xf32>
      %c0_11 = arith.constant 0 : index
      %c0_12 = arith.constant 0 : index
      %13 = vector.load %arg4[%c0_11, %c0_12] : memref<1x256xf32, #tpu.memory_space<vmem>>, vector<1x256xf32>
      %14 = vector.broadcast %13 : vector<1x256xf32> to vector<2x256xf32>
      %15 = arith.addf %12, %14 : vector<2x256xf32>
      %cst_13 = arith.constant 0.000000e+00 : f32
      %16 = vector.broadcast %cst_13 : f32 to vector<2x256xf32>
      %17 = arith.maximumf %15, %16 : vector<2x256xf32>
      %c0_14 = arith.constant 0 : index
      %c0_15 = arith.constant 0 : index
      %18 = vector.load %arg5[%c0_14, %c0_15] : memref<2x256xf32, #tpu.memory_space<vmem>>, vector<2x256xf32>
      tpu.vector_store %arg5[%c0_14, %c0_15], %17 {strides = array<i32>} : memref<2x256xf32, #tpu.memory_space<vmem>>, vector<2x256xf32>,
    } else {
    }
    return
  }
  func.func @transform_0(%arg0: i32, %arg1: i32) -> (i32, i32) {
    %c0_i32 = arith.constant 0 : i32
    %c0_i32_0 = arith.constant 0 : i32
    return %c0_i32, %arg1 : i32, i32
  }
  func.func @transform_1(%arg0: i32, %arg1: i32) -> (i32, i32) {
    %c0_i32 = arith.constant 0 : i32
    return %arg1, %arg0 : i32, i32
  }
  func.func @transform_2(%arg0: i32, %arg1: i32) -> (i32, i32) {
    %c0_i32 = arith.constant 0 : i32
    %c0_i32_0 = arith.constant 0 : i32
    return %c0_i32, %arg0 : i32, i32
  }
  func.func @transform_3(%arg0: i32, %arg1: i32) -> (i32, i32) {
    %c0_i32 = arith.constant 0 : i32
    %c0_i32_0 = arith.constant 0 : i32
    return %c0_i32, %arg0 : i32, i32
  }
}

module attributes {stable_mosaic.version = 11 : i64} {
  func.func @_fc_kernel(%arg0: i32, %arg1: i32, %arg2: memref<2x512xf32, #tpu.memory_space<vmem>>, %arg3: memref<512x10xf32, #tpu.memory_space<vmem>>, %arg4: memref<1x10xf32, #tpu.memory_space<vmem>>, %arg5: memref<2x10xf32, #tpu.memory_space<vmem>>, %arg6: memref<2x10xf32, #tpu.memory_space<vmem>>) attributes {dimension_semantics = [#tpu.dimension_semantics<parallel>, #tpu.dimension_semantics<arbitrary>], iteration_bounds = array<i64: 1, 1>, scalar_prefetch = 0 : i64, scratch_operands = 1 : i64, tpu.core_type = #tpu.core_type<tc>, window_params = [{transform_indices = @transform_0, window_bounds = array<i64: 2, 512>}, {transform_indices = @transform_1, window_bounds = array<i64: 512, 10>}, {transform_indices = @transform_2, window_bounds = array<i64: 1, 10>}, {transform_indices = @transform_3, window_bounds = array<i64: 2, 10>}]} {
    %c0_i32 = arith.constant 0 : i32
    %0 = arith.cmpi eq, %arg1, %c0_i32 : i32
    %1 = arith.extui %0 : i1 to i32
    %c0_i32_0 = arith.constant 0 : i32
    %2 = arith.cmpi ne, %1, %c0_i32_0 : i32
    scf.if %2 {
      %cst_10 = arith.constant 0.000000e+00 : f32
      %12 = vector.broadcast %cst_10 : f32 to vector<2x10xf32>
      %c0_11 = arith.constant 0 : index
      %c0_12 = arith.constant 0 : index
      %13 = vector.load %arg6[%c0_11, %c0_12] : memref<2x10xf32, #tpu.memory_space<vmem>>, vector<2x10xf32>
      tpu.vector_store %arg6[%c0_11, %c0_12], %12 {strides = array<i32>} : memref<2x10xf32, #tpu.memory_space<vmem>>, vector<2x10xf32>,
    } else {
    }
    %c0 = arith.constant 0 : index
    %c0_1 = arith.constant 0 : index
    %3 = vector.load %arg6[%c0, %c0_1] : memref<2x10xf32, #tpu.memory_space<vmem>>, vector<2x10xf32>
    %c0_2 = arith.constant 0 : index
    %c0_3 = arith.constant 0 : index
    %4 = vector.load %arg2[%c0_2, %c0_3] : memref<2x512xf32, #tpu.memory_space<vmem>>, vector<2x512xf32>
    %c0_4 = arith.constant 0 : index
    %c0_5 = arith.constant 0 : index
    %5 = vector.load %arg3[%c0_4, %c0_5] : memref<512x10xf32, #tpu.memory_space<vmem>>, vector<512x10xf32>
    %cst = arith.constant dense<0.000000e+00> : vector<2x10xf32>
    %6 = tpu.matmul %4, %5, %cst {dimension_numbers = #tpu.dot_dimension_numbers<[1], [0], [0], [1], [0, 0, 1, 1], [], []>} : vector<2x512xf32>, vector<512x10xf32>, vector<2x10xf32> -> vector<2x10xf32>
    %7 = arith.addf %3, %6 : vector<2x10xf32>
    %c0_6 = arith.constant 0 : index
    %c0_7 = arith.constant 0 : index
    %8 = vector.load %arg6[%c0_6, %c0_7] : memref<2x10xf32, #tpu.memory_space<vmem>>, vector<2x10xf32>
    tpu.vector_store %arg6[%c0_6, %c0_7], %7 {strides = array<i32>} : memref<2x10xf32, #tpu.memory_space<vmem>>, vector<2x10xf32>,
    %c0_i32_8 = arith.constant 0 : i32
    %9 = arith.cmpi eq, %arg1, %c0_i32_8 : i32
    %10 = arith.extui %9 : i1 to i32
    %c0_i32_9 = arith.constant 0 : i32
    %11 = arith.cmpi ne, %10, %c0_i32_9 : i32
    scf.if %11 {
      %c0_10 = arith.constant 0 : index
      %c0_11 = arith.constant 0 : index
      %12 = vector.load %arg6[%c0_10, %c0_11] : memref<2x10xf32, #tpu.memory_space<vmem>>, vector<2x10xf32>
      %c0_12 = arith.constant 0 : index
      %c0_13 = arith.constant 0 : index
      %13 = vector.load %arg4[%c0_12, %c0_13] : memref<1x10xf32, #tpu.memory_space<vmem>>, vector<1x10xf32>
      %14 = vector.broadcast %13 : vector<1x10xf32> to vector<2x10xf32>
      %15 = arith.addf %12, %14 : vector<2x10xf32>
      %c0_14 = arith.constant 0 : index
      %c0_15 = arith.constant 0 : index
      %16 = vector.load %arg5[%c0_14, %c0_15] : memref<2x10xf32, #tpu.memory_space<vmem>>, vector<2x10xf32>
      tpu.vector_store %arg5[%c0_14, %c0_15], %15 {strides = array<i32>} : memref<2x10xf32, #tpu.memory_space<vmem>>, vector<2x10xf32>,
    } else {
    }
    return
  }
  func.func @transform_0(%arg0: i32, %arg1: i32) -> (i32, i32) {
    %c0_i32 = arith.constant 0 : i32
    %c0_i32_0 = arith.constant 0 : i32
    return %c0_i32, %arg1 : i32, i32
  }
  func.func @transform_1(%arg0: i32, %arg1: i32) -> (i32, i32) {
    %c0_i32 = arith.constant 0 : i32
    return %arg1, %arg0 : i32, i32
  }
  func.func @transform_2(%arg0: i32, %arg1: i32) -> (i32, i32) {
    %c0_i32 = arith.constant 0 : i32
    %c0_i32_0 = arith.constant 0 : i32
    return %c0_i32, %arg0 : i32, i32
  }
  func.func @transform_3(%arg0: i32, %arg1: i32) -> (i32, i32) {
    %c0_i32 = arith.constant 0 : i32
    %c0_i32_0 = arith.constant 0 : i32
    return %c0_i32, %arg0 : i32, i32
  }
}

</mosaic_0001>

<bundles_post_ra>
// kernel: tpu_custom_call.1
= control target key start
LH: loop header
LB: loop body
LE: loop exit
PB: predicated region body
PF: predicated region fallthrough
CT: control target
= control target key end

     0   :  { %6 = vsyncpa [#allocation3], 0  ;;  %s137_s0 = inlined_call_operand.hbm [shape: f32[8,224], index: 0, kind: input, shape index: {}]   ;;  %s138_s1 = inlined_call_operand.hbm [shape: f32[8,224], index: 1, kind: output, shape index: {}]  }
   0x1   :  { %7 = vsyncpa [#allocation4], 0  ;;  %s13_s8 = sshll.u32 %s137_s0, 4  ;;  %s117_s9 = smov [#allocation2]   ;;  %s14_s8 = int_to_ptr.hbm [resolvable:$true] %s13_s8 }
   0x2   :  { %s15_s10 = sshll.u32 %s117_s9, 4  ;;  %s16_s10 = int_to_ptr.vmem [resolvable:$true] %s15_s10 }
   0x3   :  { %18 = dma.hbm_to_vmem [thread:$0]  %s14_s8, 256, %s16_s10, [#allocation3]  }
   0x4   :  { %113 = dma.done.wait [#allocation3], 256  }
   0x5   :  { %114 = vsyncadd [#allocation3], 4294967040  ;;  %v23_v0 = vld [vmem:[#allocation2] sm:$0xff]  ;;  %s118_s11 = smov 96   ;;  %s119_s12 = smov 127   ;;  %v24_v1 = vld [vmem:[#allocation2 + $0x8] sm:$0xff] }
   0x6   :  { %26 = vrot.lane.b32.xlu0 %v23_v0, %s118_s11  ;;  %vm25_vm0 = vcmask 1048320   ;;  %vm35_vm1 = vcmask 1039360   ;;  %s120_s0 = smov [#allocation5]   ;;  %s51_s16 = sshll.u32 %s138_s1, 4  ;;  %vm42_vm2 = vcmask 785408   ;;  %s52_s16 = int_to_ptr.hbm [resolvable:$true] %s51_s16 }
   0x7   :  { %s49_s13 = sshll.u32 %s120_s0, 4  ;;  %s50_s13 = int_to_ptr.vmem [resolvable:$true] %s49_s13 }
   0xe   :  { %31 = vrot.lane.b32.xlu0 %v23_v0, %s119_s12 }
  0x78   :  { %v27_v2 = vpop.permute.xlu0 %26 }
  0x79   :  { %v28_v3 = vsel %vm25_vm0, %v27_v2, %v24_v1 }
  0x7a   :  { %33 = vrot.lane.b32.xlu1 %v28_v3, %s119_s12 }
  0x80   :  { %v32_v4 = vpop.permute.xlu0 %31 }
  0xec   :  { %v34_v5 = vpop.permute.xlu1 %33 }
  0xed   :  { %v40_v6 = vmax.f32 %v24_v1, %v34_v5  ;;  %v36_v7 = vsel %vm35_vm1, %v32_v4, %v34_v5 }
  0xee   :  { %v39_v8 = vmax.f32 %v23_v0, %v36_v7 }
  0xef   :  { %43 = vst.msk [vmem:[#allocation5 + $0x8] sm:$0xff] %vm42_vm2, %v40_v6 }
  0xf0   :  { %41 = vst [vmem:[#allocation5] sm:$0xff] %v39_v8 }
  0xf1   :  { %54 = dma.vmem_to_hbm [thread:$0]  %s50_s13, 256, %s52_s16, [#allocation4]  }
  0xf2   :  { %115 = dma.done.wait [#allocation4], 256  }
  0xf3   :  { %116 = vsyncadd [#allocation4], 4294967040 }
  0xf4   :  { %59 = vsyncpa [#allocation3], 1 }
  0xf5   :  { %60 = vsyncpa [#allocation4], 1 }

// kernel: cnn_forward.5
= control target key start
LH: loop header
LB: loop body
LE: loop exit
PB: predicated region body
PF: predicated region fallthrough
CT: control target
= control target key end

     0   :  { %s1442_s18 = smov 0   ;;  %s1444_s19 = smov 0   ;;  %s2121_s0 = inlined_call_operand.vmem [shape: f32[2,1808,226], index: 0, kind: input, shape index: {}]   ;;  %s2122_s1 = inlined_call_operand.vmem [shape: f32[3,32,24], index: 1, kind: input, shape index: {}]   ;;  %s2123_s2 = inlined_call_operand.vmem [shape: f32[32,1], index: 2, kind: input, shape index: {}]   ;;  %s2124_s3 = inlined_call_operand.vmem [shape: f32[224,112], index: 3, kind: input, shape index: {}]   ;;  %s2125_s4 = inlined_call_operand.vmem [shape: f32[224,112], index: 4, kind: input, shape index: {}]   ;;  %s2126_s5 = inlined_call_operand.vmem [shape: f32[2,112,32,112], index: 5, kind: output, shape index: {}]  }
   0x1   :  { %s1446_s20 = smov 0   ;;  %s1448_s21 = smov 0  }
   0x2   :  { %s1450_s22 = smov 0  }
   0x3 LB: > { %s24_s23 = sadd.s32 1, %s1395_s20  ;;  %s27_s24 = sadd.s32 1, %s1399_s21  ;;  %s1403_s22 = sphi %s1450_s22, %s15_s22   ;;  %s1399_s21 = sphi %s1448_s21, %s2276_s21   ;;  %s1395_s20 = sphi %s1446_s20, %s2275_s20   ;;  %s1391_s19 = sphi %s1444_s19, %s2274_s19   ;;  %s1387_s18 = sphi %s1442_s18, %s2273_s18  }
   0x4   : > { %p25_p0 = scmp.ge.s32.totalorder %s24_s23, 8  ;;  %p1162_p1 = scmp.ge.s32.totalorder %s1403_s22, 1 }
   0x5   : > { %p201_p2 = scmp.lt.s32.totalorder %s1403_s22, 17 }
   0x6   : > { %s2278_s23 = smov (%p25_p0, %s24_s23), 0  ;;  %s2280_s24 = smov (!%p25_p0, %s27_s24), %s1399_s21 }
   0x7   : > { %p202_p3 = pnand %p1162_p1, %p201_p2  ;;  %p29_p4 = scmp.ge.s32.totalorder %s2280_s24, 2 }
   0x8   : > { %p234_p5 = scmp.lt.s32.totalorder (!%p202_p3), %s1391_s19, 1  ;;  %s1472_s25 = smul.u32 (!%p202_p3), 14, %s1387_s18 }
   0x9   : > { %s2282_s24 = smov (%p29_p4, %s2280_s24), 0  ;;  %205 = sbr.rel (%p202_p3) target bundleno = 575 (0x23f), region = 40 }
   0xa   : > { %p242_p6 = scmp.lt.s32.totalorder (!%p202_p3), %s1472_s25, 111  ;;  %s1846_s17 = smov (!%p202_p3), 0  }
   0xe   : > { %v1477_v0 = vld [vmem:[%s2122_s1] sm:$0xff]  ;;  %v1482_v1 = vld [vmem:[%s2122_s1 + $0x8] sm:$0xff]  ;;  %v1487_v2 = vld [vmem:[%s2122_s1 + $0x10] sm:$0xff]  ;;  %s2284_s19 = smov (!%p234_p5, %s1391_s19), 1 }
   0xf   : > { %2145 = vst [vmem:[#allocation2_spill] sm:$0xff] %v1477_v0  ;;  %v1492_v3 = vld [vmem:[%s2122_s1 + $0x18] sm:$0xff]  ;;  %v1497_v4 = vld [vmem:[%s2122_s1 + $0x20] sm:$0xff]  ;;  %v1502_v5 = vld [vmem:[%s2122_s1 + $0x28] sm:$0xff]  ;;  %s1245_s7 = smul.u32 3616, %s2284_s19 }
  0x10   : > { %2146 = vst [vmem:[#allocation3_spill] sm:$0xff] %v1482_v1  ;;  %v1507_v6 = vld [vmem:[%s2122_s1 + $0x30] sm:$0xff]  ;;  %v1512_v7 = vld [vmem:[%s2122_s1 + $0x38] sm:$0xff]  ;;  %v1517_v8 = vld [vmem:[%s2122_s1 + $0x40] sm:$0xff]  ;;  %s243_s14 = scalar_select %p242_p6, %s1472_s25, 111 }
  0x11   : > { %2147 = vst [vmem:[#allocation4_spill] sm:$0xff] %v1487_v2  ;;  %v1523_v9 = vld [vmem:[%s2122_s1 + $0x48] sm:$0xff]  ;;  %v1528_v10 = vld [vmem:[%s2122_s1 + $0x50] sm:$0xff]  ;;  %v1533_v11 = vld [vmem:[%s2122_s1 + $0x58] sm:$0xff]  ;;  %s1569_s30 = scalar_lea.vmem %s2121_s0, %s1245_s7  ;;  %s1246_s6 = smul.u32 448, %s2284_s19 }
  0x12   : > { %2148 = vst [vmem:[#allocation5_spill] sm:$0xff] %v1492_v3  ;;  %v1538_v12 = vld [vmem:[%s2123_s2] sm:$0xff]  ;;  %v1543_v13 = vld [vmem:[%s2123_s2 + $0x8] sm:$0xff]  ;;  %v1548_v14 = vld [vmem:[%s2123_s2 + $0x10] sm:$0xff]  ;;  %s1164_s15 = sshll.u32 %s243_s14, 2 }
  0x13   : > { %2149 = vst [vmem:[#allocation6_spill] sm:$0xff] %v1497_v4  ;;  %v1554_v15 = vld [vmem:[%s2123_s2 + $0x18] sm:$0xff]  ;;  %v1559_v16 = vld [vmem:[%s2124_s3] sm:$0xff]  ;;  %v1564_v17 = vld [vmem:[%s2124_s3 + $0x8] sm:$0xff]  ;;  %s246_s27 = sadd.s32 %s1246_s6, %s1164_s15 }
  0x14   : > { %2150 = vst [vmem:[#allocation7_spill] sm:$0xff] %v1502_v5  ;;  %v1574_v18 = vld [vmem:[%s2124_s3 + $0x10] sm:$0xff]  ;;  %v1579_v19 = vld [vmem:[%s2124_s3 + $0x18] sm:$0xff]  ;;  %v1584_v20 = vld [vmem:[%s2124_s3 + $0x20] sm:$0xff]  ;;  %s1165_s11 = sshll.u32 %s246_s27, 3 }
  0x15   : > { %2151 = vst [vmem:[#allocation8_spill] sm:$0xff] %v1507_v6  ;;  %v1589_v21 = vld [vmem:[%s2124_s3 + $0x28] sm:$0xff]  ;;  %v1594_v22 = vld [vmem:[%s2124_s3 + $0x30] sm:$0xff]  ;;  %v1599_v23 = vld [vmem:[%s2124_s3 + $0x38] sm:$0xff]  ;;  %s1634_s18 = scalar_lea.vmem %s2126_s5, %s1165_s11 }
  0x16   : > { %2152 = vst [vmem:[#allocation9_spill] sm:$0xff] %v1512_v7  ;;  %v1604_v24 = vld [vmem:[%s2124_s3 + $0x40] sm:$0xff]  ;;  %v1609_v25 = vld [vmem:[%s2124_s3 + $0x48] sm:$0xff]  ;;  %v1614_v26 = vld [vmem:[%s2124_s3 + $0x50] sm:$0xff] }
  0x17   : > { %2153 = vst [vmem:[#allocation10_spill] sm:$0xff] %v1517_v8  ;;  %v1619_v27 = vld [vmem:[%s2124_s3 + $0x58] sm:$0xff]  ;;  %v1624_v28 = vld [vmem:[%s2124_s3 + $0x60] sm:$0xff]  ;;  %v1629_v29 = vld [vmem:[%s2124_s3 + $0x68] sm:$0xff] }
  0x18   : > { %2154 = vst [vmem:[#allocation11_spill] sm:$0xff] %v1523_v9  ;;  %v1639_v30 = vld [vmem:[%s2124_s3 + $0x70] sm:$0xff]  ;;  %v1644_v31 = vld [vmem:[%s2124_s3 + $0x78] sm:$0xff]  ;;  %v1649_v32 = vld [vmem:[%s2124_s3 + $0x80] sm:$0xff] }
  0x19   : > { %2155 = vst [vmem:[#allocation12_spill] sm:$0xff] %v1528_v10  ;;  %v1654_v33 = vld [vmem:[%s2124_s3 + $0x88] sm:$0xff]  ;;  %v1659_v34 = vld [vmem:[%s2124_s3 + $0x90] sm:$0xff]  ;;  %v1664_v35 = vld [vmem:[%s2124_s3 + $0x98] sm:$0xff] }
  0x1a   : > { %2156 = vst [vmem:[#allocation13_spill] sm:$0xff] %v1533_v11  ;;  %v1669_v36 = vld [vmem:[%s2124_s3 + $0xa0] sm:$0xff]  ;;  %v1674_v37 = vld [vmem:[%s2124_s3 + $0xa8] sm:$0xff]  ;;  %v1679_v38 = vld [vmem:[%s2124_s3 + $0xb0] sm:$0xff] }
  0x1b   : > { %2157 = vst [vmem:[#allocation14_spill] sm:$0xff] %v1538_v12  ;;  %v1684_v39 = vld [vmem:[%s2124_s3 + $0xb8] sm:$0xff]  ;;  %v1689_v40 = vld [vmem:[%s2124_s3 + $0xc0] sm:$0xff]  ;;  %v1694_v41 = vld [vmem:[%s2124_s3 + $0xc8] sm:$0xff] }
  0x1c   : > { %2158 = vst [vmem:[#allocation15_spill] sm:$0xff] %v1543_v13  ;;  %v1699_v42 = vld [vmem:[%s2124_s3 + $0xd0] sm:$0xff]  ;;  %v1704_v43 = vld [vmem:[%s2124_s3 + $0xd8] sm:$0xff]  ;;  %v1709_v44 = vld [vmem:[%s2125_s4] sm:$0xff] }
  0x1d   : > { %2159 = vst [vmem:[#allocation16_spill] sm:$0xff] %v1548_v14  ;;  %v1714_v45 = vld [vmem:[%s2125_s4 + $0x8] sm:$0xff]  ;;  %v1719_v46 = vld [vmem:[%s2125_s4 + $0x10] sm:$0xff]  ;;  %v1724_v47 = vld [vmem:[%s2125_s4 + $0x18] sm:$0xff] }
  0x1e   : > { %2160 = vst [vmem:[#allocation17_spill] sm:$0xff] %v1554_v15  ;;  %v1729_v48 = vld [vmem:[%s2125_s4 + $0x20] sm:$0xff]  ;;  %v1734_v49 = vld [vmem:[%s2125_s4 + $0x28] sm:$0xff]  ;;  %v1739_v50 = vld [vmem:[%s2125_s4 + $0x30] sm:$0xff] }
  0x1f   : > { %2161 = vst [vmem:[#allocation18_spill] sm:$0xff] %v1559_v16  ;;  %v1744_v51 = vld [vmem:[%s2125_s4 + $0x38] sm:$0xff]  ;;  %v1749_v52 = vld [vmem:[%s2125_s4 + $0x40] sm:$0xff]  ;;  %v1754_v53 = vld [vmem:[%s2125_s4 + $0x48] sm:$0xff] }
  0x20   : > { %2162 = vst [vmem:[#allocation19_spill] sm:$0xff] %v1564_v17  ;;  %v1759_v54 = vld [vmem:[%s2125_s4 + $0x50] sm:$0xff]  ;;  %v1764_v55 = vld [vmem:[%s2125_s4 + $0x58] sm:$0xff]  ;;  %v1769_v56 = vld [vmem:[%s2125_s4 + $0x60] sm:$0xff] }
  0x21   : > { %2163 = vst [vmem:[#allocation20_spill] sm:$0xff] %v1574_v18  ;;  %v1774_v57 = vld [vmem:[%s2125_s4 + $0x68] sm:$0xff]  ;;  %v1779_v58 = vld [vmem:[%s2125_s4 + $0x70] sm:$0xff]  ;;  %v1784_v59 = vld [vmem:[%s2125_s4 + $0x78] sm:$0xff] }
  0x22   : > { %2164 = vst [vmem:[#allocation21_spill] sm:$0xff] %v1579_v19  ;;  %v1789_v60 = vld [vmem:[%s2125_s4 + $0x80] sm:$0xff]  ;;  %v1794_v61 = vld [vmem:[%s2125_s4 + $0x88] sm:$0xff]  ;;  %v1799_v62 = vld [vmem:[%s2125_s4 + $0x90] sm:$0xff] }
  0x23   : > { %2165 = vst [vmem:[#allocation22_spill] sm:$0xff] %v1584_v20  ;;  %v1804_v63 = vld [vmem:[%s2125_s4 + $0x98] sm:$0xff]  ;;  %v1809_v16 = vld [vmem:[%s2125_s4 + $0xa0] sm:$0xff]  ;;  %v1814_v17 = vld [vmem:[%s2125_s4 + $0xa8] sm:$0xff] }
  0x24   : > { %2166 = vst [vmem:[#allocation23_spill] sm:$0xff] %v1589_v21  ;;  %v1819_v18 = vld [vmem:[%s2125_s4 + $0xb0] sm:$0xff]  ;;  %v1824_v19 = vld [vmem:[%s2125_s4 + $0xb8] sm:$0xff]  ;;  %v1829_v20 = vld [vmem:[%s2125_s4 + $0xc0] sm:$0xff] }
  0x25   : > { %2167 = vst [vmem:[#allocation24_spill] sm:$0xff] %v1594_v22  ;;  %v1834_v21 = vld [vmem:[%s2125_s4 + $0xc8] sm:$0xff] }
  0x26   : > { %2168 = vst [vmem:[#allocation25_spill] sm:$0xff] %v1599_v23 }
  0x27   : > { %2169 = vst [vmem:[#allocation26_spill] sm:$0xff] %v1604_v24 }
  0x28   : > { %2170 = vst [vmem:[#allocation27_spill] sm:$0xff] %v1609_v25 }
  0x29   : > { %2171 = vst [vmem:[#allocation28_spill] sm:$0xff] %v1614_v26 }
  0x2a   : > { %2172 = vst [vmem:[#allocation29_spill] sm:$0xff] %v1619_v27 }
  0x2b   : > { %2173 = vst [vmem:[#allocation30_spill] sm:$0xff] %v1624_v28 }
  0x2c   : > { %2174 = vst [vmem:[#allocation31_spill] sm:$0xff] %v1629_v29 }
  0x2d   : > { %2175 = vst [vmem:[#allocation32_spill] sm:$0xff] %v1639_v30 }
  0x2e   : > { %2176 = vst [vmem:[#allocation33_spill] sm:$0xff] %v1644_v31 }
  0x2f   : > { %2177 = vst [vmem:[#allocation34_spill] sm:$0xff] %v1649_v32 }
  0x30   : > { %2178 = vst [vmem:[#allocation35_spill] sm:$0xff] %v1654_v33 }
  0x31   : > { %2179 = vst [vmem:[#allocation36_spill] sm:$0xff] %v1659_v34 }
  0x32   : > { %2180 = vst [vmem:[#allocation37_spill] sm:$0xff] %v1664_v35 }
  0x33   : > { %2181 = vst [vmem:[#allocation38_spill] sm:$0xff] %v1669_v36 }
  0x34   : > { %2182 = vst [vmem:[#allocation39_spill] sm:$0xff] %v1674_v37 }
  0x35   : > { %2183 = vst [vmem:[#allocation40_spill] sm:$0xff] %v1679_v38 }
  0x36   : > { %2184 = vst [vmem:[#allocation41_spill] sm:$0xff] %v1684_v39 }
  0x37   : > { %2185 = vst [vmem:[#allocation42_spill] sm:$0xff] %v1689_v40 }
  0x38   : > { %2186 = vst [vmem:[#allocation43_spill] sm:$0xff] %v1694_v41 }
  0x39   : > { %2187 = vst [vmem:[#allocation44_spill] sm:$0xff] %v1699_v42 }
  0x3a   : > { %2188 = vst [vmem:[#allocation45_spill] sm:$0xff] %v1704_v43 }
  0x3b   : > { %2189 = vst [vmem:[#allocation46_spill] sm:$0xff] %v1709_v44  ;;  %v1839_v44 = vld [vmem:[%s2125_s4 + $0xd0] sm:$0xff] }
  0x3c   : > { %2190 = vst [vmem:[#allocation47_spill] sm:$0xff] %v1714_v45 }
  0x3d   : > { %2191 = vst [vmem:[#allocation48_spill] sm:$0xff] %v1719_v46 }
  0x3e   : > { %2192 = vst [vmem:[#allocation49_spill] sm:$0xff] %v1724_v47 }
  0x3f   : > { %2193 = vst [vmem:[#allocation50_spill] sm:$0xff] %v1729_v48 }
  0x40   : > { %2194 = vst [vmem:[#allocation51_spill] sm:$0xff] %v1734_v49 }
  0x41   : > { %2195 = vst [vmem:[#allocation52_spill] sm:$0xff] %v1739_v50 }
  0x42   : > { %2196 = vst [vmem:[#allocation53_spill] sm:$0xff] %v1789_v60  ;;  %v1844_v60 = vld [vmem:[%s2125_s4 + $0xd8] sm:$0xff] }
  0x43   : > { %2197 = vst [vmem:[#allocation54_spill] sm:$0xff] %v1794_v61 }
  0x44   : > { %2198 = vst [vmem:[#allocation55_spill] sm:$0xff] %v1799_v62 }
  0x45   : > { %2199 = vst [vmem:[#allocation56_spill] sm:$0xff] %v1804_v63 }
  0x46   : > { %2200 = vst [vmem:[#allocation57_spill] sm:$0xff] %v1809_v16 }
  0x47   : > { %2201 = vst [vmem:[#allocation58_spill] sm:$0xff] %v1814_v17 }
  0x48   : > { %2202 = vst [vmem:[#allocation59_spill] sm:$0xff] %v1819_v18 }
  0x49   : > { %2203 = vst [vmem:[#allocation60_spill] sm:$0xff] %v1824_v19 }
  0x4a   : > { %2204 = vst [vmem:[#allocation61_spill] sm:$0xff] %v1829_v20 }
  0x4b   : > { %2205 = vst [vmem:[#allocation62_spill] sm:$0xff] %v1834_v21 }
  0x4c   : > { %2206 = vst [vmem:[#allocation63_spill] sm:$0xff] %v1839_v44 }
  0x4d LB: >> { %v2207_v9 = vld [vmem:[#allocation11_spill] sm:$0xff]  ;;  %v2208_v8 = vld [vmem:[#allocation10_spill] sm:$0xff]  ;;  %v2209_v7 = vld [vmem:[#allocation9_spill] sm:$0xff]  ;;  %s331_s26 = sadd.s32 %s1407_s17, %s1472_s25  ;;  %s1409_s12 = smov 127   ;;  %vm373_vm0 = vcmask 195584   ;;  %vm363_vm1 = vcmask 1039360   ;;  %s1407_s17 = sphi %s1846_s17, %s330_s17  }
  0x4e   : >> { %v2210_v6 = vld [vmem:[#allocation8_spill] sm:$0xff]  ;;  %v2211_v5 = vld [vmem:[#allocation7_spill] sm:$0xff]  ;;  %v2212_v4 = vld [vmem:[#allocation6_spill] sm:$0xff]  ;;  %s1175_s27 = sshll.u32 %s331_s26, 4  ;;  %s1410_s13 = smov 126   ;;  %vm526_vm2 = vcmask 1031168  }
  0x4f   : >> { %v2213_v3 = vld [vmem:[#allocation5_spill] sm:$0xff]  ;;  %v2214_v0 = vld [vmem:[#allocation2_spill] sm:$0xff]  ;;  %v2215_v1 = vld [vmem:[#allocation3_spill] sm:$0xff]  ;;  %s334_s28 = sshra.s32 %s1175_s27, 3  ;;  %s1242_s29 = sadd.s32 8, %s1175_s27  ;;  %vm917_vm3 = vcmask 785408  }
  0x50   : >> { %v2216_v2 = vld [vmem:[#allocation4_spill] sm:$0xff]  ;;  %s1240_s14 = sshll.u32 %s334_s28, 4  ;;  %s652_s8 = sshra.s32 %s1242_s29, 3  ;;  %v2217_v12 = vld [vmem:[#allocation14_spill] sm:$0xff]  ;;  %v2218_v13 = vld [vmem:[#allocation15_spill] sm:$0xff]  ;;  %vm1052_vm4 = vcmask 916480  }
  0x51   : >> { %s338_s9 = scalar_lea.vmem %s1569_s30, %s1240_s14  ;;  %s1243_s10 = sshll.u32 %s652_s8, 4  ;;  %v2219_v14 = vld [vmem:[#allocation16_spill] sm:$0xff]  ;;  %v2220_v15 = vld [vmem:[#allocation17_spill] sm:$0xff]  ;;  %v2229_v41 = vld [vmem:[#allocation43_spill] sm:$0xff] }
  0x52   : >> { %v343_v32 = vld [vmem:[%s338_s9 + $0x20] sm:$0xff]  ;;  %v344_v22 = vld [vmem:[%s338_s9 + $0x28] sm:$0xff]  ;;  %s656_s11 = scalar_lea.vmem %s1569_s30, %s1243_s10  ;;  %v341_v23 = vld [vmem:[%s338_s9 + $0x10] sm:$0xff]  ;;  %s1237_s6 = sshll.u32 %s1407_s17, 5 }
  0x53   : >> { %v339_v45 = vld [vmem:[%s338_s9] sm:$0xff]  ;;  %v1298_v11 = vpack.i.bf16 %v344_v22, %v343_v32  ;;  %v340_v33 = vld [vmem:[%s338_s9 + $0x8] sm:$0xff]  ;;  %469 = vmatpush.msra.mxu2 %v343_v32  ;;  %498 = vmatpush.msra.mxu3 %v344_v22  ;;  %v342_v46 = vld [vmem:[%s338_s9 + $0x18] sm:$0xff]  ;;  %s1051_s15 = scalar_lea.vmem %s1634_s18, %s1237_s6  ;;  %s330_s17 = sadd.s32 1, %s1407_s17  }
  0x54   : >> { %v1308_v61 = vpack.i.bf16 %v340_v33, %v339_v45  ;;  %v1855_v34 = vld [vmem:[%s656_s11 + $0x10] sm:$0xff]  ;;  %v1857_v62 = vld [vmem:[%s656_s11 + $0x18] sm:$0xff]  ;;  %v1859_v24 = vld [vmem:[%s656_s11 + $0x20] sm:$0xff]  ;;  %v1303_v22 = vpack.i.bf16 %v342_v46, %v341_v23  ;;  %p327_p7 = scmp.ge.s32.totalorder %s330_s17, 14  }
  0x55   : >> { %1299 = vrot.lane.b32.xlu0 %v1298_v11, %s1409_s12  ;;  %1314 = vrot.lane.b32.xlu2 %v1298_v11, %s1410_s13  ;;  %v1861_v47 = vld [vmem:[%s656_s11 + $0x28] sm:$0xff]  ;;  %v1323_v32 = vpack.i.bf16 %v1857_v62, %v1855_v34  ;;  %v1867_v35 = vld [vmem:[%s656_s11] sm:$0xff]  ;;  %v2223_v20 = vld [vmem:[#allocation61_spill] sm:$0xff] }
  0x56   : >> { %1309 = vrot.lane.b32.xlu1 %v1308_v61, %s1409_s12  ;;  %470 = vmatpush.msra.mxu2 %v341_v23  ;;  %v1318_v11 = vpack.i.bf16 %v1861_v47, %v1859_v24  ;;  %v1869_v63 = vld [vmem:[%s656_s11 + $0x8] sm:$0xff]  ;;  %v2222_v21 = vld [vmem:[#allocation62_spill] sm:$0xff]  ;;  %v2224_v43 = vld [vmem:[#allocation45_spill] sm:$0xff] }
  0x57   : >> { %499 = vmatpush.msra.mxu3 %v342_v46  ;;  %v1328_v25 = vpack.i.bf16 %v1869_v63, %v1867_v35  ;;  %v2221_v44 = vld [vmem:[#allocation63_spill] sm:$0xff]  ;;  %v2225_v31 = vld [vmem:[#allocation33_spill] sm:$0xff]  ;;  %v2226_v42 = vld [vmem:[#allocation44_spill] sm:$0xff] }
  0x58   : >> { %471 = vmatpush.msra.mxu2 %v339_v45  ;;  %v2227_v19 = vld [vmem:[#allocation60_spill] sm:$0xff]  ;;  %v2230_v18 = vld [vmem:[#allocation59_spill] sm:$0xff]  ;;  %v2232_v40 = vld [vmem:[#allocation42_spill] sm:$0xff] }
  0x59   : >> { %500 = vmatpush.msra.mxu3 %v340_v33  ;;  %1186 = vmatmul.msk.f32.vlgmr.msra.gmra.mxu2 %vm373_vm0, %v2214_v0  ;;  %v2228_v30 = vld [vmem:[#allocation32_spill] sm:$0xff]  ;;  %v2231_v29 = vld [vmem:[#allocation31_spill] sm:$0xff]  ;;  %v2233_v39 = vld [vmem:[#allocation41_spill] sm:$0xff] }
  0x5a   : >> { %1190 = vmatmul.msk.f32.vlgmr.msra.gmra.mxu3 %vm373_vm0, %v2214_v0  ;;  %v2234_v28 = vld [vmem:[#allocation30_spill] sm:$0xff]  ;;  %v2236_v38 = vld [vmem:[#allocation40_spill] sm:$0xff]  ;;  %v2237_v27 = vld [vmem:[#allocation29_spill] sm:$0xff] }
  0x5b   : >> { %v2235_v17 = vld [vmem:[#allocation58_spill] sm:$0xff]  ;;  %v2238_v50 = vld [vmem:[#allocation52_spill] sm:$0xff]  ;;  %v2239_v37 = vld [vmem:[#allocation39_spill] sm:$0xff] }
  0x5d   : >> { %1304 = vrot.lane.b32.xlu0 %v1303_v22, %s1409_s12  ;;  %1324 = vrot.lane.b32.xlu2 %v1323_v32, %s1409_s12 }
  0x5e   : >> { %1319 = vrot.lane.b32.xlu1 %v1318_v11, %s1409_s12 }
  0x61   : >> { %1187 = vmatmul.msk.f32.gmra.mxu2 %vm373_vm0, %v2215_v1 }
  0x62   : >> { %1191 = vmatmul.msk.f32.gmra.mxu3 %vm373_vm0, %v2215_v1 }
  0x65   : >> { %1329 = vrot.lane.b32.xlu0 %v1328_v25, %s1409_s12  ;;  %1339 = vrot.lane.b32.xlu2 %v1308_v61, %s1410_s13 }
  0x66   : >> { %1334 = vrot.lane.b32.xlu1 %v1303_v22, %s1410_s13 }
  0x69   : >> { %1188 = vmatmul.msk.f32.gmra.mxu2 %vm373_vm0, %v2216_v2 }
  0x6a   : >> { %1192 = vmatmul.msk.f32.gmra.mxu3 %vm373_vm0, %v2216_v2 }
  0x6d   : >> { %1344 = vrot.lane.b32.xlu0 %v1318_v11, %s1410_s13  ;;  %1354 = vrot.lane.b32.xlu2 %v1328_v25, %s1410_s13 }
  0x6e   : >> { %1349 = vrot.lane.b32.xlu1 %v1323_v32, %s1410_s13 }
  0x71   : >> { %1189 = vmatmul.msk.f32.gmra.mxu2 %vm373_vm0, %v2213_v3 }
  0x72   : >> { %1193 = vmatmul.msk.f32.gmra.mxu3 %vm373_vm0, %v2213_v3 }
  0xaf   : >> { %v1315_v23 = vpop.permute.xlu2 %1314 }
  0xb0   : >> { %v1316_v1 = vunpack.i.l.bf16 %v1315_v23  ;;  %v1317_v36 = vunpack.i.h.bf16 %v1315_v23 }
  0xb7   : >> { %v1325_v22 = vpop.permute.xlu2 %1324 }
  0xb8   : >> { %v1326_v26 = vunpack.i.l.bf16 %v1325_v22  ;;  %v1327_v16 = vunpack.i.h.bf16 %v1325_v22 }
  0xc7   : >> { %v1300_v25 = vpop.permute.xlu0 %1299 }
  0xc8   : >> { %v1301_v33 = vunpack.i.l.bf16 %v1300_v25  ;;  %v1310_v45 = vpop.permute.xlu1 %1309  ;;  %v1302_v46 = vunpack.i.h.bf16 %v1300_v25 }
  0xc9   : >> { %v1311_v32 = vunpack.i.l.bf16 %v1310_v45  ;;  %v1312_v11 = vunpack.i.h.bf16 %v1310_v45 }
  0xca   : >> { %428 = vmatpush.msra.mxu1 %v1302_v46  ;;  %v366_v61 = vsel %vm363_vm1, %v1301_v33, %v1302_v46  ;;  %v529_v46 = vsel %vm526_vm2, %v1316_v1, %v1317_v36 }
  0xcb   : >> { %399 = vmatpush.msra.mxu0 %v366_v61  ;;  %v364_v33 = vsel %vm363_vm1, %v1311_v32, %v1312_v11 }
  0xcf   : >> { %v1305_v2 = vpop.permute.xlu0 %1304 }
  0xd0   : >> { %v1306_v0 = vunpack.i.l.bf16 %v1305_v2  ;;  %v1320_v48 = vpop.permute.xlu1 %1319  ;;  %v1307_v10 = vunpack.i.h.bf16 %v1305_v2  ;;  %v682_v2 = vsel %vm363_vm1, %v1326_v26, %v1327_v16 }
  0xd1   : >> { %v1321_v25 = vunpack.i.l.bf16 %v1320_v48  ;;  %v1322_v49 = vunpack.i.h.bf16 %v1320_v48  ;;  %v1340_v48 = vpop.permute.xlu2 %1339 }
  0xd2   : >> { %429 = vmatpush.msra.mxu1 %v1307_v10  ;;  %v365_v3 = vsel %vm363_vm1, %v1306_v0, %v1307_v10  ;;  %v1341_v23 = vunpack.i.l.bf16 %v1340_v48  ;;  %v1342_v1 = vunpack.i.h.bf16 %v1340_v48 }
  0xd3   : >> { %732 = vmatpush.msrb.mxu3 %v1322_v49  ;;  %400 = vmatpush.msra.mxu0 %v365_v3  ;;  %v683_v45 = vsel %vm363_vm1, %v1321_v25, %v1322_v49 }
  0xd4   : >> { %703 = vmatpush.msrb.mxu2 %v683_v45  ;;  %430 = vmatpush.msra.mxu1 %v1312_v11 }
  0xd5   : >> { %401 = vmatpush.msra.mxu0 %v364_v33  ;;  %1182 = vmatmul.msk.f32.vlgmr.msra.gmra.mxu1 %vm373_vm0, %v2212_v4 }
  0xd6   : >> { %590 = vmatpush.msrb.mxu1 %v1317_v36  ;;  %1178 = vmatmul.msk.f32.vlgmr.msra.gmra.mxu0 %vm373_vm0, %v2212_v4  ;;  %v527_v36 = vsel %vm526_vm2, %v1341_v23, %v1342_v1  ;;  %v2245_v23 = vld [vmem:[#allocation50_spill] sm:$0xff] }
  0xd7   : >> { %561 = vmatpush.msrb.mxu0 %v529_v46  ;;  %733 = vmatpush.msrb.mxu3 %v1327_v16  ;;  %v1330_v0 = vpop.permute.xlu0 %1329  ;;  %v1411_v46 = vmov 0  }
  0xd8   : >> { %v1335_v3 = vpop.permute.xlu1 %1334  ;;  %704 = vmatpush.msrb.mxu2 %v682_v2  ;;  %v1331_v10 = vunpack.i.l.bf16 %v1330_v0  ;;  %v1332_v49 = vunpack.i.h.bf16 %v1330_v0  ;;  %1358 = vset.pattern.permute.xlu0 %v1411_v46 }
  0xd9   : >> { %v1336_v61 = vunpack.i.l.bf16 %v1335_v3  ;;  %v1337_v22 = vunpack.i.h.bf16 %v1335_v3  ;;  %v1355_v11 = vpop.permute.xlu2 %1354  ;;  %616 = vperm.xlu0 %1358, %v2217_v12   ;;  %1359 = vset.pattern.permute.xlu1 %v1411_v46 }
  0xda   : >> { %734 = vmatpush.msrb.mxu3 %v1332_v49  ;;  %v681_v32 = vsel %vm363_vm1, %v1331_v10, %v1332_v49  ;;  %v1356_v3 = vunpack.i.l.bf16 %v1355_v11  ;;  %621 = vperm.xlu1 %1359, %v2218_v13   ;;  %v2243_v10 = vld [vmem:[#allocation38_spill] sm:$0xff]  ;;  %v2244_v49 = vld [vmem:[#allocation12_spill] sm:$0xff] }
  0xdb   : >> { %591 = vmatpush.msrb.mxu1 %v1337_v22  ;;  %v528_v26 = vsel %vm526_vm2, %v1336_v61, %v1337_v22  ;;  %705 = vmatpush.msrb.mxu2 %v681_v32  ;;  %v2247_v61 = vld [vmem:[#allocation56_spill] sm:$0xff]  ;;  %v2248_v22 = vld [vmem:[#allocation37_spill] sm:$0xff] }
  0xdc   : >> { %562 = vmatpush.msrb.mxu0 %v528_v26  ;;  %1209 = vmatmul.msk.f32.vlgmr.msrb.gmra.mxu3 %vm373_vm0, %v2212_v4  ;;  %v2249_v32 = vld [vmem:[#allocation49_spill] sm:$0xff]  ;;  %v2250_v26 = vld [vmem:[#allocation26_spill] sm:$0xff] }
  0xdd   : >> { %1183 = vmatmul.msk.f32.gmra.mxu1 %vm373_vm0, %v2211_v5  ;;  %1205 = vmatmul.msk.f32.vlgmr.msrb.gmra.mxu2 %vm373_vm0, %v2212_v4 }
  0xde   : >> { %1179 = vmatmul.msk.f32.gmra.mxu0 %vm373_vm0, %v2211_v5  ;;  %592 = vmatpush.msrb.mxu1 %v1342_v1  ;;  %v2246_v1 = vld [vmem:[#allocation27_spill] sm:$0xff] }
  0xdf   : >> { %563 = vmatpush.msrb.mxu0 %v527_v36  ;;  %v1345_v16 = vpop.permute.xlu0 %1344  ;;  %1360 = vset.pattern.permute.xlu2 %v1411_v46  ;;  %v2251_v36 = vld [vmem:[#allocation55_spill] sm:$0xff]  ;;  %v2257_v46 = vld [vmem:[#allocation13_spill] sm:$0xff] }
  0xe0   : >> { %790 = vmatpush.msra.mxu1 %v1861_v47  ;;  %v1347_v25 = vunpack.i.h.bf16 %v1345_v16  ;;  %v1346_v33 = vunpack.i.l.bf16 %v1345_v16  ;;  %v1350_v45 = vpop.permute.xlu1 %1349  ;;  %v1357_v47 = vunpack.i.h.bf16 %v1355_v11  ;;  %626 = vperm.xlu2 %1360, %v2219_v14   ;;  %v2252_v16 = vld [vmem:[#allocation36_spill] sm:$0xff] }
  0xe1   : >> { %761 = vmatpush.msra.mxu0 %v1859_v24  ;;  %v1352_v2 = vunpack.i.h.bf16 %v1350_v45  ;;  %v1351_v48 = vunpack.i.l.bf16 %v1350_v45  ;;  %v2253_v11 = vld [vmem:[#allocation48_spill] sm:$0xff]  ;;  %v2256_v45 = vld [vmem:[#allocation35_spill] sm:$0xff] }
  0xe2   : >> { %791 = vmatpush.msra.mxu1 %v1857_v62  ;;  %869 = vmatpush.msra.mxu3 %v1347_v25  ;;  %v820_v0 = vsel %vm526_vm2, %v1346_v33, %v1347_v25  ;;  %v2241_v62 = vld [vmem:[#allocation28_spill] sm:$0xff]  ;;  %v2254_v25 = vld [vmem:[#allocation25_spill] sm:$0xff]  ;;  %v2255_v33 = vld [vmem:[#allocation54_spill] sm:$0xff] }
  0xe3   : >> { %762 = vmatpush.msra.mxu0 %v1855_v34  ;;  %840 = vmatpush.msra.mxu2 %v820_v0  ;;  %v819_v24 = vsel %vm526_vm2, %v1351_v48, %v1352_v2  ;;  %v818_v34 = vsel %vm526_vm2, %v1356_v3, %v1357_v47  ;;  %v2259_v48 = vld [vmem:[#allocation24_spill] sm:$0xff]  ;;  %v2260_v0 = vld [vmem:[#allocation34_spill] sm:$0xff] }
  0xe4   : >> { %1210 = vmatmul.msk.f32.gmra.mxu3 %vm373_vm0, %v2211_v5  ;;  %792 = vmatpush.msra.mxu1 %v1869_v63  ;;  %v2242_v63 = vld [vmem:[#allocation51_spill] sm:$0xff]  ;;  %v2262_v3 = vld [vmem:[#allocation46_spill] sm:$0xff] }
  0xe5   : >> { %1184 = vmatmul.msk.f32.gmra.mxu1 %vm373_vm0, %v2210_v6  ;;  %1206 = vmatmul.msk.f32.gmra.mxu2 %vm373_vm0, %v2211_v5 }
  0xe6   : >> { %1180 = vmatmul.msk.f32.gmra.mxu0 %vm373_vm0, %v2210_v6  ;;  %870 = vmatpush.msra.mxu3 %v1352_v2  ;;  %v2258_v2 = vld [vmem:[#allocation47_spill] sm:$0xff] }
  0xe7   : >> { %841 = vmatpush.msra.mxu2 %v819_v24  ;;  %763 = vmatpush.msra.mxu0 %v1867_v35  ;;  %v2240_v35 = vld [vmem:[#allocation57_spill] sm:$0xff]  ;;  %v2263_v24 = vld [vmem:[#allocation23_spill] sm:$0xff] }
  0xe8   : >> { %871 = vmatpush.msra.mxu3 %v1357_v47  ;;  %631 = vperm.xlu1 %1359, %v2220_v15   ;;  %v2261_v47 = vld [vmem:[#allocation53_spill] sm:$0xff] }
  0xe9   : >> { %842 = vmatpush.msra.mxu2 %v818_v34  ;;  %v2264_v34 = vld [vmem:[#allocation22_spill] sm:$0xff] }
  0xea   : >> { %1021 = vmatpush.msrb.mxu3 %v1844_v60 }
  0xeb   : >> { %988 = vmatpush.msrb.mxu2 %v1784_v59 }
  0xec   : >> { %1211 = vmatmul.msk.f32.gmra.mxu3 %vm373_vm0, %v2210_v6 }
  0xed   : >> { %1185 = vmatmul.msk.f32.gmra.mxu1 %vm373_vm0, %v2209_v7  ;;  %1207 = vmatmul.msk.f32.gmra.mxu2 %vm373_vm0, %v2210_v6 }
  0xee   : >> { %1181 = vmatmul.msk.f32.gmra.mxu0 %vm373_vm0, %v2209_v7  ;;  %989 = vmatpush.msrb.mxu2 %v1779_v58 }
  0xef   : >> { %1022 = vmatpush.msrb.mxu3 %v2221_v44 }
  0xf0   : >> { %990 = vmatpush.msrb.mxu2 %v1774_v57 }
  0xf1   : >> { %1023 = vmatpush.msrb.mxu3 %v2222_v21 }
  0xf2   : >> { %991 = vmatpush.msrb.mxu2 %v1769_v56 }
  0xf3   : >> { %1024 = vmatpush.msrb.mxu3 %v2223_v20 }
  0xf4   : >> { %1212 = vmatmul.msk.f32.gmra.mxu3 %vm373_vm0, %v2209_v7  ;;  %992 = vmatpush.msrb.mxu2 %v1764_v55 }
  0xf5   : >> { %1198 = vmatmul.msk.f32.vlgmr.msrb.gmra.mxu1 %vm373_vm0, %v2208_v8  ;;  %1208 = vmatmul.msk.f32.gmra.mxu2 %vm373_vm0, %v2209_v7 }
  0xf6   : >> { %1194 = vmatmul.msk.f32.vlgmr.msrb.gmra.mxu0 %vm373_vm0, %v2208_v8  ;;  %963 = vmatpush.msrb.mxu1 %v2224_v43 }
  0xf7   : >> { %930 = vmatpush.msrb.mxu0 %v2225_v31  ;;  %993 = vmatpush.msrb.mxu2 %v1759_v54 }
  0xf8   : >> { %964 = vmatpush.msrb.mxu1 %v2226_v42  ;;  %1025 = vmatpush.msrb.mxu3 %v2227_v19 }
  0xf9   : >> { %931 = vmatpush.msrb.mxu0 %v2228_v30  ;;  %994 = vmatpush.msrb.mxu2 %v1754_v53 }
  0xfa   : >> { %965 = vmatpush.msrb.mxu1 %v2229_v41  ;;  %1026 = vmatpush.msrb.mxu3 %v2230_v18 }
  0xfb   : >> { %932 = vmatpush.msrb.mxu0 %v2231_v29  ;;  %995 = vmatpush.msrb.mxu2 %v1749_v52 }
  0xfc   : >> { %1225 = vmatmul.msk.f32.vlgmr.msra.gmra.mxu3 %vm373_vm0, %v2208_v8  ;;  %966 = vmatpush.msrb.mxu1 %v2232_v40 }
  0xfd   : >> { %1199 = vmatmul.msk.f32.gmra.mxu1 %vm373_vm0, %v2207_v9  ;;  %1221 = vmatmul.msk.f32.vlgmr.msra.gmra.mxu2 %vm373_vm0, %v2208_v8 }
  0xfe   : >> { %1195 = vmatmul.msk.f32.gmra.mxu0 %vm373_vm0, %v2207_v9  ;;  %967 = vmatpush.msrb.mxu1 %v2233_v39 }
  0xff   : >> { %933 = vmatpush.msrb.mxu0 %v2234_v28  ;;  %996 = vmatpush.msrb.mxu2 %v1744_v51 }
 0x100   : >> { %1027 = vmatpush.msrb.mxu3 %v2235_v17  ;;  %968 = vmatpush.msrb.mxu1 %v2236_v38 }
 0x101   : >> { %934 = vmatpush.msrb.mxu0 %v2237_v27  ;;  %997 = vmatpush.msrb.mxu2 %v2238_v50 }
 0x102   : >> { %969 = vmatpush.msrb.mxu1 %v2239_v37  ;;  %1028 = vmatpush.msrb.mxu3 %v2240_v35  ;;  %v2265_v35 = vld [vmem:[#allocation2_spill] sm:$0xff] }
 0x103   : >> { %935 = vmatpush.msrb.mxu0 %v2241_v62  ;;  %998 = vmatpush.msrb.mxu2 %v2242_v63  ;;  %v2266_v62 = vld [vmem:[#allocation21_spill] sm:$0xff]  ;;  %v2267_v63 = vld [vmem:[#allocation20_spill] sm:$0xff] }
 0x104   : >> { %1226 = vmatmul.msk.f32.gmra.mxu3 %vm373_vm0, %v2207_v9  ;;  %970 = vmatpush.msrb.mxu1 %v2243_v10  ;;  %v2268_v10 = vld [vmem:[#allocation19_spill] sm:$0xff] }
 0x105   : >> { %1200 = vmatmul.msk.f32.gmra.mxu1 %vm373_vm0, %v2244_v49  ;;  %1222 = vmatmul.msk.f32.gmra.mxu2 %vm373_vm0, %v2207_v9 }
 0x106   : >> { %1196 = vmatmul.msk.f32.gmra.mxu0 %vm373_vm0, %v2244_v49  ;;  %999 = vmatpush.msrb.mxu2 %v2245_v23  ;;  %v2269_v23 = vld [vmem:[#allocation3_spill] sm:$0xff] }
 0x107   : >> { %936 = vmatpush.msrb.mxu0 %v2246_v1  ;;  %1029 = vmatpush.msrb.mxu3 %v2247_v61  ;;  %v2270_v1 = vld [vmem:[#allocation18_spill] sm:$0xff]  ;;  %v2271_v61 = vld [vmem:[#allocation4_spill] sm:$0xff] }
 0x108   : >> { %971 = vmatpush.msrb.mxu1 %v2248_v22  ;;  %1000 = vmatpush.msrb.mxu2 %v2249_v32  ;;  %v2272_v22 = vld [vmem:[#allocation5_spill] sm:$0xff]  ;;  %v502_v32 = vpop.f32.mrf.mxu3 }
 0x109   : >> { %937 = vmatpush.msrb.mxu0 %v2250_v26  ;;  %1030 = vmatpush.msrb.mxu3 %v2251_v36  ;;  %v473_v26 = vpop.f32.mrf.mxu2 }
 0x10a   : >> { %972 = vmatpush.msrb.mxu1 %v2252_v16  ;;  %1001 = vmatpush.msrb.mxu2 %v2253_v11 }
 0x10b   : >> { %938 = vmatpush.msrb.mxu0 %v2254_v25  ;;  %1031 = vmatpush.msrb.mxu3 %v2255_v33 }
 0x10c   : >> { %1227 = vmatmul.msk.f32.gmra.mxu3 %vm373_vm0, %v2244_v49  ;;  %973 = vmatpush.msrb.mxu1 %v2256_v45 }
 0x10d   : >> { %1201 = vmatmul.msk.f32.gmra.mxu1 %vm373_vm0, %v2257_v46  ;;  %1223 = vmatmul.msk.f32.gmra.mxu2 %vm373_vm0, %v2244_v49 }
 0x10e   : >> { %1197 = vmatmul.msk.f32.gmra.mxu0 %vm373_vm0, %v2257_v46  ;;  %1002 = vmatpush.msrb.mxu2 %v2258_v2 }
 0x10f   : >> { %939 = vmatpush.msrb.mxu0 %v2259_v48  ;;  %974 = vmatpush.msrb.mxu1 %v2260_v0 }
 0x110   : >> { %1032 = vmatpush.msrb.mxu3 %v2261_v47  ;;  %1003 = vmatpush.msrb.mxu2 %v2262_v3  ;;  %v505_v36 = vpop.f32.mrf.mxu3 }
 0x111   : >> { %940 = vmatpush.msrb.mxu0 %v2263_v24  ;;  %v476_v16 = vpop.f32.mrf.mxu2 }
 0x113   : >> { %941 = vmatpush.msrb.mxu0 %v2264_v34 }
 0x114   : >> { %1228 = vmatmul.msk.f32.gmra.mxu3 %vm373_vm0, %v2257_v46 }
 0x115   : >> { %1217 = vmatmul.msk.f32.vlgmr.msra.gmra.mxu1 %vm373_vm0, %v2265_v35  ;;  %1224 = vmatmul.msk.f32.gmra.mxu2 %vm373_vm0, %v2257_v46 }
 0x116   : >> { %1213 = vmatmul.msk.f32.vlgmr.msra.gmra.mxu0 %vm373_vm0, %v2265_v35 }
 0x117   : >> { %942 = vmatpush.msrb.mxu0 %v2266_v62 }
 0x118   : >> { %v2047_v11 = vpop.f32.mrf.mxu3 }
 0x119   : >> { %943 = vmatpush.msrb.mxu0 %v2267_v63  ;;  %v2049_v45 = vpop.f32.mrf.mxu2 }
 0x11b   : >> { %944 = vmatpush.msrb.mxu0 %v2268_v10 }
 0x11d   : >> { %1218 = vmatmul.msk.f32.gmra.mxu1 %vm373_vm0, %v2269_v23  ;;  %945 = vmatpush.msrb.mxu0 %v2270_v1 }
 0x11e   : >> { %1214 = vmatmul.msk.f32.gmra.mxu0 %vm373_vm0, %v2269_v23 }
 0x120   : >> { %v2051_v48 = vpop.f32.mrf.mxu3 }
 0x121   : >> { %v2053_v47 = vpop.f32.mrf.mxu2 }
 0x125   : >> { %1219 = vmatmul.msk.f32.gmra.mxu1 %vm373_vm0, %v2271_v61 }
 0x126   : >> { %1215 = vmatmul.msk.f32.gmra.mxu0 %vm373_vm0, %v2271_v61 }
 0x12d   : >> { %1220 = vmatmul.msk.f32.gmra.mxu1 %vm373_vm0, %v2272_v22 }
 0x12e   : >> { %1216 = vmatmul.msk.f32.gmra.mxu0 %vm373_vm0, %v2272_v22 }
 0x14b   : >> { %v617_v27 = vpop.permute.xlu0 %616 }
 0x152   : >> { %v432_v25 = vpop.f32.mrf.mxu1 }
 0x153   : >> { %v403_v33 = vpop.f32.mrf.mxu0  ;;  %v503_v18 = vadd.f32 %v502_v32, %v432_v25  ;;  %v622_v25 = vpop.permute.xlu1 %621 }
 0x154   : >> { %v474_v19 = vadd.f32 %v473_v26, %v403_v33 }
 0x15a   : >> { %v435_v2 = vpop.f32.mrf.mxu1 }
 0x15b   : >> { %v406_v0 = vpop.f32.mrf.mxu0  ;;  %v506_v42 = vadd.f32 %v505_v36, %v435_v2 }
 0x15c   : >> { %v477_v46 = vadd.f32 %v476_v16, %v406_v0 }
 0x15f   : >> { %v736_v34 = vpop.f32.mrf.mxu3 }
 0x160   : >> { %v707_v35 = vpop.f32.mrf.mxu2 }
 0x162   : >> { %v2055_v3 = vpop.f32.mrf.mxu1 }
 0x163   : >> { %v2057_v24 = vpop.f32.mrf.mxu0 }
 0x167   : >> { %v739_v10 = vpop.f32.mrf.mxu3 }
 0x168   : >> { %v710_v23 = vpop.f32.mrf.mxu2 }
 0x16a   : >> { %v2059_v62 = vpop.f32.mrf.mxu1 }
 0x16b   : >> { %v2061_v63 = vpop.f32.mrf.mxu0 }
 0x16f   : >> { %v2063_v22 = vpop.f32.mrf.mxu3 }
 0x170   : >> { %v2065_v4 = vpop.f32.mrf.mxu2 }
 0x172   : >> { %v594_v1 = vpop.f32.mrf.mxu1 }
 0x173   : >> { %v565_v61 = vpop.f32.mrf.mxu0  ;;  %v607_v20 = vadd.f32 %v594_v1, %v503_v18 }
 0x174   : >> { %v606_v21 = vadd.f32 %v565_v61, %v474_v19 }
 0x175   : >> { %v635_v37 = vadd.f32 %v617_v27, %v607_v20 }
 0x176   : >> { %v634_v39 = vadd.f32 %v617_v27, %v606_v21 }
 0x177   : >> { %v2067_v8 = vpop.f32.mrf.mxu3  ;;  %v643_v50 = vmax.f32 %v635_v37, 0.0 }
 0x178   : >> { %v2069_v12 = vpop.f32.mrf.mxu2  ;;  %v642_v18 = vmax.f32 %v634_v39, 0.0 }
 0x17a   : >> { %v597_v5 = vpop.f32.mrf.mxu1 }
 0x17b   : >> { %v568_v6 = vpop.f32.mrf.mxu0  ;;  %v609_v32 = vadd.f32 %v597_v5, %v506_v42 }
 0x17c   : >> { %v608_v19 = vadd.f32 %v568_v6, %v477_v46  ;;  %v509_v6 = vadd.f32 %v2047_v11, %v2055_v3  ;;  %v627_v46 = vpop.permute.xlu2 %626 }
 0x17e   : >> { %v636_v5 = vadd.f32 %v622_v25, %v608_v19 }
 0x17f   : >> { %v873_v15 = vpop.f32.mrf.mxu3 }
 0x180   : >> { %v844_v17 = vpop.f32.mrf.mxu2  ;;  %v644_v16 = vmax.f32 %v636_v5, 0.0 }
 0x182   : >> { %v600_v7 = vpop.f32.mrf.mxu1 }
 0x183   : >> { %v571_v9 = vpop.f32.mrf.mxu0  ;;  %v611_v42 = vadd.f32 %v600_v7, %v509_v6 }
 0x187   : >> { %v876_v41 = vpop.f32.mrf.mxu3 }
 0x188   : >> { %v847_v44 = vpop.f32.mrf.mxu2 }
 0x18a   : >> { %v2071_v13 = vpop.f32.mrf.mxu1 }
 0x18b   : >> { %v2073_v14 = vpop.f32.mrf.mxu0 }
 0x192   : >> { %v794_v28 = vpop.f32.mrf.mxu1 }
 0x193   : >> { %v795_v29 = vadd.f32 %v794_v28, %v736_v34  ;;  %v765_v30 = vpop.f32.mrf.mxu0 }
 0x194   : >> { %v766_v31 = vadd.f32 %v765_v30, %v707_v35  ;;  %v639_v35 = vadd.f32 %v627_v46, %v611_v42 }
 0x195   : >> { %v886_v38 = vadd.f32 %v873_v15, %v795_v29  ;;  %v637_v29 = vadd.f32 %v622_v25, %v609_v32 }
 0x196   : >> { %v885_v40 = vadd.f32 %v844_v17, %v766_v31 }
 0x197   : >> { %v894_v43 = vadd.f32 %v886_v38, %v617_v27  ;;  %v480_v38 = vadd.f32 %v2049_v45, %v2057_v24 }
 0x198   : >> { %v893_v49 = vadd.f32 %v885_v40, %v617_v27  ;;  %v879_v40 = vpop.f32.mrf.mxu3 }
 0x199   : >> { %v902_v26 = vmax.f32 %v894_v43, 0.0 }
 0x19a   : >> { %v901_v33 = vmax.f32 %v893_v49, 0.0  ;;  %v797_v28 = vpop.f32.mrf.mxu1  ;;  %v610_v49 = vadd.f32 %v571_v9, %v480_v38  ;;  %v512_v9 = vadd.f32 %v2051_v48, %v2059_v62 }
 0x19b   : >> { %v910_v30 = vmax.f32 %v643_v50, %v902_v26  ;;  %v798_v20 = vadd.f32 %v797_v28, %v739_v10  ;;  %v768_v15 = vpop.f32.mrf.mxu0  ;;  %v645_v50 = vmax.f32 %v637_v29, 0.0 }
 0x19c   : >> { %v909_v21 = vmax.f32 %v642_v18, %v901_v33  ;;  %v769_v17 = vadd.f32 %v768_v15, %v710_v23  ;;  %v638_v7 = vadd.f32 %v627_v46, %v610_v49  ;;  %v483_v23 = vadd.f32 %v2053_v47, %v2061_v63 }
 0x19d   : >> { %v888_v31 = vadd.f32 %v876_v41, %v798_v20  ;;  %1229 = vmatmul.msk.f32.vlgmr.msrb.gmra.mxu1 %vm917_vm3, %v910_v30  ;;  %1233 = vmatmul.msk.f32.vlgmr.msrb.gmra.mxu3 %vm917_vm3, %v910_v30  ;;  %v850_v41 = vpop.f32.mrf.mxu2  ;;  %v613_v61 = vadd.f32 %v2071_v13, %v512_v9 }
 0x19e   : >> { %v887_v27 = vadd.f32 %v847_v44, %v769_v17  ;;  %946 = vmatmul.f32.vlgmr.msrb.gmra.mxu0 %v909_v21  ;;  %1004 = vmatmul.f32.vlgmr.msrb.gmra.mxu2 %v909_v21  ;;  %v612_v26 = vadd.f32 %v2073_v14, %v483_v23  ;;  %v646_v33 = vmax.f32 %v638_v7, 0.0 }
 0x19f   : >> { %v896_v37 = vadd.f32 %v888_v31, %v622_v25 }
 0x1a0   : >> { %v895_v39 = vadd.f32 %v887_v27, %v622_v25  ;;  %v882_v25 = vpop.f32.mrf.mxu3 }
 0x1a1   : >> { %v904_v43 = vmax.f32 %v896_v37, 0.0 }
 0x1a2   : >> { %v903_v36 = vmax.f32 %v895_v39, 0.0  ;;  %v800_v44 = vpop.f32.mrf.mxu1 }
 0x1a3   : >> { %v801_v2 = vadd.f32 %v800_v44, %v2063_v22  ;;  %v771_v0 = vpop.f32.mrf.mxu0  ;;  %v912_v34 = vmax.f32 %v645_v50, %v904_v43  ;;  %v632_v22 = vpop.permute.xlu1 %631 }
 0x1a4   : >> { %v772_v11 = vadd.f32 %v771_v0, %v2065_v4  ;;  %v911_v3 = vmax.f32 %v644_v16, %v903_v36  ;;  %v647_v4 = vmax.f32 %v639_v35, 0.0  ;;  %v641_v63 = vadd.f32 %v632_v22, %v613_v61 }
 0x1a5   : >> { %v890_v45 = vadd.f32 %v879_v40, %v801_v2  ;;  %1230 = vmatmul.msk.f32.gmra.mxu1 %vm917_vm3, %v912_v34  ;;  %1234 = vmatmul.msk.f32.gmra.mxu3 %vm917_vm3, %v912_v34  ;;  %v853_v48 = vpop.f32.mrf.mxu2  ;;  %v640_v13 = vadd.f32 %v632_v22, %v612_v26 }
 0x1a6   : >> { %v889_v24 = vadd.f32 %v850_v41, %v772_v11  ;;  %949 = vmatmul.f32.gmra.mxu0 %v911_v3  ;;  %1007 = vmatmul.f32.gmra.mxu2 %v911_v3 }
 0x1a7   : >> { %v898_v10 = vadd.f32 %v890_v45, %v627_v46  ;;  %v648_v27 = vmax.f32 %v640_v13, 0.0 }
 0x1a8   : >> { %v897_v1 = vadd.f32 %v889_v24, %v627_v46 }
 0x1a9   : >> { %v906_v32 = vmax.f32 %v898_v10, 0.0 }
 0x1aa   : >> { %v905_v18 = vmax.f32 %v897_v1, 0.0  ;;  %v803_v19 = vpop.f32.mrf.mxu1 }
 0x1ab   : >> { %v804_v28 = vadd.f32 %v803_v19, %v2067_v8  ;;  %v774_v30 = vpop.f32.mrf.mxu0  ;;  %v914_v62 = vmax.f32 %v647_v4, %v906_v32  ;;  %v649_v8 = vmax.f32 %v641_v63, 0.0 }
 0x1ac   : >> { %v775_v20 = vadd.f32 %v774_v30, %v2069_v12  ;;  %v913_v47 = vmax.f32 %v646_v33, %v905_v18 }
 0x1ad   : >> { %v892_v15 = vadd.f32 %v882_v25, %v804_v28  ;;  %1231 = vmatmul.msk.f32.gmra.mxu1 %vm917_vm3, %v914_v62  ;;  %1235 = vmatmul.msk.f32.gmra.mxu3 %vm917_vm3, %v914_v62 }
 0x1ae   : >> { %v891_v14 = vadd.f32 %v853_v48, %v775_v20  ;;  %952 = vmatmul.f32.gmra.mxu0 %v913_v47  ;;  %1010 = vmatmul.f32.gmra.mxu2 %v913_v47 }
 0x1af   : >> { %v900_v21 = vadd.f32 %v892_v15, %v632_v22 }
 0x1b0   : >> { %v899_v17 = vadd.f32 %v891_v14, %v632_v22 }
 0x1b1   : >> { %v908_v29 = vmax.f32 %v900_v21, 0.0 }
 0x1b2   : >> { %v907_v31 = vmax.f32 %v899_v17, 0.0 }
 0x1b3   : >> { %v916_v12 = vmax.f32 %v649_v8, %v908_v29 }
 0x1b4   : >> { %v915_v5 = vmax.f32 %v648_v27, %v907_v31 }
 0x1b5   : >> { %1232 = vmatmul.msk.f32.gmra.mxu1 %vm917_vm3, %v916_v12  ;;  %1236 = vmatmul.msk.f32.gmra.mxu3 %vm917_vm3, %v916_v12 }
 0x1b6   : >> { %955 = vmatmul.f32.gmra.mxu0 %v915_v5  ;;  %1013 = vmatmul.f32.gmra.mxu2 %v915_v5 }
 0x21a   : >> { %v976_v6 = vpop.f32.mrf.mxu1 }
 0x21b   : >> { %v947_v37 = vpop.f32.mrf.mxu0 }
 0x21c   : >> { %v977_v40 = vadd.f32 %v976_v6, %v947_v37 }
 0x220   : >> { %v1034_v38 = vpop.f32.mrf.mxu3 }
 0x221   : >> { %v1005_v39 = vpop.f32.mrf.mxu2 }
 0x222   : >> { %v1035_v42 = vadd.f32 %v1034_v38, %v1005_v39  ;;  %v979_v43 = vpop.f32.mrf.mxu1 }
 0x223   : >> { %v950_v41 = vpop.f32.mrf.mxu0 }
 0x224   : >> { %v1046_v50 = vmax.f32 %v977_v40, %v1035_v42  ;;  %v980_v36 = vadd.f32 %v979_v43, %v950_v41 }
 0x226   : >> { %1053 = vst.msk [vmem:[%s1051_s15] sm:$0xff] %vm1052_vm4, %v1046_v50 }
 0x228   : >> { %v1037_v49 = vpop.f32.mrf.mxu3 }
 0x229   : >> { %v1008_v46 = vpop.f32.mrf.mxu2 }
 0x22a   : >> { %v1038_v44 = vadd.f32 %v1037_v49, %v1008_v46  ;;  %v982_v2 = vpop.f32.mrf.mxu1 }
 0x22b   : >> { %v953_v0 = vpop.f32.mrf.mxu0 }
 0x22c   : >> { %v1047_v16 = vmax.f32 %v980_v36, %v1038_v44  ;;  %v983_v3 = vadd.f32 %v982_v2, %v953_v0 }
 0x22e   : >> { %1054 = vst.msk [vmem:[%s1051_s15 + $0x8] sm:$0xff] %vm1052_vm4, %v1047_v16 }
 0x230   : >> { %v1040_v34 = vpop.f32.mrf.mxu3 }
 0x231   : >> { %v1011_v11 = vpop.f32.mrf.mxu2 }
 0x232   : >> { %v1041_v35 = vadd.f32 %v1040_v34, %v1011_v11  ;;  %v985_v7 = vpop.f32.mrf.mxu1 }
 0x233   : >> { %v956_v24 = vpop.f32.mrf.mxu0 }
 0x234   : >> { %v1048_v45 = vmax.f32 %v983_v3, %v1041_v35  ;;  %v986_v23 = vadd.f32 %v985_v7, %v956_v24 }
 0x236   : >> { %1055 = vst.msk [vmem:[%s1051_s15 + $0x10] sm:$0xff] %vm1052_vm4, %v1048_v45 }
 0x238   : >> { %v1043_v9 = vpop.f32.mrf.mxu3 }
 0x239   : >> { %v1014_v10 = vpop.f32.mrf.mxu2 }
 0x23a   : >> { %v1044_v1 = vadd.f32 %v1043_v9, %v1014_v10  ;;  %329 = sbr.rel (!%p327_p7) target bundleno = 77 (0x4d), region = 82 }
 0x23c   : >> { %v1049_v4 = vmax.f32 %v986_v23, %v1044_v1 }
 0x23e   : >> { %1056 = vst.msk [vmem:[%s1051_s15 + $0x18] sm:$0xff] %vm1052_vm4, %v1049_v4 }
 0x23f PF: > { %s15_s22 = sadd.s32 1, %s1403_s22   ;;  %s2273_s18 = smov %s1395_s20 }
 0x240   : > { %p12_p8 = scmp.ge.s32.totalorder %s15_s22, 18   ;;  %s2274_s19 = smov %s1399_s21 }
 0x241   : > { %s2275_s20 = smov %s2278_s23  ;;  %s2276_s21 = smov %s2282_s24 }
 0x242   :  { %14 = sbr.rel (!%p12_p8) target bundleno = 3 (0x3), region = 93 }

// kernel: cnn_forward.6
= control target key start
LH: loop header
LB: loop body
LE: loop exit
PB: predicated region body
PF: predicated region fallthrough
CT: control target
= control target key end

     0   :  { %s1530_s18 = smov 0   ;;  %s1532_s19 = smov 0   ;;  %s2190_s0 = inlined_call_operand.vmem [shape: f32[2,3648,114], index: 0, kind: input, shape index: {}]   ;;  %s2191_s1 = inlined_call_operand.vmem [shape: f32[3,64,96], index: 1, kind: input, shape index: {}]   ;;  %s2192_s2 = inlined_call_operand.vmem [shape: f32[64,1], index: 2, kind: input, shape index: {}]   ;;  %s2193_s3 = inlined_call_operand.vmem [shape: f32[112,56], index: 3, kind: input, shape index: {}]   ;;  %s2194_s4 = inlined_call_operand.vmem [shape: f32[112,56], index: 4, kind: input, shape index: {}]   ;;  %s2195_s5 = inlined_call_operand.vmem [shape: f32[2,56,64,56], index: 5, kind: output, shape index: {}]  }
   0x1   :  { %s1534_s20 = smov 0   ;;  %s1536_s21 = smov 0  }
   0x2   :  { %s1538_s22 = smov 0  }
   0x3 LB: > { %s24_s23 = sadd.s32 1, %s1483_s20  ;;  %s27_s24 = sadd.s32 1, %s1487_s21  ;;  %s1491_s22 = sphi %s1538_s22, %s15_s22   ;;  %s1487_s21 = sphi %s1536_s21, %s2311_s21   ;;  %s1483_s20 = sphi %s1534_s20, %s2310_s20   ;;  %s1479_s19 = sphi %s1532_s19, %s2309_s19   ;;  %s1475_s18 = sphi %s1530_s18, %s2308_s18  }
   0x4   : > { %p25_p0 = scmp.ge.s32.totalorder %s24_s23, 4  ;;  %p1170_p1 = scmp.ge.s32.totalorder %s1491_s22, 1 }
   0x5   : > { %p201_p2 = scmp.lt.s32.totalorder %s1491_s22, 9 }
   0x6   : > { %s2313_s23 = smov (%p25_p0, %s24_s23), 0  ;;  %s2315_s24 = smov (!%p25_p0, %s27_s24), %s1487_s21 }
   0x7   : > { %p202_p3 = pnand %p1170_p1, %p201_p2  ;;  %p29_p4 = scmp.ge.s32.totalorder %s2315_s24, 2 }
   0x8   : > { %p234_p5 = scmp.lt.s32.totalorder (!%p202_p3), %s1479_s19, 1  ;;  %s1560_s25 = smul.u32 (!%p202_p3), 14, %s1475_s18 }
   0x9   : > { %s2317_s24 = smov (%p29_p4, %s2315_s24), 0  ;;  %205 = sbr.rel (%p202_p3) target bundleno = 601 (0x259), region = 40 }
   0xa   : > { %p242_p6 = scmp.lt.s32.totalorder (!%p202_p3), %s1560_s25, 55  ;;  %s1874_s12 = smov (!%p202_p3), 0  }
   0xe   : > { %v1565_v0 = vld [vmem:[%s2191_s1] sm:$0xff]  ;;  %v1570_v1 = vld [vmem:[%s2191_s1 + $0x8] sm:$0xff]  ;;  %v1575_v2 = vld [vmem:[%s2191_s1 + $0x10] sm:$0xff]  ;;  %s2319_s19 = smov (!%p234_p5, %s1479_s19), 1 }
   0xf   : > { %2220 = vst [vmem:[#allocation2_spill] sm:$0xff] %v1565_v0  ;;  %v1580_v3 = vld [vmem:[%s2191_s1 + $0x18] sm:$0xff]  ;;  %v1585_v4 = vld [vmem:[%s2191_s1 + $0x20] sm:$0xff]  ;;  %v1590_v5 = vld [vmem:[%s2191_s1 + $0x28] sm:$0xff]  ;;  %s1273_s7 = smul.u32 3648, %s2319_s19 }
  0x10   : > { %2221 = vst [vmem:[#allocation3_spill] sm:$0xff] %v1570_v1  ;;  %v1595_v6 = vld [vmem:[%s2191_s1 + $0x30] sm:$0xff]  ;;  %v1600_v7 = vld [vmem:[%s2191_s1 + $0x38] sm:$0xff]  ;;  %v1605_v8 = vld [vmem:[%s2191_s1 + $0x40] sm:$0xff]  ;;  %s243_s14 = scalar_select %p242_p6, %s1560_s25, 55 }
  0x11   : > { %2222 = vst [vmem:[#allocation4_spill] sm:$0xff] %v1575_v2  ;;  %v1611_v9 = vld [vmem:[%s2191_s1 + $0x48] sm:$0xff]  ;;  %v1616_v10 = vld [vmem:[%s2191_s1 + $0x50] sm:$0xff]  ;;  %v1621_v11 = vld [vmem:[%s2191_s1 + $0x58] sm:$0xff]  ;;  %s1657_s30 = scalar_lea.vmem %s2190_s0, %s1273_s7  ;;  %s1274_s6 = smul.u32 448, %s2319_s19 }
  0x12   : > { %2223 = vst [vmem:[#allocation5_spill] sm:$0xff] %v1580_v3  ;;  %v1626_v12 = vld [vmem:[%s2191_s1 + $0x60] sm:$0xff]  ;;  %v1631_v13 = vld [vmem:[%s2191_s1 + $0x68] sm:$0xff]  ;;  %v1636_v14 = vld [vmem:[%s2191_s1 + $0x70] sm:$0xff]  ;;  %s1172_s15 = sshll.u32 %s243_s14, 3 }
  0x13   : > { %2224 = vst [vmem:[#allocation6_spill] sm:$0xff] %v1585_v4  ;;  %v1642_v15 = vld [vmem:[%s2191_s1 + $0x78] sm:$0xff]  ;;  %v1647_v16 = vld [vmem:[%s2191_s1 + $0x80] sm:$0xff]  ;;  %v1652_v17 = vld [vmem:[%s2191_s1 + $0x88] sm:$0xff]  ;;  %s246_s27 = sadd.s32 %s1274_s6, %s1172_s15 }
  0x14   : > { %2225 = vst [vmem:[#allocation7_spill] sm:$0xff] %v1590_v5  ;;  %v1662_v18 = vld [vmem:[%s2191_s1 + $0x90] sm:$0xff]  ;;  %v1667_v19 = vld [vmem:[%s2191_s1 + $0x98] sm:$0xff]  ;;  %v1672_v20 = vld [vmem:[%s2191_s1 + $0xa0] sm:$0xff]  ;;  %s1173_s11 = sshll.u32 %s246_s27, 3 }
  0x15   : > { %2226 = vst [vmem:[#allocation8_spill] sm:$0xff] %v1595_v6  ;;  %v1677_v21 = vld [vmem:[%s2191_s1 + $0xa8] sm:$0xff]  ;;  %v1682_v22 = vld [vmem:[%s2191_s1 + $0xb0] sm:$0xff]  ;;  %v1687_v23 = vld [vmem:[%s2191_s1 + $0xb8] sm:$0xff]  ;;  %s1722_s18 = scalar_lea.vmem %s2195_s5, %s1173_s11 }
  0x16   : > { %2227 = vst [vmem:[#allocation9_spill] sm:$0xff] %v1600_v7  ;;  %v1692_v24 = vld [vmem:[%s2192_s2] sm:$0xff]  ;;  %v1697_v25 = vld [vmem:[%s2192_s2 + $0x8] sm:$0xff]  ;;  %v1702_v26 = vld [vmem:[%s2192_s2 + $0x10] sm:$0xff] }
  0x17   : > { %2228 = vst [vmem:[#allocation10_spill] sm:$0xff] %v1605_v8  ;;  %v1707_v27 = vld [vmem:[%s2192_s2 + $0x18] sm:$0xff]  ;;  %v1712_v28 = vld [vmem:[%s2192_s2 + $0x20] sm:$0xff]  ;;  %v1717_v29 = vld [vmem:[%s2192_s2 + $0x28] sm:$0xff] }
  0x18   : > { %2229 = vst [vmem:[#allocation11_spill] sm:$0xff] %v1611_v9  ;;  %v1727_v30 = vld [vmem:[%s2192_s2 + $0x30] sm:$0xff]  ;;  %v1732_v31 = vld [vmem:[%s2192_s2 + $0x38] sm:$0xff]  ;;  %v1737_v32 = vld [vmem:[%s2193_s3] sm:$0xff] }
  0x19   : > { %2230 = vst [vmem:[#allocation12_spill] sm:$0xff] %v1616_v10  ;;  %v1742_v33 = vld [vmem:[%s2193_s3 + $0x8] sm:$0xff]  ;;  %v1747_v34 = vld [vmem:[%s2193_s3 + $0x10] sm:$0xff]  ;;  %v1752_v35 = vld [vmem:[%s2193_s3 + $0x18] sm:$0xff] }
  0x1a   : > { %2231 = vst [vmem:[#allocation13_spill] sm:$0xff] %v1621_v11  ;;  %v1757_v36 = vld [vmem:[%s2193_s3 + $0x20] sm:$0xff]  ;;  %v1762_v37 = vld [vmem:[%s2193_s3 + $0x28] sm:$0xff]  ;;  %v1767_v38 = vld [vmem:[%s2193_s3 + $0x30] sm:$0xff] }
  0x1b   : > { %2232 = vst [vmem:[#allocation14_spill] sm:$0xff] %v1626_v12  ;;  %v1772_v39 = vld [vmem:[%s2193_s3 + $0x38] sm:$0xff]  ;;  %v1777_v40 = vld [vmem:[%s2193_s3 + $0x40] sm:$0xff]  ;;  %v1782_v41 = vld [vmem:[%s2193_s3 + $0x48] sm:$0xff] }
  0x1c   : > { %2233 = vst [vmem:[#allocation15_spill] sm:$0xff] %v1631_v13  ;;  %v1787_v42 = vld [vmem:[%s2193_s3 + $0x50] sm:$0xff]  ;;  %v1792_v43 = vld [vmem:[%s2193_s3 + $0x58] sm:$0xff]  ;;  %v1797_v44 = vld [vmem:[%s2193_s3 + $0x60] sm:$0xff] }
  0x1d   : > { %2234 = vst [vmem:[#allocation16_spill] sm:$0xff] %v1636_v14  ;;  %v1802_v45 = vld [vmem:[%s2193_s3 + $0x68] sm:$0xff]  ;;  %v1807_v46 = vld [vmem:[%s2194_s4] sm:$0xff]  ;;  %v1817_v48 = vld [vmem:[%s2194_s4 + $0x10] sm:$0xff] }
  0x1e   : > { %2235 = vst [vmem:[#allocation17_spill] sm:$0xff] %v1642_v15  ;;  %v1812_v47 = vld [vmem:[%s2194_s4 + $0x8] sm:$0xff]  ;;  %v1822_v49 = vld [vmem:[%s2194_s4 + $0x18] sm:$0xff]  ;;  %v1827_v50 = vld [vmem:[%s2194_s4 + $0x20] sm:$0xff] }
  0x1f   : > { %2236 = vst [vmem:[#allocation18_spill] sm:$0xff] %v1647_v16  ;;  %v1832_v51 = vld [vmem:[%s2194_s4 + $0x28] sm:$0xff]  ;;  %v1837_v52 = vld [vmem:[%s2194_s4 + $0x30] sm:$0xff]  ;;  %v1842_v53 = vld [vmem:[%s2194_s4 + $0x38] sm:$0xff] }
  0x20   : > { %2237 = vst [vmem:[#allocation19_spill] sm:$0xff] %v1652_v17  ;;  %v1847_v54 = vld [vmem:[%s2194_s4 + $0x40] sm:$0xff]  ;;  %v1852_v55 = vld [vmem:[%s2194_s4 + $0x48] sm:$0xff]  ;;  %v1857_v56 = vld [vmem:[%s2194_s4 + $0x50] sm:$0xff] }
  0x21   : > { %2238 = vst [vmem:[#allocation20_spill] sm:$0xff] %v1662_v18  ;;  %v1862_v57 = vld [vmem:[%s2194_s4 + $0x58] sm:$0xff]  ;;  %v1867_v58 = vld [vmem:[%s2194_s4 + $0x60] sm:$0xff]  ;;  %v1872_v59 = vld [vmem:[%s2194_s4 + $0x68] sm:$0xff] }
  0x22   : > { %2239 = vst [vmem:[#allocation21_spill] sm:$0xff] %v1667_v19 }
  0x23   : > { %2240 = vst [vmem:[#allocation22_spill] sm:$0xff] %v1672_v20 }
  0x24   : > { %2241 = vst [vmem:[#allocation23_spill] sm:$0xff] %v1677_v21 }
  0x25   : > { %2242 = vst [vmem:[#allocation24_spill] sm:$0xff] %v1682_v22 }
  0x26   : > { %2243 = vst [vmem:[#allocation25_spill] sm:$0xff] %v1687_v23 }
  0x27   : > { %2244 = vst [vmem:[#allocation26_spill] sm:$0xff] %v1692_v24 }
  0x28   : > { %2245 = vst [vmem:[#allocation27_spill] sm:$0xff] %v1697_v25 }
  0x29   : > { %2246 = vst [vmem:[#allocation28_spill] sm:$0xff] %v1737_v32 }
  0x2a   : > { %2247 = vst [vmem:[#allocation29_spill] sm:$0xff] %v1742_v33 }
  0x2b   : > { %2248 = vst [vmem:[#allocation30_spill] sm:$0xff] %v1747_v34 }
  0x2c   : > { %2249 = vst [vmem:[#allocation31_spill] sm:$0xff] %v1752_v35 }
  0x2d   : > { %2250 = vst [vmem:[#allocation32_spill] sm:$0xff] %v1757_v36 }
  0x2e   : > { %2251 = vst [vmem:[#allocation33_spill] sm:$0xff] %v1762_v37 }
  0x2f   : > { %2252 = vst [vmem:[#allocation34_spill] sm:$0xff] %v1767_v38 }
  0x30   : > { %2253 = vst [vmem:[#allocation35_spill] sm:$0xff] %v1772_v39 }
  0x31   : > { %2254 = vst [vmem:[#allocation36_spill] sm:$0xff] %v1777_v40 }
  0x32   : > { %2255 = vst [vmem:[#allocation37_spill] sm:$0xff] %v1807_v46 }
  0x33   : > { %2256 = vst [vmem:[#allocation38_spill] sm:$0xff] %v1812_v47 }
  0x34   : > { %2257 = vst [vmem:[#allocation39_spill] sm:$0xff] %v1817_v48 }
  0x35   : > { %2258 = vst [vmem:[#allocation40_spill] sm:$0xff] %v1822_v49 }
  0x36   : > { %2259 = vst [vmem:[#allocation41_spill] sm:$0xff] %v1827_v50 }
  0x37   : > { %2260 = vst [vmem:[#allocation42_spill] sm:$0xff] %v1832_v51 }
  0x38   : > { %2261 = vst [vmem:[#allocation43_spill] sm:$0xff] %v1837_v52 }
  0x39   : > { %2262 = vst [vmem:[#allocation44_spill] sm:$0xff] %v1842_v53 }
  0x3a LB: >> { %v2263_v17 = vld [vmem:[#allocation19_spill] sm:$0xff]  ;;  %v2264_v16 = vld [vmem:[#allocation18_spill] sm:$0xff]  ;;  %v2267_v11 = vld [vmem:[#allocation13_spill] sm:$0xff]  ;;  %s319_s13 = sadd.s32 %s1495_s12, %s1560_s25  ;;  %s1497_s16 = smov 127   ;;  %vm383_vm0 = vcmask 785408   ;;  %vm933_vm1 = vcmask 916480   ;;  %s1495_s12 = sphi %s1874_s12, %s318_s12  }
  0x3b   : >> { %v2265_v13 = vld [vmem:[#allocation15_spill] sm:$0xff]  ;;  %v2266_v12 = vld [vmem:[#allocation14_spill] sm:$0xff]  ;;  %v2268_v10 = vld [vmem:[#allocation12_spill] sm:$0xff]  ;;  %s1190_s6 = sshll.u32 %s319_s13, 6  ;;  %s1498_s7 = smov 126   ;;  %vm1050_vm2 = vcmask 457728  }
  0x3c   : >> { %v2269_v9 = vld [vmem:[#allocation11_spill] sm:$0xff]  ;;  %v2270_v8 = vld [vmem:[#allocation10_spill] sm:$0xff]  ;;  %v2271_v7 = vld [vmem:[#allocation9_spill] sm:$0xff]  ;;  %s1882_s15 = scalar_lea.vmem %s1657_s30, %s1190_s6  ;;  %s1269_s19 = sshll.u32 %s1495_s12, 6 }
  0x3d   : >> { %v2272_v6 = vld [vmem:[#allocation8_spill] sm:$0xff]  ;;  %v2273_v5 = vld [vmem:[#allocation7_spill] sm:$0xff]  ;;  %v2274_v4 = vld [vmem:[#allocation6_spill] sm:$0xff]  ;;  %s2154_s17 = scalar_lea.vmem %s1722_s18, %s1269_s19  ;;  %s318_s12 = sadd.s32 1, %s1495_s12  }
  0x3e   : >> { %v2275_v3 = vld [vmem:[#allocation5_spill] sm:$0xff]  ;;  %v2276_v2 = vld [vmem:[#allocation4_spill] sm:$0xff]  ;;  %v1907_v20 = vld [vmem:[%s1882_s15 + $0x40] sm:$0xff]  ;;  %p315_p7 = scmp.ge.s32.totalorder %s318_s12, 14  }
  0x3f   : >> { %v1885_v60 = vld [vmem:[%s1882_s15 + $0x50] sm:$0xff]  ;;  %v1888_v61 = vld [vmem:[%s1882_s15 + $0x58] sm:$0xff]  ;;  %v1910_v47 = vld [vmem:[%s1882_s15 + $0x48] sm:$0xff] }
  0x40   : >> { %v1891_v62 = vld [vmem:[%s1882_s15 + $0x30] sm:$0xff]  ;;  %v1326_v63 = vpack.i.bf16 %v1885_v60, %v1888_v61  ;;  %v1896_v23 = vld [vmem:[%s1882_s15 + $0x38] sm:$0xff]  ;;  %477 = vmatpush.msra.mxu1 %v1888_v61  ;;  %v1913_v48 = vld [vmem:[%s1882_s15 + $0x20] sm:$0xff]  ;;  %v1331_v15 = vpack.i.bf16 %v1907_v20, %v1910_v47 }
  0x41   : >> { %v1336_v22 = vpack.i.bf16 %v1891_v62, %v1896_v23  ;;  %v325_v21 = vld [vmem:[%s1882_s15 + $0x10] sm:$0xff]  ;;  %v326_v46 = vld [vmem:[%s1882_s15 + $0x18] sm:$0xff]  ;;  %v1916_v33 = vld [vmem:[%s1882_s15 + $0x28] sm:$0xff] }
  0x42   : >> { %1327 = vrot.lane.b32.xlu0 %v1326_v63, %s1497_s16  ;;  %478 = vmatpush.msra.mxu1 %v1885_v60  ;;  %v1346_v32 = vpack.i.bf16 %v325_v21, %v326_v46  ;;  %v323_v34 = vld [vmem:[%s1882_s15] sm:$0xff]  ;;  %v324_v49 = vld [vmem:[%s1882_s15 + $0x8] sm:$0xff]  ;;  %v1341_v19 = vpack.i.bf16 %v1913_v48, %v1916_v33  ;;  %v1935_v50 = vld [vmem:[%s1882_s15 + $0x78] sm:$0xff]  ;;  %v1411_v38 = vpack.i.bf16 %v326_v46, %v1888_v61 }
  0x43   : >> { %1337 = vrot.lane.b32.xlu1 %v1336_v22, %s1497_s16  ;;  %v1351_v35 = vpack.i.bf16 %v323_v34, %v324_v49  ;;  %v1942_v51 = vld [vmem:[%s1882_s15 + $0x68] sm:$0xff]  ;;  %v1946_v37 = vld [vmem:[%s1882_s15 + $0x60] sm:$0xff] }
  0x44   : >> { %479 = vmatpush.msra.mxu1 %v1910_v47  ;;  %1347 = vrot.lane.b32.xlu2 %v1346_v32, %s1497_s16  ;;  %v1932_v32 = vld [vmem:[%s1882_s15 + $0x70] sm:$0xff]  ;;  %v1366_v14 = vpack.i.bf16 %v1946_v37, %v1942_v51  ;;  %v2277_v0 = vld [vmem:[#allocation2_spill] sm:$0xff]  ;;  %v2278_v1 = vld [vmem:[#allocation3_spill] sm:$0xff] }
  0x45   : >> { %v1356_v36 = vpack.i.bf16 %v1932_v32, %v1935_v50  ;;  %v1386_v52 = vpack.i.bf16 %v1891_v62, %v1932_v32  ;;  %v2279_v24 = vld [vmem:[#allocation26_spill] sm:$0xff]  ;;  %v2280_v25 = vld [vmem:[#allocation27_spill] sm:$0xff] }
  0x46   : >> { %480 = vmatpush.msra.mxu1 %v1907_v20 }
  0x48   : >> { %481 = vmatpush.msra.mxu1 %v1896_v23 }
  0x4a   : >> { %1332 = vrot.lane.b32.xlu0 %v1331_v15, %s1497_s16  ;;  %482 = vmatpush.msra.mxu1 %v1891_v62 }
  0x4b   : >> { %1342 = vrot.lane.b32.xlu1 %v1341_v19, %s1497_s16 }
  0x4c   : >> { %483 = vmatpush.msra.mxu1 %v1916_v33  ;;  %1352 = vrot.lane.b32.xlu2 %v1351_v35, %s1497_s16  ;;  %v1381_v35 = vpack.i.bf16 %v1896_v23, %v1935_v50 }
  0x4e   : >> { %484 = vmatpush.msra.mxu1 %v1913_v48 }
  0x50   : >> { %485 = vmatpush.msra.mxu1 %v326_v46 }
  0x52   : >> { %1357 = vrot.lane.b32.xlu0 %v1356_v36, %s1497_s16  ;;  %486 = vmatpush.msra.mxu1 %v325_v21  ;;  %v1396_v36 = vpack.i.bf16 %v1916_v33, %v1942_v51 }
  0x53   : >> { %1362 = vrot.lane.b32.xlu1 %v1326_v63, %s1498_s7 }
  0x54   : >> { %487 = vmatpush.msra.mxu1 %v324_v49  ;;  %1367 = vrot.lane.b32.xlu2 %v1366_v14, %s1497_s16  ;;  %v1401_v14 = vpack.i.bf16 %v1913_v48, %v1946_v37 }
  0x56   : >> { %488 = vmatpush.msra.mxu1 %v323_v34 }
  0x57   : >> { %1199 = vmatmul.msk.f32.vlgmr.msra.gmra.mxu1 %vm383_vm0, %v2277_v0 }
  0x5a   : >> { %1372 = vrot.lane.b32.xlu0 %v1331_v15, %s1498_s7 }
  0x5b   : >> { %1377 = vrot.lane.b32.xlu1 %v1326_v63, %s1497_s16  ;;  %v1416_v63 = vpack.i.bf16 %v325_v21, %v1885_v60 }
  0x5c   : >> { %1382 = vrot.lane.b32.xlu2 %v1381_v35, %s1498_s7  ;;  %v1426_v35 = vpack.i.bf16 %v324_v49, %v1910_v47 }
  0x5f   : >> { %1200 = vmatmul.msk.f32.gmra.mxu1 %vm383_vm0, %v2278_v1 }
  0x62   : >> { %1387 = vrot.lane.b32.xlu0 %v1386_v52, %s1498_s7 }
  0x63   : >> { %1392 = vrot.lane.b32.xlu1 %v1331_v15, %s1497_s16  ;;  %v1431_v15 = vpack.i.bf16 %v323_v34, %v1907_v20 }
  0x64   : >> { %1397 = vrot.lane.b32.xlu2 %v1396_v36, %s1498_s7 }
  0x67   : >> { %1201 = vmatmul.msk.f32.gmra.mxu1 %vm383_vm0, %v2276_v2 }
  0x6a   : >> { %1402 = vrot.lane.b32.xlu0 %v1401_v14, %s1498_s7 }
  0x6b   : >> { %1407 = vrot.lane.b32.xlu1 %v1336_v22, %s1497_s16 }
  0x6c   : >> { %1412 = vrot.lane.b32.xlu2 %v1411_v38, %s1498_s7 }
  0x6f   : >> { %1202 = vmatmul.msk.f32.gmra.mxu1 %vm383_vm0, %v2275_v3 }
  0x72   : >> { %1417 = vrot.lane.b32.xlu0 %v1416_v63, %s1498_s7 }
  0x73   : >> { %1422 = vrot.lane.b32.xlu1 %v1341_v19, %s1497_s16 }
  0x74   : >> { %1427 = vrot.lane.b32.xlu2 %v1426_v35, %s1498_s7 }
  0x77   : >> { %1203 = vmatmul.msk.f32.gmra.mxu1 %vm383_vm0, %v2274_v4 }
  0x7a   : >> { %1432 = vrot.lane.b32.xlu0 %v1431_v15, %s1498_s7 }
  0x7b   : >> { %1437 = vrot.lane.b32.xlu1 %v1336_v22, %s1498_s7 }
  0x7c   : >> { %1442 = vrot.lane.b32.xlu2 %v1341_v19, %s1498_s7 }
  0x7f   : >> { %1204 = vmatmul.msk.f32.gmra.mxu1 %vm383_vm0, %v2273_v5 }
  0x87   : >> { %1205 = vmatmul.msk.f32.gmra.mxu1 %vm383_vm0, %v2272_v6 }
  0x8f   : >> { %1206 = vmatmul.msk.f32.gmra.mxu1 %vm383_vm0, %v2271_v7 }
  0x9e   : >> { %v1348_v52 = vpop.permute.xlu2 %1347 }
  0xa6   : >> { %v1353_v36 = vpop.permute.xlu2 %1352 }
  0xae   : >> { %v1368_v46 = vpop.permute.xlu2 %1367 }
  0xb4   : >> { %v1328_v38 = vpop.permute.xlu0 %1327 }
  0xb5   : >> { %v1329_v21 = vunpack.i.l.bf16 %v1328_v38  ;;  %v1338_v14 = vpop.permute.xlu1 %1337  ;;  %v1330_v49 = vunpack.i.h.bf16 %v1328_v38 }
  0xb6   : >> { %v1383_v63 = vpop.permute.xlu2 %1382  ;;  %v1339_v15 = vunpack.i.l.bf16 %v1338_v14  ;;  %v1340_v0 = vunpack.i.h.bf16 %v1338_v14  ;;  %v1370_v14 = vunpack.i.h.bf16 %v1368_v46 }
  0xb7   : >> { %412 = vmatpush.msra.mxu0 %v1329_v21  ;;  %v1384_v18 = vunpack.i.l.bf16 %v1383_v63 }
  0xb9   : >> { %413 = vmatpush.msra.mxu0 %v1330_v49  ;;  %864 = vmatpush.msrb.mxu1 %v1384_v18 }
  0xbc   : >> { %v1333_v19 = vpop.permute.xlu0 %1332 }
  0xbd   : >> { %v1334_v22 = vunpack.i.l.bf16 %v1333_v19  ;;  %v1343_v34 = vpop.permute.xlu1 %1342  ;;  %v1335_v35 = vunpack.i.h.bf16 %v1333_v19  ;;  %v1349_v19 = vunpack.i.l.bf16 %v1348_v52 }
  0xbe   : >> { %v1344_v39 = vunpack.i.l.bf16 %v1343_v34  ;;  %v1345_v40 = vunpack.i.h.bf16 %v1343_v34 }
  0xbf   : >> { %414 = vmatpush.msra.mxu0 %v1334_v22  ;;  %v1369_v22 = vunpack.i.l.bf16 %v1368_v46 }
  0xc1   : >> { %415 = vmatpush.msra.mxu0 %v1335_v35  ;;  %v1350_v35 = vunpack.i.h.bf16 %v1348_v52 }
  0xc3   : >> { %416 = vmatpush.msra.mxu0 %v1339_v15  ;;  %v1354_v15 = vunpack.i.l.bf16 %v1353_v36 }
  0xc4   : >> { %v1358_v38 = vpop.permute.xlu0 %1357 }
  0xc5   : >> { %417 = vmatpush.msra.mxu0 %v1340_v0  ;;  %v1359_v21 = vunpack.i.l.bf16 %v1358_v38  ;;  %v1360_v18 = vunpack.i.h.bf16 %v1358_v38  ;;  %v1363_v49 = vpop.permute.xlu1 %1362 }
  0xc6   : >> { %v1364_v53 = vunpack.i.l.bf16 %v1363_v49  ;;  %v1365_v1 = vunpack.i.h.bf16 %v1363_v49 }
  0xc7   : >> { %418 = vmatpush.msra.mxu0 %v1344_v39  ;;  %746 = vmatpush.msra.mxu3 %v1359_v21  ;;  %v1398_v21 = vpop.permute.xlu2 %1397 }
  0xc8   : >> { %578 = vmatpush.msra.mxu2 %v1364_v53 }
  0xc9   : >> { %747 = vmatpush.msra.mxu3 %v1360_v18  ;;  %419 = vmatpush.msra.mxu0 %v1345_v40  ;;  %v1355_v40 = vunpack.i.h.bf16 %v1353_v36  ;;  %v1400_v36 = vunpack.i.h.bf16 %v1398_v21 }
  0xca   : >> { %579 = vmatpush.msra.mxu2 %v1365_v1  ;;  %v1385_v1 = vunpack.i.h.bf16 %v1383_v63  ;;  %v1399_v63 = vunpack.i.l.bf16 %v1398_v21 }
  0xcb   : >> { %420 = vmatpush.msra.mxu0 %v1349_v19  ;;  %748 = vmatpush.msra.mxu3 %v1369_v22 }
  0xcc   : >> { %v1373_v0 = vpop.permute.xlu0 %1372 }
  0xcd   : >> { %421 = vmatpush.msra.mxu0 %v1350_v35  ;;  %749 = vmatpush.msra.mxu3 %v1370_v14  ;;  %v1374_v39 = vunpack.i.l.bf16 %v1373_v0  ;;  %v1375_v38 = vunpack.i.h.bf16 %v1373_v0  ;;  %v1378_v34 = vpop.permute.xlu1 %1377 }
  0xce   : >> { %v1379_v53 = vunpack.i.l.bf16 %v1378_v34  ;;  %v1380_v18 = vunpack.i.h.bf16 %v1378_v34 }
  0xcf   : >> { %422 = vmatpush.msra.mxu0 %v1354_v15  ;;  %580 = vmatpush.msra.mxu2 %v1374_v39  ;;  %v1413_v35 = vpop.permute.xlu2 %1412 }
  0xd0   : >> { %750 = vmatpush.msra.mxu3 %v1379_v53  ;;  %v1415_v0 = vunpack.i.h.bf16 %v1413_v35  ;;  %v1414_v39 = vunpack.i.l.bf16 %v1413_v35  ;;  %v2284_v35 = vld [vmem:[#allocation20_spill] sm:$0xff] }
  0xd1   : >> { %423 = vmatpush.msra.mxu0 %v1355_v40  ;;  %581 = vmatpush.msra.mxu2 %v1375_v38 }
  0xd2   : >> { %1191 = vmatmul.msk.f32.vlgmr.msra.gmra.mxu0 %vm383_vm0, %v2270_v8  ;;  %751 = vmatpush.msra.mxu3 %v1380_v18 }
  0xd3   : >> { %787 = vmatpush.msrb.mxu0 %v1935_v50  ;;  %582 = vmatpush.msra.mxu2 %v1385_v1 }
  0xd4   : >> { %v1388_v52 = vpop.permute.xlu0 %1387 }
  0xd5   : >> { %788 = vmatpush.msrb.mxu0 %v1932_v32  ;;  %v1390_v46 = vunpack.i.h.bf16 %v1388_v52  ;;  %v1389_v49 = vunpack.i.l.bf16 %v1388_v52  ;;  %v1393_v22 = vpop.permute.xlu1 %1392 }
  0xd6   : >> { %v1394_v19 = vunpack.i.l.bf16 %v1393_v22  ;;  %v1395_v14 = vunpack.i.h.bf16 %v1393_v22 }
  0xd7   : >> { %583 = vmatpush.msra.mxu2 %v1390_v46  ;;  %865 = vmatpush.msrb.mxu1 %v1389_v49 }
  0xd8   : >> { %789 = vmatpush.msrb.mxu0 %v1942_v51  ;;  %752 = vmatpush.msra.mxu3 %v1394_v19  ;;  %v2282_v19 = vld [vmem:[#allocation44_spill] sm:$0xff] }
  0xd9   : >> { %584 = vmatpush.msra.mxu2 %v1400_v36  ;;  %866 = vmatpush.msrb.mxu1 %v1399_v63 }
  0xda   : >> { %1192 = vmatmul.msk.f32.gmra.mxu0 %vm383_vm0, %v2269_v9  ;;  %753 = vmatpush.msra.mxu3 %v1395_v14  ;;  %v2283_v14 = vld [vmem:[#allocation35_spill] sm:$0xff] }
  0xdb   : >> { %790 = vmatpush.msrb.mxu0 %v1946_v37  ;;  %v1428_v37 = vpop.permute.xlu2 %1427 }
  0xdc   : >> { %v1403_v50 = vpop.permute.xlu0 %1402  ;;  %v1430_v18 = vunpack.i.h.bf16 %v1428_v37  ;;  %v1429_v1 = vunpack.i.l.bf16 %v1428_v37  ;;  %v2293_v37 = vld [vmem:[#allocation21_spill] sm:$0xff] }
  0xdd   : >> { %v1405_v32 = vunpack.i.h.bf16 %v1403_v50  ;;  %v1404_v15 = vunpack.i.l.bf16 %v1403_v50  ;;  %791 = vmatpush.msrb.mxu0 %v1888_v61  ;;  %v1408_v51 = vpop.permute.xlu1 %1407  ;;  %v1499_v61 = vmov 0   ;;  %v2285_v50 = vld [vmem:[#allocation34_spill] sm:$0xff] }
  0xde   : >> { %v1409_v38 = vunpack.i.l.bf16 %v1408_v51  ;;  %v1410_v34 = vunpack.i.h.bf16 %v1408_v51  ;;  %1446 = vset.pattern.permute.xlu0 %v1499_v61  ;;  %1447 = vset.pattern.permute.xlu1 %v1499_v61  ;;  %v2289_v51 = vld [vmem:[#allocation42_spill] sm:$0xff] }
  0xdf   : >> { %585 = vmatpush.msra.mxu2 %v1405_v32  ;;  %867 = vmatpush.msrb.mxu1 %v1404_v15  ;;  %v2286_v32 = vld [vmem:[#allocation43_spill] sm:$0xff]  ;;  %v2287_v15 = vld [vmem:[#allocation16_spill] sm:$0xff] }
  0xe0   : >> { %754 = vmatpush.msra.mxu3 %v1409_v38  ;;  %792 = vmatpush.msrb.mxu0 %v1885_v60  ;;  %v2291_v38 = vld [vmem:[#allocation41_spill] sm:$0xff] }
  0xe1   : >> { %586 = vmatpush.msra.mxu2 %v1415_v0  ;;  %868 = vmatpush.msrb.mxu1 %v1414_v39  ;;  %v2288_v0 = vld [vmem:[#allocation33_spill] sm:$0xff]  ;;  %v2290_v39 = vld [vmem:[#allocation32_spill] sm:$0xff] }
  0xe2   : >> { %1193 = vmatmul.msk.f32.gmra.mxu0 %vm383_vm0, %v2268_v10  ;;  %755 = vmatpush.msra.mxu3 %v1410_v34  ;;  %v2292_v34 = vld [vmem:[#allocation31_spill] sm:$0xff] }
  0xe3   : >> { %793 = vmatpush.msrb.mxu0 %v1910_v47  ;;  %625 = vperm.xlu0 %1446, %v2279_v24   ;;  %v1443_v63 = vpop.permute.xlu2 %1442 }
  0xe4   : >> { %v1418_v21 = vpop.permute.xlu0 %1417  ;;  %630 = vperm.xlu1 %1447, %v2280_v25   ;;  %1448 = vset.pattern.permute.xlu2 %v1499_v61  ;;  %v1444_v22 = vunpack.i.l.bf16 %v1443_v63  ;;  %v2294_v61 = vld [vmem:[#allocation40_spill] sm:$0xff] }
  0xe5   : >> { %v1420_v53 = vunpack.i.h.bf16 %v1418_v21  ;;  %v1419_v60 = vunpack.i.l.bf16 %v1418_v21  ;;  %v1423_v40 = vpop.permute.xlu1 %1422  ;;  %794 = vmatpush.msrb.mxu0 %v1907_v20  ;;  %635 = vperm.xlu2 %1448, %v1702_v26   ;;  %v2295_v21 = vld [vmem:[#allocation30_spill] sm:$0xff] }
  0xe6   : >> { %v1424_v52 = vunpack.i.l.bf16 %v1423_v40  ;;  %v1425_v46 = vunpack.i.h.bf16 %v1423_v40  ;;  %v2299_v40 = vld [vmem:[#allocation28_spill] sm:$0xff] }
  0xe7   : >> { %587 = vmatpush.msra.mxu2 %v1420_v53  ;;  %869 = vmatpush.msrb.mxu1 %v1419_v60  ;;  %v2296_v53 = vld [vmem:[#allocation17_spill] sm:$0xff]  ;;  %v2298_v60 = vld [vmem:[#allocation39_spill] sm:$0xff] }
  0xe8   : >> { %756 = vmatpush.msra.mxu3 %v1424_v52  ;;  %795 = vmatpush.msrb.mxu0 %v1896_v23  ;;  %v2301_v52 = vld [vmem:[#allocation22_spill] sm:$0xff] }
  0xe9   : >> { %588 = vmatpush.msra.mxu2 %v1430_v18  ;;  %870 = vmatpush.msrb.mxu1 %v1429_v1  ;;  %v2297_v18 = vld [vmem:[#allocation29_spill] sm:$0xff]  ;;  %v2300_v1 = vld [vmem:[#allocation38_spill] sm:$0xff] }
  0xea   : >> { %1194 = vmatmul.msk.f32.gmra.mxu0 %vm383_vm0, %v2267_v11  ;;  %757 = vmatpush.msra.mxu3 %v1425_v46  ;;  %v2302_v46 = vld [vmem:[#allocation37_spill] sm:$0xff] }
  0xeb   : >> { %796 = vmatpush.msrb.mxu0 %v1891_v62  ;;  %1229 = vmatmul.msk.f32.vlgmr.msra.gmra.mxu3 %vm383_vm0, %v2270_v8 }
  0xec   : >> { %v1433_v20 = vpop.permute.xlu0 %1432  ;;  %650 = vperm.xlu0 %1446, %v1717_v29   ;;  %640 = vperm.xlu1 %1447, %v1707_v27  }
  0xed   : >> { %v1435_v47 = vunpack.i.h.bf16 %v1433_v20  ;;  %v1438_v49 = vpop.permute.xlu1 %1437  ;;  %v1434_v23 = vunpack.i.l.bf16 %v1433_v20  ;;  %797 = vmatpush.msrb.mxu0 %v1916_v33  ;;  %1001 = vmatpush.msrb.mxu3 %v1872_v59  ;;  %v1445_v33 = vunpack.i.h.bf16 %v1443_v63  ;;  %v2303_v20 = vld [vmem:[#allocation2_spill] sm:$0xff]  ;;  %v490_v63 = vpop.f32.mrf.mxu1 }
  0xee   : >> { %v1439_v36 = vunpack.i.l.bf16 %v1438_v49  ;;  %v1440_v62 = vunpack.i.h.bf16 %v1438_v49  ;;  %645 = vperm.xlu2 %1448, %v1712_v28   ;;  %v2305_v49 = vld [vmem:[#allocation3_spill] sm:$0xff] }
  0xef   : >> { %589 = vmatpush.msra.mxu2 %v1435_v47  ;;  %871 = vmatpush.msrb.mxu1 %v1434_v23  ;;  %v2304_v47 = vld [vmem:[#allocation23_spill] sm:$0xff]  ;;  %v2306_v23 = vld [vmem:[#allocation24_spill] sm:$0xff] }
  0xf0   : >> { %1207 = vmatmul.msk.f32.vlgmr.msra.gmra.mxu2 %vm383_vm0, %v2264_v16  ;;  %798 = vmatpush.msrb.mxu0 %v1913_v48  ;;  %v2281_v48 = vld [vmem:[#allocation36_spill] sm:$0xff] }
  0xf1   : >> { %872 = vmatpush.msrb.mxu1 %v1439_v36  ;;  %960 = vmatpush.msrb.mxu2 %v1802_v45  ;;  %v2307_v36 = vld [vmem:[#allocation25_spill] sm:$0xff] }
  0xf2   : >> { %1195 = vmatmul.msk.f32.gmra.mxu0 %vm383_vm0, %v2266_v12  ;;  %1002 = vmatpush.msrb.mxu3 %v1867_v58 }
  0xf3   : >> { %873 = vmatpush.msrb.mxu1 %v1440_v62  ;;  %1230 = vmatmul.msk.f32.gmra.mxu3 %vm383_vm0, %v2269_v9 }
  0xf4   : >> { %961 = vmatpush.msrb.mxu2 %v1797_v44  ;;  %1003 = vmatpush.msrb.mxu3 %v1862_v57 }
  0xf5   : >> { %874 = vmatpush.msrb.mxu1 %v1444_v22  ;;  %655 = vperm.xlu1 %1447, %v1727_v30   ;;  %v493_v62 = vpop.f32.mrf.mxu1 }
  0xf6   : >> { %962 = vmatpush.msrb.mxu2 %v1792_v43  ;;  %1004 = vmatpush.msrb.mxu3 %v1857_v56 }
  0xf7   : >> { %875 = vmatpush.msrb.mxu1 %v1445_v33  ;;  %660 = vperm.xlu2 %1448, %v1732_v31  }
  0xf8   : >> { %1208 = vmatmul.msk.f32.gmra.mxu2 %vm383_vm0, %v2263_v17  ;;  %1245 = vmatmul.msk.f32.vlgmr.msrb.gmra.mxu1 %vm383_vm0, %v2264_v16 }
  0xf9   : >> { %963 = vmatpush.msrb.mxu2 %v1787_v42  ;;  %1005 = vmatpush.msrb.mxu3 %v1852_v55 }
  0xfa   : >> { %1196 = vmatmul.msk.f32.gmra.mxu0 %vm383_vm0, %v2265_v13 }
  0xfb   : >> { %1231 = vmatmul.msk.f32.gmra.mxu3 %vm383_vm0, %v2268_v10  ;;  %964 = vmatpush.msrb.mxu2 %v1782_v41 }
  0xfc   : >> { %1006 = vmatpush.msrb.mxu3 %v1847_v54 }
  0xfd   : >> { %965 = vmatpush.msrb.mxu2 %v2281_v48  ;;  %v496_v22 = vpop.f32.mrf.mxu1 }
  0xfe   : >> { %1007 = vmatpush.msrb.mxu3 %v2282_v19 }
  0xff   : >> { %966 = vmatpush.msrb.mxu2 %v2283_v14 }
 0x100   : >> { %1209 = vmatmul.msk.f32.gmra.mxu2 %vm383_vm0, %v2284_v35  ;;  %1246 = vmatmul.msk.f32.gmra.mxu1 %vm383_vm0, %v2263_v17 }
 0x101   : >> { %967 = vmatpush.msrb.mxu2 %v2285_v50  ;;  %1008 = vmatpush.msrb.mxu3 %v2286_v32 }
 0x102   : >> { %1197 = vmatmul.msk.f32.gmra.mxu0 %vm383_vm0, %v2287_v15 }
 0x103   : >> { %1232 = vmatmul.msk.f32.gmra.mxu3 %vm383_vm0, %v2267_v11  ;;  %968 = vmatpush.msrb.mxu2 %v2288_v0 }
 0x104   : >> { %1009 = vmatpush.msrb.mxu3 %v2289_v51 }
 0x105   : >> { %969 = vmatpush.msrb.mxu2 %v2290_v39  ;;  %v499_v48 = vpop.f32.mrf.mxu1 }
 0x106   : >> { %1010 = vmatpush.msrb.mxu3 %v2291_v38 }
 0x107   : >> { %970 = vmatpush.msrb.mxu2 %v2292_v34 }
 0x108   : >> { %1210 = vmatmul.msk.f32.gmra.mxu2 %vm383_vm0, %v2293_v37  ;;  %1247 = vmatmul.msk.f32.gmra.mxu1 %vm383_vm0, %v2284_v35 }
 0x109   : >> { %1011 = vmatpush.msrb.mxu3 %v2294_v61  ;;  %971 = vmatpush.msrb.mxu2 %v2295_v21 }
 0x10a   : >> { %1198 = vmatmul.msk.f32.gmra.mxu0 %vm383_vm0, %v2296_v53 }
 0x10b   : >> { %1233 = vmatmul.msk.f32.gmra.mxu3 %vm383_vm0, %v2266_v12  ;;  %972 = vmatpush.msrb.mxu2 %v2297_v18 }
 0x10c   : >> { %1012 = vmatpush.msrb.mxu3 %v2298_v60 }
 0x10d   : >> { %973 = vmatpush.msrb.mxu2 %v2299_v40  ;;  %v2112_v14 = vpop.f32.mrf.mxu1 }
 0x10e   : >> { %1013 = vmatpush.msrb.mxu3 %v2300_v1 }
 0x110   : >> { %1211 = vmatmul.msk.f32.gmra.mxu2 %vm383_vm0, %v2301_v52  ;;  %1248 = vmatmul.msk.f32.gmra.mxu1 %vm383_vm0, %v2293_v37 }
 0x111   : >> { %1014 = vmatpush.msrb.mxu3 %v2302_v46 }
 0x112   : >> { %1237 = vmatmul.msk.f32.vlgmr.msrb.gmra.mxu0 %vm383_vm0, %v2303_v20 }
 0x113   : >> { %1234 = vmatmul.msk.f32.gmra.mxu3 %vm383_vm0, %v2265_v13 }
 0x115   : >> { %v2114_v32 = vpop.f32.mrf.mxu1 }
 0x118   : >> { %1212 = vmatmul.msk.f32.gmra.mxu2 %vm383_vm0, %v2304_v47  ;;  %1249 = vmatmul.msk.f32.gmra.mxu1 %vm383_vm0, %v2301_v52 }
 0x11a   : >> { %1238 = vmatmul.msk.f32.gmra.mxu0 %vm383_vm0, %v2305_v49 }
 0x11b   : >> { %1235 = vmatmul.msk.f32.gmra.mxu3 %vm383_vm0, %v2287_v15 }
 0x11d   : >> { %v2118_v39 = vpop.f32.mrf.mxu1 }
 0x120   : >> { %1213 = vmatmul.msk.f32.gmra.mxu2 %vm383_vm0, %v2306_v23  ;;  %1250 = vmatmul.msk.f32.gmra.mxu1 %vm383_vm0, %v2304_v47 }
 0x122   : >> { %1239 = vmatmul.msk.f32.gmra.mxu0 %vm383_vm0, %v2276_v2 }
 0x123   : >> { %1236 = vmatmul.msk.f32.gmra.mxu3 %vm383_vm0, %v2296_v53 }
 0x125   : >> { %v2122_v34 = vpop.f32.mrf.mxu1 }
 0x128   : >> { %1214 = vmatmul.msk.f32.gmra.mxu2 %vm383_vm0, %v2307_v36  ;;  %1251 = vmatmul.msk.f32.gmra.mxu1 %vm383_vm0, %v2306_v23 }
 0x12a   : >> { %1240 = vmatmul.msk.f32.gmra.mxu0 %vm383_vm0, %v2275_v3 }
 0x130   : >> { %1252 = vmatmul.msk.f32.gmra.mxu1 %vm383_vm0, %v2307_v36 }
 0x132   : >> { %1241 = vmatmul.msk.f32.gmra.mxu0 %vm383_vm0, %v2274_v4 }
 0x13a   : >> { %1242 = vmatmul.msk.f32.gmra.mxu0 %vm383_vm0, %v2273_v5 }
 0x142   : >> { %1243 = vmatmul.msk.f32.gmra.mxu0 %vm383_vm0, %v2272_v6 }
 0x14a   : >> { %1244 = vmatmul.msk.f32.gmra.mxu0 %vm383_vm0, %v2271_v7 }
 0x14f   : >> { %v425_v33 = vpop.f32.mrf.mxu0 }
 0x150   : >> { %v491_v49 = vadd.f32 %v490_v63, %v425_v33 }
 0x155   : >> { %v626_v3 = vpop.permute.xlu0 %625 }
 0x156   : >> { %v631_v17 = vpop.permute.xlu1 %630 }
 0x157   : >> { %v428_v19 = vpop.f32.mrf.mxu0 }
 0x158   : >> { %v494_v10 = vadd.f32 %v493_v62, %v428_v19 }
 0x15f   : >> { %v431_v50 = vpop.f32.mrf.mxu0 }
 0x167   : >> { %v434_v0 = vpop.f32.mrf.mxu0 }
 0x16e   : >> { %v759_v18 = vpop.f32.mrf.mxu3 }
 0x16f   : >> { %v2116_v51 = vpop.f32.mrf.mxu0 }
 0x173   : >> { %v591_v61 = vpop.f32.mrf.mxu2 }
 0x174   : >> { %v615_v2 = vadd.f32 %v591_v61, %v491_v49 }
 0x175   : >> { %v877_v60 = vpop.f32.mrf.mxu1 }
 0x176   : >> { %v762_v46 = vpop.f32.mrf.mxu3  ;;  %v663_v7 = vadd.f32 %v626_v3, %v615_v2 }
 0x177   : >> { %v2120_v38 = vpop.f32.mrf.mxu0 }
 0x178   : >> { %v671_v13 = vmax.f32 %v663_v7, 0.0  ;;  %v636_v7 = vpop.permute.xlu2 %635 }
 0x17b   : >> { %v594_v40 = vpop.f32.mrf.mxu2 }
 0x17c   : >> { %v616_v15 = vadd.f32 %v594_v40, %v494_v10 }
 0x17d   : >> { %v880_v20 = vpop.f32.mrf.mxu1 }
 0x17e   : >> { %v765_v9 = vpop.f32.mrf.mxu3  ;;  %v664_v63 = vadd.f32 %v631_v17, %v616_v15 }
 0x17f   : >> { %v2124_v21 = vpop.f32.mrf.mxu0 }
 0x183   : >> { %v597_v6 = vpop.f32.mrf.mxu2 }
 0x185   : >> { %v883_v12 = vpop.f32.mrf.mxu1 }
 0x186   : >> { %v768_v62 = vpop.f32.mrf.mxu3 }
 0x187   : >> { %v2126_v1 = vpop.f32.mrf.mxu0 }
 0x18b   : >> { %v600_v2 = vpop.f32.mrf.mxu2 }
 0x18d   : >> { %v886_v19 = vpop.f32.mrf.mxu1 }
 0x18f   : >> { %v800_v4 = vpop.f32.mrf.mxu0 }
 0x190   : >> { %v801_v5 = vadd.f32 %v800_v4, %v759_v18  ;;  %v497_v4 = vadd.f32 %v496_v22, %v431_v50  ;;  %v641_v22 = vpop.permute.xlu1 %640 }
 0x192   : >> { %v901_v8 = vadd.f32 %v877_v60, %v801_v5  ;;  %v771_v60 = vpop.f32.mrf.mxu3 }
 0x193   : >> { %v603_v15 = vpop.f32.mrf.mxu2 }
 0x194   : >> { %v909_v11 = vadd.f32 %v901_v8, %v626_v3  ;;  %v672_v3 = vmax.f32 %v664_v63, 0.0  ;;  %v617_v8 = vadd.f32 %v597_v6, %v497_v4 }
 0x196   : >> { %v917_v16 = vmax.f32 %v909_v11, 0.0 }
 0x197   : >> { %v803_v23 = vpop.f32.mrf.mxu0 }
 0x198   : >> { %v925_v24 = vmax.f32 %v671_v13, %v917_v16  ;;  %v804_v25 = vadd.f32 %v803_v23, %v762_v46  ;;  %v665_v13 = vadd.f32 %v636_v7, %v617_v8 }
 0x19a   : >> { %v902_v33 = vadd.f32 %v880_v20, %v804_v25  ;;  %1253 = vmatmul.msk.f32.vlgmr.msrb.gmra.mxu2 %vm933_vm1, %v925_v24  ;;  %1261 = vmatmul.msk.f32.vlgmr.msrb.gmra.mxu3 %vm933_vm1, %v925_v24  ;;  %v500_v25 = vadd.f32 %v499_v48, %v434_v0  ;;  %v673_v23 = vmax.f32 %v665_v13, 0.0  ;;  %v889_v20 = vpop.f32.mrf.mxu1  ;;  %v774_v8 = vpop.f32.mrf.mxu3 }
 0x19b   : >> { %v606_v4 = vpop.f32.mrf.mxu2 }
 0x19c   : >> { %v910_v5 = vadd.f32 %v902_v33, %v631_v17  ;;  %v618_v17 = vadd.f32 %v600_v2, %v500_v25  ;;  %v646_v33 = vpop.permute.xlu2 %645 }
 0x19e   : >> { %v918_v10 = vmax.f32 %v910_v5, 0.0 }
 0x19f   : >> { %v806_v11 = vpop.f32.mrf.mxu0 }
 0x1a0   : >> { %v807_v61 = vadd.f32 %v806_v11, %v765_v9  ;;  %v926_v18 = vmax.f32 %v672_v3, %v918_v10  ;;  %v666_v9 = vadd.f32 %v641_v22, %v618_v17 }
 0x1a2   : >> { %v903_v16 = vadd.f32 %v883_v12, %v807_v61  ;;  %1254 = vmatmul.msk.f32.gmra.mxu2 %vm933_vm1, %v926_v18  ;;  %1262 = vmatmul.msk.f32.gmra.mxu3 %vm933_vm1, %v926_v18  ;;  %v503_v12 = vadd.f32 %v2112_v14, %v2116_v51  ;;  %v674_v0 = vmax.f32 %v666_v9, 0.0  ;;  %v892_v11 = vpop.f32.mrf.mxu1  ;;  %v506_v14 = vadd.f32 %v2114_v32, %v2120_v38 }
 0x1a4   : >> { %v911_v24 = vadd.f32 %v903_v16, %v636_v7  ;;  %v619_v63 = vadd.f32 %v603_v15, %v503_v12  ;;  %v620_v61 = vadd.f32 %v606_v4, %v506_v14  ;;  %v609_v15 = vpop.f32.mrf.mxu2 }
 0x1a6   : >> { %v919_v50 = vmax.f32 %v911_v24, 0.0  ;;  %v667_v7 = vadd.f32 %v646_v33, %v619_v63  ;;  %v651_v24 = vpop.permute.xlu0 %650  ;;  %v512_v63 = vadd.f32 %v2122_v34, %v2126_v1 }
 0x1a7   : >> { %v809_v6 = vpop.f32.mrf.mxu0 }
 0x1a8   : >> { %v810_v40 = vadd.f32 %v809_v6, %v768_v62  ;;  %v927_v46 = vmax.f32 %v673_v23, %v919_v50  ;;  %v668_v23 = vadd.f32 %v651_v24, %v620_v61  ;;  %v509_v50 = vadd.f32 %v2118_v39, %v2124_v21 }
 0x1aa   : >> { %v904_v49 = vadd.f32 %v886_v19, %v810_v40  ;;  %1255 = vmatmul.msk.f32.gmra.mxu2 %vm933_vm1, %v927_v46  ;;  %1263 = vmatmul.msk.f32.gmra.mxu3 %vm933_vm1, %v927_v46  ;;  %v675_v19 = vmax.f32 %v667_v7, 0.0  ;;  %v895_v38 = vpop.f32.mrf.mxu1  ;;  %v676_v6 = vmax.f32 %v668_v23, 0.0  ;;  %v661_v7 = vpop.permute.xlu2 %660 }
 0x1ac   : >> { %v912_v48 = vadd.f32 %v904_v49, %v641_v22  ;;  %v777_v22 = vpop.f32.mrf.mxu3  ;;  %v656_v49 = vpop.permute.xlu1 %655 }
 0x1ae   : >> { %v920_v2 = vmax.f32 %v912_v48, 0.0 }
 0x1af   : >> { %v812_v5 = vpop.f32.mrf.mxu0 }
 0x1b0   : >> { %v813_v3 = vadd.f32 %v812_v5, %v771_v60  ;;  %v928_v62 = vmax.f32 %v674_v0, %v920_v2  ;;  %v621_v60 = vadd.f32 %v609_v15, %v509_v50  ;;  %v612_v0 = vpop.f32.mrf.mxu2 }
 0x1b1   : >> { %v622_v2 = vadd.f32 %v612_v0, %v512_v63 }
 0x1b2   : >> { %v905_v10 = vadd.f32 %v889_v20, %v813_v3  ;;  %1256 = vmatmul.msk.f32.gmra.mxu2 %vm933_vm1, %v928_v62  ;;  %1264 = vmatmul.msk.f32.gmra.mxu3 %vm933_vm1, %v928_v62  ;;  %v669_v12 = vadd.f32 %v656_v49, %v621_v60  ;;  %v898_v3 = vpop.f32.mrf.mxu1 }
 0x1b4   : >> { %v913_v51 = vadd.f32 %v905_v10, %v646_v33  ;;  %v780_v21 = vpop.f32.mrf.mxu3  ;;  %v677_v33 = vmax.f32 %v669_v12, 0.0  ;;  %v670_v10 = vadd.f32 %v661_v7, %v622_v2 }
 0x1b6   : >> { %v921_v18 = vmax.f32 %v913_v51, 0.0  ;;  %v678_v34 = vmax.f32 %v670_v10, 0.0 }
 0x1b7   : >> { %v815_v13 = vpop.f32.mrf.mxu0 }
 0x1b8   : >> { %v816_v16 = vadd.f32 %v815_v13, %v774_v8  ;;  %v929_v25 = vmax.f32 %v675_v19, %v921_v18 }
 0x1ba   : >> { %v906_v17 = vadd.f32 %v892_v11, %v816_v16  ;;  %1257 = vmatmul.msk.f32.gmra.mxu2 %vm933_vm1, %v929_v25  ;;  %1265 = vmatmul.msk.f32.gmra.mxu3 %vm933_vm1, %v929_v25 }
 0x1bc   : >> { %v914_v32 = vadd.f32 %v906_v17, %v651_v24 }
 0x1be   : >> { %v922_v40 = vmax.f32 %v914_v32, 0.0 }
 0x1bf   : >> { %v818_v46 = vpop.f32.mrf.mxu0 }
 0x1c0   : >> { %v819_v20 = vadd.f32 %v818_v46, %v777_v22  ;;  %v930_v9 = vmax.f32 %v676_v6, %v922_v40 }
 0x1c2   : >> { %v907_v48 = vadd.f32 %v895_v38, %v819_v20  ;;  %1258 = vmatmul.msk.f32.gmra.mxu2 %vm933_vm1, %v930_v9  ;;  %1266 = vmatmul.msk.f32.gmra.mxu3 %vm933_vm1, %v930_v9 }
 0x1c4   : >> { %v915_v39 = vadd.f32 %v907_v48, %v656_v49 }
 0x1c6   : >> { %v923_v4 = vmax.f32 %v915_v39, 0.0 }
 0x1c7   : >> { %v821_v5 = vpop.f32.mrf.mxu0 }
 0x1c8   : >> { %v822_v62 = vadd.f32 %v821_v5, %v780_v21  ;;  %v931_v8 = vmax.f32 %v677_v33, %v923_v4 }
 0x1ca   : >> { %v908_v11 = vadd.f32 %v898_v3, %v822_v62  ;;  %1259 = vmatmul.msk.f32.gmra.mxu2 %vm933_vm1, %v931_v8  ;;  %1267 = vmatmul.msk.f32.gmra.mxu3 %vm933_vm1, %v931_v8 }
 0x1cc   : >> { %v916_v14 = vadd.f32 %v908_v11, %v661_v7 }
 0x1ce   : >> { %v924_v1 = vmax.f32 %v916_v14, 0.0 }
 0x1d0   : >> { %v932_v51 = vmax.f32 %v678_v34, %v924_v1 }
 0x1d2   : >> { %1260 = vmatmul.msk.f32.gmra.mxu2 %vm933_vm1, %v932_v51  ;;  %1268 = vmatmul.msk.f32.gmra.mxu3 %vm933_vm1, %v932_v51 }
 0x21d   : >> { %v975_v19 = vpop.f32.mrf.mxu2  ;;  %v1016_v61 = vpop.f32.mrf.mxu3 }
 0x21e   : >> { %v1040_v18 = vmax.f32 %v975_v19, %v1016_v61 }
 0x220   : >> { %1051 = vst.msk [vmem:[%s2154_s17] sm:$0xff] %vm1050_vm2, %v1040_v18 }
 0x225   : >> { %v978_v13 = vpop.f32.mrf.mxu2  ;;  %v1019_v16 = vpop.f32.mrf.mxu3 }
 0x226   : >> { %v1041_v25 = vmax.f32 %v978_v13, %v1019_v16 }
 0x228   : >> { %1052 = vst.msk [vmem:[%s2154_s17 + $0x8] sm:$0xff] %vm1050_vm2, %v1041_v25 }
 0x22d   : >> { %v981_v24 = vpop.f32.mrf.mxu2  ;;  %v1022_v15 = vpop.f32.mrf.mxu3 }
 0x22e   : >> { %v1042_v23 = vmax.f32 %v981_v24, %v1022_v15 }
 0x230   : >> { %1053 = vst.msk [vmem:[%s2154_s17 + $0x10] sm:$0xff] %vm1050_vm2, %v1042_v23 }
 0x235   : >> { %v984_v17 = vpop.f32.mrf.mxu2  ;;  %v1025_v22 = vpop.f32.mrf.mxu3 }
 0x236   : >> { %v1043_v50 = vmax.f32 %v984_v17, %v1025_v22 }
 0x238   : >> { %1054 = vst.msk [vmem:[%s2154_s17 + $0x18] sm:$0xff] %vm1050_vm2, %v1043_v50 }
 0x23d   : >> { %v987_v32 = vpop.f32.mrf.mxu2  ;;  %v1028_v38 = vpop.f32.mrf.mxu3 }
 0x23e   : >> { %v1044_v6 = vmax.f32 %v987_v32, %v1028_v38 }
 0x240   : >> { %1055 = vst.msk [vmem:[%s2154_s17 + $0x20] sm:$0xff] %vm1050_vm2, %v1044_v6 }
 0x245   : >> { %v990_v60 = vpop.f32.mrf.mxu2  ;;  %v1031_v40 = vpop.f32.mrf.mxu3 }
 0x246   : >> { %v1045_v46 = vmax.f32 %v990_v60, %v1031_v40 }
 0x248   : >> { %1056 = vst.msk [vmem:[%s2154_s17 + $0x28] sm:$0xff] %vm1050_vm2, %v1045_v46 }
 0x24d   : >> { %v993_v20 = vpop.f32.mrf.mxu2  ;;  %v1034_v9 = vpop.f32.mrf.mxu3 }
 0x24e   : >> { %v1046_v49 = vmax.f32 %v993_v20, %v1034_v9 }
 0x250   : >> { %1057 = vst.msk [vmem:[%s2154_s17 + $0x30] sm:$0xff] %vm1050_vm2, %v1046_v49 }
 0x254   : > { %317 = sbr.rel (!%p315_p7) target bundleno = 58 (0x3a), region = 82 }
 0x255   : >> { %v996_v12 = vpop.f32.mrf.mxu2  ;;  %v1037_v48 = vpop.f32.mrf.mxu3 }
 0x256   : >> { %v1047_v0 = vmax.f32 %v996_v12, %v1037_v48 }
 0x258   : >> { %1058 = vst.msk [vmem:[%s2154_s17 + $0x38] sm:$0xff] %vm1050_vm2, %v1047_v0 }
 0x259 PF: > { %s15_s22 = sadd.s32 1, %s1491_s22   ;;  %s2308_s18 = smov %s1483_s20 }
 0x25a   : > { %p12_p8 = scmp.ge.s32.totalorder %s15_s22, 10   ;;  %s2309_s19 = smov %s1487_s21 }
 0x25b   : > { %s2310_s20 = smov %s2313_s23  ;;  %s2311_s21 = smov %s2317_s24 }
 0x25c   :  { %14 = sbr.rel (!%p12_p8) target bundleno = 3 (0x3), region = 93 }

// kernel: cnn_forward.7
= control target key start
LH: loop header
LB: loop body
LE: loop exit
PB: predicated region body
PF: predicated region fallthrough
CT: control target
= control target key end

     0   :  { %s2838_s18 = smov 0   ;;  %s2840_s19 = smov 0   ;;  %s4580_s0 = inlined_call_operand.vmem [shape: f32[2,3712,58], index: 0, kind: input, shape index: {}]   ;;  %s4581_s1 = inlined_call_operand.vmem [shape: f32[3,128,192], index: 1, kind: input, shape index: {}]   ;;  %s4582_s2 = inlined_call_operand.vmem [shape: f32[128,1], index: 2, kind: input, shape index: {}]   ;;  %s4583_s3 = inlined_call_operand.vmem [shape: f32[56,28], index: 3, kind: input, shape index: {}]   ;;  %s4584_s4 = inlined_call_operand.vmem [shape: f32[56,28], index: 4, kind: input, shape index: {}]   ;;  %s4585_s5 = inlined_call_operand.vmem [shape: f32[2,28,128,28], index: 5, kind: output, shape index: {}]  }
   0x1   :  { %s2842_s20 = smov 0   ;;  %s2844_s21 = smov 0  }
   0x2   :  { %s2846_s22 = smov 0  }
   0x3 LB: > { %s24_s23 = sadd.s32 1, %s2791_s20  ;;  %s27_s24 = sadd.s32 1, %s2795_s21  ;;  %s2799_s22 = sphi %s2846_s22, %s15_s22   ;;  %s2795_s21 = sphi %s2844_s21, %s5079_s21   ;;  %s2791_s20 = sphi %s2842_s20, %s5078_s20   ;;  %s2787_s19 = sphi %s2840_s19, %s5077_s19   ;;  %s2783_s18 = sphi %s2838_s18, %s5076_s18  }
   0x4   : > { %p25_p0 = scmp.ge.s32.totalorder %s24_s23, 2  ;;  %p2218_p1 = scmp.ge.s32.totalorder %s2799_s22, 1 }
   0x5   : > { %p201_p2 = scmp.lt.s32.totalorder %s2799_s22, 5 }
   0x6   : > { %s5081_s23 = smov (%p25_p0, %s24_s23), 0  ;;  %s5083_s24 = smov (!%p25_p0, %s27_s24), %s2795_s21 }
   0x7   : > { %p202_p3 = pnand %p2218_p1, %p201_p2  ;;  %p29_p4 = scmp.ge.s32.totalorder %s5083_s24, 2 }
   0x8   : > { %p234_p5 = scmp.lt.s32.totalorder (!%p202_p3), %s2787_s19, 1  ;;  %s2868_s25 = smul.u32 (!%p202_p3), 14, %s2783_s18 }
   0x9   : > { %s5085_s24 = smov (%p29_p4, %s5083_s24), 0  ;;  %205 = sbr.rel (%p202_p3) target bundleno = 1004 (0x3ec), region = 40 }
   0xa   : > { %p242_p6 = scmp.lt.s32.totalorder (!%p202_p3), %s2868_s25, 27  ;;  %s3512_s8 = smov (!%p202_p3), 0  }
   0xe   : > { %v2873_v0 = vld [vmem:[%s4581_s1] sm:$0xff]  ;;  %v2878_v1 = vld [vmem:[%s4581_s1 + $0x8] sm:$0xff]  ;;  %v2883_v2 = vld [vmem:[%s4581_s1 + $0x10] sm:$0xff]  ;;  %s5087_s19 = smov (!%p234_p5, %s2787_s19), 1 }
   0xf   : > { %4698 = vst [vmem:[#allocation2_spill] sm:$0xff] %v2873_v0  ;;  %v2888_v3 = vld [vmem:[%s4581_s1 + $0x18] sm:$0xff]  ;;  %v2893_v4 = vld [vmem:[%s4581_s1 + $0x20] sm:$0xff]  ;;  %v2898_v5 = vld [vmem:[%s4581_s1 + $0x28] sm:$0xff]  ;;  %s2461_s7 = smul.u32 3712, %s5087_s19 }
  0x10   : > { %4699 = vst [vmem:[#allocation3_spill] sm:$0xff] %v2878_v1  ;;  %v2903_v6 = vld [vmem:[%s4581_s1 + $0x30] sm:$0xff]  ;;  %v2908_v7 = vld [vmem:[%s4581_s1 + $0x38] sm:$0xff]  ;;  %v2913_v8 = vld [vmem:[%s4581_s1 + $0x40] sm:$0xff]  ;;  %s243_s14 = scalar_select %p242_p6, %s2868_s25, 27 }
  0x11   : > { %4700 = vst [vmem:[#allocation4_spill] sm:$0xff] %v2883_v2  ;;  %v2919_v9 = vld [vmem:[%s4581_s1 + $0x48] sm:$0xff]  ;;  %v2924_v10 = vld [vmem:[%s4581_s1 + $0x50] sm:$0xff]  ;;  %v2929_v11 = vld [vmem:[%s4581_s1 + $0x58] sm:$0xff]  ;;  %s2965_s30 = scalar_lea.vmem %s4580_s0, %s2461_s7  ;;  %s2462_s6 = smul.u32 448, %s5087_s19 }
  0x12   : > { %4701 = vst [vmem:[#allocation5_spill] sm:$0xff] %v2888_v3  ;;  %v2934_v12 = vld [vmem:[%s4581_s1 + $0x60] sm:$0xff]  ;;  %v2939_v13 = vld [vmem:[%s4581_s1 + $0x68] sm:$0xff]  ;;  %v2944_v14 = vld [vmem:[%s4581_s1 + $0x70] sm:$0xff]  ;;  %s2220_s15 = sshll.u32 %s243_s14, 4 }
  0x13   : > { %4702 = vst [vmem:[#allocation6_spill] sm:$0xff] %v2893_v4  ;;  %v2950_v15 = vld [vmem:[%s4581_s1 + $0x78] sm:$0xff]  ;;  %v2955_v16 = vld [vmem:[%s4581_s1 + $0x80] sm:$0xff]  ;;  %v2960_v17 = vld [vmem:[%s4581_s1 + $0x88] sm:$0xff]  ;;  %s246_s27 = sadd.s32 %s2462_s6, %s2220_s15 }
  0x14   : > { %4703 = vst [vmem:[#allocation7_spill] sm:$0xff] %v2898_v5  ;;  %v2970_v18 = vld [vmem:[%s4581_s1 + $0x90] sm:$0xff]  ;;  %v2975_v19 = vld [vmem:[%s4581_s1 + $0x98] sm:$0xff]  ;;  %v2980_v20 = vld [vmem:[%s4581_s1 + $0xa0] sm:$0xff]  ;;  %s2221_s11 = sshll.u32 %s246_s27, 3 }
  0x15   : > { %4704 = vst [vmem:[#allocation8_spill] sm:$0xff] %v2903_v6  ;;  %v2985_v21 = vld [vmem:[%s4581_s1 + $0xa8] sm:$0xff]  ;;  %v2990_v22 = vld [vmem:[%s4581_s1 + $0xb0] sm:$0xff]  ;;  %v2995_v23 = vld [vmem:[%s4581_s1 + $0xb8] sm:$0xff]  ;;  %s3030_s18 = scalar_lea.vmem %s4585_s5, %s2221_s11 }
  0x16   : > { %4705 = vst [vmem:[#allocation9_spill] sm:$0xff] %v2908_v7  ;;  %v3000_v24 = vld [vmem:[%s4581_s1 + $0xc0] sm:$0xff]  ;;  %v3005_v25 = vld [vmem:[%s4581_s1 + $0xc8] sm:$0xff]  ;;  %v3010_v26 = vld [vmem:[%s4581_s1 + $0xd0] sm:$0xff] }
  0x17   : > { %4706 = vst [vmem:[#allocation10_spill] sm:$0xff] %v2913_v8  ;;  %v3015_v27 = vld [vmem:[%s4581_s1 + $0xd8] sm:$0xff]  ;;  %v3020_v28 = vld [vmem:[%s4581_s1 + $0xe0] sm:$0xff]  ;;  %v3025_v29 = vld [vmem:[%s4581_s1 + $0xe8] sm:$0xff] }
  0x18   : > { %4707 = vst [vmem:[#allocation11_spill] sm:$0xff] %v2919_v9  ;;  %v3035_v30 = vld [vmem:[%s4581_s1 + $0xf0] sm:$0xff]  ;;  %v3040_v31 = vld [vmem:[%s4581_s1 + $0xf8] sm:$0xff]  ;;  %v3045_v32 = vld [vmem:[%s4581_s1 + $0x100] sm:$0xff] }
  0x19   : > { %4708 = vst [vmem:[#allocation12_spill] sm:$0xff] %v2924_v10  ;;  %v3050_v33 = vld [vmem:[%s4581_s1 + $0x108] sm:$0xff]  ;;  %v3055_v34 = vld [vmem:[%s4581_s1 + $0x110] sm:$0xff]  ;;  %v3060_v35 = vld [vmem:[%s4581_s1 + $0x118] sm:$0xff] }
  0x1a   : > { %4709 = vst [vmem:[#allocation13_spill] sm:$0xff] %v2929_v11  ;;  %v3065_v36 = vld [vmem:[%s4581_s1 + $0x120] sm:$0xff]  ;;  %v3070_v37 = vld [vmem:[%s4581_s1 + $0x128] sm:$0xff]  ;;  %v3075_v38 = vld [vmem:[%s4581_s1 + $0x130] sm:$0xff] }
  0x1b   : > { %4710 = vst [vmem:[#allocation14_spill] sm:$0xff] %v2934_v12  ;;  %v3080_v39 = vld [vmem:[%s4581_s1 + $0x138] sm:$0xff]  ;;  %v3085_v40 = vld [vmem:[%s4581_s1 + $0x140] sm:$0xff]  ;;  %v3090_v41 = vld [vmem:[%s4581_s1 + $0x148] sm:$0xff] }
  0x1c   : > { %4711 = vst [vmem:[#allocation15_spill] sm:$0xff] %v2939_v13  ;;  %v3095_v42 = vld [vmem:[%s4581_s1 + $0x150] sm:$0xff]  ;;  %v3100_v43 = vld [vmem:[%s4581_s1 + $0x158] sm:$0xff]  ;;  %v3105_v44 = vld [vmem:[%s4581_s1 + $0x160] sm:$0xff] }
  0x1d   : > { %4712 = vst [vmem:[#allocation16_spill] sm:$0xff] %v2944_v14  ;;  %v3110_v45 = vld [vmem:[%s4581_s1 + $0x168] sm:$0xff]  ;;  %v3115_v46 = vld [vmem:[%s4581_s1 + $0x170] sm:$0xff]  ;;  %v3120_v47 = vld [vmem:[%s4581_s1 + $0x178] sm:$0xff] }
  0x1e   : > { %4713 = vst [vmem:[#allocation17_spill] sm:$0xff] %v2950_v15  ;;  %v3125_v48 = vld [vmem:[%s4581_s1 + $0x180] sm:$0xff]  ;;  %v3130_v49 = vld [vmem:[%s4581_s1 + $0x188] sm:$0xff]  ;;  %v3135_v50 = vld [vmem:[%s4581_s1 + $0x190] sm:$0xff] }
  0x1f   : > { %4714 = vst [vmem:[#allocation18_spill] sm:$0xff] %v2955_v16  ;;  %v3140_v51 = vld [vmem:[%s4581_s1 + $0x198] sm:$0xff]  ;;  %v3145_v52 = vld [vmem:[%s4581_s1 + $0x1a0] sm:$0xff]  ;;  %v3150_v53 = vld [vmem:[%s4581_s1 + $0x1a8] sm:$0xff] }
  0x20   : > { %4715 = vst [vmem:[#allocation19_spill] sm:$0xff] %v2960_v17  ;;  %v3155_v54 = vld [vmem:[%s4581_s1 + $0x1b0] sm:$0xff]  ;;  %v3160_v55 = vld [vmem:[%s4581_s1 + $0x1b8] sm:$0xff]  ;;  %v3165_v56 = vld [vmem:[%s4581_s1 + $0x1c0] sm:$0xff] }
  0x21   : > { %4716 = vst [vmem:[#allocation20_spill] sm:$0xff] %v2970_v18  ;;  %v3170_v57 = vld [vmem:[%s4581_s1 + $0x1c8] sm:$0xff]  ;;  %v3175_v58 = vld [vmem:[%s4581_s1 + $0x1d0] sm:$0xff]  ;;  %v3180_v59 = vld [vmem:[%s4581_s1 + $0x1d8] sm:$0xff] }
  0x22   : > { %4717 = vst [vmem:[#allocation21_spill] sm:$0xff] %v2975_v19  ;;  %v3185_v60 = vld [vmem:[%s4581_s1 + $0x1e0] sm:$0xff]  ;;  %v3190_v61 = vld [vmem:[%s4581_s1 + $0x1e8] sm:$0xff]  ;;  %v3195_v62 = vld [vmem:[%s4581_s1 + $0x1f0] sm:$0xff] }
  0x23   : > { %4718 = vst [vmem:[#allocation22_spill] sm:$0xff] %v2980_v20  ;;  %v3200_v63 = vld [vmem:[%s4581_s1 + $0x1f8] sm:$0xff] }
  0x24   : > { %4719 = vst [vmem:[#allocation23_spill] sm:$0xff] %v2985_v21 }
  0x25   : > { %4720 = vst [vmem:[#allocation24_spill] sm:$0xff] %v2990_v22 }
  0x26   : > { %4721 = vst [vmem:[#allocation25_spill] sm:$0xff] %v2995_v23 }
  0x27   : > { %4722 = vst [vmem:[#allocation26_spill] sm:$0xff] %v3000_v24 }
  0x28   : > { %4723 = vst [vmem:[#allocation27_spill] sm:$0xff] %v3005_v25 }
  0x29   : > { %4724 = vst [vmem:[#allocation28_spill] sm:$0xff] %v3010_v26 }
  0x2a   : > { %4725 = vst [vmem:[#allocation29_spill] sm:$0xff] %v3015_v27 }
  0x2b   : > { %4726 = vst [vmem:[#allocation30_spill] sm:$0xff] %v3020_v28 }
  0x2c   : > { %4727 = vst [vmem:[#allocation31_spill] sm:$0xff] %v3025_v29 }
  0x2d   : > { %4728 = vst [vmem:[#allocation32_spill] sm:$0xff] %v3035_v30 }
  0x2e   : > { %4729 = vst [vmem:[#allocation33_spill] sm:$0xff] %v3040_v31 }
  0x2f   : > { %4730 = vst [vmem:[#allocation34_spill] sm:$0xff] %v3045_v32 }
  0x30   : > { %4731 = vst [vmem:[#allocation35_spill] sm:$0xff] %v3050_v33  ;;  %v3235_v33 = vld [vmem:[%s4581_s1 + $0x230] sm:$0xff] }
  0x31   : > { %4732 = vst [vmem:[#allocation36_spill] sm:$0xff] %v3055_v34 }
  0x32   : > { %4733 = vst [vmem:[#allocation37_spill] sm:$0xff] %v3060_v35  ;;  %v3230_v35 = vld [vmem:[%s4581_s1 + $0x228] sm:$0xff] }
  0x33   : > { %4734 = vst [vmem:[#allocation38_spill] sm:$0xff] %v3065_v36 }
  0x34   : > { %4735 = vst [vmem:[#allocation39_spill] sm:$0xff] %v3070_v37  ;;  %v3225_v37 = vld [vmem:[%s4581_s1 + $0x220] sm:$0xff] }
  0x35   : > { %4736 = vst [vmem:[#allocation40_spill] sm:$0xff] %v3075_v38 }
  0x36   : > { %4737 = vst [vmem:[#allocation41_spill] sm:$0xff] %v3080_v39  ;;  %v3220_v39 = vld [vmem:[%s4581_s1 + $0x218] sm:$0xff] }
  0x37   : > { %4738 = vst [vmem:[#allocation42_spill] sm:$0xff] %v3085_v40 }
  0x38   : > { %4739 = vst [vmem:[#allocation43_spill] sm:$0xff] %v3090_v41  ;;  %v3215_v41 = vld [vmem:[%s4581_s1 + $0x210] sm:$0xff] }
  0x39   : > { %4740 = vst [vmem:[#allocation44_spill] sm:$0xff] %v3095_v42 }
  0x3a   : > { %4741 = vst [vmem:[#allocation45_spill] sm:$0xff] %v3100_v43  ;;  %v3210_v43 = vld [vmem:[%s4581_s1 + $0x208] sm:$0xff] }
  0x3b   : > { %4742 = vst [vmem:[#allocation46_spill] sm:$0xff] %v3105_v44 }
  0x3c   : > { %4743 = vst [vmem:[#allocation47_spill] sm:$0xff] %v3110_v45  ;;  %v3205_v45 = vld [vmem:[%s4581_s1 + $0x200] sm:$0xff] }
  0x3d   : > { %4744 = vst [vmem:[#allocation48_spill] sm:$0xff] %v3115_v46 }
  0x3e   : > { %4745 = vst [vmem:[#allocation49_spill] sm:$0xff] %v3120_v47 }
  0x3f   : > { %4746 = vst [vmem:[#allocation50_spill] sm:$0xff] %v3125_v48 }
  0x40   : > { %4747 = vst [vmem:[#allocation51_spill] sm:$0xff] %v3130_v49 }
  0x41   : > { %4748 = vst [vmem:[#allocation52_spill] sm:$0xff] %v3135_v50 }
  0x42   : > { %4749 = vst [vmem:[#allocation53_spill] sm:$0xff] %v3140_v51 }
  0x43   : > { %4750 = vst [vmem:[#allocation54_spill] sm:$0xff] %v3145_v52 }
  0x44   : > { %4751 = vst [vmem:[#allocation55_spill] sm:$0xff] %v3150_v53 }
  0x45   : > { %4752 = vst [vmem:[#allocation56_spill] sm:$0xff] %v3155_v54  ;;  %v3275_v54 = vld [vmem:[%s4581_s1 + $0x270] sm:$0xff] }
  0x46   : > { %4753 = vst [vmem:[#allocation57_spill] sm:$0xff] %v3160_v55 }
  0x47   : > { %4754 = vst [vmem:[#allocation58_spill] sm:$0xff] %v3165_v56  ;;  %v3255_v56 = vld [vmem:[%s4581_s1 + $0x250] sm:$0xff] }
  0x48   : > { %4755 = vst [vmem:[#allocation59_spill] sm:$0xff] %v3170_v57 }
  0x49   : > { %4756 = vst [vmem:[#allocation60_spill] sm:$0xff] %v3175_v58  ;;  %v3250_v58 = vld [vmem:[%s4581_s1 + $0x248] sm:$0xff] }
  0x4a   : > { %4757 = vst [vmem:[#allocation61_spill] sm:$0xff] %v3180_v59 }
  0x4b   : > { %4758 = vst [vmem:[#allocation62_spill] sm:$0xff] %v3185_v60  ;;  %v3245_v60 = vld [vmem:[%s4581_s1 + $0x240] sm:$0xff] }
  0x4c   : > { %4759 = vst [vmem:[#allocation63_spill] sm:$0xff] %v3190_v61 }
  0x4d   : > { %4760 = vst [vmem:[#allocation64_spill] sm:$0xff] %v3195_v62  ;;  %v3240_v62 = vld [vmem:[%s4581_s1 + $0x238] sm:$0xff] }
  0x4e   : > { %4761 = vst [vmem:[#allocation65_spill] sm:$0xff] %v3200_v63 }
  0x4f   : > { %4762 = vst [vmem:[#allocation66_spill] sm:$0xff] %v3205_v45 }
  0x50   : > { %4763 = vst [vmem:[#allocation67_spill] sm:$0xff] %v3210_v43 }
  0x51   : > { %4764 = vst [vmem:[#allocation68_spill] sm:$0xff] %v3215_v41 }
  0x52   : > { %4765 = vst [vmem:[#allocation69_spill] sm:$0xff] %v3220_v39 }
  0x53   : > { %4766 = vst [vmem:[#allocation70_spill] sm:$0xff] %v3225_v37  ;;  %v3265_v37 = vld [vmem:[%s4581_s1 + $0x260] sm:$0xff] }
  0x54   : > { %4767 = vst [vmem:[#allocation71_spill] sm:$0xff] %v3230_v35 }
  0x55   : > { %4768 = vst [vmem:[#allocation72_spill] sm:$0xff] %v3235_v33  ;;  %v3260_v33 = vld [vmem:[%s4581_s1 + $0x258] sm:$0xff] }
  0x56   : > { %4769 = vst [vmem:[#allocation73_spill] sm:$0xff] %v3240_v62 }
  0x57   : > { %4770 = vst [vmem:[#allocation74_spill] sm:$0xff] %v3245_v60  ;;  %v3270_v60 = vld [vmem:[%s4581_s1 + $0x268] sm:$0xff] }
  0x58   : > { %4771 = vst [vmem:[#allocation75_spill] sm:$0xff] %v3250_v58 }
  0x59   : > { %4772 = vst [vmem:[#allocation76_spill] sm:$0xff] %v3255_v56  ;;  %v3280_v56 = vld [vmem:[%s4581_s1 + $0x278] sm:$0xff] }
  0x5a   : > { %4773 = vst [vmem:[#allocation77_spill] sm:$0xff] %v3260_v33  ;;  %v3285_v33 = vld [vmem:[%s4581_s1 + $0x280] sm:$0xff] }
  0x5b   : > { %4774 = vst [vmem:[#allocation78_spill] sm:$0xff] %v3265_v37  ;;  %v3290_v37 = vld [vmem:[%s4581_s1 + $0x288] sm:$0xff] }
  0x5c   : > { %4775 = vst [vmem:[#allocation79_spill] sm:$0xff] %v3270_v60  ;;  %v3295_v60 = vld [vmem:[%s4581_s1 + $0x290] sm:$0xff] }
  0x5d   : > { %4776 = vst [vmem:[#allocation80_spill] sm:$0xff] %v3275_v54  ;;  %v3300_v54 = vld [vmem:[%s4581_s1 + $0x298] sm:$0xff] }
  0x5e   : > { %4777 = vst [vmem:[#allocation81_spill] sm:$0xff] %v3280_v56  ;;  %v3305_v56 = vld [vmem:[%s4581_s1 + $0x2a0] sm:$0xff] }
  0x5f   : > { %4778 = vst [vmem:[#allocation82_spill] sm:$0xff] %v3285_v33  ;;  %v3310_v33 = vld [vmem:[%s4581_s1 + $0x2a8] sm:$0xff] }
  0x60   : > { %4779 = vst [vmem:[#allocation83_spill] sm:$0xff] %v3290_v37  ;;  %v3315_v37 = vld [vmem:[%s4581_s1 + $0x2b0] sm:$0xff] }
  0x61   : > { %4780 = vst [vmem:[#allocation84_spill] sm:$0xff] %v3295_v60  ;;  %v3320_v60 = vld [vmem:[%s4581_s1 + $0x2b8] sm:$0xff] }
  0x62   : > { %4781 = vst [vmem:[#allocation85_spill] sm:$0xff] %v3300_v54  ;;  %v3325_v54 = vld [vmem:[%s4581_s1 + $0x2c0] sm:$0xff] }
  0x63   : > { %4782 = vst [vmem:[#allocation86_spill] sm:$0xff] %v3305_v56  ;;  %v3330_v56 = vld [vmem:[%s4581_s1 + $0x2c8] sm:$0xff] }
  0x64   : > { %4783 = vst [vmem:[#allocation87_spill] sm:$0xff] %v3310_v33  ;;  %v3335_v33 = vld [vmem:[%s4581_s1 + $0x2d0] sm:$0xff] }
  0x65   : > { %4784 = vst [vmem:[#allocation88_spill] sm:$0xff] %v3315_v37  ;;  %v3340_v37 = vld [vmem:[%s4581_s1 + $0x2d8] sm:$0xff] }
  0x66   : > { %4785 = vst [vmem:[#allocation89_spill] sm:$0xff] %v3320_v60  ;;  %v3345_v60 = vld [vmem:[%s4581_s1 + $0x2e0] sm:$0xff] }
  0x67   : > { %4786 = vst [vmem:[#allocation90_spill] sm:$0xff] %v3325_v54  ;;  %v3350_v54 = vld [vmem:[%s4581_s1 + $0x2e8] sm:$0xff] }
  0x68   : > { %4787 = vst [vmem:[#allocation91_spill] sm:$0xff] %v3330_v56  ;;  %v3355_v56 = vld [vmem:[%s4581_s1 + $0x2f0] sm:$0xff] }
  0x69   : > { %4788 = vst [vmem:[#allocation92_spill] sm:$0xff] %v3335_v33  ;;  %v3360_v33 = vld [vmem:[%s4581_s1 + $0x2f8] sm:$0xff] }
  0x6a   : > { %4789 = vst [vmem:[#allocation93_spill] sm:$0xff] %v3340_v37  ;;  %v3365_v37 = vld [vmem:[%s4582_s2] sm:$0xff] }
  0x6b   : > { %4790 = vst [vmem:[#allocation94_spill] sm:$0xff] %v3345_v60  ;;  %v3370_v60 = vld [vmem:[%s4582_s2 + $0x8] sm:$0xff] }
  0x6c   : > { %4791 = vst [vmem:[#allocation95_spill] sm:$0xff] %v3350_v54  ;;  %v3375_v54 = vld [vmem:[%s4582_s2 + $0x10] sm:$0xff] }
  0x6d   : > { %4792 = vst [vmem:[#allocation96_spill] sm:$0xff] %v3355_v56  ;;  %v3380_v56 = vld [vmem:[%s4582_s2 + $0x18] sm:$0xff] }
  0x6e   : > { %4793 = vst [vmem:[#allocation97_spill] sm:$0xff] %v3360_v33  ;;  %v3385_v33 = vld [vmem:[%s4582_s2 + $0x20] sm:$0xff] }
  0x6f   : > { %4794 = vst [vmem:[#allocation98_spill] sm:$0xff] %v3365_v37  ;;  %v3390_v37 = vld [vmem:[%s4582_s2 + $0x28] sm:$0xff] }
  0x70   : > { %4795 = vst [vmem:[#allocation99_spill] sm:$0xff] %v3370_v60  ;;  %v3395_v60 = vld [vmem:[%s4582_s2 + $0x30] sm:$0xff] }
  0x71   : > { %4796 = vst [vmem:[#allocation100_spill] sm:$0xff] %v3375_v54  ;;  %v3400_v54 = vld [vmem:[%s4582_s2 + $0x38] sm:$0xff] }
  0x72   : > { %4797 = vst [vmem:[#allocation101_spill] sm:$0xff] %v3380_v56  ;;  %v3405_v56 = vld [vmem:[%s4582_s2 + $0x40] sm:$0xff] }
  0x73   : > { %4798 = vst [vmem:[#allocation102_spill] sm:$0xff] %v3385_v33  ;;  %v3410_v33 = vld [vmem:[%s4582_s2 + $0x48] sm:$0xff] }
  0x74   : > { %4799 = vst [vmem:[#allocation103_spill] sm:$0xff] %v3390_v37  ;;  %v3415_v37 = vld [vmem:[%s4582_s2 + $0x50] sm:$0xff] }
  0x75   : > { %4800 = vst [vmem:[#allocation104_spill] sm:$0xff] %v3395_v60  ;;  %v3420_v60 = vld [vmem:[%s4582_s2 + $0x58] sm:$0xff] }
  0x76   : > { %4801 = vst [vmem:[#allocation105_spill] sm:$0xff] %v3400_v54  ;;  %v3425_v54 = vld [vmem:[%s4582_s2 + $0x60] sm:$0xff] }
  0x77   : > { %4802 = vst [vmem:[#allocation106_spill] sm:$0xff] %v3405_v56  ;;  %v3430_v56 = vld [vmem:[%s4582_s2 + $0x68] sm:$0xff] }
  0x78   : > { %4803 = vst [vmem:[#allocation107_spill] sm:$0xff] %v3410_v33  ;;  %v3435_v33 = vld [vmem:[%s4582_s2 + $0x70] sm:$0xff] }
  0x79   : > { %4804 = vst [vmem:[#allocation108_spill] sm:$0xff] %v3415_v37  ;;  %v3440_v37 = vld [vmem:[%s4582_s2 + $0x78] sm:$0xff] }
  0x7a   : > { %4805 = vst [vmem:[#allocation109_spill] sm:$0xff] %v3420_v60  ;;  %v3445_v60 = vld [vmem:[%s4583_s3] sm:$0xff] }
  0x7b   : > { %4806 = vst [vmem:[#allocation110_spill] sm:$0xff] %v3425_v54  ;;  %v3450_v54 = vld [vmem:[%s4583_s3 + $0x8] sm:$0xff] }
  0x7c   : > { %4807 = vst [vmem:[#allocation111_spill] sm:$0xff] %v3430_v56  ;;  %v3455_v56 = vld [vmem:[%s4583_s3 + $0x10] sm:$0xff] }
  0x7d   : > { %4808 = vst [vmem:[#allocation112_spill] sm:$0xff] %v3435_v33  ;;  %v3460_v33 = vld [vmem:[%s4583_s3 + $0x18] sm:$0xff] }
  0x7e   : > { %4809 = vst [vmem:[#allocation113_spill] sm:$0xff] %v3440_v37  ;;  %v3465_v37 = vld [vmem:[%s4583_s3 + $0x20] sm:$0xff] }
  0x7f   : > { %4810 = vst [vmem:[#allocation114_spill] sm:$0xff] %v3445_v60  ;;  %v3470_v60 = vld [vmem:[%s4583_s3 + $0x28] sm:$0xff] }
  0x80   : > { %4811 = vst [vmem:[#allocation115_spill] sm:$0xff] %v3450_v54  ;;  %v3475_v54 = vld [vmem:[%s4583_s3 + $0x30] sm:$0xff] }
  0x81   : > { %4812 = vst [vmem:[#allocation116_spill] sm:$0xff] %v3455_v56  ;;  %v3480_v56 = vld [vmem:[%s4584_s4] sm:$0xff] }
  0x82   : > { %4813 = vst [vmem:[#allocation117_spill] sm:$0xff] %v3460_v33  ;;  %v3485_v33 = vld [vmem:[%s4584_s4 + $0x8] sm:$0xff] }
  0x83   : > { %4814 = vst [vmem:[#allocation118_spill] sm:$0xff] %v3465_v37  ;;  %v3490_v37 = vld [vmem:[%s4584_s4 + $0x10] sm:$0xff] }
  0x84   : > { %4815 = vst [vmem:[#allocation119_spill] sm:$0xff] %v3470_v60  ;;  %v3495_v60 = vld [vmem:[%s4584_s4 + $0x18] sm:$0xff] }
  0x85   : > { %4816 = vst [vmem:[#allocation120_spill] sm:$0xff] %v3475_v54  ;;  %v3500_v54 = vld [vmem:[%s4584_s4 + $0x20] sm:$0xff] }
  0x86   : > { %4817 = vst [vmem:[#allocation121_spill] sm:$0xff] %v3480_v56  ;;  %v3505_v56 = vld [vmem:[%s4584_s4 + $0x28] sm:$0xff] }
  0x87   : > { %4818 = vst [vmem:[#allocation122_spill] sm:$0xff] %v3485_v33  ;;  %v3510_v33 = vld [vmem:[%s4584_s4 + $0x30] sm:$0xff] }
  0x88   : > { %4819 = vst [vmem:[#allocation123_spill] sm:$0xff] %v3490_v37 }
  0x89   : > { %4820 = vst [vmem:[#allocation124_spill] sm:$0xff] %v3495_v60 }
  0x8a   : > { %4821 = vst [vmem:[#allocation125_spill] sm:$0xff] %v3500_v54 }
  0x8b   : > { %4822 = vst [vmem:[#allocation126_spill] sm:$0xff] %v3505_v56 }
  0x8c   : > { %4823 = vst [vmem:[#allocation127_spill] sm:$0xff] %v3510_v33 }
  0x8d LB: >> { %v4824_v23 = vld [vmem:[#allocation25_spill] sm:$0xff]  ;;  %v4825_v21 = vld [vmem:[#allocation23_spill] sm:$0xff]  ;;  %v4828_v12 = vld [vmem:[#allocation14_spill] sm:$0xff]  ;;  %s385_s9 = sadd.s32 %s2803_s8, %s2868_s25  ;;  %s2805_s12 = smov 127   ;;  %vm509_vm0 = vcmask 523264   ;;  %vm1893_vm1 = vcmask 457728   ;;  %s2803_s8 = sphi %s3512_s8, %s384_s8  }
  0x8e   : >> { %v4826_v17 = vld [vmem:[#allocation19_spill] sm:$0xff]  ;;  %v4827_v15 = vld [vmem:[#allocation17_spill] sm:$0xff]  ;;  %v4829_v10 = vld [vmem:[#allocation12_spill] sm:$0xff]  ;;  %s2286_s10 = sshll.u32 %s385_s9, 7  ;;  %s2806_s13 = smov 126   ;;  %vm2090_vm2 = vcmask 228352  }
  0x8f   : >> { %v4830_v51 = vld [vmem:[#allocation53_spill] sm:$0xff]  ;;  %v4831_v36 = vld [vmem:[#allocation38_spill] sm:$0xff]  ;;  %v4832_v49 = vld [vmem:[#allocation51_spill] sm:$0xff]  ;;  %s3520_s11 = scalar_lea.vmem %s2965_s30, %s2286_s10  ;;  %s2441_s6 = sshll.u32 %s2803_s8, 7 }
  0x90   : >> { %v4833_v34 = vld [vmem:[#allocation36_spill] sm:$0xff]  ;;  %v4834_v47 = vld [vmem:[#allocation49_spill] sm:$0xff]  ;;  %v4835_v32 = vld [vmem:[#allocation34_spill] sm:$0xff]  ;;  %s4528_s15 = scalar_lea.vmem %s3030_s18, %s2441_s6  ;;  %s384_s8 = sadd.s32 1, %s2803_s8  }
  0x91   : >> { %v4836_v3 = vld [vmem:[#allocation5_spill] sm:$0xff]  ;;  %v4837_v1 = vld [vmem:[#allocation3_spill] sm:$0xff]  ;;  %v3523_v58 = vld [vmem:[%s3520_s11 + $0x70] sm:$0xff]  ;;  %p381_p7 = scmp.ge.s32.totalorder %s384_s8, 14  }
  0x92   : >> { %v3526_v41 = vld [vmem:[%s3520_s11 + $0x78] sm:$0xff]  ;;  %v3529_v52 = vld [vmem:[%s3520_s11 + $0x50] sm:$0xff]  ;;  %v3549_v62 = vld [vmem:[%s3520_s11 + $0x60] sm:$0xff] }
  0x93   : >> { %v3533_v37 = vpack.i.bf16 %v3523_v58, %v3526_v41  ;;  %v3536_v60 = vld [vmem:[%s3520_s11 + $0x58] sm:$0xff]  ;;  %736 = vmatpush.msra.mxu2 %v3526_v41  ;;  %v3552_v45 = vld [vmem:[%s3520_s11 + $0x68] sm:$0xff]  ;;  %v3555_v50 = vld [vmem:[%s3520_s11 + $0x30] sm:$0xff] }
  0x94   : >> { %v3541_v54 = vpack.i.bf16 %v3529_v52, %v3536_v60  ;;  %v3558_v56 = vld [vmem:[%s3520_s11 + $0x40] sm:$0xff]  ;;  %v3561_v33 = vld [vmem:[%s3520_s11 + $0x48] sm:$0xff]  ;;  %v3564_v35 = vld [vmem:[%s3520_s11 + $0x38] sm:$0xff]  ;;  %v2519_v48 = vpack.i.bf16 %v3549_v62, %v3552_v45 }
  0x95   : >> { %2515 = vrot.lane.b32.xlu0 %v3533_v37, %s2805_s12  ;;  %737 = vmatpush.msra.mxu2 %v3523_v58  ;;  %4838 = vst [vmem:[#allocation128_spill] sm:$0xff] %v3558_v56  ;;  %v2534_v63 = vpack.i.bf16 %v3555_v50, %v3564_v35  ;;  %v3572_v13 = vld [vmem:[%s3520_s11 + $0xb8] sm:$0xff]  ;;  %v3577_v39 = vpack.i.bf16 %v3558_v56, %v3561_v33  ;;  %v3582_v61 = vld [vmem:[%s3520_s11 + $0x20] sm:$0xff]  ;;  %v3585_v46 = vld [vmem:[%s3520_s11 + $0x28] sm:$0xff] }
  0x96   : >> { %2525 = vrot.lane.b32.xlu1 %v3541_v54, %s2805_s12  ;;  %2453 = vmatpush.msra.mxu3 %v3572_v13  ;;  %v3588_v11 = vld [vmem:[%s3520_s11 + $0xb0] sm:$0xff]  ;;  %v3594_v43 = vld [vmem:[%s3520_s11 + $0xa8] sm:$0xff]  ;;  %v3603_v59 = vld [vmem:[%s3520_s11 + $0x18] sm:$0xff]  ;;  %v2539_v44 = vpack.i.bf16 %v3582_v61, %v3585_v46 }
  0x97   : >> { %738 = vmatpush.msra.mxu2 %v3552_v45  ;;  %2535 = vrot.lane.b32.xlu2 %v2534_v63, %s2805_s12  ;;  %v3600_v63 = vld [vmem:[%s3520_s11 + $0x10] sm:$0xff]  ;;  %v389_v9 = vld [vmem:[%s3520_s11] sm:$0xff]  ;;  %v390_v57 = vld [vmem:[%s3520_s11 + $0x8] sm:$0xff] }
  0x98   : >> { %2454 = vmatpush.msra.mxu3 %v3588_v11  ;;  %v3611_v42 = vld [vmem:[%s3520_s11 + $0xa0] sm:$0xff]  ;;  %v2544_v7 = vpack.i.bf16 %v3600_v63, %v3603_v59  ;;  %v3618_v55 = vld [vmem:[%s3520_s11 + $0x98] sm:$0xff]  ;;  %v3621_v40 = vpack.i.bf16 %v389_v9, %v390_v57  ;;  %v3626_v5 = vld [vmem:[%s3520_s11 + $0x90] sm:$0xff] }
  0x99   : >> { %739 = vmatpush.msra.mxu2 %v3549_v62  ;;  %v3632_v31 = vld [vmem:[%s3520_s11 + $0x88] sm:$0xff]  ;;  %v3643_v53 = vld [vmem:[%s3520_s11 + $0x80] sm:$0xff]  ;;  %v3654_v38 = vpack.i.bf16 %v3626_v5, %v3618_v55  ;;  %v4840_v2 = vld [vmem:[#allocation4_spill] sm:$0xff] }
  0x9a   : >> { %2455 = vmatpush.msra.mxu3 %v3594_v43  ;;  %v2569_v29 = vpack.i.bf16 %v3643_v53, %v3632_v31  ;;  %v4839_v0 = vld [vmem:[#allocation2_spill] sm:$0xff]  ;;  %v4842_v6 = vld [vmem:[#allocation8_spill] sm:$0xff]  ;;  %v4850_v19 = vld [vmem:[#allocation21_spill] sm:$0xff] }
  0x9b   : >> { %740 = vmatpush.msra.mxu2 %v3536_v60  ;;  %v4841_v4 = vld [vmem:[#allocation6_spill] sm:$0xff]  ;;  %v4844_v14 = vld [vmem:[#allocation16_spill] sm:$0xff]  ;;  %v4855_v25 = vld [vmem:[#allocation27_spill] sm:$0xff] }
  0x9c   : >> { %2456 = vmatpush.msra.mxu3 %v3611_v42  ;;  %v4843_v8 = vld [vmem:[#allocation10_spill] sm:$0xff]  ;;  %v4846_v18 = vld [vmem:[#allocation20_spill] sm:$0xff]  ;;  %v4857_v27 = vld [vmem:[#allocation29_spill] sm:$0xff] }
  0x9d   : >> { %2520 = vrot.lane.b32.xlu0 %v2519_v48, %s2805_s12  ;;  %741 = vmatpush.msra.mxu2 %v3529_v52  ;;  %v4845_v16 = vld [vmem:[#allocation18_spill] sm:$0xff]  ;;  %v4848_v22 = vld [vmem:[#allocation24_spill] sm:$0xff] }
  0x9e   : >> { %2530 = vrot.lane.b32.xlu1 %v3577_v39, %s2805_s12  ;;  %2457 = vmatpush.msra.mxu3 %v3618_v55  ;;  %v4847_v20 = vld [vmem:[#allocation22_spill] sm:$0xff]  ;;  %v4851_v26 = vld [vmem:[#allocation28_spill] sm:$0xff] }
  0x9f   : >> { %742 = vmatpush.msra.mxu2 %v3561_v33  ;;  %2540 = vrot.lane.b32.xlu2 %v2539_v44, %s2805_s12  ;;  %v3639_v44 = vpack.i.bf16 %v3588_v11, %v3572_v13  ;;  %v4849_v24 = vld [vmem:[#allocation26_spill] sm:$0xff]  ;;  %v4853_v30 = vld [vmem:[#allocation32_spill] sm:$0xff] }
  0xa0   : >> { %2458 = vmatpush.msra.mxu3 %v3626_v5  ;;  %v4852_v28 = vld [vmem:[#allocation30_spill] sm:$0xff] }
  0xa1   : >> { %743 = vmatpush.msra.mxu2 %v3558_v56 }
  0xa2   : >> { %2459 = vmatpush.msra.mxu3 %v3632_v31 }
  0xa3   : >> { %744 = vmatpush.msra.mxu2 %v3564_v35 }
  0xa4   : >> { %2460 = vmatpush.msra.mxu3 %v3643_v53 }
  0xa5   : >> { %2545 = vrot.lane.b32.xlu0 %v2544_v7, %s2805_s12  ;;  %745 = vmatpush.msra.mxu2 %v3555_v50  ;;  %v3649_v7 = vpack.i.bf16 %v3611_v42, %v3594_v43 }
  0xa6   : >> { %2550 = vrot.lane.b32.xlu1 %v3621_v40, %s2805_s12  ;;  %2310 = vmatmul.msk.f32.vlgmr.msra.gmra.mxu3 %vm509_vm0, %v4827_v15 }
  0xa7   : >> { %746 = vmatpush.msra.mxu2 %v3585_v46  ;;  %2555 = vrot.lane.b32.xlu2 %v3639_v44, %s2805_s12 }
  0xa9   : >> { %747 = vmatpush.msra.mxu2 %v3582_v61 }
  0xab   : >> { %748 = vmatpush.msra.mxu2 %v3603_v59 }
  0xad   : >> { %2560 = vrot.lane.b32.xlu0 %v3649_v7, %s2805_s12  ;;  %749 = vmatpush.msra.mxu2 %v3600_v63 }
  0xae   : >> { %2565 = vrot.lane.b32.xlu1 %v3654_v38, %s2805_s12  ;;  %2311 = vmatmul.msk.f32.gmra.mxu3 %vm509_vm0, %v4826_v17 }
  0xaf   : >> { %750 = vmatpush.msra.mxu2 %v390_v57  ;;  %2570 = vrot.lane.b32.xlu2 %v2569_v29, %s2805_s12  ;;  %v2604_v29 = vpack.i.bf16 %v3572_v13, %v3561_v33 }
  0xb1   : >> { %751 = vmatpush.msra.mxu2 %v389_v9  ;;  %v3685_v9 = vld [vmem:[%s3520_s11 + $0xf8] sm:$0xff] }
  0xb2   : >> { %752 = vmatmul.f32.vlgmr.msra.gmra.mxu2 %v4839_v0  ;;  %v3720_v0 = vld [vmem:[%s3520_s11 + $0xe0] sm:$0xff] }
  0xb3   : >> { %809 = vmatpush.msrb.mxu2 %v3572_v13 }
  0xb5   : >> { %2575 = vrot.lane.b32.xlu0 %v3533_v37, %s2806_s13  ;;  %810 = vmatpush.msrb.mxu2 %v3588_v11  ;;  %v3693_v37 = vpack.i.bf16 %v3632_v31, %v3685_v9 }
  0xb6   : >> { %2580 = vrot.lane.b32.xlu1 %v3639_v44, %s2805_s12  ;;  %2312 = vmatmul.msk.f32.gmra.mxu3 %vm509_vm0, %v4850_v19 }
  0xb7   : >> { %811 = vmatpush.msrb.mxu2 %v3594_v43  ;;  %2585 = vrot.lane.b32.xlu2 %v2519_v48, %s2806_s13  ;;  %v3702_v48 = vld [vmem:[%s3520_s11 + $0xf0] sm:$0xff] }
  0xb8   : >> { %v2619_v57 = vpack.i.bf16 %v3643_v53, %v3702_v48 }
  0xb9   : >> { %812 = vmatpush.msrb.mxu2 %v3611_v42 }
  0xba   : >> { %755 = vmatmul.f32.gmra.mxu2 %v4840_v2  ;;  %v2624_v2 = vpack.i.bf16 %v3594_v43, %v3564_v35  ;;  %v3726_v35 = vpack.i.bf16 %v3523_v58, %v3720_v0 }
  0xbb   : >> { %813 = vmatpush.msrb.mxu2 %v3618_v55 }
  0xbd   : >> { %2590 = vrot.lane.b32.xlu0 %v3649_v7, %s2805_s12  ;;  %814 = vmatpush.msrb.mxu2 %v3626_v5 }
  0xbe   : >> { %2595 = vrot.lane.b32.xlu1 %v3541_v54, %s2806_s13  ;;  %v2614_v54 = vpack.i.bf16 %v3588_v11, %v3558_v56  ;;  %v2634_v56 = vpack.i.bf16 %v3611_v42, %v3555_v50  ;;  %2313 = vmatmul.msk.f32.gmra.mxu3 %vm509_vm0, %v4825_v21 }
  0xbf   : >> { %815 = vmatpush.msrb.mxu2 %v3632_v31  ;;  %2600 = vrot.lane.b32.xlu2 %v3654_v38, %s2805_s12 }
  0xc1   : >> { %816 = vmatpush.msrb.mxu2 %v3643_v53 }
  0xc2   : >> { %758 = vmatmul.f32.gmra.mxu2 %v4841_v4 }
  0xc5   : >> { %2605 = vrot.lane.b32.xlu0 %v2604_v29, %s2806_s13  ;;  %v3713_v29 = vld [vmem:[%s3520_s11 + $0xe8] sm:$0xff] }
  0xc6   : >> { %2610 = vrot.lane.b32.xlu1 %v3693_v37, %s2805_s12  ;;  %v2629_v4 = vpack.i.bf16 %v3526_v41, %v3713_v29  ;;  %2314 = vmatmul.msk.f32.gmra.mxu3 %vm509_vm0, %v4824_v23 }
  0xc7   : >> { %2615 = vrot.lane.b32.xlu2 %v2614_v54, %s2806_s13  ;;  %v2644_v54 = vpack.i.bf16 %v3618_v55, %v3585_v46 }
  0xca   : >> { %761 = vmatmul.f32.gmra.mxu2 %v4842_v6  ;;  %v2654_v6 = vpack.i.bf16 %v3626_v5, %v3582_v61  ;;  %v3760_v61 = vld [vmem:[%s3520_s11 + $0xd0] sm:$0xff] }
  0xcd   : >> { %2620 = vrot.lane.b32.xlu0 %v2619_v57, %s2805_s12 }
  0xce   : >> { %2625 = vrot.lane.b32.xlu1 %v2624_v2, %s2806_s13  ;;  %v3734_v2 = vld [vmem:[%s3520_s11 + $0xd8] sm:$0xff]  ;;  %2315 = vmatmul.msk.f32.gmra.mxu3 %vm509_vm0, %v4855_v25 }
  0xcf   : >> { %2630 = vrot.lane.b32.xlu2 %v2629_v4, %s2805_s12  ;;  %v2649_v50 = vpack.i.bf16 %v3552_v45, %v3734_v2 }
  0xd2   : >> { %764 = vmatmul.f32.gmra.mxu2 %v4843_v8  ;;  %v2664_v8 = vpack.i.bf16 %v3632_v31, %v3603_v59  ;;  %v2674_v59 = vpack.i.bf16 %v3643_v53, %v3600_v63 }
  0xd5   : >> { %2635 = vrot.lane.b32.xlu0 %v2634_v56, %s2806_s13  ;;  %v3747_v56 = vld [vmem:[%s3520_s11 + $0xc8] sm:$0xff] }
  0xd6   : >> { %2640 = vrot.lane.b32.xlu1 %v3726_v35, %s2805_s12  ;;  %v3753_v46 = vpack.i.bf16 %v3536_v60, %v3747_v56  ;;  %2316 = vmatmul.msk.f32.gmra.mxu3 %vm509_vm0, %v4857_v27  ;;  %v4859_v27 = vld [vmem:[#allocation40_spill] sm:$0xff] }
  0xd7   : >> { %2645 = vrot.lane.b32.xlu2 %v2644_v54, %s2806_s13 }
  0xda   : >> { %767 = vmatmul.f32.gmra.mxu2 %v4829_v10 }
  0xdd   : >> { %2650 = vrot.lane.b32.xlu0 %v2649_v50, %s2805_s12 }
  0xde   : >> { %2655 = vrot.lane.b32.xlu1 %v2654_v6, %s2806_s13  ;;  %v2659_v6 = vpack.i.bf16 %v3549_v62, %v3760_v61 }
  0xe0   : >> { %2660 = vrot.lane.b32.xlu2 %v2659_v6, %s2805_s12 }
  0xe2   : >> { %770 = vmatmul.f32.gmra.mxu2 %v4828_v12 }
  0xe5   : >> { %2665 = vrot.lane.b32.xlu0 %v2664_v8, %s2806_s13 }
  0xe6   : >> { %2670 = vrot.lane.b32.xlu1 %v3753_v46, %s2805_s12 }
  0xe8   : >> { %2675 = vrot.lane.b32.xlu2 %v2674_v59, %s2806_s13 }
  0xea   : >> { %773 = vmatmul.f32.gmra.mxu2 %v4844_v14 }
  0xee   : >> { %2685 = vrot.lane.b32.xlu1 %v3621_v40, %s2806_s13 }
  0xf0   : >> { %2690 = vrot.lane.b32.xlu2 %v3577_v39, %s2805_s12 }
  0xf1   : >> { %v2536_v8 = vpop.permute.xlu2 %2535 }
  0xf2   : >> { %776 = vmatmul.f32.gmra.mxu2 %v4845_v16 }
  0xf6   : >> { %2700 = vrot.lane.b32.xlu1 %v3649_v7, %s2806_s13 }
  0xf8   : >> { %2705 = vrot.lane.b32.xlu2 %v3654_v38, %s2806_s13 }
  0xf9   : >> { %v2541_v54 = vpop.permute.xlu2 %2540 }
  0xfa   : >> { %779 = vmatmul.f32.gmra.mxu2 %v4846_v18 }
  0xfe   : >> { %2715 = vrot.lane.b32.xlu1 %v2619_v57, %s2806_s13 }
 0x100   : >> { %2720 = vrot.lane.b32.xlu2 %v2629_v4, %s2806_s13 }
 0x101   : >> { %v3781_v40 = vpop.permute.xlu2 %2555 }
 0x102   : >> { %782 = vmatmul.f32.gmra.mxu2 %v4847_v20  ;;  %v4652_v63 = vunpack.i.l.bf16 %v3781_v40  ;;  %v4653_v59 = vunpack.i.h.bf16 %v3781_v40 }
 0x104   : >> { %2445 = vmatpush.msra.mxu1 %v4652_v63 }
 0x106   : >> { %2730 = vrot.lane.b32.xlu1 %v2649_v50, %s2806_s13  ;;  %2446 = vmatpush.msra.mxu1 %v4653_v59 }
 0x107   : >> { %v2516_v7 = vpop.permute.xlu0 %2515 }
 0x108   : >> { %v2517_v57 = vunpack.i.l.bf16 %v2516_v7  ;;  %v2526_v38 = vpop.permute.xlu1 %2525  ;;  %v2518_v20 = vunpack.i.h.bf16 %v2516_v7  ;;  %2735 = vrot.lane.b32.xlu2 %v2659_v6, %s2806_s13 }
 0x109   : >> { %v3796_v16 = vpop.permute.xlu2 %2570  ;;  %v2527_v4 = vunpack.i.l.bf16 %v2526_v38  ;;  %v2528_v7 = vunpack.i.h.bf16 %v2526_v38  ;;  %v2542_v38 = vunpack.i.l.bf16 %v2541_v54 }
 0x10a   : >> { %558 = vmatpush.msra.mxu0 %v2517_v57  ;;  %785 = vmatmul.f32.gmra.mxu2 %v4848_v22 }
 0x10c   : >> { %559 = vmatpush.msra.mxu0 %v2518_v20 }
 0x10f   : >> { %v2521_v50 = vpop.permute.xlu0 %2520 }
 0x110   : >> { %v2522_v63 = vunpack.i.l.bf16 %v2521_v50  ;;  %v2531_v18 = vpop.permute.xlu1 %2530  ;;  %v2523_v14 = vunpack.i.h.bf16 %v2521_v50  ;;  %2750 = vrot.lane.b32.xlu2 %v3577_v39, %s2806_s13  ;;  %v2543_v39 = vunpack.i.h.bf16 %v2541_v54  ;;  %v2573_v54 = vunpack.i.h.bf16 %v3796_v16 }
 0x111   : >> { %v2532_v57 = vunpack.i.l.bf16 %v2531_v18  ;;  %v3802_v22 = vpop.permute.xlu2 %2585  ;;  %v2533_v6 = vunpack.i.h.bf16 %v2531_v18 }
 0x112   : >> { %560 = vmatpush.msra.mxu0 %v2522_v63  ;;  %788 = vmatmul.f32.gmra.mxu2 %v4849_v24  ;;  %v2538_v63 = vunpack.i.h.bf16 %v2536_v8 }
 0x114   : >> { %561 = vmatpush.msra.mxu0 %v2523_v14  ;;  %v2537_v14 = vunpack.i.l.bf16 %v2536_v8 }
 0x116   : >> { %562 = vmatpush.msra.mxu0 %v2527_v4 }
 0x117   : >> { %v2546_v20 = vpop.permute.xlu0 %2545 }
 0x118   : >> { %563 = vmatpush.msra.mxu0 %v2528_v7  ;;  %v2551_v59 = vpop.permute.xlu1 %2550 }
 0x119   : >> { %v3809_v19 = vpop.permute.xlu2 %2600 }
 0x11a   : >> { %564 = vmatpush.msra.mxu0 %v2532_v57  ;;  %791 = vmatmul.f32.gmra.mxu2 %v4851_v26  ;;  %v2547_v57 = vunpack.i.l.bf16 %v2546_v20 }
 0x11c   : >> { %565 = vmatpush.msra.mxu0 %v2533_v6  ;;  %v2548_v6 = vunpack.i.h.bf16 %v2546_v20 }
 0x11e   : >> { %566 = vmatpush.msra.mxu0 %v2537_v14  ;;  %v2552_v14 = vunpack.i.l.bf16 %v2551_v59 }
 0x11f   : >> { %v2561_v50 = vpop.permute.xlu0 %2560 }
 0x120   : >> { %567 = vmatpush.msra.mxu0 %v2538_v63  ;;  %v2562_v4 = vunpack.i.l.bf16 %v2561_v50  ;;  %v2566_v7 = vpop.permute.xlu1 %2565  ;;  %v2563_v24 = vunpack.i.h.bf16 %v2561_v50  ;;  %v2572_v63 = vunpack.i.l.bf16 %v3796_v16  ;;  %v2553_v50 = vunpack.i.h.bf16 %v2551_v59 }
 0x121   : >> { %v2567_v18 = vunpack.i.l.bf16 %v2566_v7  ;;  %v2568_v8 = vunpack.i.h.bf16 %v2566_v7  ;;  %v3822_v20 = vpop.permute.xlu2 %2615  ;;  %v4854_v7 = vunpack.i.l.bf16 %v3781_v40  ;;  %v4856_v59 = vunpack.i.h.bf16 %v3781_v40 }
 0x122   : >> { %568 = vmatpush.msra.mxu0 %v2542_v38  ;;  %2447 = vmatpush.msra.mxu1 %v2562_v4  ;;  %v2587_v40 = vunpack.i.l.bf16 %v3802_v22 }
 0x123   : >> { %794 = vmatmul.f32.gmra.mxu2 %v4852_v28 }
 0x124   : >> { %569 = vmatpush.msra.mxu0 %v2543_v39  ;;  %2448 = vmatpush.msra.mxu1 %v2563_v24 }
 0x126   : >> { %570 = vmatpush.msra.mxu0 %v2547_v57  ;;  %2449 = vmatpush.msra.mxu1 %v2567_v18 }
 0x127   : >> { %v2576_v26 = vpop.permute.xlu0 %2575 }
 0x128   : >> { %571 = vmatpush.msra.mxu0 %v2548_v6  ;;  %2450 = vmatpush.msra.mxu1 %v2568_v8  ;;  %v3816_v38 = vpop.permute.xlu1 %2580  ;;  %v2577_v57 = vunpack.i.l.bf16 %v2576_v26  ;;  %v3838_v6 = vld [vmem:[%s3520_s11 + $0xc0] sm:$0xff] }
 0x12a   : >> { %572 = vmatpush.msra.mxu0 %v2552_v14  ;;  %2451 = vmatpush.msra.mxu1 %v2572_v63  ;;  %v2578_v14 = vunpack.i.h.bf16 %v2576_v26  ;;  %v2588_v26 = vunpack.i.h.bf16 %v3802_v22 }
 0x12b   : >> { %797 = vmatmul.f32.gmra.mxu2 %v4853_v30  ;;  %v2583_v30 = vunpack.i.h.bf16 %v3816_v38 }
 0x12c   : >> { %573 = vmatpush.msra.mxu0 %v2553_v50  ;;  %2452 = vmatpush.msra.mxu1 %v2573_v54  ;;  %v2679_v50 = vpack.i.bf16 %v3529_v52, %v3838_v6 }
 0x12d   : >> { %574 = vmatmul.f32.vlgmr.msra.gmra.mxu0 %v4835_v32  ;;  %2294 = vmatmul.msk.f32.vlgmr.msra.gmra.mxu1 %vm509_vm0, %v4834_v47 }
 0x12e   : >> { %631 = vmatpush.msrb.mxu0 %v4854_v7  ;;  %986 = vmatpush.msrb.mxu1 %v2577_v57  ;;  %v3843_v7 = vpop.permute.xlu2 %2630 }
 0x12f   : >> { %v3826_v16 = vpop.permute.xlu0 %2590  ;;  %2680 = vrot.lane.b32.xlu0 %v2679_v50, %s2805_s12  ;;  %2745 = vrot.lane.b32.xlu1 %v2679_v50, %s2806_s13  ;;  %v2632_v28 = vunpack.i.l.bf16 %v3843_v7 }
 0x130   : >> { %632 = vmatpush.msrb.mxu0 %v4856_v59  ;;  %v2596_v39 = vpop.permute.xlu1 %2595  ;;  %987 = vmatpush.msrb.mxu1 %v2578_v14 }
 0x131   : >> { %v2597_v57 = vunpack.i.l.bf16 %v2596_v39  ;;  %v2598_v22 = vunpack.i.h.bf16 %v2596_v39  ;;  %v2617_v39 = vunpack.i.l.bf16 %v3822_v20 }
 0x132   : >> { %633 = vmatpush.msrb.mxu0 %v2562_v4  ;;  %988 = vmatpush.msrb.mxu1 %v2587_v40  ;;  %v4858_v40 = vld [vmem:[#allocation31_spill] sm:$0xff] }
 0x133   : >> { %2303 = vmatmul.msk.f32.vlgmr.msrb.gmra.mxu2 %vm509_vm0, %v4837_v1  ;;  %2317 = vmatmul.msk.f32.gmra.mxu3 %vm509_vm0, %v4858_v40  ;;  %v2602_v40 = vunpack.i.l.bf16 %v3809_v19 }
 0x134   : >> { %634 = vmatpush.msrb.mxu0 %v2563_v24  ;;  %989 = vmatpush.msrb.mxu1 %v2588_v26  ;;  %v2618_v26 = vunpack.i.h.bf16 %v3822_v20 }
 0x135   : >> { %577 = vmatmul.f32.gmra.mxu0 %v4833_v34  ;;  %2295 = vmatmul.msk.f32.gmra.mxu1 %vm509_vm0, %v4832_v49 }
 0x136   : >> { %635 = vmatpush.msrb.mxu0 %v2567_v18  ;;  %v2582_v18 = vunpack.i.l.bf16 %v3816_v38  ;;  %990 = vmatpush.msrb.mxu1 %v2597_v57  ;;  %v2593_v57 = vunpack.i.h.bf16 %v3826_v16 }
 0x137   : >> { %v2606_v4 = vpop.permute.xlu0 %2605  ;;  %2695 = vrot.lane.b32.xlu0 %v3639_v44, %s2806_s13  ;;  %v4860_v44 = vld [vmem:[#allocation55_spill] sm:$0xff] }
 0x138   : >> { %v3847_v24 = vpop.permute.xlu1 %2610  ;;  %636 = vmatpush.msrb.mxu0 %v2568_v8  ;;  %v2608_v8 = vunpack.i.h.bf16 %v2606_v4  ;;  %v2607_v14 = vunpack.i.l.bf16 %v2606_v4  ;;  %991 = vmatpush.msrb.mxu1 %v2598_v22  ;;  %v4861_v22 = vld [vmem:[#allocation33_spill] sm:$0xff] }
 0x139   : >> { %v2612_v59 = vunpack.i.l.bf16 %v3847_v24 }
 0x13a   : >> { %637 = vmatpush.msrb.mxu0 %v2572_v63  ;;  %v2592_v63 = vunpack.i.l.bf16 %v3826_v16  ;;  %1059 = vmatpush.msrb.mxu3 %v2608_v8 }
 0x13b   : >> { %1440 = vmatpush.msra.mxu2 %v2612_v59  ;;  %992 = vmatpush.msrb.mxu1 %v2607_v14 }
 0x13c   : >> { %2304 = vmatmul.msk.f32.gmra.mxu2 %vm509_vm0, %v4836_v3  ;;  %638 = vmatpush.msrb.mxu0 %v2573_v54  ;;  %v2646_v54 = vpop.permute.xlu2 %2645 }
 0x13d   : >> { %580 = vmatmul.f32.gmra.mxu0 %v4831_v36  ;;  %2296 = vmatmul.msk.f32.gmra.mxu1 %vm509_vm0, %v4830_v51 }
 0x13e   : >> { %1367 = vmatpush.msra.mxu0 %v2582_v18  ;;  %1060 = vmatpush.msrb.mxu3 %v2618_v26  ;;  %v4862_v26 = vld [vmem:[#allocation7_spill] sm:$0xff] }
 0x13f   : >> { %v2621_v50 = vpop.permute.xlu0 %2620  ;;  %993 = vmatpush.msrb.mxu1 %v2617_v39  ;;  %2318 = vmatmul.msk.f32.gmra.mxu3 %vm509_vm0, %v4861_v22 }
 0x140   : >> { %v2626_v38 = vpop.permute.xlu1 %2625  ;;  %v2622_v59 = vunpack.i.l.bf16 %v2621_v50  ;;  %1368 = vmatpush.msra.mxu0 %v2583_v30  ;;  %v2603_v30 = vunpack.i.h.bf16 %v3809_v19  ;;  %2710 = vrot.lane.b32.xlu0 %v3693_v37, %s2806_s13  ;;  %v2613_v19 = vunpack.i.h.bf16 %v3847_v24  ;;  %v2623_v39 = vunpack.i.h.bf16 %v2621_v50 }
 0x141   : >> { %v2628_v4 = vunpack.i.h.bf16 %v2626_v38  ;;  %v2627_v18 = vunpack.i.l.bf16 %v2626_v38  ;;  %v2633_v37 = vunpack.i.h.bf16 %v3843_v7 }
 0x142   : >> { %1441 = vmatpush.msra.mxu2 %v2622_v59  ;;  %1369 = vmatpush.msra.mxu0 %v2592_v63  ;;  %v2647_v63 = vunpack.i.l.bf16 %v2646_v54 }
 0x143   : >> { %1061 = vmatpush.msrb.mxu3 %v2628_v4  ;;  %994 = vmatpush.msrb.mxu1 %v2627_v18  ;;  %v4863_v4 = vld [vmem:[#allocation42_spill] sm:$0xff] }
 0x144   : >> { %1442 = vmatpush.msra.mxu2 %v2632_v28  ;;  %1370 = vmatpush.msra.mxu0 %v2593_v57  ;;  %v2648_v28 = vunpack.i.h.bf16 %v2646_v54  ;;  %v2661_v59 = vpop.permute.xlu2 %2660  ;;  %v4864_v57 = vld [vmem:[#allocation57_spill] sm:$0xff] }
 0x145   : >> { %583 = vmatmul.f32.gmra.mxu0 %v4859_v27  ;;  %2297 = vmatmul.msk.f32.gmra.mxu1 %vm509_vm0, %v4860_v44  ;;  %v2663_v7 = vunpack.i.h.bf16 %v2661_v59 }
 0x146   : >> { %2305 = vmatmul.msk.f32.gmra.mxu2 %vm509_vm0, %v4862_v26  ;;  %1371 = vmatpush.msra.mxu0 %v2602_v40 }
 0x147   : >> { %v2636_v20 = vpop.permute.xlu0 %2635 }
 0x148   : >> { %v2641_v16 = vpop.permute.xlu1 %2640  ;;  %v2638_v8 = vunpack.i.h.bf16 %v2636_v20  ;;  %v2637_v14 = vunpack.i.l.bf16 %v2636_v20  ;;  %1372 = vmatpush.msra.mxu0 %v2603_v30  ;;  %v2662_v20 = vunpack.i.l.bf16 %v2661_v59  ;;  %2725 = vrot.lane.b32.xlu0 %v3726_v35, %s2806_s13 }
 0x149   : >> { %v2642_v38 = vunpack.i.l.bf16 %v2641_v16  ;;  %v2643_v40 = vunpack.i.h.bf16 %v2641_v16  ;;  %v4866_v16 = vld [vmem:[#allocation44_spill] sm:$0xff] }
 0x14a   : >> { %1062 = vmatpush.msrb.mxu3 %v2638_v8  ;;  %995 = vmatpush.msrb.mxu1 %v2637_v14  ;;  %v4865_v8 = vld [vmem:[#allocation9_spill] sm:$0xff] }
 0x14b   : >> { %1443 = vmatpush.msra.mxu2 %v2642_v38  ;;  %1373 = vmatpush.msra.mxu0 %v2613_v19 }
 0x14c   : >> { %1063 = vmatpush.msrb.mxu3 %v2648_v28  ;;  %996 = vmatpush.msrb.mxu1 %v2647_v63  ;;  %v4867_v28 = vld [vmem:[#allocation59_spill] sm:$0xff]  ;;  %v2676_v35 = vpop.permute.xlu2 %2675 }
 0x14d   : >> { %586 = vmatmul.f32.gmra.mxu0 %v4863_v4  ;;  %2298 = vmatmul.msk.f32.gmra.mxu1 %vm509_vm0, %v4864_v57 }
 0x14e   : >> { %1374 = vmatpush.msra.mxu0 %v2623_v39  ;;  %2306 = vmatmul.msk.f32.gmra.mxu2 %vm509_vm0, %v4865_v8 }
 0x14f   : >> { %v2651_v54 = vpop.permute.xlu0 %2650 }
 0x150   : >> { %v2656_v18 = vpop.permute.xlu1 %2655  ;;  %v2652_v24 = vunpack.i.l.bf16 %v2651_v54  ;;  %v2653_v14 = vunpack.i.h.bf16 %v2651_v54  ;;  %1375 = vmatpush.msra.mxu0 %v2633_v37  ;;  %v2677_v54 = vunpack.i.l.bf16 %v2676_v35  ;;  %2740 = vrot.lane.b32.xlu0 %v3753_v46, %s2806_s13 }
 0x151   : >> { %v2658_v50 = vunpack.i.h.bf16 %v2656_v18  ;;  %v2657_v30 = vunpack.i.l.bf16 %v2656_v18  ;;  %v2678_v18 = vunpack.i.h.bf16 %v2676_v35  ;;  %v4873_v35 = vld [vmem:[#allocation48_spill] sm:$0xff] }
 0x152   : >> { %1444 = vmatpush.msra.mxu2 %v2652_v24  ;;  %1376 = vmatpush.msra.mxu0 %v2643_v40  ;;  %v4868_v40 = vld [vmem:[#allocation11_spill] sm:$0xff]  ;;  %v4869_v24 = vld [vmem:[#allocation46_spill] sm:$0xff] }
 0x153   : >> { %1064 = vmatpush.msrb.mxu3 %v2658_v50  ;;  %997 = vmatpush.msrb.mxu1 %v2657_v30  ;;  %v4871_v50 = vld [vmem:[#allocation67_spill] sm:$0xff] }
 0x154   : >> { %1445 = vmatpush.msra.mxu2 %v2662_v20  ;;  %1377 = vmatpush.msra.mxu0 %v2653_v14  ;;  %v4870_v20 = vld [vmem:[#allocation61_spill] sm:$0xff] }
 0x155   : >> { %589 = vmatmul.f32.gmra.mxu0 %v4866_v16  ;;  %2299 = vmatmul.msk.f32.gmra.mxu1 %vm509_vm0, %v4867_v28  ;;  %v4872_v14 = vld [vmem:[#allocation13_spill] sm:$0xff] }
 0x156   : >> { %1378 = vmatpush.msra.mxu0 %v2663_v7  ;;  %2307 = vmatmul.msk.f32.gmra.mxu2 %vm509_vm0, %v4868_v40 }
 0x157   : >> { %v2666_v63 = vpop.permute.xlu0 %2665 }
 0x158   : >> { %v2671_v38 = vpop.permute.xlu1 %2670  ;;  %v2668_v19 = vunpack.i.h.bf16 %v2666_v63  ;;  %v2667_v39 = vunpack.i.l.bf16 %v2666_v63  ;;  %v4874_v63 = vld [vmem:[#allocation63_spill] sm:$0xff] }
 0x159   : >> { %v2673_v59 = vunpack.i.h.bf16 %v2671_v38  ;;  %v2672_v37 = vunpack.i.l.bf16 %v2671_v38  ;;  %v4875_v38 = vld [vmem:[#allocation69_spill] sm:$0xff] }
 0x15a   : >> { %1065 = vmatpush.msrb.mxu3 %v2668_v19  ;;  %998 = vmatpush.msrb.mxu1 %v2667_v39  ;;  %v4879_v19 = vld [vmem:[#allocation71_spill] sm:$0xff]  ;;  %v4896_v39 = vld [vmem:[#allocation128_spill] sm:$0xff] }
 0x15b   : >> { %1379 = vmatpush.msra.mxu0 %v2673_v59  ;;  %1446 = vmatpush.msra.mxu2 %v2672_v37  ;;  %v4901_v59 = vld [vmem:[#allocation72_spill] sm:$0xff]  ;;  %v4902_v37 = vld [vmem:[#allocation79_spill] sm:$0xff] }
 0x15c   : >> { %1066 = vmatpush.msrb.mxu3 %v2678_v18  ;;  %999 = vmatpush.msrb.mxu1 %v2677_v54  ;;  %v4898_v18 = vld [vmem:[#allocation119_spill] sm:$0xff]  ;;  %v3962_v54 = vpop.f32.mrf.mxu3 }
 0x15d   : >> { %592 = vmatmul.f32.gmra.mxu0 %v4869_v24  ;;  %2300 = vmatmul.msk.f32.gmra.mxu1 %vm509_vm0, %v4870_v20 }
 0x15e   : >> { %2319 = vmatmul.msk.f32.vlgmr.msrb.gmra.mxu3 %vm509_vm0, %v4871_v50  ;;  %2308 = vmatmul.msk.f32.gmra.mxu2 %vm509_vm0, %v4872_v14 }
 0x15f   : >> { %1570 = vmatpush.msra.mxu3 %v3685_v9  ;;  %v4876_v9 = vld [vmem:[#allocation15_spill] sm:$0xff] }
 0x160   : >> { %v2686_v46 = vpop.permute.xlu1 %2685 }
 0x161   : >> { %v2687_v30 = vunpack.i.l.bf16 %v2686_v46  ;;  %1571 = vmatpush.msra.mxu3 %v3702_v48  ;;  %v2688_v7 = vunpack.i.h.bf16 %v2686_v46  ;;  %v4877_v48 = vld [vmem:[#allocation50_spill] sm:$0xff]  ;;  %v4903_v46 = vld [vmem:[#allocation117_spill] sm:$0xff] }
 0x163   : >> { %1000 = vmatpush.msrb.mxu1 %v2687_v30  ;;  %1572 = vmatpush.msra.mxu3 %v3713_v29  ;;  %v4878_v29 = vld [vmem:[#allocation65_spill] sm:$0xff]  ;;  %v4904_v30 = vld [vmem:[#allocation116_spill] sm:$0xff] }
 0x165   : >> { %595 = vmatmul.f32.gmra.mxu0 %v4873_v35  ;;  %2301 = vmatmul.msk.f32.gmra.mxu1 %vm509_vm0, %v4874_v63 }
 0x166   : >> { %1001 = vmatpush.msrb.mxu1 %v2688_v7  ;;  %2320 = vmatmul.msk.f32.gmra.mxu3 %vm509_vm0, %v4875_v38 }
 0x167   : >> { %1573 = vmatpush.msra.mxu3 %v3720_v0  ;;  %2309 = vmatmul.msk.f32.gmra.mxu2 %vm509_vm0, %v4876_v9  ;;  %v4880_v0 = vld [vmem:[#allocation127_spill] sm:$0xff] }
 0x168   : >> { %1497 = vmatpush.msra.mxu1 %v3572_v13  ;;  %v4882_v13 = vld [vmem:[#allocation52_spill] sm:$0xff] }
 0x169   : >> { %1574 = vmatpush.msra.mxu3 %v3734_v2  ;;  %v4884_v2 = vld [vmem:[#allocation73_spill] sm:$0xff] }
 0x16a   : >> { %1498 = vmatpush.msra.mxu1 %v3588_v11  ;;  %v4881_v11 = vld [vmem:[#allocation126_spill] sm:$0xff] }
 0x16b   : >> { %1575 = vmatpush.msra.mxu3 %v3760_v61  ;;  %v4890_v61 = vld [vmem:[#allocation75_spill] sm:$0xff] }
 0x16c   : >> { %1499 = vmatpush.msra.mxu1 %v3594_v43  ;;  %v4883_v43 = vld [vmem:[#allocation66_spill] sm:$0xff] }
 0x16d   : >> { %598 = vmatmul.f32.gmra.mxu0 %v4877_v48  ;;  %2302 = vmatmul.msk.f32.gmra.mxu1 %vm509_vm0, %v4878_v29 }
 0x16e   : >> { %2321 = vmatmul.msk.f32.gmra.mxu3 %vm509_vm0, %v4879_v19  ;;  %1500 = vmatpush.msra.mxu1 %v3611_v42  ;;  %v4885_v42 = vld [vmem:[#allocation125_spill] sm:$0xff] }
 0x16f   : >> { %1576 = vmatpush.msra.mxu3 %v3747_v56  ;;  %v4889_v56 = vld [vmem:[#allocation68_spill] sm:$0xff] }
 0x170   : >> { %1501 = vmatpush.msra.mxu1 %v3618_v55  ;;  %v4888_v55 = vld [vmem:[#allocation54_spill] sm:$0xff] }
 0x171   : >> { %1577 = vmatpush.msra.mxu3 %v3838_v6  ;;  %v4895_v6 = vld [vmem:[#allocation77_spill] sm:$0xff] }
 0x172   : >> { %1502 = vmatpush.msra.mxu1 %v3626_v5  ;;  %v4886_v5 = vld [vmem:[#allocation124_spill] sm:$0xff] }
 0x173   : >> { %2016 = vmatpush.msrb.mxu3 %v4880_v0  ;;  %v3973_v0 = vpop.f32.mrf.mxu3 }
 0x174   : >> { %1503 = vmatpush.msra.mxu1 %v3632_v31  ;;  %v4887_v31 = vld [vmem:[#allocation123_spill] sm:$0xff]  ;;  %4905 = vst [vmem:[#allocation128_spill] sm:$0xff] %v3973_v0 }
 0x175   : >> { %2017 = vmatpush.msrb.mxu3 %v4881_v11  ;;  %601 = vmatmul.f32.gmra.mxu0 %v4882_v13  ;;  %v4906_v11 = vld [vmem:[#allocation115_spill] sm:$0xff] }
 0x176   : >> { %1002 = vmatmul.f32.vlgmr.msrb.gmra.mxu1 %v4883_v43  ;;  %2322 = vmatmul.msk.f32.gmra.mxu3 %vm509_vm0, %v4884_v2  ;;  %v4919_v0 = vld [vmem:[#allocation83_spill] sm:$0xff]  ;;  %v2691_v43 = vpop.permute.xlu2 %2690 }
 0x177   : >> { %1504 = vmatpush.msra.mxu1 %v3643_v53  ;;  %2018 = vmatpush.msrb.mxu3 %v4885_v42  ;;  %v4891_v53 = vld [vmem:[#allocation122_spill] sm:$0xff]  ;;  %v2807_v42 = vmov 0  }
 0x178   : >> { %2755 = vset.pattern.permute.xlu1 %v2807_v42  ;;  %2754 = vset.pattern.permute.xlu0 %v2807_v42 }
 0x179   : >> { %1505 = vmatpush.msra.mxu1 %v3526_v41  ;;  %2019 = vmatpush.msrb.mxu3 %v4886_v5  ;;  %v4892_v41 = vld [vmem:[#allocation121_spill] sm:$0xff]  ;;  %v4907_v5 = vld [vmem:[#allocation98_spill] sm:$0xff] }
 0x17a   : >> { %1134 = vperm.xlu0 %2754, %v4907_v5   ;;  %2756 = vset.pattern.permute.xlu2 %v2807_v42  ;;  %v4917_v5 = vld [vmem:[#allocation62_spill] sm:$0xff] }
 0x17b   : >> { %1506 = vmatpush.msra.mxu1 %v3523_v58  ;;  %2020 = vmatpush.msrb.mxu3 %v4887_v31  ;;  %v4894_v58 = vld [vmem:[#allocation70_spill] sm:$0xff]  ;;  %v4908_v31 = vld [vmem:[#allocation99_spill] sm:$0xff] }
 0x17c   : >> { %1139 = vperm.xlu1 %2755, %v4908_v31   ;;  %v4918_v31 = vld [vmem:[#allocation76_spill] sm:$0xff]  ;;  %v4920_v42 = vld [vmem:[#allocation102_spill] sm:$0xff] }
 0x17d   : >> { %1507 = vmatpush.msra.mxu1 %v3552_v45  ;;  %604 = vmatmul.f32.gmra.mxu0 %v4888_v55  ;;  %v4893_v45 = vld [vmem:[#allocation56_spill] sm:$0xff] }
 0x17e   : >> { %1005 = vmatmul.f32.gmra.mxu1 %v4889_v56  ;;  %2323 = vmatmul.msk.f32.gmra.mxu3 %vm509_vm0, %v4890_v61 }
 0x17f   : >> { %1508 = vmatpush.msra.mxu1 %v3549_v62  ;;  %2021 = vmatpush.msrb.mxu3 %v4891_v53  ;;  %v4897_v62 = vld [vmem:[#allocation120_spill] sm:$0xff] }
 0x180   : >> { %v4909_v53 = vld [vmem:[#allocation60_spill] sm:$0xff] }
 0x181   : >> { %1509 = vmatpush.msra.mxu1 %v3536_v60  ;;  %2022 = vmatpush.msrb.mxu3 %v4892_v41  ;;  %v3960_v60 = vpop.f32.mrf.mxu2  ;;  %v4910_v41 = vld [vmem:[#allocation74_spill] sm:$0xff] }
 0x183   : >> { %1510 = vmatpush.msra.mxu1 %v3529_v52  ;;  %v4899_v52 = vld [vmem:[#allocation118_spill] sm:$0xff] }
 0x185   : >> { %1511 = vmatpush.msra.mxu1 %v3561_v33  ;;  %607 = vmatmul.f32.gmra.mxu0 %v4893_v45  ;;  %v4900_v33 = vld [vmem:[#allocation58_spill] sm:$0xff] }
 0x186   : >> { %1008 = vmatmul.f32.gmra.mxu1 %v4894_v58  ;;  %2324 = vmatmul.msk.f32.gmra.mxu3 %vm509_vm0, %v4895_v6 }
 0x187   : >> { %1512 = vmatpush.msra.mxu1 %v4896_v39  ;;  %v4911_v39 = vld [vmem:[#allocation81_spill] sm:$0xff] }
 0x189   : >> { %1951 = vmatpush.msrb.mxu1 %v4897_v62  ;;  %v3971_v7 = vpop.f32.mrf.mxu2  ;;  %v4912_v62 = vld [vmem:[#allocation100_spill] sm:$0xff] }
 0x18a   : >> { %1144 = vperm.xlu2 %2756, %v4912_v62  }
 0x18b   : >> { %1952 = vmatpush.msrb.mxu1 %v4898_v18  ;;  %v4913_v18 = vld [vmem:[#allocation114_spill] sm:$0xff] }
 0x18d   : >> { %1953 = vmatpush.msrb.mxu1 %v4899_v52  ;;  %610 = vmatmul.f32.gmra.mxu0 %v4900_v33 }
 0x18e   : >> { %1011 = vmatmul.f32.gmra.mxu1 %v4901_v59  ;;  %2325 = vmatmul.msk.f32.gmra.mxu3 %vm509_vm0, %v4902_v37  ;;  %v4927_v59 = vld [vmem:[#allocation85_spill] sm:$0xff]  ;;  %v4934_v37 = vld [vmem:[#allocation87_spill] sm:$0xff] }
 0x18f   : >> { %1954 = vmatpush.msrb.mxu1 %v4903_v46  ;;  %v3986_v46 = vpop.f32.mrf.mxu3 }
 0x190   : >> { %4914 = vst [vmem:[#allocation129_spill] sm:$0xff] %v3986_v46  ;;  %v4924_v46 = vld [vmem:[#allocation64_spill] sm:$0xff] }
 0x191   : >> { %1955 = vmatpush.msrb.mxu1 %v4904_v30  ;;  %v3984_v52 = vpop.f32.mrf.mxu2  ;;  %v4915_v30 = vld [vmem:[#allocation103_spill] sm:$0xff] }
 0x192   : >> { %1159 = vperm.xlu0 %2754, %v4915_v30   ;;  %1154 = vperm.xlu2 %2756, %v4920_v42   ;;  %v4925_v30 = vld [vmem:[#allocation78_spill] sm:$0xff] }
 0x193   : >> { %1956 = vmatpush.msrb.mxu1 %v4906_v11  ;;  %v4916_v11 = vld [vmem:[#allocation101_spill] sm:$0xff] }
 0x194   : >> { %1149 = vperm.xlu1 %2755, %v4916_v11  }
 0x195   : >> { %613 = vmatmul.f32.gmra.mxu0 %v4909_v53  ;;  %1957 = vmatpush.msrb.mxu1 %v4913_v18  ;;  %v4922_v18 = vld [vmem:[#allocation106_spill] sm:$0xff] }
 0x196   : >> { %1014 = vmatmul.f32.gmra.mxu1 %v4910_v41  ;;  %2326 = vmatmul.msk.f32.gmra.mxu3 %vm509_vm0, %v4911_v39  ;;  %v4923_v41 = vld [vmem:[#allocation104_spill] sm:$0xff]  ;;  %v4930_v39 = vld [vmem:[#allocation107_spill] sm:$0xff] }
 0x197   : >> { %v4001_v11 = vpop.f32.mrf.mxu3 }
 0x198   : >> { %4926 = vst [vmem:[#allocation131_spill] sm:$0xff] %v4001_v11  ;;  %v4932_v11 = vld [vmem:[#allocation35_spill] sm:$0xff] }
 0x199   : >> { %v3995_v62 = vpop.f32.mrf.mxu2 }
 0x19a   : >> { %4921 = vst [vmem:[#allocation130_spill] sm:$0xff] %v3995_v62  ;;  %1174 = vperm.xlu0 %2754, %v4922_v18   ;;  %v4961_v62 = vld [vmem:[#allocation45_spill] sm:$0xff] }
 0x19c   : >> { %1164 = vperm.xlu1 %2755, %v4923_v41  }
 0x19d   : >> { %616 = vmatmul.f32.gmra.mxu0 %v4917_v5  ;;  %v4943_v5 = vld [vmem:[#allocation111_spill] sm:$0xff] }
 0x19e   : >> { %1017 = vmatmul.f32.gmra.mxu1 %v4918_v31  ;;  %2327 = vmatmul.msk.f32.gmra.mxu3 %vm509_vm0, %v4919_v0  ;;  %v4928_v31 = vld [vmem:[#allocation105_spill] sm:$0xff] }
 0x19f   : >> { %1169 = vperm.xlu2 %2756, %v4928_v31   ;;  %v2692_v31 = vunpack.i.l.bf16 %v2691_v43  ;;  %v4019_v6 = vpop.f32.mrf.mxu3 }
 0x1a0   : >> { %4935 = vst [vmem:[#allocation133_spill] sm:$0xff] %v4019_v6  ;;  %v4939_v6 = vld [vmem:[#allocation112_spill] sm:$0xff] }
 0x1a1   : >> { %v2681_v0 = vpop.permute.xlu0 %2680  ;;  %v4010_v56 = vpop.f32.mrf.mxu2 }
 0x1a2   : >> { %4929 = vst [vmem:[#allocation132_spill] sm:$0xff] %v4010_v56  ;;  %v2683_v18 = vunpack.i.h.bf16 %v2681_v0  ;;  %v2682_v41 = vunpack.i.l.bf16 %v2681_v0  ;;  %v4936_v0 = vld [vmem:[#allocation108_spill] sm:$0xff] }
 0x1a4   : >> { %1179 = vperm.xlu1 %2755, %v4930_v39   ;;  %1380 = vmatpush.msra.mxu0 %v2683_v18  ;;  %v4938_v18 = vld [vmem:[#allocation110_spill] sm:$0xff] }
 0x1a5   : >> { %619 = vmatmul.f32.gmra.mxu0 %v4924_v46  ;;  %v2693_v46 = vunpack.i.h.bf16 %v2691_v43  ;;  %1447 = vmatpush.msra.mxu2 %v2682_v41  ;;  %v4940_v41 = vld [vmem:[#allocation37_spill] sm:$0xff] }
 0x1a6   : >> { %1020 = vmatmul.f32.gmra.mxu1 %v4925_v30  ;;  %2328 = vmatmul.msk.f32.gmra.mxu3 %vm509_vm0, %v4927_v59  ;;  %v4931_v30 = vld [vmem:[#allocation109_spill] sm:$0xff]  ;;  %v4933_v59 = vld [vmem:[#allocation80_spill] sm:$0xff] }
 0x1a7   : >> { %1189 = vperm.xlu0 %2754, %v4931_v30   ;;  %1184 = vperm.xlu2 %2756, %v4936_v0   ;;  %v2701_v0 = vpop.permute.xlu1 %2700 }
 0x1a8   : >> { %1381 = vmatpush.msra.mxu0 %v2692_v31  ;;  %2361 = vmatmul.msk.f32.vlgmr.msra.gmra.mxu2 %vm509_vm0, %v4932_v11  ;;  %v4941_v31 = vld [vmem:[#allocation82_spill] sm:$0xff] }
 0x1a9   : >> { %v4028_v22 = vpop.f32.mrf.mxu2 }
 0x1aa   : >> { %v4006_v58 = vpop.f32.mrf.mxu0  ;;  %v4008_v42 = vpop.f32.mrf.mxu1  ;;  %1382 = vmatpush.msra.mxu0 %v2693_v46  ;;  %4937 = vst [vmem:[#allocation134_spill] sm:$0xff] %v4028_v22  ;;  %v2702_v46 = vunpack.i.l.bf16 %v2701_v0  ;;  %v2703_v22 = vunpack.i.h.bf16 %v2701_v0  ;;  %v4946_v0 = vld [vmem:[#allocation113_spill] sm:$0xff] }
 0x1ac   : >> { %1194 = vperm.xlu1 %2755, %v4938_v18  }
 0x1ad   : >> { %2287 = vmatmul.msk.f32.vlgmr.msrb.gmra.mxu0 %vm509_vm0, %v4932_v11  ;;  %v4942_v11 = vld [vmem:[#allocation89_spill] sm:$0xff] }
 0x1ae   : >> { %1023 = vmatmul.f32.gmra.mxu1 %v4933_v59  ;;  %2329 = vmatmul.msk.f32.gmra.mxu3 %vm509_vm0, %v4934_v37  ;;  %v2696_v59 = vpop.permute.xlu0 %2695 }
 0x1af   : >> { %v2698_v37 = vunpack.i.h.bf16 %v2696_v59  ;;  %v2697_v43 = vunpack.i.l.bf16 %v2696_v59  ;;  %1204 = vperm.xlu0 %2754, %v4939_v6   ;;  %1199 = vperm.xlu2 %2756, %v4943_v5   ;;  %v4040_v59 = vpop.f32.mrf.mxu3  ;;  %v2706_v6 = vpop.permute.xlu2 %2705 }
 0x1b0   : >> { %2362 = vmatmul.msk.f32.gmra.mxu2 %vm509_vm0, %v4940_v41  ;;  %4944 = vst [vmem:[#allocation135_spill] sm:$0xff] %v4040_v59  ;;  %v4949_v59 = vld [vmem:[#allocation91_spill] sm:$0xff] }
 0x1b1   : >> { %1699 = vmatpush.msrb.mxu0 %v2697_v43  ;;  %v4046_v53 = vpop.f32.mrf.mxu2 }
 0x1b2   : >> { %v4024_v39 = vpop.f32.mrf.mxu0  ;;  %v4026_v30 = vpop.f32.mrf.mxu1  ;;  %4945 = vst [vmem:[#allocation136_spill] sm:$0xff] %v4046_v53  ;;  %v4952_v53 = vld [vmem:[#allocation41_spill] sm:$0xff] }
 0x1b3   : >> { %1700 = vmatpush.msrb.mxu0 %v2698_v37  ;;  %v4947_v37 = vld [vmem:[#allocation39_spill] sm:$0xff] }
 0x1b4   : >> { %1209 = vperm.xlu1 %2755, %v4946_v0  }
 0x1b5   : >> { %2288 = vmatmul.msk.f32.gmra.mxu0 %vm509_vm0, %v4940_v41  ;;  %v4948_v41 = vld [vmem:[#allocation84_spill] sm:$0xff] }
 0x1b6   : >> { %1026 = vmatmul.f32.gmra.mxu1 %v4941_v31  ;;  %2330 = vmatmul.msk.f32.gmra.mxu3 %vm509_vm0, %v4942_v11  ;;  %v2707_v31 = vunpack.i.l.bf16 %v2706_v6  ;;  %v2711_v43 = vpop.permute.xlu0 %2710  ;;  %v2708_v11 = vunpack.i.h.bf16 %v2706_v6 }
 0x1b7   : >> { %1701 = vmatpush.msrb.mxu0 %v2702_v46  ;;  %v2712_v5 = vunpack.i.l.bf16 %v2711_v43  ;;  %v2713_v56 = vunpack.i.h.bf16 %v2711_v43  ;;  %v4060_v6 = vpop.f32.mrf.mxu3 }
 0x1b8   : >> { %2363 = vmatmul.msk.f32.gmra.mxu2 %vm509_vm0, %v4947_v37  ;;  %4951 = vst [vmem:[#allocation138_spill] sm:$0xff] %v4060_v6 }
 0x1b9   : >> { %1702 = vmatpush.msrb.mxu0 %v2703_v22  ;;  %1772 = vmatpush.msrb.mxu2 %v2712_v5  ;;  %v774_v0 = vpop.f32.mrf.mxu2 }
 0x1ba   : >> { %v4042_v18 = vpop.f32.mrf.mxu0  ;;  %v4044_v61 = vpop.f32.mrf.mxu1 }
 0x1bb   : >> { %1703 = vmatpush.msrb.mxu0 %v2707_v31  ;;  %v4954_v31 = vld [vmem:[#allocation93_spill] sm:$0xff] }
 0x1bd   : >> { %2289 = vmatmul.msk.f32.gmra.mxu0 %vm509_vm0, %v4947_v37  ;;  %v4957_v37 = vld [vmem:[#allocation88_spill] sm:$0xff] }
 0x1be   : >> { %1029 = vmatmul.f32.gmra.mxu1 %v4948_v41  ;;  %2331 = vmatmul.msk.f32.gmra.mxu3 %vm509_vm0, %v4949_v59  ;;  %v4953_v41 = vld [vmem:[#allocation86_spill] sm:$0xff]  ;;  %v4959_v59 = vld [vmem:[#allocation95_spill] sm:$0xff] }
 0x1bf   : >> { %1704 = vmatpush.msrb.mxu0 %v2708_v11  ;;  %v4076_v6 = vpop.f32.mrf.mxu3 }
 0x1c0   : >> { %2364 = vmatmul.msk.f32.gmra.mxu2 %vm509_vm0, %v4952_v53  ;;  %4958 = vst [vmem:[#allocation140_spill] sm:$0xff] %v4076_v6  ;;  %v4962_v6 = vld [vmem:[#allocation90_spill] sm:$0xff] }
 0x1c1   : >> { %1705 = vmatpush.msrb.mxu0 %v2713_v56  ;;  %v777_v5 = vpop.f32.mrf.mxu2  ;;  %v4956_v56 = vld [vmem:[#allocation43_spill] sm:$0xff] }
 0x1c2   : >> { %v4056_v46 = vpop.f32.mrf.mxu0  ;;  %v4058_v22 = vpop.f32.mrf.mxu1 }
 0x1c3   : >> { %4950 = vst [vmem:[#allocation137_spill] sm:$0xff] %v4056_v46 }
 0x1c5   : >> { %2290 = vmatmul.msk.f32.gmra.mxu0 %vm509_vm0, %v4952_v53 }
 0x1c6   : >> { %1032 = vmatmul.f32.gmra.mxu1 %v4953_v41  ;;  %2332 = vmatmul.msk.f32.gmra.mxu3 %vm509_vm0, %v4954_v31  ;;  %v2716_v41 = vpop.permute.xlu1 %2715 }
 0x1c7   : >> { %v2718_v31 = vunpack.i.h.bf16 %v2716_v41  ;;  %v2717_v2 = vunpack.i.l.bf16 %v2716_v41 }
 0x1c8   : >> { %2365 = vmatmul.msk.f32.gmra.mxu2 %vm509_vm0, %v4956_v56 }
 0x1c9   : >> { %1706 = vmatpush.msrb.mxu0 %v2718_v31  ;;  %1773 = vmatpush.msrb.mxu2 %v2717_v2  ;;  %v780_v33 = vpop.f32.mrf.mxu2  ;;  %v4966_v2 = vld [vmem:[#allocation47_spill] sm:$0xff] }
 0x1ca   : >> { %v4069_v11 = vpop.f32.mrf.mxu0  ;;  %v4071_v43 = vpop.f32.mrf.mxu1 }
 0x1cb   : >> { %4955 = vst [vmem:[#allocation139_spill] sm:$0xff] %v4069_v11 }
 0x1cd   : >> { %2291 = vmatmul.msk.f32.gmra.mxu0 %vm509_vm0, %v4956_v56 }
 0x1ce   : >> { %1035 = vmatmul.f32.gmra.mxu1 %v4957_v37  ;;  %2333 = vmatmul.msk.f32.gmra.mxu3 %vm509_vm0, %v4959_v59  ;;  %v4963_v37 = vld [vmem:[#allocation97_spill] sm:$0xff]  ;;  %v4091_v59 = vpop.f32.mrf.mxu3 }
 0x1cf   : >> { %4964 = vst [vmem:[#allocation142_spill] sm:$0xff] %v4091_v59 }
 0x1d0   : >> { %2366 = vmatmul.msk.f32.gmra.mxu2 %vm509_vm0, %v4961_v62 }
 0x1d1   : >> { %v783_v31 = vpop.f32.mrf.mxu2 }
 0x1d2   : >> { %v4082_v53 = vpop.f32.mrf.mxu0  ;;  %v4084_v11 = vpop.f32.mrf.mxu1 }
 0x1d3   : >> { %4960 = vst [vmem:[#allocation141_spill] sm:$0xff] %v4082_v53  ;;  %v4967_v53 = vld [vmem:[#allocation92_spill] sm:$0xff] }
 0x1d5   : >> { %2292 = vmatmul.msk.f32.gmra.mxu0 %vm509_vm0, %v4961_v62 }
 0x1d6   : >> { %1038 = vmatmul.f32.gmra.mxu1 %v4962_v6  ;;  %2334 = vmatmul.msk.f32.gmra.mxu3 %vm509_vm0, %v4963_v37  ;;  %v2721_v6 = vpop.permute.xlu2 %2720 }
 0x1d7   : >> { %v2723_v37 = vunpack.i.h.bf16 %v2721_v6  ;;  %v2722_v46 = vunpack.i.l.bf16 %v2721_v6 }
 0x1d8   : >> { %2367 = vmatmul.msk.f32.gmra.mxu2 %vm509_vm0, %v4966_v2 }
 0x1d9   : >> { %1707 = vmatpush.msrb.mxu0 %v2723_v37  ;;  %1774 = vmatpush.msrb.mxu2 %v2722_v46  ;;  %v4111_v25 = vpop.f32.mrf.mxu2  ;;  %v4970_v46 = vld [vmem:[#allocation96_spill] sm:$0xff] }
 0x1da   : >> { %v4095_v41 = vpop.f32.mrf.mxu0  ;;  %v4097_v56 = vpop.f32.mrf.mxu1 }
 0x1db   : >> { %4965 = vst [vmem:[#allocation143_spill] sm:$0xff] %v4095_v41 }
 0x1dd   : >> { %2293 = vmatmul.msk.f32.gmra.mxu0 %vm509_vm0, %v4966_v2 }
 0x1de   : >> { %1041 = vmatmul.f32.gmra.mxu1 %v4967_v53  ;;  %2377 = vmatmul.msk.f32.vlgmr.msra.gmra.mxu3 %vm509_vm0, %v4837_v1  ;;  %v4968_v1 = vld [vmem:[#allocation94_spill] sm:$0xff] }
 0x1e0   : >> { %2368 = vmatmul.msk.f32.gmra.mxu2 %vm509_vm0, %v4834_v47 }
 0x1e1   : >> { %v4106_v62 = vpop.f32.mrf.mxu3 }
 0x1e2   : >> { %v596_v59 = vpop.f32.mrf.mxu0  ;;  %v4108_v41 = vpop.f32.mrf.mxu1 }
 0x1e3   : >> { %v662_v19 = vadd.f32 %v4008_v42, %v596_v59  ;;  %v4126_v59 = vpop.f32.mrf.mxu2 }
 0x1e5   : >> { %v4113_v53 = vadd.f32 %v774_v0, %v662_v19  ;;  %1383 = vmatmul.f32.vlgmr.msra.gmra.mxu0 %v4835_v32  ;;  %v2726_v0 = vpop.permute.xlu0 %2725 }
 0x1e6   : >> { %1044 = vmatmul.f32.gmra.mxu1 %v4968_v1  ;;  %2378 = vmatmul.msk.f32.gmra.mxu3 %vm509_vm0, %v4836_v3  ;;  %v2728_v3 = vunpack.i.h.bf16 %v2726_v0  ;;  %v2727_v32 = vunpack.i.l.bf16 %v2726_v0  ;;  %v2736_v0 = vpop.permute.xlu2 %2735 }
 0x1e8   : >> { %2369 = vmatmul.msk.f32.gmra.mxu2 %vm509_vm0, %v4832_v49  ;;  %1708 = vmatpush.msrb.mxu0 %v2728_v3  ;;  %v2731_v49 = vpop.permute.xlu1 %2730 }
 0x1e9   : >> { %v4124_v42 = vpop.f32.mrf.mxu3  ;;  %1775 = vmatpush.msrb.mxu2 %v2727_v32  ;;  %v2733_v3 = vunpack.i.h.bf16 %v2731_v49  ;;  %v2737_v32 = vunpack.i.l.bf16 %v2736_v0 }
 0x1ea   : >> { %v599_v6 = vpop.f32.mrf.mxu0  ;;  %v4121_v2 = vpop.f32.mrf.mxu1 }
 0x1eb   : >> { %v665_v37 = vadd.f32 %v4026_v30, %v599_v6  ;;  %1709 = vmatpush.msrb.mxu0 %v2733_v3 }
 0x1ed   : >> { %v4128_v19 = vadd.f32 %v777_v5, %v665_v37  ;;  %1386 = vmatmul.f32.gmra.mxu0 %v4833_v34  ;;  %v4139_v37 = vpop.f32.mrf.mxu2 }
 0x1ee   : >> { %1047 = vmatmul.f32.gmra.mxu1 %v4970_v46  ;;  %2379 = vmatmul.msk.f32.gmra.mxu3 %vm509_vm0, %v4862_v26  ;;  %v4971_v26 = vld [vmem:[#allocation2_spill] sm:$0xff]  ;;  %v2732_v46 = vunpack.i.l.bf16 %v2731_v49  ;;  %v2741_v49 = vpop.permute.xlu0 %2740 }
 0x1ef   : >> { %4969 = vst [vmem:[#allocation144_spill] sm:$0xff] %v4128_v19  ;;  %v2738_v19 = vunpack.i.h.bf16 %v2736_v0  ;;  %v2743_v3 = vunpack.i.h.bf16 %v2741_v49 }
 0x1f0   : >> { %2370 = vmatmul.msk.f32.gmra.mxu2 %vm509_vm0, %v4830_v51 }
 0x1f1   : >> { %v4145_v34 = vpop.f32.mrf.mxu3  ;;  %1776 = vmatpush.msrb.mxu2 %v2732_v46  ;;  %1710 = vmatpush.msrb.mxu0 %v2738_v19  ;;  %v2746_v46 = vpop.permute.xlu1 %2745 }
 0x1f2   : >> { %v602_v30 = vpop.f32.mrf.mxu0  ;;  %v2748_v51 = vunpack.i.h.bf16 %v2746_v46 }
 0x1f3   : >> { %v4136_v6 = vpop.f32.mrf.mxu1  ;;  %v668_v5 = vadd.f32 %v4044_v61, %v602_v30  ;;  %1777 = vmatpush.msrb.mxu2 %v2737_v32  ;;  %1711 = vmatpush.msrb.mxu0 %v2743_v3 }
 0x1f5   : >> { %v4141_v47 = vadd.f32 %v780_v33, %v668_v5  ;;  %1389 = vmatmul.f32.gmra.mxu0 %v4831_v36  ;;  %v795_v30 = vpop.f32.mrf.mxu2  ;;  %v2742_v36 = vunpack.i.l.bf16 %v2741_v49 }
 0x1f6   : >> { %1513 = vmatmul.f32.vlgmr.msra.gmra.mxu1 %v4971_v26  ;;  %2380 = vmatmul.msk.f32.gmra.mxu3 %vm509_vm0, %v4865_v8  ;;  %v4972_v8 = vld [vmem:[#allocation4_spill] sm:$0xff] }
 0x1f7   : >> { %1778 = vmatpush.msrb.mxu2 %v2742_v36  ;;  %1712 = vmatpush.msrb.mxu0 %v2748_v51 }
 0x1f8   : >> { %2371 = vmatmul.msk.f32.gmra.mxu2 %vm509_vm0, %v4860_v44 }
 0x1f9   : >> { %v4160_v0 = vpop.f32.mrf.mxu3 }
 0x1fa   : >> { %v605_v61 = vpop.f32.mrf.mxu0 }
 0x1fb   : >> { %v4151_v33 = vpop.f32.mrf.mxu1  ;;  %v671_v26 = vadd.f32 %v4058_v22, %v605_v61  ;;  %v2747_v22 = vunpack.i.l.bf16 %v2746_v46  ;;  %v4974_v46 = vld [vmem:[#allocation6_spill] sm:$0xff] }
 0x1fd   : >> { %v4154_v5 = vadd.f32 %v783_v31, %v671_v26  ;;  %1392 = vmatmul.f32.gmra.mxu0 %v4859_v27  ;;  %v2751_v31 = vpop.permute.xlu2 %2750  ;;  %v798_v26 = vpop.f32.mrf.mxu2  ;;  %1779 = vmatpush.msrb.mxu2 %v2747_v22 }
 0x1fe   : >> { %1516 = vmatmul.f32.gmra.mxu1 %v4972_v8  ;;  %2381 = vmatmul.msk.f32.gmra.mxu3 %vm509_vm0, %v4868_v40  ;;  %v2752_v8 = vunpack.i.l.bf16 %v2751_v31  ;;  %v2753_v27 = vunpack.i.h.bf16 %v2751_v31  ;;  %v4976_v31 = vld [vmem:[#allocation8_spill] sm:$0xff] }
 0x200   : >> { %1713 = vmatpush.msrb.mxu0 %v2752_v8  ;;  %2372 = vmatmul.msk.f32.gmra.mxu2 %vm509_vm0, %v4864_v57 }
 0x201   : >> { %v4176_v36 = vpop.f32.mrf.mxu3 }
 0x202   : >> { %v608_v19 = vpop.f32.mrf.mxu0  ;;  %1714 = vmatpush.msrb.mxu0 %v2753_v27 }
 0x203   : >> { %v4164_v32 = vpop.f32.mrf.mxu1  ;;  %v674_v61 = vadd.f32 %v4071_v43, %v608_v19 }
 0x205   : >> { %v4168_v49 = vadd.f32 %v4111_v25, %v674_v61  ;;  %1395 = vmatmul.f32.gmra.mxu0 %v4863_v4  ;;  %v818_v3 = vpop.f32.mrf.mxu2 }
 0x206   : >> { %1519 = vmatmul.f32.gmra.mxu1 %v4974_v46  ;;  %2382 = vmatmul.msk.f32.gmra.mxu3 %vm509_vm0, %v4872_v14  ;;  %v4978_v46 = vld [vmem:[#allocation10_spill] sm:$0xff]  ;;  %v840_v14 = vadd.f32 %v3962_v54, %v4113_v53 }
 0x207   : >> { %4973 = vst [vmem:[#allocation145_spill] sm:$0xff] %v4168_v49 }
 0x208   : >> { %2373 = vmatmul.msk.f32.gmra.mxu2 %vm509_vm0, %v4867_v28 }
 0x209   : >> { %v4193_v61 = vpop.f32.mrf.mxu3 }
 0x20a   : >> { %v611_v51 = vpop.f32.mrf.mxu0 }
 0x20b   : >> { %v4178_v43 = vpop.f32.mrf.mxu1  ;;  %v677_v25 = vadd.f32 %v4084_v11, %v611_v51 }
 0x20d   : >> { %v4182_v22 = vadd.f32 %v4126_v59, %v677_v25  ;;  %1398 = vmatmul.f32.gmra.mxu0 %v4866_v16  ;;  %v821_v11 = vpop.f32.mrf.mxu2 }
 0x20e   : >> { %1522 = vmatmul.f32.gmra.mxu1 %v4976_v31  ;;  %2383 = vmatmul.msk.f32.gmra.mxu3 %vm509_vm0, %v4876_v9 }
 0x20f   : >> { %4975 = vst [vmem:[#allocation146_spill] sm:$0xff] %v4182_v22 }
 0x210   : >> { %2374 = vmatmul.msk.f32.gmra.mxu2 %vm509_vm0, %v4870_v20 }
 0x212   : >> { %v614_v27 = vpop.f32.mrf.mxu0 }
 0x213   : >> { %v4190_v19 = vpop.f32.mrf.mxu1  ;;  %v680_v8 = vadd.f32 %v4097_v56, %v614_v27 }
 0x215   : >> { %v4196_v59 = vadd.f32 %v4139_v37, %v680_v8  ;;  %1401 = vmatmul.f32.gmra.mxu0 %v4869_v24  ;;  %v824_v31 = vpop.f32.mrf.mxu2  ;;  %v4211_v37 = vpop.f32.mrf.mxu3 }
 0x216   : >> { %1525 = vmatmul.f32.gmra.mxu1 %v4978_v46  ;;  %2384 = vmatmul.msk.f32.gmra.mxu3 %vm509_vm0, %v4827_v15 }
 0x217   : >> { %4977 = vst [vmem:[#allocation147_spill] sm:$0xff] %v4196_v59  ;;  %v5045_v59 = vld [vmem:[#allocation92_spill] sm:$0xff] }
 0x218   : >> { %2375 = vmatmul.msk.f32.gmra.mxu2 %vm509_vm0, %v4874_v63 }
 0x21a   : >> { %v617_v51 = vpop.f32.mrf.mxu0 }
 0x21b   : >> { %v4204_v25 = vpop.f32.mrf.mxu1  ;;  %v683_v56 = vadd.f32 %v4108_v41, %v617_v51 }
 0x21d   : >> { %v4207_v27 = vadd.f32 %v795_v30, %v683_v56  ;;  %1404 = vmatmul.f32.gmra.mxu0 %v4873_v35  ;;  %v827_v51 = vpop.f32.mrf.mxu2  ;;  %v4981_v56 = vld [vmem:[#allocation21_spill] sm:$0xff]  ;;  %v1089_v4 = vpop.f32.mrf.mxu3  ;;  %v5032_v35 = vld [vmem:[#allocation82_spill] sm:$0xff] }
 0x21e   : >> { %1528 = vmatmul.f32.gmra.mxu1 %v4829_v10  ;;  %2385 = vmatmul.msk.f32.gmra.mxu3 %vm509_vm0, %v4826_v17 }
 0x21f   : >> { %4979 = vst [vmem:[#allocation148_spill] sm:$0xff] %v4207_v27 }
 0x220   : >> { %2376 = vmatmul.msk.f32.gmra.mxu2 %vm509_vm0, %v4878_v29 }
 0x222   : >> { %v620_v8 = vpop.f32.mrf.mxu0 }
 0x223   : >> { %v4217_v46 = vpop.f32.mrf.mxu1  ;;  %v686_v41 = vadd.f32 %v4121_v2, %v620_v8 }
 0x225   : >> { %v4220_v30 = vadd.f32 %v798_v26, %v686_v41  ;;  %1407 = vmatmul.f32.gmra.mxu0 %v4877_v48  ;;  %v830_v8 = vpop.f32.mrf.mxu2  ;;  %v1069_v41 = vadd.f32 %v4106_v62, %v4136_v6  ;;  %v4984_v6 = vld [vmem:[#allocation20_spill] sm:$0xff] }
 0x226   : >> { %1531 = vmatmul.f32.gmra.mxu1 %v4828_v12  ;;  %2386 = vmatmul.msk.f32.gmra.mxu3 %vm509_vm0, %v4981_v56  ;;  %v4982_v56 = vld [vmem:[#allocation16_spill] sm:$0xff] }
 0x227   : >> { %4980 = vst [vmem:[#allocation149_spill] sm:$0xff] %v4220_v30 }
 0x228   : >> { %2393 = vmatmul.msk.f32.vlgmr.msrb.gmra.mxu2 %vm509_vm0, %v4871_v50 }
 0x22a   : >> { %v640_v9 = vpop.f32.mrf.mxu0 }
 0x22b   : >> { %v1024_v10 = vpop.f32.mrf.mxu1  ;;  %v641_v2 = vadd.f32 %v640_v9, %v4006_v58 }
 0x22c   : >> { %v1090_v26 = vadd.f32 %v1089_v4, %v1024_v10 }
 0x22d   : >> { %v754_v12 = vadd.f32 %v3960_v60, %v641_v2  ;;  %1410 = vmatmul.f32.gmra.mxu0 %v4882_v13  ;;  %v833_v58 = vpop.f32.mrf.mxu2  ;;  %v1072_v60 = vadd.f32 %v4124_v42, %v4151_v33  ;;  %v4985_v33 = vld [vmem:[#allocation27_spill] sm:$0xff] }
 0x22e   : >> { %1534 = vmatmul.f32.gmra.mxu1 %v4982_v56  ;;  %v4236_v15 = vadd.f32 %v1090_v26, %v840_v14  ;;  %2387 = vmatmul.msk.f32.gmra.mxu3 %vm509_vm0, %v4825_v21  ;;  %v4983_v14 = vld [vmem:[#allocation18_spill] sm:$0xff]  ;;  %v4987_v26 = vld [vmem:[#allocation137_spill] sm:$0xff]  ;;  %v5028_v21 = vld [vmem:[#allocation80_spill] sm:$0xff] }
 0x22f   : >> { %v819_v16 = vadd.f32 %v818_v3, %v754_v12 }
 0x230   : >> { %2394 = vmatmul.msk.f32.gmra.mxu2 %vm509_vm0, %v4875_v38 }
 0x231   : >> { %v4242_v10 = vadd.f32 %v1069_v41, %v819_v16 }
 0x232   : >> { %v643_v4 = vpop.f32.mrf.mxu0 }
 0x233   : >> { %v644_v9 = vadd.f32 %v643_v4, %v4024_v39  ;;  %v4989_v4 = vld [vmem:[#allocation58_spill] sm:$0xff] }
 0x235   : >> { %v757_v54 = vadd.f32 %v3971_v7, %v644_v9  ;;  %1413 = vmatmul.f32.gmra.mxu0 %v4888_v55  ;;  %v836_v39 = vpop.f32.mrf.mxu2  ;;  %v1075_v7 = vadd.f32 %v4145_v34, %v4164_v32  ;;  %v1078_v34 = vadd.f32 %v4160_v0, %v4178_v43  ;;  %v4990_v9 = vld [vmem:[#allocation22_spill] sm:$0xff]  ;;  %v1081_v0 = vadd.f32 %v4176_v36, %v4190_v19  ;;  %v4994_v43 = vld [vmem:[#allocation132_spill] sm:$0xff] }
 0x236   : >> { %1537 = vmatmul.f32.gmra.mxu1 %v4983_v14  ;;  %2388 = vmatmul.msk.f32.gmra.mxu3 %vm509_vm0, %v4824_v23  ;;  %v1084_v36 = vadd.f32 %v4193_v61, %v4204_v25  ;;  %v5000_v19 = vld [vmem:[#allocation134_spill] sm:$0xff]  ;;  %v1087_v61 = vadd.f32 %v4211_v37, %v4217_v46  ;;  %v5006_v25 = vld [vmem:[#allocation136_spill] sm:$0xff]  ;;  %v5012_v37 = vld [vmem:[#allocation81_spill] sm:$0xff] }
 0x237   : >> { %v822_v12 = vadd.f32 %v821_v11, %v757_v54  ;;  %v4986_v11 = vld [vmem:[#allocation71_spill] sm:$0xff]  ;;  %v4992_v54 = vld [vmem:[#allocation73_spill] sm:$0xff] }
 0x238   : >> { %2395 = vmatmul.msk.f32.gmra.mxu2 %vm509_vm0, %v4986_v11  ;;  %v4998_v11 = vld [vmem:[#allocation75_spill] sm:$0xff] }
 0x239   : >> { %v4254_v16 = vadd.f32 %v1072_v60, %v822_v12  ;;  %v5030_v23 = vld [vmem:[#allocation95_spill] sm:$0xff] }
 0x23a   : >> { %v646_v53 = vpop.f32.mrf.mxu0 }
 0x23b   : >> { %v647_v62 = vadd.f32 %v646_v53, %v4042_v18  ;;  %v4993_v53 = vld [vmem:[#allocation139_spill] sm:$0xff] }
 0x23d   : >> { %v760_v42 = vadd.f32 %v3984_v52, %v647_v62  ;;  %1416 = vmatmul.f32.gmra.mxu0 %v4893_v45  ;;  %v4269_v56 = vpop.f32.mrf.mxu2  ;;  %v4988_v52 = vld [vmem:[#allocation130_spill] sm:$0xff]  ;;  %v5035_v45 = vld [vmem:[#allocation84_spill] sm:$0xff] }
 0x23e   : >> { %1540 = vmatmul.f32.gmra.mxu1 %v4984_v6  ;;  %2389 = vmatmul.msk.f32.gmra.mxu3 %vm509_vm0, %v4985_v33  ;;  %v4995_v6 = vld [vmem:[#allocation60_spill] sm:$0xff] }
 0x23f   : >> { %v825_v3 = vadd.f32 %v824_v31, %v760_v42  ;;  %v4991_v31 = vld [vmem:[#allocation29_spill] sm:$0xff]  ;;  %v4996_v33 = vld [vmem:[#allocation24_spill] sm:$0xff] }
 0x240   : >> { %2396 = vmatmul.msk.f32.gmra.mxu2 %vm509_vm0, %v4992_v54 }
 0x241   : >> { %v4266_v2 = vadd.f32 %v1075_v7, %v825_v3 }
 0x242   : >> { %v649_v18 = vpop.f32.mrf.mxu0 }
 0x243   : >> { %v650_v41 = vadd.f32 %v649_v18, %v4987_v26 }
 0x245   : >> { %v763_v32 = vadd.f32 %v4988_v52, %v650_v41  ;;  %1419 = vmatmul.f32.gmra.mxu0 %v4989_v4  ;;  %v4283_v7 = vpop.f32.mrf.mxu2  ;;  %v4999_v41 = vld [vmem:[#allocation141_spill] sm:$0xff]  ;;  %v5001_v4 = vld [vmem:[#allocation62_spill] sm:$0xff] }
 0x246   : >> { %1543 = vmatmul.f32.gmra.mxu1 %v4990_v9  ;;  %2390 = vmatmul.msk.f32.gmra.mxu3 %vm509_vm0, %v4991_v31  ;;  %v5002_v9 = vld [vmem:[#allocation26_spill] sm:$0xff] }
 0x247   : >> { %v828_v60 = vadd.f32 %v827_v51, %v763_v32  ;;  %v4997_v51 = vld [vmem:[#allocation31_spill] sm:$0xff] }
 0x248   : >> { %2397 = vmatmul.msk.f32.gmra.mxu2 %vm509_vm0, %v4998_v11 }
 0x249   : >> { %v4280_v14 = vadd.f32 %v1078_v34, %v828_v60  ;;  %v5004_v60 = vld [vmem:[#allocation77_spill] sm:$0xff] }
 0x24a   : >> { %v652_v12 = vpop.f32.mrf.mxu0 }
 0x24b   : >> { %v653_v62 = vadd.f32 %v652_v12, %v4993_v53  ;;  %v5005_v53 = vld [vmem:[#allocation143_spill] sm:$0xff] }
 0x24d   : >> { %v766_v42 = vadd.f32 %v4994_v43, %v653_v62  ;;  %1422 = vmatmul.f32.gmra.mxu0 %v4995_v6  ;;  %v4297_v52 = vpop.f32.mrf.mxu2  ;;  %v5008_v6 = vld [vmem:[#allocation28_spill] sm:$0xff] }
 0x24e   : >> { %1546 = vmatmul.f32.gmra.mxu1 %v4996_v33  ;;  %2391 = vmatmul.msk.f32.gmra.mxu3 %vm509_vm0, %v4997_v51  ;;  %v5009_v33 = vld [vmem:[#allocation79_spill] sm:$0xff] }
 0x24f   : >> { %v831_v3 = vadd.f32 %v830_v8, %v766_v42  ;;  %v5003_v8 = vld [vmem:[#allocation33_spill] sm:$0xff]  ;;  %v5007_v42 = vld [vmem:[#allocation64_spill] sm:$0xff] }
 0x250   : >> { %2398 = vmatmul.msk.f32.gmra.mxu2 %vm509_vm0, %v5004_v60 }
 0x251   : >> { %v4294_v18 = vadd.f32 %v1081_v0, %v831_v3 }
 0x252   : >> { %v655_v26 = vpop.f32.mrf.mxu0 }
 0x253   : >> { %v656_v34 = vadd.f32 %v655_v26, %v4999_v41  ;;  %v5010_v26 = vld [vmem:[#allocation30_spill] sm:$0xff] }
 0x254   : >> { %v5011_v41 = vld [vmem:[#allocation66_spill] sm:$0xff] }
 0x255   : >> { %v769_v32 = vadd.f32 %v5000_v19, %v656_v34  ;;  %1425 = vmatmul.f32.gmra.mxu0 %v5001_v4  ;;  %v4311_v0 = vpop.f32.mrf.mxu2  ;;  %v4336_v19 = vpop.f32.mrf.mxu1 }
 0x256   : >> { %1549 = vmatmul.f32.gmra.mxu1 %v5002_v9  ;;  %2392 = vmatmul.msk.f32.gmra.mxu3 %vm509_vm0, %v5003_v8  ;;  %v4342_v9 = vpop.f32.mrf.mxu3 }
 0x257   : >> { %v834_v31 = vadd.f32 %v833_v58, %v769_v32  ;;  %v5015_v32 = vld [vmem:[#allocation83_spill] sm:$0xff] }
 0x258   : >> { %2399 = vmatmul.msk.f32.gmra.mxu2 %vm509_vm0, %v5009_v33  ;;  %v5020_v33 = vld [vmem:[#allocation74_spill] sm:$0xff] }
 0x259   : >> { %v4308_v54 = vadd.f32 %v1084_v36, %v834_v31  ;;  %v5014_v36 = vld [vmem:[#allocation68_spill] sm:$0xff]  ;;  %v5016_v31 = vld [vmem:[#allocation70_spill] sm:$0xff] }
 0x25a   : >> { %v658_v12 = vpop.f32.mrf.mxu0 }
 0x25b   : >> { %v659_v62 = vadd.f32 %v658_v12, %v5005_v53  ;;  %v5017_v12 = vld [vmem:[#allocation85_spill] sm:$0xff] }
 0x25d   : >> { %v772_v43 = vadd.f32 %v5006_v25, %v659_v62  ;;  %1428 = vmatmul.f32.gmra.mxu0 %v5007_v42  ;;  %v4324_v11 = vpop.f32.mrf.mxu2  ;;  %v4347_v60 = vpop.f32.mrf.mxu1  ;;  %v5018_v25 = vld [vmem:[#allocation72_spill] sm:$0xff] }
 0x25e   : >> { %1552 = vmatmul.f32.gmra.mxu1 %v5008_v6 }
 0x25f   : >> { %v837_v58 = vadd.f32 %v836_v39, %v772_v43  ;;  %v5013_v39 = vld [vmem:[#allocation32_spill] sm:$0xff]  ;;  %v5019_v43 = vld [vmem:[#allocation87_spill] sm:$0xff] }
 0x260   : >> { %2400 = vmatmul.msk.f32.gmra.mxu2 %vm509_vm0, %v5012_v37 }
 0x261   : >> { %v4320_v51 = vadd.f32 %v1087_v61, %v837_v58  ;;  %v4355_v61 = vpop.f32.mrf.mxu3 }
 0x262   : >> { %v4322_v3 = vpop.f32.mrf.mxu0 }
 0x265   : >> { %1715 = vmatmul.f32.vlgmr.msrb.gmra.mxu0 %v5011_v41  ;;  %v4332_v34 = vpop.f32.mrf.mxu2  ;;  %v4360_v42 = vpop.f32.mrf.mxu1  ;;  %v5021_v41 = vld [vmem:[#allocation89_spill] sm:$0xff] }
 0x266   : >> { %1555 = vmatmul.f32.gmra.mxu1 %v5010_v26 }
 0x268   : >> { %2401 = vmatmul.msk.f32.gmra.mxu2 %vm509_vm0, %v5015_v32  ;;  %v5022_v32 = vld [vmem:[#allocation76_spill] sm:$0xff] }
 0x269   : >> { %v4365_v26 = vpop.f32.mrf.mxu3 }
 0x26a   : >> { %v4330_v46 = vpop.f32.mrf.mxu0 }
 0x26d   : >> { %1718 = vmatmul.f32.gmra.mxu0 %v5014_v36  ;;  %v4344_v8 = vpop.f32.mrf.mxu2  ;;  %v4371_v36 = vpop.f32.mrf.mxu1 }
 0x26e   : >> { %1558 = vmatmul.f32.gmra.mxu1 %v5013_v39 }
 0x270   : >> { %2402 = vmatmul.msk.f32.gmra.mxu2 %vm509_vm0, %v5017_v12 }
 0x271   : >> { %v4376_v12 = vpop.f32.mrf.mxu3 }
 0x272   : >> { %v4340_v4 = vpop.f32.mrf.mxu0 }
 0x275   : >> { %1721 = vmatmul.f32.gmra.mxu0 %v5016_v31  ;;  %v4353_v62 = vpop.f32.mrf.mxu2  ;;  %v5023_v31 = vld [vmem:[#allocation91_spill] sm:$0xff]  ;;  %v4381_v13 = vpop.f32.mrf.mxu1 }
 0x276   : >> { %5025 = vst [vmem:[#allocation137_spill] sm:$0xff] %v4381_v13 }
 0x278   : >> { %2403 = vmatmul.msk.f32.gmra.mxu2 %vm509_vm0, %v5019_v43 }
 0x279   : >> { %v4387_v20 = vpop.f32.mrf.mxu3 }
 0x27a   : >> { %v4351_v53 = vpop.f32.mrf.mxu0  ;;  %5027 = vst [vmem:[#allocation130_spill] sm:$0xff] %v4387_v20 }
 0x27d   : >> { %1724 = vmatmul.f32.gmra.mxu0 %v5018_v25  ;;  %v1473_v58 = vpop.f32.mrf.mxu2 }
 0x280   : >> { %2404 = vmatmul.msk.f32.gmra.mxu2 %vm509_vm0, %v5021_v41  ;;  %v5026_v41 = vld [vmem:[#allocation93_spill] sm:$0xff] }
 0x281   : >> { %v4396_v29 = vpop.f32.mrf.mxu3 }
 0x282   : >> { %v4362_v6 = vpop.f32.mrf.mxu0  ;;  %5031 = vst [vmem:[#allocation132_spill] sm:$0xff] %v4396_v29 }
 0x285   : >> { %1727 = vmatmul.f32.gmra.mxu0 %v5020_v33  ;;  %v1476_v39 = vpop.f32.mrf.mxu2  ;;  %v5024_v33 = vld [vmem:[#allocation78_spill] sm:$0xff] }
 0x288   : >> { %2405 = vmatmul.msk.f32.gmra.mxu2 %vm509_vm0, %v5023_v31  ;;  %v4390_v31 = vpop.f32.mrf.mxu1 }
 0x289   : >> { %5029 = vst [vmem:[#allocation139_spill] sm:$0xff] %v4390_v31 }
 0x28a   : >> { %v4369_v37 = vpop.f32.mrf.mxu0 }
 0x28d   : >> { %1730 = vmatmul.f32.gmra.mxu0 %v5022_v32  ;;  %v1479_v43 = vpop.f32.mrf.mxu2 }
 0x290   : >> { %2406 = vmatmul.msk.f32.gmra.mxu2 %vm509_vm0, %v5026_v41  ;;  %v5033_v41 = vld [vmem:[#allocation97_spill] sm:$0xff]  ;;  %v4401_v38 = vpop.f32.mrf.mxu1 }
 0x291   : >> { %5034 = vst [vmem:[#allocation141_spill] sm:$0xff] %v4401_v38 }
 0x292   : >> { %v4378_v25 = vpop.f32.mrf.mxu0 }
 0x295   : >> { %1733 = vmatmul.f32.gmra.mxu0 %v5024_v33  ;;  %v1482_v32 = vpop.f32.mrf.mxu2 }
 0x298   : >> { %2407 = vmatmul.msk.f32.gmra.mxu2 %vm509_vm0, %v5030_v23  ;;  %v4406_v23 = vpop.f32.mrf.mxu3  ;;  %v4410_v50 = vpop.f32.mrf.mxu1 }
 0x299   : >> { %5036 = vst [vmem:[#allocation134_spill] sm:$0xff] %v4406_v23 }
 0x29a   : >> { %v4385_v17 = vpop.f32.mrf.mxu0  ;;  %5037 = vst [vmem:[#allocation143_spill] sm:$0xff] %v4410_v50 }
 0x29d   : >> { %1736 = vmatmul.f32.gmra.mxu0 %v5028_v21  ;;  %v1485_v33 = vpop.f32.mrf.mxu2 }
 0x2a0   : >> { %2408 = vmatmul.msk.f32.gmra.mxu2 %vm509_vm0, %v5033_v41  ;;  %v4413_v55 = vpop.f32.mrf.mxu3  ;;  %v1514_v63 = vpop.f32.mrf.mxu1 }
 0x2a1   : >> { %5039 = vst [vmem:[#allocation136_spill] sm:$0xff] %v4413_v55 }
 0x2a2   : >> { %v1408_v24 = vpop.f32.mrf.mxu0 }
 0x2a3   : >> { %v4394_v28 = vadd.f32 %v1473_v58, %v1408_v24 }
 0x2a5   : >> { %1739 = vmatmul.f32.gmra.mxu0 %v5032_v35  ;;  %v1488_v44 = vpop.f32.mrf.mxu2  ;;  %v5038_v35 = vld [vmem:[#allocation86_spill] sm:$0xff] }
 0x2a8   : >> { %v1517_v23 = vpop.f32.mrf.mxu1 }
 0x2aa   : >> { %v1411_v40 = vpop.f32.mrf.mxu0 }
 0x2ab   : >> { %v4403_v21 = vadd.f32 %v1476_v39, %v1411_v40  ;;  %v5041_v39 = vld [vmem:[#allocation88_spill] sm:$0xff] }
 0x2ad   : >> { %1742 = vmatmul.f32.gmra.mxu0 %v5035_v45  ;;  %v1491_v48 = vpop.f32.mrf.mxu2  ;;  %v1579_v45 = vpop.f32.mrf.mxu3 }
 0x2b2   : >> { %v1414_v24 = vpop.f32.mrf.mxu0 }
 0x2b3   : >> { %v4408_v58 = vadd.f32 %v1479_v43, %v1414_v24  ;;  %v5043_v24 = vld [vmem:[#allocation90_spill] sm:$0xff] }
 0x2b5   : >> { %1745 = vmatmul.f32.gmra.mxu0 %v5038_v35  ;;  %v1494_v40 = vpop.f32.mrf.mxu2  ;;  %v1582_v38 = vpop.f32.mrf.mxu3 }
 0x2ba   : >> { %v1417_v41 = vpop.f32.mrf.mxu0 }
 0x2bb   : >> { %v4415_v57 = vadd.f32 %v1482_v32, %v1417_v41  ;;  %v1520_v32 = vpop.f32.mrf.mxu1 }
 0x2bd   : >> { %5040 = vst [vmem:[#allocation150_spill] sm:$0xff] %v4415_v57  ;;  %1748 = vmatmul.f32.gmra.mxu0 %v5041_v39  ;;  %v1781_v43 = vpop.f32.mrf.mxu2  ;;  %v1585_v39 = vpop.f32.mrf.mxu3 }
 0x2c2   : >> { %v1420_v30 = vpop.f32.mrf.mxu0 }
 0x2c3   : >> { %v4418_v27 = vadd.f32 %v1485_v33, %v1420_v30 }
 0x2c5   : >> { %5042 = vst [vmem:[#allocation151_spill] sm:$0xff] %v4418_v27  ;;  %1751 = vmatmul.f32.gmra.mxu0 %v5043_v24  ;;  %v1784_v55 = vpop.f32.mrf.mxu2  ;;  %v1523_v24 = vpop.f32.mrf.mxu1  ;;  %v1450_v27 = vadd.f32 %v4269_v56, %v4322_v3 }
 0x2ca   : >> { %v1423_v50 = vpop.f32.mrf.mxu0 }
 0x2cb   : >> { %v4421_v35 = vadd.f32 %v1488_v44, %v1423_v50  ;;  %v5048_v44 = vld [vmem:[#allocation96_spill] sm:$0xff]  ;;  %v1515_v50 = vadd.f32 %v1514_v63, %v1450_v27 }
 0x2cd   : >> { %5044 = vst [vmem:[#allocation152_spill] sm:$0xff] %v4421_v35  ;;  %1754 = vmatmul.f32.gmra.mxu0 %v5045_v59  ;;  %v1787_v30 = vpop.f32.mrf.mxu2  ;;  %v1588_v35 = vpop.f32.mrf.mxu3  ;;  %v1580_v20 = vadd.f32 %v1579_v45, %v1515_v50 }
 0x2ce   : >> { %v1145_v50 = vpop.permute.xlu2 %1144 }
 0x2d2   : >> { %v1426_v41 = vpop.f32.mrf.mxu0 }
 0x2d3   : >> { %v4424_v29 = vadd.f32 %v1491_v48, %v1426_v41  ;;  %v1135_v41 = vpop.permute.xlu0 %1134 }
 0x2d5   : >> { %5046 = vst [vmem:[#allocation153_spill] sm:$0xff] %v4424_v29  ;;  %1757 = vmatmul.f32.gmra.mxu0 %v4968_v1  ;;  %v1790_v59 = vpop.f32.mrf.mxu2  ;;  %v1212_v29 = vadd.f32 %v1135_v41, %v4242_v10  ;;  %v1453_v1 = vadd.f32 %v4283_v7, %v4330_v46  ;;  %v1591_v56 = vpop.f32.mrf.mxu3  ;;  %v1456_v10 = vadd.f32 %v4297_v52, %v4340_v4 }
 0x2d6   : >> { %v1459_v52 = vadd.f32 %v4311_v0, %v4351_v53  ;;  %v1462_v0 = vadd.f32 %v4324_v11, %v4362_v6  ;;  %v1465_v11 = vadd.f32 %v4332_v34, %v4369_v37  ;;  %v1468_v34 = vadd.f32 %v4344_v8, %v4378_v25 }
 0x2d7   : >> { %v1228_v57 = vmax.f32 %v1212_v29, 0.0  ;;  %v1471_v8 = vadd.f32 %v4353_v62, %v4385_v17  ;;  %v1093_v17 = vadd.f32 %v4342_v9, %v4336_v19 }
 0x2da   : >> { %v1429_v33 = vpop.f32.mrf.mxu0 }
 0x2db   : >> { %v4427_v31 = vadd.f32 %v1494_v40, %v1429_v33  ;;  %v1526_v33 = vpop.f32.mrf.mxu1 }
 0x2dd   : >> { %5047 = vst [vmem:[#allocation154_spill] sm:$0xff] %v4427_v31  ;;  %1760 = vmatmul.f32.gmra.mxu0 %v5048_v44  ;;  %v1518_v31 = vadd.f32 %v1517_v23, %v1453_v1  ;;  %v1793_v63 = vpop.f32.mrf.mxu2  ;;  %v1521_v1 = vadd.f32 %v1520_v32, %v1456_v10 }
 0x2df   : >> { %v1583_v27 = vadd.f32 %v1582_v38, %v1518_v31  ;;  %v1586_v38 = vadd.f32 %v1585_v39, %v1521_v1 }
 0x2e2   : >> { %v1716_v22 = vpop.f32.mrf.mxu0 }
 0x2e3   : >> { %v1782_v48 = vadd.f32 %v1781_v43, %v1716_v22  ;;  %v1140_v22 = vpop.permute.xlu1 %1139  ;;  %v1529_v29 = vpop.f32.mrf.mxu1 }
 0x2e4   : >> { %v1213_v43 = vadd.f32 %v1140_v22, %v4254_v16 }
 0x2e5   : >> { %v1829_v40 = vadd.f32 %v1782_v48, %v1580_v20  ;;  %v1796_v16 = vpop.f32.mrf.mxu2  ;;  %v1214_v48 = vadd.f32 %v1145_v50, %v4266_v2 }
 0x2e7   : >> { %v1845_v13 = vadd.f32 %v1829_v40, %v1135_v41  ;;  %v1230_v41 = vmax.f32 %v1214_v48, 0.0 }
 0x2e9   : >> { %v1861_v3 = vmax.f32 %v1845_v13, 0.0  ;;  %v1229_v13 = vmax.f32 %v1213_v43, 0.0  ;;  %v1527_v43 = vadd.f32 %v1526_v33, %v1462_v0  ;;  %v1530_v33 = vadd.f32 %v1529_v29, %v1465_v11 }
 0x2ea   : >> { %v1719_v44 = vpop.f32.mrf.mxu0 }
 0x2eb   : >> { %v1877_v49 = vmax.f32 %v1228_v57, %v1861_v3  ;;  %v1785_v45 = vadd.f32 %v1784_v55, %v1719_v44  ;;  %v1594_v57 = vpop.f32.mrf.mxu3  ;;  %v1532_v39 = vpop.f32.mrf.mxu1 }
 0x2ed   : >> { %v1830_v7 = vadd.f32 %v1785_v45, %v1583_v27  ;;  %2409 = vmatmul.msk.f32.vlgmr.msrb.gmra.mxu1 %vm1893_vm1, %v1877_v49  ;;  %2425 = vmatmul.msk.f32.vlgmr.msrb.gmra.mxu3 %vm1893_vm1, %v1877_v49  ;;  %v1524_v49 = vadd.f32 %v1523_v24, %v1459_v52  ;;  %v1150_v45 = vpop.permute.xlu1 %1149  ;;  %v1799_v24 = vpop.f32.mrf.mxu2 }
 0x2ee   : >> { %v1215_v2 = vadd.f32 %v1150_v45, %v4280_v14 }
 0x2ef   : >> { %v1846_v20 = vadd.f32 %v1830_v7, %v1140_v22  ;;  %v1589_v44 = vadd.f32 %v1588_v35, %v1524_v49  ;;  %v1160_v49 = vpop.permute.xlu0 %1159 }
 0x2f0   : >> { %v1231_v7 = vmax.f32 %v1215_v2, 0.0 }
 0x2f1   : >> { %v1862_v46 = vmax.f32 %v1846_v20, 0.0  ;;  %v1592_v20 = vadd.f32 %v1591_v56, %v1527_v43 }
 0x2f2   : >> { %v1722_v23 = vpop.f32.mrf.mxu0 }
 0x2f3   : >> { %v1878_v55 = vmax.f32 %v1229_v13, %v1862_v46  ;;  %v1788_v31 = vadd.f32 %v1787_v30, %v1722_v23  ;;  %v1597_v53 = vpop.f32.mrf.mxu3  ;;  %v1155_v46 = vpop.permute.xlu2 %1154 }
 0x2f4   : >> { %v1535_v14 = vpop.f32.mrf.mxu1  ;;  %v1216_v23 = vadd.f32 %v1155_v46, %v4294_v18  ;;  %v1217_v18 = vadd.f32 %v1160_v49, %v4308_v54 }
 0x2f5   : >> { %v1831_v4 = vadd.f32 %v1788_v31, %v1586_v38  ;;  %2410 = vmatmul.msk.f32.gmra.mxu1 %vm1893_vm1, %v1878_v55  ;;  %2426 = vmatmul.msk.f32.gmra.mxu3 %vm1893_vm1, %v1878_v55  ;;  %v1802_v31 = vpop.f32.mrf.mxu2  ;;  %v1165_v54 = vpop.permute.xlu1 %1164 }
 0x2f6   : >> { %v1218_v2 = vadd.f32 %v1165_v54, %v4320_v51 }
 0x2f7   : >> { %v1847_v32 = vadd.f32 %v1831_v4, %v1145_v50  ;;  %v1232_v50 = vmax.f32 %v1216_v23, 0.0 }
 0x2f8   : >> { %v1234_v43 = vmax.f32 %v1218_v2, 0.0 }
 0x2f9   : >> { %v1863_v40 = vmax.f32 %v1847_v32, 0.0  ;;  %v1533_v32 = vadd.f32 %v1532_v39, %v1468_v34  ;;  %v1536_v39 = vadd.f32 %v1535_v14, %v1471_v8 }
 0x2fa   : >> { %v1725_v3 = vpop.f32.mrf.mxu0 }
 0x2fb   : >> { %v1879_v30 = vmax.f32 %v1230_v41, %v1863_v40  ;;  %v1791_v27 = vadd.f32 %v1790_v59, %v1725_v3  ;;  %v1600_v38 = vpop.f32.mrf.mxu3  ;;  %v1233_v40 = vmax.f32 %v1217_v18, 0.0 }
 0x2fc   : >> { %v1538_v29 = vpop.f32.mrf.mxu1 }
 0x2fd   : >> { %v1832_v22 = vadd.f32 %v1791_v27, %v1589_v44  ;;  %2411 = vmatmul.msk.f32.gmra.mxu1 %vm1893_vm1, %v1879_v30  ;;  %2427 = vmatmul.msk.f32.gmra.mxu3 %vm1893_vm1, %v1879_v30  ;;  %v1805_v30 = vpop.f32.mrf.mxu2  ;;  %v1539_v23 = vadd.f32 %v1538_v29, %v4394_v28 }
 0x2ff   : >> { %v1848_v10 = vadd.f32 %v1832_v22, %v1150_v45 }
 0x301   : >> { %v1864_v1 = vmax.f32 %v1848_v10, 0.0 }
 0x302   : >> { %v1728_v35 = vpop.f32.mrf.mxu0 }
 0x303   : >> { %v1880_v59 = vmax.f32 %v1231_v7, %v1864_v1  ;;  %v1794_v13 = vadd.f32 %v1793_v63, %v1728_v35  ;;  %v1595_v63 = vadd.f32 %v1594_v57, %v1530_v33  ;;  %v1603_v3 = vpop.f32.mrf.mxu3  ;;  %v1170_v7 = vpop.permute.xlu2 %1169  ;;  %v1601_v1 = vadd.f32 %v1600_v38, %v1536_v39 }
 0x304   : >> { %v1541_v22 = vpop.f32.mrf.mxu1  ;;  %v1175_v33 = vpop.permute.xlu0 %1174 }
 0x305   : >> { %v1833_v6 = vadd.f32 %v1794_v13, %v1592_v20  ;;  %2412 = vmatmul.msk.f32.gmra.mxu1 %vm1893_vm1, %v1880_v59  ;;  %2428 = vmatmul.msk.f32.gmra.mxu3 %vm1893_vm1, %v1880_v59  ;;  %v1808_v51 = vpop.f32.mrf.mxu2  ;;  %v1219_v59 = vadd.f32 %v1170_v7, %v4236_v15  ;;  %v5049_v13 = vld [vmem:[#allocation144_spill] sm:$0xff]  ;;  %v1542_v18 = vadd.f32 %v1541_v22, %v4403_v21 }
 0x307   : >> { %v1849_v55 = vadd.f32 %v1833_v6, %v1155_v46  ;;  %v5050_v46 = vld [vmem:[#allocation128_spill] sm:$0xff]  ;;  %v1235_v6 = vmax.f32 %v1219_v59, 0.0 }
 0x308   : >> { %v843_v14 = vadd.f32 %v5050_v46, %v5049_v13 }
 0x309   : >> { %v1865_v56 = vmax.f32 %v1849_v55, 0.0 }
 0x30a   : >> { %v1731_v48 = vpop.f32.mrf.mxu0  ;;  %v1124_v38 = vadd.f32 %v1093_v17, %v843_v14 }
 0x30b   : >> { %v1881_v52 = vmax.f32 %v1232_v50, %v1865_v56  ;;  %v1797_v4 = vadd.f32 %v1796_v16, %v1731_v48  ;;  %v1598_v16 = vadd.f32 %v1597_v53, %v1533_v32  ;;  %v1604_v50 = vadd.f32 %v1603_v3, %v1539_v23 }
 0x30c   : >> { %v1220_v9 = vadd.f32 %v1175_v33, %v1124_v38  ;;  %v1096_v48 = vadd.f32 %v4355_v61, %v4347_v60  ;;  %v1190_v17 = vpop.permute.xlu0 %1189  ;;  %v5057_v38 = vld [vmem:[#allocation130_spill] sm:$0xff] }
 0x30d   : >> { %v1834_v37 = vadd.f32 %v1797_v4, %v1595_v63  ;;  %2413 = vmatmul.msk.f32.gmra.mxu1 %vm1893_vm1, %v1881_v52  ;;  %2429 = vmatmul.msk.f32.gmra.mxu3 %vm1893_vm1, %v1881_v52  ;;  %v1811_v28 = vpop.f32.mrf.mxu2  ;;  %v5051_v4 = vld [vmem:[#allocation129_spill] sm:$0xff] }
 0x30f   : >> { %v1850_v41 = vadd.f32 %v1834_v37, %v1160_v49  ;;  %v846_v49 = vadd.f32 %v5051_v4, %v4141_v47  ;;  %v1236_v37 = vmax.f32 %v1220_v9, 0.0  ;;  %v5052_v47 = vld [vmem:[#allocation131_spill] sm:$0xff] }
 0x310   : >> { %v849_v21 = vadd.f32 %v5052_v47, %v4154_v5  ;;  %v5065_v47 = vld [vmem:[#allocation152_spill] sm:$0xff] }
 0x311   : >> { %v1866_v44 = vmax.f32 %v1850_v41, 0.0  ;;  %v1125_v29 = vadd.f32 %v1096_v48, %v846_v49  ;;  %v1180_v41 = vpop.permute.xlu1 %1179 }
 0x312   : >> { %v1734_v57 = vpop.f32.mrf.mxu0 }
 0x313   : >> { %v1882_v27 = vmax.f32 %v1233_v40, %v1866_v44  ;;  %v1800_v45 = vadd.f32 %v1799_v24, %v1734_v57  ;;  %v1606_v24 = vpop.f32.mrf.mxu3  ;;  %v1221_v57 = vadd.f32 %v1180_v41, %v1125_v29 }
 0x314   : >> { %v1607_v3 = vadd.f32 %v1606_v24, %v1542_v18 }
 0x315   : >> { %v1835_v25 = vadd.f32 %v1800_v45, %v1598_v16  ;;  %2414 = vmatmul.msk.f32.gmra.mxu1 %vm1893_vm1, %v1882_v27  ;;  %2430 = vmatmul.msk.f32.gmra.mxu3 %vm1893_vm1, %v1882_v27  ;;  %v1814_v2 = vpop.f32.mrf.mxu2  ;;  %v1237_v8 = vmax.f32 %v1221_v57, 0.0  ;;  %v5063_v57 = vld [vmem:[#allocation147_spill] sm:$0xff] }
 0x317   : >> { %v1851_v0 = vadd.f32 %v1835_v25, %v1165_v54 }
 0x319   : >> { %v1867_v10 = vmax.f32 %v1851_v0, 0.0  ;;  %v1185_v0 = vpop.permute.xlu2 %1184  ;;  %v1195_v49 = vpop.permute.xlu1 %1194 }
 0x31a   : >> { %v1737_v53 = vpop.f32.mrf.mxu0 }
 0x31b   : >> { %v1883_v35 = vmax.f32 %v1234_v43, %v1867_v10  ;;  %v1803_v20 = vadd.f32 %v1802_v31, %v1737_v53  ;;  %v1544_v31 = vpop.f32.mrf.mxu1  ;;  %v1609_v63 = vpop.f32.mrf.mxu3 }
 0x31c   : >> { %v1545_v27 = vadd.f32 %v1544_v31, %v4408_v58  ;;  %v5053_v58 = vld [vmem:[#allocation145_spill] sm:$0xff] }
 0x31d   : >> { %v1836_v62 = vadd.f32 %v1803_v20, %v1601_v1  ;;  %2415 = vmatmul.msk.f32.gmra.mxu1 %vm1893_vm1, %v1883_v35  ;;  %2431 = vmatmul.msk.f32.gmra.mxu3 %vm1893_vm1, %v1883_v35  ;;  %v5054_v1 = vld [vmem:[#allocation133_spill] sm:$0xff]  ;;  %v5055_v35 = vld [vmem:[#allocation150_spill] sm:$0xff]  ;;  %v1817_v23 = vpop.f32.mrf.mxu2 }
 0x31e   : >> { %v1610_v43 = vadd.f32 %v1609_v63, %v1545_v27  ;;  %v852_v24 = vadd.f32 %v5054_v1, %v5053_v58  ;;  %v5068_v1 = vld [vmem:[#allocation148_spill] sm:$0xff] }
 0x31f   : >> { %v1852_v11 = vadd.f32 %v1836_v62, %v1170_v7  ;;  %v1102_v7 = vadd.f32 %v4376_v12, %v4371_v36 }
 0x321   : >> { %v1868_v55 = vmax.f32 %v1852_v11, 0.0  ;;  %v1127_v62 = vadd.f32 %v1102_v7, %v852_v24  ;;  %v5069_v24 = vld [vmem:[#allocation140_spill] sm:$0xff] }
 0x322   : >> { %v1740_v15 = vpop.f32.mrf.mxu0 }
 0x323   : >> { %v1884_v56 = vmax.f32 %v1235_v6, %v1868_v55  ;;  %v1806_v19 = vadd.f32 %v1805_v30, %v1740_v15  ;;  %v1547_v44 = vpop.f32.mrf.mxu1  ;;  %v1099_v30 = vadd.f32 %v4365_v26, %v4360_v42  ;;  %v1612_v45 = vpop.f32.mrf.mxu3  ;;  %v1223_v6 = vadd.f32 %v1190_v17, %v1127_v62  ;;  %v5058_v15 = vld [vmem:[#allocation146_spill] sm:$0xff] }
 0x324   : >> { %v1548_v20 = vadd.f32 %v1547_v44, %v5055_v35  ;;  %v861_v35 = vadd.f32 %v5069_v24, %v5068_v1 }
 0x325   : >> { %v1837_v52 = vadd.f32 %v1806_v19, %v1604_v50  ;;  %2416 = vmatmul.msk.f32.gmra.mxu1 %vm1893_vm1, %v1884_v56  ;;  %2432 = vmatmul.msk.f32.gmra.mxu3 %vm1893_vm1, %v1884_v56  ;;  %v1126_v25 = vadd.f32 %v1099_v30, %v849_v21  ;;  %v5059_v50 = vld [vmem:[#allocation135_spill] sm:$0xff]  ;;  %v5064_v30 = vld [vmem:[#allocation138_spill] sm:$0xff] }
 0x326   : >> { %v1613_v36 = vadd.f32 %v1612_v45, %v1548_v20  ;;  %v855_v56 = vadd.f32 %v5059_v50, %v5058_v15  ;;  %v5060_v19 = vld [vmem:[#allocation151_spill] sm:$0xff]  ;;  %v5070_v20 = vld [vmem:[#allocation153_spill] sm:$0xff]  ;;  %v5074_v50 = vld [vmem:[#allocation142_spill] sm:$0xff] }
 0x327   : >> { %v1853_v34 = vadd.f32 %v1837_v52, %v1175_v33  ;;  %v1222_v10 = vadd.f32 %v1185_v0, %v1126_v25  ;;  %v5056_v33 = vld [vmem:[#allocation137_spill] sm:$0xff]  ;;  %v1239_v52 = vmax.f32 %v1223_v6, 0.0 }
 0x328   : >> { %v1105_v55 = vadd.f32 %v5057_v38, %v5056_v33  ;;  %v5071_v33 = vld [vmem:[#allocation143_spill] sm:$0xff]  ;;  %v5072_v38 = vld [vmem:[#allocation136_spill] sm:$0xff]  ;;  %v5073_v15 = vld [vmem:[#allocation149_spill] sm:$0xff] }
 0x329   : >> { %v1869_v32 = vmax.f32 %v1853_v34, 0.0  ;;  %v1238_v59 = vmax.f32 %v1222_v10, 0.0  ;;  %v5067_v10 = vld [vmem:[#allocation134_spill] sm:$0xff] }
 0x32a   : >> { %v1743_v40 = vpop.f32.mrf.mxu0 }
 0x32b   : >> { %v1885_v60 = vmax.f32 %v1236_v37, %v1869_v32  ;;  %v1809_v61 = vadd.f32 %v1808_v51, %v1743_v40  ;;  %v1550_v5 = vpop.f32.mrf.mxu1  ;;  %v1615_v13 = vpop.f32.mrf.mxu3 }
 0x32c   : >> { %v1551_v9 = vadd.f32 %v1550_v5, %v5060_v19  ;;  %v5075_v19 = vld [vmem:[#allocation154_spill] sm:$0xff] }
 0x32d   : >> { %v1838_v16 = vadd.f32 %v1809_v61, %v1607_v3  ;;  %2417 = vmatmul.msk.f32.gmra.mxu1 %vm1893_vm1, %v1885_v60  ;;  %2433 = vmatmul.msk.f32.gmra.mxu3 %vm1893_vm1, %v1885_v60  ;;  %v5061_v3 = vld [vmem:[#allocation139_spill] sm:$0xff]  ;;  %v5062_v60 = vld [vmem:[#allocation132_spill] sm:$0xff] }
 0x32e   : >> { %v1616_v34 = vadd.f32 %v1615_v13, %v1551_v9  ;;  %v1108_v61 = vadd.f32 %v5062_v60, %v5061_v3 }
 0x32f   : >> { %v1854_v54 = vadd.f32 %v1838_v16, %v1180_v41  ;;  %v1820_v41 = vpop.f32.mrf.mxu2  ;;  %v858_v16 = vadd.f32 %v5064_v30, %v5063_v57 }
 0x331   : >> { %v1870_v39 = vmax.f32 %v1854_v54, 0.0  ;;  %v1200_v54 = vpop.permute.xlu2 %1199 }
 0x332   : >> { %v1746_v22 = vpop.f32.mrf.mxu0 }
 0x333   : >> { %v1886_v42 = vmax.f32 %v1237_v8, %v1870_v39  ;;  %v1812_v26 = vadd.f32 %v1811_v28, %v1746_v22  ;;  %v1553_v63 = vpop.f32.mrf.mxu1  ;;  %v1128_v28 = vadd.f32 %v1105_v55, %v855_v56  ;;  %v1618_v32 = vpop.f32.mrf.mxu3  ;;  %v1114_v55 = vadd.f32 %v5072_v38, %v5071_v33 }
 0x334   : >> { %v1554_v21 = vadd.f32 %v1553_v63, %v5065_v47  ;;  %v864_v56 = vadd.f32 %v5074_v50, %v5073_v15 }
 0x335   : >> { %v1839_v53 = vadd.f32 %v1812_v26, %v1610_v43  ;;  %2418 = vmatmul.msk.f32.gmra.mxu1 %vm1893_vm1, %v1886_v42  ;;  %2434 = vmatmul.msk.f32.gmra.mxu3 %vm1893_vm1, %v1886_v42  ;;  %v1224_v40 = vadd.f32 %v1195_v49, %v1128_v28  ;;  %v5066_v26 = vld [vmem:[#allocation141_spill] sm:$0xff] }
 0x336   : >> { %v1111_v7 = vadd.f32 %v5067_v10, %v5066_v26 }
 0x337   : >> { %v1855_v51 = vadd.f32 %v1839_v53, %v1185_v0  ;;  %v1240_v45 = vmax.f32 %v1224_v40, 0.0  ;;  %v1619_v0 = vadd.f32 %v1618_v32, %v1554_v21  ;;  %v1823_v58 = vpop.f32.mrf.mxu2 }
 0x338   : >> { %v1130_v62 = vadd.f32 %v1111_v7, %v861_v35 }
 0x339   : >> { %v1871_v46 = vmax.f32 %v1855_v51, 0.0 }
 0x33a   : >> { %v1749_v14 = vpop.f32.mrf.mxu0 }
 0x33b   : >> { %v1887_v12 = vmax.f32 %v1238_v59, %v1871_v46  ;;  %v1815_v11 = vadd.f32 %v1814_v2, %v1749_v14  ;;  %v1129_v2 = vadd.f32 %v1108_v61, %v858_v16  ;;  %v1556_v25 = vpop.f32.mrf.mxu1  ;;  %v1621_v5 = vpop.f32.mrf.mxu3 }
 0x33c   : >> { %v1557_v51 = vadd.f32 %v1556_v25, %v5070_v20  ;;  %v1205_v46 = vpop.permute.xlu0 %1204 }
 0x33d   : >> { %v1840_v31 = vadd.f32 %v1815_v11, %v1613_v36  ;;  %2419 = vmatmul.msk.f32.gmra.mxu1 %vm1893_vm1, %v1887_v12  ;;  %2435 = vmatmul.msk.f32.gmra.mxu3 %vm1893_vm1, %v1887_v12  ;;  %v1225_v42 = vadd.f32 %v1200_v54, %v1129_v2  ;;  %v1226_v6 = vadd.f32 %v1205_v46, %v1130_v62 }
 0x33f   : >> { %v1856_v48 = vadd.f32 %v1840_v31, %v1190_v17  ;;  %v1241_v17 = vmax.f32 %v1225_v42, 0.0  ;;  %v1242_v28 = vmax.f32 %v1226_v6, 0.0 }
 0x341   : >> { %v1872_v4 = vmax.f32 %v1856_v48, 0.0 }
 0x342   : >> { %v1752_v18 = vpop.f32.mrf.mxu0 }
 0x343   : >> { %v1888_v37 = vmax.f32 %v1239_v52, %v1872_v4  ;;  %v1818_v29 = vadd.f32 %v1817_v23, %v1752_v18  ;;  %v1622_v23 = vadd.f32 %v1621_v5, %v1557_v51  ;;  %v1559_v11 = vpop.f32.mrf.mxu1  ;;  %v1624_v63 = vpop.f32.mrf.mxu3  ;;  %v1131_v4 = vadd.f32 %v1114_v55, %v864_v56 }
 0x344   : >> { %v1560_v9 = vadd.f32 %v1559_v11, %v5075_v19  ;;  %v1826_v52 = vpop.f32.mrf.mxu2  ;;  %v1210_v18 = vpop.permute.xlu1 %1209 }
 0x345   : >> { %v1841_v44 = vadd.f32 %v1818_v29, %v1616_v34  ;;  %2420 = vmatmul.msk.f32.gmra.mxu1 %vm1893_vm1, %v1888_v37  ;;  %2436 = vmatmul.msk.f32.gmra.mxu3 %vm1893_vm1, %v1888_v37 }
 0x346   : >> { %v1625_v37 = vadd.f32 %v1624_v63, %v1560_v9 }
 0x347   : >> { %v1857_v27 = vadd.f32 %v1841_v44, %v1195_v49 }
 0x349   : >> { %v1873_v8 = vmax.f32 %v1857_v27, 0.0 }
 0x34a   : >> { %v1755_v39 = vpop.f32.mrf.mxu0 }
 0x34b   : >> { %v1889_v22 = vmax.f32 %v1240_v45, %v1873_v8  ;;  %v1821_v43 = vadd.f32 %v1820_v41, %v1755_v39  ;;  %v1227_v41 = vadd.f32 %v1210_v18, %v1131_v4 }
 0x34d   : >> { %v1842_v53 = vadd.f32 %v1821_v43, %v1619_v0  ;;  %2421 = vmatmul.msk.f32.gmra.mxu1 %vm1893_vm1, %v1889_v22  ;;  %2437 = vmatmul.msk.f32.gmra.mxu3 %vm1893_vm1, %v1889_v22  ;;  %v1243_v60 = vmax.f32 %v1227_v41, 0.0 }
 0x34f   : >> { %v1858_v59 = vadd.f32 %v1842_v53, %v1200_v54 }
 0x351   : >> { %v1874_v13 = vmax.f32 %v1858_v59, 0.0 }
 0x352   : >> { %v1758_v14 = vpop.f32.mrf.mxu0 }
 0x353   : >> { %v1890_v36 = vmax.f32 %v1241_v17, %v1874_v13  ;;  %v1824_v12 = vadd.f32 %v1823_v58, %v1758_v14 }
 0x355   : >> { %v1843_v31 = vadd.f32 %v1824_v12, %v1622_v23  ;;  %2422 = vmatmul.msk.f32.gmra.mxu1 %vm1893_vm1, %v1890_v36  ;;  %2438 = vmatmul.msk.f32.gmra.mxu3 %vm1893_vm1, %v1890_v36 }
 0x357   : >> { %v1859_v48 = vadd.f32 %v1843_v31, %v1205_v46 }
 0x359   : >> { %v1875_v49 = vmax.f32 %v1859_v48, 0.0 }
 0x35a   : >> { %v1761_v34 = vpop.f32.mrf.mxu0 }
 0x35b   : >> { %v1891_v29 = vmax.f32 %v1242_v28, %v1875_v49  ;;  %v1827_v32 = vadd.f32 %v1826_v52, %v1761_v34 }
 0x35d   : >> { %v1844_v40 = vadd.f32 %v1827_v32, %v1625_v37  ;;  %2423 = vmatmul.msk.f32.gmra.mxu1 %vm1893_vm1, %v1891_v29  ;;  %2439 = vmatmul.msk.f32.gmra.mxu3 %vm1893_vm1, %v1891_v29 }
 0x35f   : >> { %v1860_v3 = vadd.f32 %v1844_v40, %v1210_v18 }
 0x361   : >> { %v1876_v61 = vmax.f32 %v1860_v3, 0.0 }
 0x363   : >> { %v1892_v44 = vmax.f32 %v1243_v60, %v1876_v61 }
 0x365   : >> { %2424 = vmatmul.msk.f32.gmra.mxu1 %vm1893_vm1, %v1892_v44  ;;  %2440 = vmatmul.msk.f32.gmra.mxu3 %vm1893_vm1, %v1892_v44 }
 0x36a   : >> { %v1959_v57 = vpop.f32.mrf.mxu1 }
 0x370   : >> { %v2024_v30 = vpop.f32.mrf.mxu3 }
 0x371   : >> { %v2072_v16 = vmax.f32 %v1959_v57, %v2024_v30 }
 0x372   : >> { %v1962_v47 = vpop.f32.mrf.mxu1 }
 0x373   : >> { %2091 = vst.msk [vmem:[%s4528_s15] sm:$0xff] %vm2090_vm2, %v2072_v16 }
 0x378   : >> { %v2027_v21 = vpop.f32.mrf.mxu3 }
 0x379   : >> { %v2073_v27 = vmax.f32 %v1962_v47, %v2027_v21 }
 0x37a   : >> { %v1965_v45 = vpop.f32.mrf.mxu1 }
 0x37b   : >> { %2092 = vst.msk [vmem:[%s4528_s15 + $0x8] sm:$0xff] %vm2090_vm2, %v2073_v27 }
 0x380   : >> { %v2030_v54 = vpop.f32.mrf.mxu3 }
 0x381   : >> { %v2074_v2 = vmax.f32 %v1965_v45, %v2030_v54 }
 0x382   : >> { %v1968_v8 = vpop.f32.mrf.mxu1 }
 0x383   : >> { %2093 = vst.msk [vmem:[%s4528_s15 + $0x10] sm:$0xff] %vm2090_vm2, %v2074_v2 }
 0x388   : >> { %v2033_v25 = vpop.f32.mrf.mxu3 }
 0x389   : >> { %v2075_v39 = vmax.f32 %v1968_v8, %v2033_v25 }
 0x38a   : >> { %v1971_v0 = vpop.f32.mrf.mxu1 }
 0x38b   : >> { %2094 = vst.msk [vmem:[%s4528_s15 + $0x18] sm:$0xff] %vm2090_vm2, %v2075_v39 }
 0x390   : >> { %v2036_v22 = vpop.f32.mrf.mxu3 }
 0x391   : >> { %v2076_v43 = vmax.f32 %v1971_v0, %v2036_v22 }
 0x392   : >> { %v1974_v42 = vpop.f32.mrf.mxu1 }
 0x393   : >> { %2095 = vst.msk [vmem:[%s4528_s15 + $0x20] sm:$0xff] %vm2090_vm2, %v2076_v43 }
 0x398   : >> { %v2039_v26 = vpop.f32.mrf.mxu3 }
 0x399   : >> { %v2077_v10 = vmax.f32 %v1974_v42, %v2039_v26 }
 0x39a   : >> { %v1977_v7 = vpop.f32.mrf.mxu1 }
 0x39b   : >> { %2096 = vst.msk [vmem:[%s4528_s15 + $0x28] sm:$0xff] %vm2090_vm2, %v2077_v10 }
 0x3a0   : >> { %v2042_v53 = vpop.f32.mrf.mxu3 }
 0x3a1   : >> { %v2078_v5 = vmax.f32 %v1977_v7, %v2042_v53 }
 0x3a2   : >> { %v1980_v58 = vpop.f32.mrf.mxu1 }
 0x3a3   : >> { %2097 = vst.msk [vmem:[%s4528_s15 + $0x30] sm:$0xff] %vm2090_vm2, %v2078_v5 }
 0x3a8   : >> { %v2045_v1 = vpop.f32.mrf.mxu3 }
 0x3a9   : >> { %v2079_v24 = vmax.f32 %v1980_v58, %v2045_v1 }
 0x3aa   : >> { %v1983_v35 = vpop.f32.mrf.mxu1 }
 0x3ab   : >> { %2098 = vst.msk [vmem:[%s4528_s15 + $0x38] sm:$0xff] %vm2090_vm2, %v2079_v24 }
 0x3b0   : >> { %v2048_v20 = vpop.f32.mrf.mxu3 }
 0x3b1   : >> { %v2080_v51 = vmax.f32 %v1983_v35, %v2048_v20 }
 0x3b2   : >> { %v1986_v59 = vpop.f32.mrf.mxu1 }
 0x3b3   : >> { %2099 = vst.msk [vmem:[%s4528_s15 + $0x40] sm:$0xff] %vm2090_vm2, %v2080_v51 }
 0x3b8   : >> { %v2051_v17 = vpop.f32.mrf.mxu3 }
 0x3b9   : >> { %v2081_v62 = vmax.f32 %v1986_v59, %v2051_v17 }
 0x3ba   : >> { %v1989_v13 = vpop.f32.mrf.mxu1 }
 0x3bb   : >> { %2100 = vst.msk [vmem:[%s4528_s15 + $0x48] sm:$0xff] %vm2090_vm2, %v2081_v62 }
 0x3c0   : >> { %v2054_v46 = vpop.f32.mrf.mxu3 }
 0x3c1   : >> { %v2082_v14 = vmax.f32 %v1989_v13, %v2054_v46 }
 0x3c2   : >> { %v1992_v23 = vpop.f32.mrf.mxu1 }
 0x3c3   : >> { %2101 = vst.msk [vmem:[%s4528_s15 + $0x50] sm:$0xff] %vm2090_vm2, %v2082_v14 }
 0x3c8   : >> { %v2057_v36 = vpop.f32.mrf.mxu3 }
 0x3c9   : >> { %v2083_v12 = vmax.f32 %v1992_v23, %v2057_v36 }
 0x3ca   : >> { %v1995_v11 = vpop.f32.mrf.mxu1 }
 0x3cb   : >> { %2102 = vst.msk [vmem:[%s4528_s15 + $0x58] sm:$0xff] %vm2090_vm2, %v2083_v12 }
 0x3d0   : >> { %v2060_v6 = vpop.f32.mrf.mxu3 }
 0x3d1   : >> { %v2084_v33 = vmax.f32 %v1995_v11, %v2060_v6 }
 0x3d2   : >> { %v1998_v38 = vpop.f32.mrf.mxu1 }
 0x3d3   : >> { %2103 = vst.msk [vmem:[%s4528_s15 + $0x60] sm:$0xff] %vm2090_vm2, %v2084_v33 }
 0x3d8   : >> { %v2063_v55 = vpop.f32.mrf.mxu3 }
 0x3d9   : >> { %v2085_v31 = vmax.f32 %v1998_v38, %v2063_v55 }
 0x3da   : >> { %v2001_v15 = vpop.f32.mrf.mxu1 }
 0x3db   : >> { %2104 = vst.msk [vmem:[%s4528_s15 + $0x68] sm:$0xff] %vm2090_vm2, %v2085_v31 }
 0x3e0   : >> { %v2066_v50 = vpop.f32.mrf.mxu3 }
 0x3e1   : >> { %v2086_v56 = vmax.f32 %v2001_v15, %v2066_v50 }
 0x3e2   : >> { %v2004_v19 = vpop.f32.mrf.mxu1 }
 0x3e3   : >> { %2105 = vst.msk [vmem:[%s4528_s15 + $0x70] sm:$0xff] %vm2090_vm2, %v2086_v56 }
 0x3e7   : > { %383 = sbr.rel (!%p381_p7) target bundleno = 141 (0x8d), region = 82 }
 0x3e8   : >> { %v2069_v9 = vpop.f32.mrf.mxu3 }
 0x3e9   : >> { %v2087_v48 = vmax.f32 %v2004_v19, %v2069_v9 }
 0x3eb   : >> { %2106 = vst.msk [vmem:[%s4528_s15 + $0x78] sm:$0xff] %vm2090_vm2, %v2087_v48 }
 0x3ec PF: > { %s15_s22 = sadd.s32 1, %s2799_s22   ;;  %s5076_s18 = smov %s2791_s20 }
 0x3ed   : > { %p12_p8 = scmp.ge.s32.totalorder %s15_s22, 6   ;;  %s5077_s19 = smov %s2795_s21 }
 0x3ee   : > { %s5078_s20 = smov %s5081_s23  ;;  %s5079_s21 = smov %s5085_s24 }
 0x3ef   :  { %14 = sbr.rel (!%p12_p8) target bundleno = 3 (0x3), region = 93 }

// kernel: cnn_forward.8
= control target key start
LH: loop header
LB: loop body
LE: loop exit
PB: predicated region body
PF: predicated region fallthrough
CT: control target
= control target key end

     0   :  { %8 = vsyncpa [#allocation4], 0  ;;  %s3861_s0 = inlined_call_operand.vmem [shape: f32[2,100352], index: 0, kind: input, shape index: {}]   ;;  %s3862_s1 = inlined_call_operand.hbm [shape: f32[100352,512], index: 1, kind: input, shape index: {}]   ;;  %s3863_s2 = inlined_call_operand.vmem [shape: f32[1,512], index: 2, kind: input, shape index: {}]   ;;  %s3864_s3 = inlined_call_operand.vmem [shape: f32[2,512], index: 3, kind: output, shape index: {}]  }
   0x1   :  { %10 = vsyncpa [#allocation4 + $0x1], 0  ;;  %s2704_s12 = smov 0   ;;  %s2706_s13 = smov 0  }
   0x2   :  { %s2708_s14 = smov 0   ;;  %s2710_s15 = smov 0  }
   0x3   :  { %s2712_s16 = smov 0   ;;  %s2714_s17 = smov 0  }
   0x4   :  { %s2716_s18 = smov 0   ;;  %s2718_s19 = smov 0  }
   0x5 LB: > { %s2480_s20 = sadd.s32 4294967295, %s2678_s19   ;;  %s25_s21 = sadd.s32 1, %s2670_s17  ;;  %s2678_s19 = sphi %s2718_s19, %s16_s19   ;;  %s2674_s18 = sphi %s2716_s18, %s3876_s18   ;;  %s2670_s17 = sphi %s2714_s17, %s3875_s17   ;;  %s2666_s16 = sphi %s2712_s16, %s3874_s16   ;;  %s2662_s15 = sphi %s2710_s15, %s3873_s15   ;;  %s2658_s14 = sphi %s2708_s14, %s3872_s14   ;;  %s2654_s13 = sphi %s2706_s13, %s3871_s13   ;;  %s2650_s12 = sphi %s2704_s12, %s3870_s12  }
   0x6   : > { %p26_p0 = scmp.ge.s32.totalorder %s25_s21, 28  ;;  %s28_s22 = sadd.s32 1, %s2674_s18 }
   0x7   : > { %s63_s23 = sadd.s32 1, %s2658_s14  ;;  %p70_p1 = scmp.ne.s32.totalorder %s2658_s14, %s2654_s13 }
   0x8   : > { %s3878_s21 = smov (%p26_p0, %s25_s21), 0  ;;  %s3880_s22 = smov (!%p26_p0, %s28_s22), %s2674_s18 }
   0x9   : > { %s58_s24 = ssub.s32 %s2670_s17, %s3878_s21  ;;  %p71_p2 = scmp.eq.s32.totalorder %s2678_s19, 0 }
   0xa   : > { %p30_p3 = scmp.ge.s32.totalorder %s3880_s22, 2  ;;  %p76_p4 = scmp.ne.s32.totalorder %s2654_s13, %s2650_s12 }
   0xb   : > { %p2755_p5 = por %p71_p2, %p70_p1  ;;  %p77_p6 = scmp.eq.s32.totalorder %s2480_s20, 0 }
   0xc   : > { %s3882_s22 = smov (%p30_p3, %s3880_s22), 0  ;;  %p2505_p8 = scmp.lt.s32.totalorder %s2678_s19, 56 }
   0xd   : > { %3867 = sst [smem:[#allocation6_spill]] %s3882_s22  ;;  %p2761_p7 = por %p77_p6, %p76_p4 }
   0xe   : > { %s59_s27 = ssub.s32 %s2674_s18, %s3882_s22  ;;  %s161_s29 = sand.u32 1, %s2658_s14  }
   0xf   : > { %s60_s28 = sor.u32 %s59_s27, %s58_s24  ;;  %s2497_s30 = smul.u32 7168, %s161_s29 }
  0x10   : > { %p61_p9 = scmp.eq.s32.totalorder %s60_s28, 0  ;;  %s2484_s4 = sshll.u32 %s2674_s18, 1 }
  0x11   : > { %s2496_s6 = smul.u32 1792, %s2670_s17  ;;  %s165_s7 = scalar_lea.vmem [#allocation3], %s2497_s30 }
  0x12   : > { %s2771_s5 = scalar_select %p61_p9, %s2658_s14, %s63_s23  }
  0x13   : > { %s176_s8 = sshll.u32 %s165_s7, 4  ;;  %p2502_p10 = pnand %p2505_p8, %p2755_p5  ;;  %s177_s8 = int_to_ptr.vmem [resolvable:$true] %s176_s8 }
  0x14   : > { %s171_s9 = sadd.s32 %s2496_s6, %s2484_s4  ;;  %s162_s27 = scalar_lea.sflag [#allocation4], %s161_s29 }
  0x15   : > { %s2486_s10 = sshll.u32 %s171_s9, 3  ;;  %s2680_s28 = smov 512  }
  0x16   : > { %s173_s20 = scalar_lea.hbm %s3862_s1, %s2486_s10  ;;  %s2681_s23 = smov 256  }
  0x17   : > { %s174_s24 = sshll.u32 %s173_s20, 4  ;;  %s2682_s22 = smov 16   ;;  %s175_s24 = int_to_ptr.hbm [resolvable:$true] %s174_s24 }
  0x18   : > { %2504 = dma.hbm_to_vmem [thread:$0]  (!%p2502_p10), %s175_s24, 114688, %s177_s8, %s162_s27, %s2680_s28, %s2681_s23, %s2682_s22  }
  0x19   : > { %p2487_p11 = scmp.ge.s32.totalorder %s2678_s19, 1  ;;  %p192_p12 = scmp.lt.s32.totalorder %s2678_s19, 57 }
  0x1b   : > { %p193_p13 = pnand %p2487_p11, %p192_p12 }
  0x1c   : > { %s198_s25 = sand.u32 (!%p193_p13), 1, %s2654_s13  }
  0x1d   : > { %196 = sbr.rel (%p193_p13) target bundleno = 677 (0x2a5), region = 32  ;;  %s199_s4 = scalar_lea.sflag (!%p193_p13), [#allocation4], %s198_s25 }
  0x1e   : > { %s2498_s30 = smul.u32 (!%p193_p13), 7168, %s198_s25 }
  0x20   : > { %s2782_s6 = scalar_lea.vmem (!%p193_p13), [#allocation3], %s2498_s30 }
  0x22   : > { %2645 = dma.done.wait (%p2761_p7), %s199_s4, 114688  }
  0x23   : > { %2647 = vsyncadd (%p2761_p7), %s199_s4, 4294852608  ;;  %s235_s29 = smul.u32 28, %s2662_s15  ;;  %s2489_s22 = sshll.u32 %s2666_s16, 1 }
  0x24   : > { %p244_p0 = scmp.lt.s32.totalorder %s2489_s22, 3  ;;  %p2492_p2 = scmp.ne.s32.totalorder %s2662_s15, 0 }
  0x25   : > { %p236_p1 = scmp.lt.s32.totalorder %s235_s29, 783 }
  0x26   : > { %s3884_s22 = smov (!%p244_p0, %s2489_s22), 3  ;;  %257 = sbr.rel (%p2492_p2) target bundleno = 45 (0x2d), region = 40 }
  0x27   : > { %s3886_s29 = smov (!%p236_p1, %s235_s29), 783  ;;  %s246_s9 = scalar_lea.vmem %s3863_s2, %s3884_s22 }
  0x28   : > { %s2491_s10 = sshll.u32 %s3884_s22, 1  ;;  %s2488_s11 = sshll.u32 %s3886_s29, 1 }
  0x29   : > { %s2800_s20 = scalar_lea.vmem %s3864_s3, %s2491_s10  ;;  %s2805_s27 = scalar_lea.vmem %s3861_s0, %s2488_s11 }
  0x2b   : > { %v2683_v0 = vmov 0.0  }
  0x2c   : > { %258 = vst [vmem:[#allocation2] sm:$0xf] %v2683_v0 }
  0x2d PF: > { %v297_v1 = vld [vmem:[%s2782_s6 + $0xf0] sm:$0xff]  ;;  %v295_v3 = vld [vmem:[%s2782_s6 + $0xe0] sm:$0xff]  ;;  %vm2357_vm0 = vcmask 1041408   ;;  %p2493_p3 = scmp.ne.s32.totalorder %s2662_s15, 27 }
  0x2e   : > { %v361_v2 = vld [vmem:[%s2782_s6 + $0x2f0] sm:$0xff]  ;;  %1234 = vmatpush.msra.mxu0 %v297_v1  ;;  %v359_v5 = vld [vmem:[%s2782_s6 + $0x2e0] sm:$0xff] }
  0x2f   : > { %1274 = vmatpush.msra.mxu2 %v361_v2  ;;  %v329_v4 = vld [vmem:[%s2782_s6 + $0x1f0] sm:$0xff]  ;;  %v327_v8 = vld [vmem:[%s2782_s6 + $0x1e0] sm:$0xff] }
  0x30   : > { %v393_v6 = vld [vmem:[%s2782_s6 + $0x3f0] sm:$0xff]  ;;  %1254 = vmatpush.msra.mxu1 %v329_v4  ;;  %1235 = vmatpush.msra.mxu0 %v295_v3  ;;  %v391_v10 = vld [vmem:[%s2782_s6 + $0x3e0] sm:$0xff] }
  0x31   : > { %1294 = vmatpush.msra.mxu3 %v393_v6  ;;  %v293_v7 = vld [vmem:[%s2782_s6 + $0xd0] sm:$0xff]  ;;  %1275 = vmatpush.msra.mxu2 %v359_v5  ;;  %v291_v12 = vld [vmem:[%s2782_s6 + $0xc0] sm:$0xff] }
  0x32   : > { %v357_v9 = vld [vmem:[%s2782_s6 + $0x2d0] sm:$0xff]  ;;  %1255 = vmatpush.msra.mxu1 %v327_v8  ;;  %v355_v13 = vld [vmem:[%s2782_s6 + $0x2c0] sm:$0xff]  ;;  %1236 = vmatpush.msra.mxu0 %v293_v7 }
  0x33   : > { %v325_v11 = vld [vmem:[%s2782_s6 + $0x1d0] sm:$0xff]  ;;  %1295 = vmatpush.msra.mxu3 %v391_v10  ;;  %1276 = vmatpush.msra.mxu2 %v357_v9  ;;  %v323_v15 = vld [vmem:[%s2782_s6 + $0x1c0] sm:$0xff] }
  0x34   : > { %v389_v14 = vld [vmem:[%s2782_s6 + $0x3d0] sm:$0xff]  ;;  %v387_v16 = vld [vmem:[%s2782_s6 + $0x3c0] sm:$0xff]  ;;  %1256 = vmatpush.msra.mxu1 %v325_v11  ;;  %1237 = vmatpush.msra.mxu0 %v291_v12 }
  0x35   : > { %1296 = vmatpush.msra.mxu3 %v389_v14  ;;  %v289_v17 = vld [vmem:[%s2782_s6 + $0xb0] sm:$0xff]  ;;  %1277 = vmatpush.msra.mxu2 %v355_v13  ;;  %v287_v21 = vld [vmem:[%s2782_s6 + $0xa0] sm:$0xff] }
  0x36   : > { %v353_v18 = vld [vmem:[%s2782_s6 + $0x2b0] sm:$0xff]  ;;  %1257 = vmatpush.msra.mxu1 %v323_v15  ;;  %v351_v22 = vld [vmem:[%s2782_s6 + $0x2a0] sm:$0xff]  ;;  %1238 = vmatpush.msra.mxu0 %v289_v17 }
  0x37   : > { %v321_v19 = vld [vmem:[%s2782_s6 + $0x1b0] sm:$0xff]  ;;  %1297 = vmatpush.msra.mxu3 %v387_v16  ;;  %1278 = vmatpush.msra.mxu2 %v353_v18  ;;  %v319_v23 = vld [vmem:[%s2782_s6 + $0x1a0] sm:$0xff] }
  0x38   : > { %v385_v20 = vld [vmem:[%s2782_s6 + $0x3b0] sm:$0xff]  ;;  %v383_v24 = vld [vmem:[%s2782_s6 + $0x3a0] sm:$0xff]  ;;  %1258 = vmatpush.msra.mxu1 %v321_v19  ;;  %1239 = vmatpush.msra.mxu0 %v287_v21 }
  0x39   : > { %1298 = vmatpush.msra.mxu3 %v385_v20  ;;  %v285_v25 = vld [vmem:[%s2782_s6 + $0x90] sm:$0xff]  ;;  %1279 = vmatpush.msra.mxu2 %v351_v22  ;;  %v283_v29 = vld [vmem:[%s2782_s6 + $0x80] sm:$0xff] }
  0x3a   : > { %v349_v26 = vld [vmem:[%s2782_s6 + $0x290] sm:$0xff]  ;;  %1259 = vmatpush.msra.mxu1 %v319_v23  ;;  %v347_v30 = vld [vmem:[%s2782_s6 + $0x280] sm:$0xff]  ;;  %1240 = vmatpush.msra.mxu0 %v285_v25 }
  0x3b   : > { %v317_v27 = vld [vmem:[%s2782_s6 + $0x190] sm:$0xff]  ;;  %1299 = vmatpush.msra.mxu3 %v383_v24  ;;  %1280 = vmatpush.msra.mxu2 %v349_v26  ;;  %v315_v31 = vld [vmem:[%s2782_s6 + $0x180] sm:$0xff] }
  0x3c   : > { %v381_v28 = vld [vmem:[%s2782_s6 + $0x390] sm:$0xff]  ;;  %v379_v32 = vld [vmem:[%s2782_s6 + $0x380] sm:$0xff]  ;;  %1260 = vmatpush.msra.mxu1 %v317_v27  ;;  %1241 = vmatpush.msra.mxu0 %v283_v29 }
  0x3d   : > { %1300 = vmatpush.msra.mxu3 %v381_v28  ;;  %v281_v33 = vld [vmem:[%s2782_s6 + $0x70] sm:$0xff]  ;;  %1281 = vmatpush.msra.mxu2 %v347_v30  ;;  %v279_v37 = vld [vmem:[%s2782_s6 + $0x60] sm:$0xff] }
  0x3e   : > { %v345_v34 = vld [vmem:[%s2782_s6 + $0x270] sm:$0xff]  ;;  %1261 = vmatpush.msra.mxu1 %v315_v31  ;;  %v343_v38 = vld [vmem:[%s2782_s6 + $0x260] sm:$0xff]  ;;  %1242 = vmatpush.msra.mxu0 %v281_v33 }
  0x3f   : > { %v313_v35 = vld [vmem:[%s2782_s6 + $0x170] sm:$0xff]  ;;  %1301 = vmatpush.msra.mxu3 %v379_v32  ;;  %1282 = vmatpush.msra.mxu2 %v345_v34  ;;  %v311_v39 = vld [vmem:[%s2782_s6 + $0x160] sm:$0xff] }
  0x40   : > { %v377_v36 = vld [vmem:[%s2782_s6 + $0x370] sm:$0xff]  ;;  %v375_v40 = vld [vmem:[%s2782_s6 + $0x360] sm:$0xff]  ;;  %1262 = vmatpush.msra.mxu1 %v313_v35  ;;  %1243 = vmatpush.msra.mxu0 %v279_v37 }
  0x41   : > { %1302 = vmatpush.msra.mxu3 %v377_v36  ;;  %v277_v41 = vld [vmem:[%s2782_s6 + $0x50] sm:$0xff]  ;;  %1283 = vmatpush.msra.mxu2 %v343_v38  ;;  %v275_v45 = vld [vmem:[%s2782_s6 + $0x40] sm:$0xff] }
  0x42   : > { %v341_v42 = vld [vmem:[%s2782_s6 + $0x250] sm:$0xff]  ;;  %1263 = vmatpush.msra.mxu1 %v311_v39  ;;  %v339_v46 = vld [vmem:[%s2782_s6 + $0x240] sm:$0xff]  ;;  %1244 = vmatpush.msra.mxu0 %v277_v41 }
  0x43   : > { %v309_v43 = vld [vmem:[%s2782_s6 + $0x150] sm:$0xff]  ;;  %1303 = vmatpush.msra.mxu3 %v375_v40  ;;  %1284 = vmatpush.msra.mxu2 %v341_v42  ;;  %v307_v47 = vld [vmem:[%s2782_s6 + $0x140] sm:$0xff] }
  0x44   : > { %v373_v44 = vld [vmem:[%s2782_s6 + $0x350] sm:$0xff]  ;;  %v371_v48 = vld [vmem:[%s2782_s6 + $0x340] sm:$0xff]  ;;  %1264 = vmatpush.msra.mxu1 %v309_v43  ;;  %1245 = vmatpush.msra.mxu0 %v275_v45 }
  0x45   : > { %1304 = vmatpush.msra.mxu3 %v373_v44  ;;  %v273_v49 = vld [vmem:[%s2782_s6 + $0x30] sm:$0xff]  ;;  %1285 = vmatpush.msra.mxu2 %v339_v46  ;;  %v271_v53 = vld [vmem:[%s2782_s6 + $0x20] sm:$0xff] }
  0x46   : > { %v337_v50 = vld [vmem:[%s2782_s6 + $0x230] sm:$0xff]  ;;  %1265 = vmatpush.msra.mxu1 %v307_v47  ;;  %v335_v54 = vld [vmem:[%s2782_s6 + $0x220] sm:$0xff]  ;;  %1246 = vmatpush.msra.mxu0 %v273_v49 }
  0x47   : > { %v305_v51 = vld [vmem:[%s2782_s6 + $0x130] sm:$0xff]  ;;  %1305 = vmatpush.msra.mxu3 %v371_v48  ;;  %1286 = vmatpush.msra.mxu2 %v337_v50  ;;  %v303_v55 = vld [vmem:[%s2782_s6 + $0x120] sm:$0xff] }
  0x48   : > { %v369_v52 = vld [vmem:[%s2782_s6 + $0x330] sm:$0xff]  ;;  %v367_v56 = vld [vmem:[%s2782_s6 + $0x320] sm:$0xff]  ;;  %1266 = vmatpush.msra.mxu1 %v305_v51  ;;  %1247 = vmatpush.msra.mxu0 %v271_v53 }
  0x49   : > { %1306 = vmatpush.msra.mxu3 %v369_v52  ;;  %v269_v57 = vld [vmem:[%s2782_s6 + $0x10] sm:$0xff]  ;;  %1287 = vmatpush.msra.mxu2 %v335_v54  ;;  %v267_v61 = vld [vmem:[%s2782_s6] sm:$0xff] }
  0x4a   : > { %v333_v58 = vld [vmem:[%s2782_s6 + $0x210] sm:$0xff]  ;;  %1267 = vmatpush.msra.mxu1 %v303_v55  ;;  %v331_v62 = vld [vmem:[%s2782_s6 + $0x200] sm:$0xff]  ;;  %1248 = vmatpush.msra.mxu0 %v269_v57 }
  0x4b   : > { %v301_v59 = vld [vmem:[%s2782_s6 + $0x110] sm:$0xff]  ;;  %1307 = vmatpush.msra.mxu3 %v367_v56  ;;  %1288 = vmatpush.msra.mxu2 %v333_v58  ;;  %v299_v1 = vld [vmem:[%s2782_s6 + $0x100] sm:$0xff] }
  0x4c   : > { %v365_v60 = vld [vmem:[%s2782_s6 + $0x310] sm:$0xff]  ;;  %1268 = vmatpush.msra.mxu1 %v301_v59  ;;  %v363_v2 = vld [vmem:[%s2782_s6 + $0x300] sm:$0xff]  ;;  %1249 = vmatpush.msra.mxu0 %v267_v61 }
  0x4d   : > { %v425_v63 = vld [vmem:[%s2782_s6 + $0x4f0] sm:$0xff]  ;;  %1308 = vmatpush.msra.mxu3 %v365_v60  ;;  %1289 = vmatpush.msra.mxu2 %v331_v62  ;;  %v423_v3 = vld [vmem:[%s2782_s6 + $0x4e0] sm:$0xff] }
  0x4e   : > { %v489_v0 = vld [vmem:[%s2782_s6 + $0x6f0] sm:$0xff]  ;;  %1314 = vmatpush.msrb.mxu0 %v425_v63  ;;  %v487_v5 = vld [vmem:[%s2782_s6 + $0x6e0] sm:$0xff]  ;;  %1269 = vmatpush.msra.mxu1 %v299_v1 }
  0x4f   : > { %v457_v4 = vld [vmem:[%s2782_s6 + $0x5f0] sm:$0xff]  ;;  %1354 = vmatpush.msrb.mxu2 %v489_v0  ;;  %1309 = vmatpush.msra.mxu3 %v363_v2  ;;  %v455_v8 = vld [vmem:[%s2782_s6 + $0x5e0] sm:$0xff] }
  0x50   : > { %v521_v6 = vld [vmem:[%s2782_s6 + $0x7f0] sm:$0xff]  ;;  %1315 = vmatpush.msrb.mxu0 %v423_v3  ;;  %1334 = vmatpush.msrb.mxu1 %v457_v4  ;;  %v519_v10 = vld [vmem:[%s2782_s6 + $0x7e0] sm:$0xff] }
  0x51   : > { %v421_v7 = vld [vmem:[%s2782_s6 + $0x4d0] sm:$0xff]  ;;  %1355 = vmatpush.msrb.mxu2 %v487_v5  ;;  %1374 = vmatpush.msrb.mxu3 %v521_v6  ;;  %v419_v11 = vld [vmem:[%s2782_s6 + $0x4c0] sm:$0xff] }
  0x52   : > { %v485_v9 = vld [vmem:[%s2782_s6 + $0x6d0] sm:$0xff]  ;;  %1316 = vmatpush.msrb.mxu0 %v421_v7  ;;  %1335 = vmatpush.msrb.mxu1 %v455_v8  ;;  %v483_v13 = vld [vmem:[%s2782_s6 + $0x6c0] sm:$0xff] }
  0x53   : > { %v453_v12 = vld [vmem:[%s2782_s6 + $0x5d0] sm:$0xff]  ;;  %1356 = vmatpush.msrb.mxu2 %v485_v9  ;;  %1375 = vmatpush.msrb.mxu3 %v519_v10  ;;  %v451_v16 = vld [vmem:[%s2782_s6 + $0x5c0] sm:$0xff] }
  0x54   : > { %v517_v14 = vld [vmem:[%s2782_s6 + $0x7d0] sm:$0xff]  ;;  %1317 = vmatpush.msrb.mxu0 %v419_v11  ;;  %1336 = vmatpush.msrb.mxu1 %v453_v12  ;;  %v515_v18 = vld [vmem:[%s2782_s6 + $0x7c0] sm:$0xff] }
  0x55   : > { %v417_v15 = vld [vmem:[%s2782_s6 + $0x4b0] sm:$0xff]  ;;  %1357 = vmatpush.msrb.mxu2 %v483_v13  ;;  %1376 = vmatpush.msrb.mxu3 %v517_v14  ;;  %v415_v19 = vld [vmem:[%s2782_s6 + $0x4a0] sm:$0xff] }
  0x56   : > { %v481_v17 = vld [vmem:[%s2782_s6 + $0x6b0] sm:$0xff]  ;;  %1318 = vmatpush.msrb.mxu0 %v417_v15  ;;  %1337 = vmatpush.msrb.mxu1 %v451_v16  ;;  %v479_v21 = vld [vmem:[%s2782_s6 + $0x6a0] sm:$0xff] }
  0x57   : > { %v449_v20 = vld [vmem:[%s2782_s6 + $0x5b0] sm:$0xff]  ;;  %1358 = vmatpush.msrb.mxu2 %v481_v17  ;;  %1377 = vmatpush.msrb.mxu3 %v515_v18  ;;  %v447_v25 = vld [vmem:[%s2782_s6 + $0x5a0] sm:$0xff] }
  0x58   : > { %v513_v22 = vld [vmem:[%s2782_s6 + $0x7b0] sm:$0xff]  ;;  %1319 = vmatpush.msrb.mxu0 %v415_v19  ;;  %1338 = vmatpush.msrb.mxu1 %v449_v20  ;;  %v511_v27 = vld [vmem:[%s2782_s6 + $0x7a0] sm:$0xff] }
  0x59   : > { %v260_v23 = vld [vmem:[%s2805_s27] sm:$0xff]  ;;  %v411_v28 = vld [vmem:[%s2782_s6 + $0x480] sm:$0xff]  ;;  %1359 = vmatpush.msrb.mxu2 %v479_v21  ;;  %1378 = vmatpush.msrb.mxu3 %v513_v22  ;;  %v263_v60 = vld [vmem:[%s2805_s27 + $0x18] sm:$0xff] }
  0x5a   : > { %v413_v24 = vld [vmem:[%s2782_s6 + $0x490] sm:$0xff]  ;;  %1170 = vst [vmem:[#allocation1] ss:$4 sm:$0xff] %v260_v23  ;;  %v475_v30 = vld [vmem:[%s2782_s6 + $0x680] sm:$0xff]  ;;  %1339 = vmatpush.msrb.mxu1 %v447_v25 }
  0x5b   : > { %v477_v26 = vld [vmem:[%s2782_s6 + $0x690] sm:$0xff]  ;;  %1320 = vmatpush.msrb.mxu0 %v413_v24  ;;  %v443_v33 = vld [vmem:[%s2782_s6 + $0x580] sm:$0xff]  ;;  %1379 = vmatpush.msrb.mxu3 %v511_v27 }
  0x5c   : > { %v445_v29 = vld [vmem:[%s2782_s6 + $0x590] sm:$0xff]  ;;  %1360 = vmatpush.msrb.mxu2 %v477_v26  ;;  %v507_v35 = vld [vmem:[%s2782_s6 + $0x780] sm:$0xff] }
  0x5d   : > { %v509_v31 = vld [vmem:[%s2782_s6 + $0x790] sm:$0xff]  ;;  %v407_v36 = vld [vmem:[%s2782_s6 + $0x460] sm:$0xff]  ;;  %1321 = vmatpush.msrb.mxu0 %v411_v28  ;;  %1340 = vmatpush.msrb.mxu1 %v445_v29 }
  0x5e   : > { %v409_v32 = vld [vmem:[%s2782_s6 + $0x470] sm:$0xff]  ;;  %v471_v38 = vld [vmem:[%s2782_s6 + $0x660] sm:$0xff]  ;;  %1361 = vmatpush.msrb.mxu2 %v475_v30  ;;  %1380 = vmatpush.msrb.mxu3 %v509_v31 }
  0x5f   : > { %v473_v34 = vld [vmem:[%s2782_s6 + $0x670] sm:$0xff]  ;;  %v261_v40 = vld [vmem:[%s2805_s27 + $0x8] sm:$0xff]  ;;  %v262_v43 = vld [vmem:[%s2805_s27 + $0x10] sm:$0xff]  ;;  %1322 = vmatpush.msrb.mxu0 %v409_v32  ;;  %1341 = vmatpush.msrb.mxu1 %v443_v33 }
  0x60   : > { %v441_v37 = vld [vmem:[%s2782_s6 + $0x570] sm:$0xff]  ;;  %v439_v42 = vld [vmem:[%s2782_s6 + $0x560] sm:$0xff]  ;;  %1172 = vst [vmem:[#allocation1 + $0x20] ss:$4 sm:$0xff] %v261_v40  ;;  %1362 = vmatpush.msrb.mxu2 %v473_v34  ;;  %1381 = vmatpush.msrb.mxu3 %v507_v35 }
  0x61   : > { %v505_v39 = vld [vmem:[%s2782_s6 + $0x770] sm:$0xff]  ;;  %v2916_v45 = vld.sshfl [vmem:[#allocation1 + $0x10] sm:$0xff pattern:$0x73625140]  ;;  %1323 = vmatpush.msrb.mxu0 %v407_v36  ;;  %1342 = vmatpush.msrb.mxu1 %v441_v37 }
  0x62   : > { %v405_v41 = vld [vmem:[%s2782_s6 + $0x450] sm:$0xff]  ;;  %v2922_v48 = vld.sshfl [vmem:[#allocation1 + $0x8] sm:$0xff pattern:$0x73625140]  ;;  %1363 = vmatpush.msrb.mxu2 %v471_v38  ;;  %1382 = vmatpush.msrb.mxu3 %v505_v39 }
  0x63   : > { %v469_v44 = vld [vmem:[%s2782_s6 + $0x650] sm:$0xff]  ;;  %v503_v49 = vld [vmem:[%s2782_s6 + $0x760] sm:$0xff]  ;;  %1324 = vmatpush.msrb.mxu0 %v405_v41  ;;  %1343 = vmatpush.msrb.mxu1 %v439_v42 }
  0x64   : > { %v2918_v46 = vld.sshfl [vmem:[#allocation1] sm:$0xff pattern:$0x73625140]  ;;  %v2920_v47 = vld.sshfl [vmem:[#allocation1 + $0x18] sm:$0xff pattern:$0x73625140]  ;;  %1364 = vmatpush.msrb.mxu2 %v469_v44  ;;  %1383 = vmatpush.msrb.mxu3 %v503_v49 }
  0x65   : > { %v403_v50 = vld [vmem:[%s2782_s6 + $0x440] sm:$0xff]  ;;  %v437_v51 = vld [vmem:[%s2782_s6 + $0x550] sm:$0xff]  ;;  %1181 = vst [vmem:[#allocation1] ss:$4 sm:$0xff] %v262_v43  ;;  %1290 = vmatmul.f32.vlgmr.msra.gmra.mxu2 %v2916_v45  ;;  %1250 = vmatmul.f32.vlgmr.msra.gmra.mxu0 %v2918_v46 }
  0x66   : > { %v467_v52 = vld [vmem:[%s2782_s6 + $0x640] sm:$0xff]  ;;  %v501_v53 = vld [vmem:[%s2782_s6 + $0x750] sm:$0xff]  ;;  %1325 = vmatpush.msrb.mxu0 %v403_v50  ;;  %1344 = vmatpush.msrb.mxu1 %v437_v51 }
  0x67   : > { %v401_v54 = vld [vmem:[%s2782_s6 + $0x430] sm:$0xff]  ;;  %v435_v55 = vld [vmem:[%s2782_s6 + $0x540] sm:$0xff]  ;;  %1365 = vmatpush.msrb.mxu2 %v467_v52  ;;  %1384 = vmatpush.msrb.mxu3 %v501_v53 }
  0x68   : > { %v465_v56 = vld [vmem:[%s2782_s6 + $0x630] sm:$0xff]  ;;  %v499_v57 = vld [vmem:[%s2782_s6 + $0x740] sm:$0xff]  ;;  %1326 = vmatpush.msrb.mxu0 %v401_v54  ;;  %1345 = vmatpush.msrb.mxu1 %v435_v55 }
  0x69   : > { %v399_v58 = vld [vmem:[%s2782_s6 + $0x420] sm:$0xff]  ;;  %v433_v59 = vld [vmem:[%s2782_s6 + $0x530] sm:$0xff]  ;;  %1366 = vmatpush.msrb.mxu2 %v465_v56  ;;  %1385 = vmatpush.msrb.mxu3 %v499_v57 }
  0x6a   : > { %v2936_v61 = vld.sshfl [vmem:[#allocation1 + $0x30] sm:$0xff pattern:$0x73625140]  ;;  %v2938_v62 = vld.sshfl [vmem:[#allocation1 + $0x20] sm:$0xff pattern:$0x73625140]  ;;  %1327 = vmatpush.msrb.mxu0 %v399_v58  ;;  %1346 = vmatpush.msrb.mxu1 %v433_v59 }
  0x6b   : > { %v2940_v63 = vld.sshfl [vmem:[#allocation1 + $0x38] sm:$0xff pattern:$0x73625140]  ;;  %v2942_v0 = vld.sshfl [vmem:[#allocation1 + $0x28] sm:$0xff pattern:$0x73625140]  ;;  %1310 = vmatmul.f32.vlgmr.msra.gmra.mxu3 %v2920_v47  ;;  %1270 = vmatmul.f32.vlgmr.msra.gmra.mxu1 %v2922_v48 }
  0x6c   : > { %v463_v1 = vld [vmem:[%s2782_s6 + $0x620] sm:$0xff]  ;;  %v497_v2 = vld [vmem:[%s2782_s6 + $0x730] sm:$0xff]  ;;  %1182 = vst [vmem:[#allocation1 + $0x20] ss:$4 sm:$0xff] %v263_v60 }
  0x6d   : > { %v397_v3 = vld [vmem:[%s2782_s6 + $0x410] sm:$0xff]  ;;  %v431_v4 = vld [vmem:[%s2782_s6 + $0x520] sm:$0xff]  ;;  %1367 = vmatpush.msrb.mxu2 %v463_v1  ;;  %1386 = vmatpush.msrb.mxu3 %v497_v2 }
  0x6e   : > { %v461_v5 = vld [vmem:[%s2782_s6 + $0x610] sm:$0xff]  ;;  %v495_v6 = vld [vmem:[%s2782_s6 + $0x720] sm:$0xff]  ;;  %1328 = vmatpush.msrb.mxu0 %v397_v3  ;;  %1347 = vmatpush.msrb.mxu1 %v431_v4 }
  0x6f   : > { %v395_v7 = vld [vmem:[%s2782_s6 + $0x400] sm:$0xff]  ;;  %v429_v8 = vld [vmem:[%s2782_s6 + $0x510] sm:$0xff]  ;;  %1368 = vmatpush.msrb.mxu2 %v461_v5  ;;  %1387 = vmatpush.msrb.mxu3 %v495_v6 }
  0x70   : > { %v459_v9 = vld [vmem:[%s2782_s6 + $0x600] sm:$0xff]  ;;  %v493_v10 = vld [vmem:[%s2782_s6 + $0x710] sm:$0xff]  ;;  %1329 = vmatpush.msrb.mxu0 %v395_v7  ;;  %1348 = vmatpush.msrb.mxu1 %v429_v8 }
  0x71   : > { %v553_v11 = vld [vmem:[%s2782_s6 + $0x8f0] sm:$0xff]  ;;  %1369 = vmatpush.msrb.mxu2 %v459_v9  ;;  %v427_v13 = vld [vmem:[%s2782_s6 + $0x500] sm:$0xff]  ;;  %1388 = vmatpush.msrb.mxu3 %v493_v10 }
  0x72   : > { %v617_v12 = vld [vmem:[%s2782_s6 + $0xaf0] sm:$0xff]  ;;  %v491_v14 = vld [vmem:[%s2782_s6 + $0x700] sm:$0xff]  ;;  %1394 = vmatpush.msra.mxu0 %v553_v11  ;;  %1349 = vmatpush.msrb.mxu1 %v427_v13 }
  0x73   : > { %v551_v15 = vld [vmem:[%s2782_s6 + $0x8e0] sm:$0xff]  ;;  %v585_v16 = vld [vmem:[%s2782_s6 + $0x9f0] sm:$0xff]  ;;  %1434 = vmatpush.msra.mxu2 %v617_v12  ;;  %1389 = vmatpush.msrb.mxu3 %v491_v14 }
  0x74   : > { %v615_v17 = vld [vmem:[%s2782_s6 + $0xae0] sm:$0xff]  ;;  %v649_v18 = vld [vmem:[%s2782_s6 + $0xbf0] sm:$0xff]  ;;  %1395 = vmatpush.msra.mxu0 %v551_v15  ;;  %1414 = vmatpush.msra.mxu1 %v585_v16 }
  0x75   : > { %v549_v19 = vld [vmem:[%s2782_s6 + $0x8d0] sm:$0xff]  ;;  %v583_v20 = vld [vmem:[%s2782_s6 + $0x9e0] sm:$0xff]  ;;  %1435 = vmatpush.msra.mxu2 %v615_v17  ;;  %1454 = vmatpush.msra.mxu3 %v649_v18 }
  0x76   : > { %v613_v21 = vld [vmem:[%s2782_s6 + $0xad0] sm:$0xff]  ;;  %v647_v22 = vld [vmem:[%s2782_s6 + $0xbe0] sm:$0xff]  ;;  %1396 = vmatpush.msra.mxu0 %v549_v19  ;;  %1415 = vmatpush.msra.mxu1 %v583_v20 }
  0x77   : > { %v547_v23 = vld [vmem:[%s2782_s6 + $0x8c0] sm:$0xff]  ;;  %v581_v24 = vld [vmem:[%s2782_s6 + $0x9d0] sm:$0xff]  ;;  %1436 = vmatpush.msra.mxu2 %v613_v21  ;;  %1455 = vmatpush.msra.mxu3 %v647_v22 }
  0x78   : > { %v611_v25 = vld [vmem:[%s2782_s6 + $0xac0] sm:$0xff]  ;;  %v2973_v26 = vld.sshfl [vmem:[#allocation1] sm:$0xff pattern:$0x73625140]  ;;  %1370 = vmatmul.f32.vlgmr.msrb.gmra.mxu2 %v2936_v61  ;;  %1397 = vmatpush.msra.mxu0 %v547_v23 }
  0x79   : > { %v2975_v27 = vld.sshfl [vmem:[#allocation1 + $0x10] sm:$0xff pattern:$0x73625140]  ;;  %v2977_v28 = vld.sshfl [vmem:[#allocation1 + $0x8] sm:$0xff pattern:$0x73625140]  ;;  %1416 = vmatpush.msra.mxu1 %v581_v24  ;;  %1437 = vmatpush.msra.mxu2 %v611_v25 }
  0x7a   : > { %v645_v29 = vld [vmem:[%s2782_s6 + $0xbd0] sm:$0xff]  ;;  %v579_v33 = vld [vmem:[%s2782_s6 + $0x9c0] sm:$0xff]  ;;  %1330 = vmatmul.f32.vlgmr.msrb.gmra.mxu0 %v2938_v62  ;;  %1390 = vmatmul.f32.vlgmr.msrb.gmra.mxu3 %v2940_v63 }
  0x7b   : > { %v264_v30 = vld [vmem:[%s2805_s27 + $0x20] sm:$0xff]  ;;  %v2981_v31 = vld.sshfl [vmem:[#allocation1 + $0x18] sm:$0xff pattern:$0x73625140]  ;;  %1456 = vmatpush.msra.mxu3 %v645_v29  ;;  %v643_v35 = vld [vmem:[%s2782_s6 + $0xbc0] sm:$0xff]  ;;  %1417 = vmatpush.msra.mxu1 %v579_v33 }
  0x7c   : > { %v545_v32 = vld [vmem:[%s2782_s6 + $0x8b0] sm:$0xff]  ;;  %1191 = vst [vmem:[#allocation1] ss:$4 sm:$0xff] %v264_v30  ;;  %v543_v36 = vld [vmem:[%s2782_s6 + $0x8a0] sm:$0xff]  ;;  %1350 = vmatmul.f32.vlgmr.msrb.gmra.mxu1 %v2942_v0 }
  0x7d   : > { %v609_v34 = vld [vmem:[%s2782_s6 + $0xab0] sm:$0xff]  ;;  %1398 = vmatpush.msra.mxu0 %v545_v32  ;;  %v607_v38 = vld [vmem:[%s2782_s6 + $0xaa0] sm:$0xff]  ;;  %1457 = vmatpush.msra.mxu3 %v643_v35 }
  0x7e   : > { %v577_v37 = vld [vmem:[%s2782_s6 + $0x9b0] sm:$0xff]  ;;  %1438 = vmatpush.msra.mxu2 %v609_v34  ;;  %v575_v41 = vld [vmem:[%s2782_s6 + $0x9a0] sm:$0xff] }
  0x7f   : > { %v641_v39 = vld [vmem:[%s2782_s6 + $0xbb0] sm:$0xff]  ;;  %1399 = vmatpush.msra.mxu0 %v543_v36  ;;  %1418 = vmatpush.msra.mxu1 %v577_v37  ;;  %v639_v43 = vld [vmem:[%s2782_s6 + $0xba0] sm:$0xff] }
  0x80   : > { %v541_v40 = vld [vmem:[%s2782_s6 + $0x890] sm:$0xff]  ;;  %1439 = vmatpush.msra.mxu2 %v607_v38  ;;  %1458 = vmatpush.msra.mxu3 %v641_v39  ;;  %v539_v44 = vld [vmem:[%s2782_s6 + $0x880] sm:$0xff] }
  0x81   : > { %v605_v42 = vld [vmem:[%s2782_s6 + $0xa90] sm:$0xff]  ;;  %1400 = vmatpush.msra.mxu0 %v541_v40  ;;  %1419 = vmatpush.msra.mxu1 %v575_v41  ;;  %v603_v50 = vld [vmem:[%s2782_s6 + $0xa80] sm:$0xff] }
  0x82   : > { %v573_v49 = vld [vmem:[%s2782_s6 + $0x990] sm:$0xff]  ;;  %1440 = vmatpush.msra.mxu2 %v605_v42  ;;  %1459 = vmatpush.msra.mxu3 %v639_v43  ;;  %v571_v53 = vld [vmem:[%s2782_s6 + $0x980] sm:$0xff] }
  0x83   : > { %v637_v51 = vld [vmem:[%s2782_s6 + $0xb90] sm:$0xff]  ;;  %1401 = vmatpush.msra.mxu0 %v539_v44  ;;  %1420 = vmatpush.msra.mxu1 %v573_v49  ;;  %v635_v55 = vld [vmem:[%s2782_s6 + $0xb80] sm:$0xff] }
  0x84   : > { %v537_v52 = vld [vmem:[%s2782_s6 + $0x870] sm:$0xff]  ;;  %1441 = vmatpush.msra.mxu2 %v603_v50  ;;  %1460 = vmatpush.msra.mxu3 %v637_v51  ;;  %v535_v56 = vld [vmem:[%s2782_s6 + $0x860] sm:$0xff] }
  0x85   : > { %v601_v54 = vld [vmem:[%s2782_s6 + $0xa70] sm:$0xff]  ;;  %1402 = vmatpush.msra.mxu0 %v537_v52  ;;  %1421 = vmatpush.msra.mxu1 %v571_v53  ;;  %v599_v58 = vld [vmem:[%s2782_s6 + $0xa60] sm:$0xff] }
  0x86   : > { %v569_v57 = vld [vmem:[%s2782_s6 + $0x970] sm:$0xff]  ;;  %1442 = vmatpush.msra.mxu2 %v601_v54  ;;  %1461 = vmatpush.msra.mxu3 %v635_v55  ;;  %v567_v1 = vld [vmem:[%s2782_s6 + $0x960] sm:$0xff] }
  0x87   : > { %v633_v59 = vld [vmem:[%s2782_s6 + $0xb70] sm:$0xff]  ;;  %1403 = vmatpush.msra.mxu0 %v535_v56  ;;  %1422 = vmatpush.msra.mxu1 %v569_v57  ;;  %v631_v3 = vld [vmem:[%s2782_s6 + $0xb60] sm:$0xff] }
  0x88   : > { %v533_v60 = vld [vmem:[%s2782_s6 + $0x850] sm:$0xff]  ;;  %1443 = vmatpush.msra.mxu2 %v599_v58  ;;  %1462 = vmatpush.msra.mxu3 %v633_v59  ;;  %v531_v4 = vld [vmem:[%s2782_s6 + $0x840] sm:$0xff] }
  0x89   : > { %v597_v2 = vld [vmem:[%s2782_s6 + $0xa50] sm:$0xff]  ;;  %1404 = vmatpush.msra.mxu0 %v533_v60  ;;  %1423 = vmatpush.msra.mxu1 %v567_v1  ;;  %v595_v6 = vld [vmem:[%s2782_s6 + $0xa40] sm:$0xff] }
  0x8a   : > { %v565_v5 = vld [vmem:[%s2782_s6 + $0x950] sm:$0xff]  ;;  %1444 = vmatpush.msra.mxu2 %v597_v2  ;;  %1463 = vmatpush.msra.mxu3 %v631_v3  ;;  %v563_v9 = vld [vmem:[%s2782_s6 + $0x940] sm:$0xff] }
  0x8b   : > { %v629_v7 = vld [vmem:[%s2782_s6 + $0xb50] sm:$0xff]  ;;  %1405 = vmatpush.msra.mxu0 %v531_v4  ;;  %1424 = vmatpush.msra.mxu1 %v565_v5  ;;  %v627_v11 = vld [vmem:[%s2782_s6 + $0xb40] sm:$0xff] }
  0x8c   : > { %v529_v8 = vld [vmem:[%s2782_s6 + $0x830] sm:$0xff]  ;;  %1445 = vmatpush.msra.mxu2 %v595_v6  ;;  %1464 = vmatpush.msra.mxu3 %v629_v7  ;;  %v527_v12 = vld [vmem:[%s2782_s6 + $0x820] sm:$0xff] }
  0x8d   : > { %v593_v10 = vld [vmem:[%s2782_s6 + $0xa30] sm:$0xff]  ;;  %1406 = vmatpush.msra.mxu0 %v529_v8  ;;  %1425 = vmatpush.msra.mxu1 %v563_v9  ;;  %v591_v14 = vld [vmem:[%s2782_s6 + $0xa20] sm:$0xff] }
  0x8e   : > { %v561_v13 = vld [vmem:[%s2782_s6 + $0x930] sm:$0xff]  ;;  %1446 = vmatpush.msra.mxu2 %v593_v10  ;;  %1465 = vmatpush.msra.mxu3 %v627_v11  ;;  %v559_v17 = vld [vmem:[%s2782_s6 + $0x920] sm:$0xff] }
  0x8f   : > { %v625_v15 = vld [vmem:[%s2782_s6 + $0xb30] sm:$0xff]  ;;  %1407 = vmatpush.msra.mxu0 %v527_v12  ;;  %1426 = vmatpush.msra.mxu1 %v561_v13  ;;  %v623_v19 = vld [vmem:[%s2782_s6 + $0xb20] sm:$0xff] }
  0x90   : > { %v525_v16 = vld [vmem:[%s2782_s6 + $0x810] sm:$0xff]  ;;  %1447 = vmatpush.msra.mxu2 %v591_v14  ;;  %1466 = vmatpush.msra.mxu3 %v625_v15  ;;  %v523_v20 = vld [vmem:[%s2782_s6 + $0x800] sm:$0xff] }
  0x91   : > { %v589_v18 = vld [vmem:[%s2782_s6 + $0xa10] sm:$0xff]  ;;  %1408 = vmatpush.msra.mxu0 %v525_v16  ;;  %1427 = vmatpush.msra.mxu1 %v559_v17  ;;  %v587_v22 = vld [vmem:[%s2782_s6 + $0xa00] sm:$0xff] }
  0x92   : > { %v557_v21 = vld [vmem:[%s2782_s6 + $0x910] sm:$0xff]  ;;  %1448 = vmatpush.msra.mxu2 %v589_v18  ;;  %1467 = vmatpush.msra.mxu3 %v623_v19  ;;  %v555_v29 = vld [vmem:[%s2782_s6 + $0x900] sm:$0xff] }
  0x93   : > { %v621_v23 = vld [vmem:[%s2782_s6 + $0xb10] sm:$0xff]  ;;  %1409 = vmatpush.msra.mxu0 %v523_v20  ;;  %1428 = vmatpush.msra.mxu1 %v557_v21  ;;  %v619_v30 = vld [vmem:[%s2782_s6 + $0xb00] sm:$0xff] }
  0x94   : > { %v681_v24 = vld [vmem:[%s2782_s6 + $0xcf0] sm:$0xff]  ;;  %1449 = vmatpush.msra.mxu2 %v587_v22  ;;  %1468 = vmatpush.msra.mxu3 %v621_v23  ;;  %v679_v32 = vld [vmem:[%s2782_s6 + $0xce0] sm:$0xff] }
  0x95   : > { %v745_v25 = vld [vmem:[%s2782_s6 + $0xef0] sm:$0xff]  ;;  %1410 = vmatmul.f32.vlgmr.msra.gmra.mxu0 %v2973_v26  ;;  %1450 = vmatmul.f32.vlgmr.msra.gmra.mxu2 %v2975_v27  ;;  %v743_v34 = vld [vmem:[%s2782_s6 + $0xee0] sm:$0xff] }
  0x96   : > { %1474 = vmatpush.msrb.mxu0 %v681_v24  ;;  %1514 = vmatpush.msrb.mxu2 %v745_v25  ;;  %v713_v33 = vld [vmem:[%s2782_s6 + $0xdf0] sm:$0xff]  ;;  %v711_v37 = vld [vmem:[%s2782_s6 + $0xde0] sm:$0xff] }
  0x97   : > { %v777_v35 = vld [vmem:[%s2782_s6 + $0xff0] sm:$0xff]  ;;  %1429 = vmatpush.msra.mxu1 %v555_v29  ;;  %1469 = vmatpush.msra.mxu3 %v619_v30  ;;  %v775_v39 = vld [vmem:[%s2782_s6 + $0xfe0] sm:$0xff] }
  0x98   : > { %v677_v36 = vld [vmem:[%s2782_s6 + $0xcd0] sm:$0xff]  ;;  %1430 = vmatmul.f32.vlgmr.msra.gmra.mxu1 %v2977_v28  ;;  %1470 = vmatmul.f32.vlgmr.msra.gmra.mxu3 %v2981_v31  ;;  %v675_v40 = vld [vmem:[%s2782_s6 + $0xcc0] sm:$0xff] }
  0x99   : > { %v741_v38 = vld [vmem:[%s2782_s6 + $0xed0] sm:$0xff]  ;;  %1475 = vmatpush.msrb.mxu0 %v679_v32  ;;  %1494 = vmatpush.msrb.mxu1 %v713_v33  ;;  %v3054_v42 = vld.sshfl [vmem:[#allocation1 + $0x30] sm:$0xff pattern:$0x73625140]  ;;  %v265_v49 = vld [vmem:[%s2805_s27 + $0x28] sm:$0xff] }
  0x9a   : > { %v3052_v41 = vld.sshfl [vmem:[#allocation1 + $0x20] sm:$0xff pattern:$0x73625140]  ;;  %v3056_v43 = vld.sshfl [vmem:[#allocation1 + $0x28] sm:$0xff pattern:$0x73625140]  ;;  %1515 = vmatpush.msrb.mxu2 %v743_v34  ;;  %1534 = vmatpush.msrb.mxu3 %v777_v35 }
  0x9b   : > { %v709_v44 = vld [vmem:[%s2782_s6 + $0xdd0] sm:$0xff]  ;;  %1476 = vmatpush.msrb.mxu0 %v677_v36  ;;  %1495 = vmatpush.msrb.mxu1 %v711_v37  ;;  %v739_v51 = vld [vmem:[%s2782_s6 + $0xec0] sm:$0xff] }
  0x9c   : > { %v3060_v50 = vld.sshfl [vmem:[#allocation1 + $0x38] sm:$0xff pattern:$0x73625140]  ;;  %1516 = vmatpush.msrb.mxu2 %v741_v38  ;;  %1535 = vmatpush.msrb.mxu3 %v775_v39  ;;  %v707_v54 = vld [vmem:[%s2782_s6 + $0xdc0] sm:$0xff] }
  0x9d   : > { %v773_v52 = vld [vmem:[%s2782_s6 + $0xfd0] sm:$0xff]  ;;  %1192 = vst [vmem:[#allocation1 + $0x20] ss:$4 sm:$0xff] %v265_v49  ;;  %1477 = vmatpush.msrb.mxu0 %v675_v40  ;;  %1496 = vmatpush.msrb.mxu1 %v709_v44  ;;  %v771_v56 = vld [vmem:[%s2782_s6 + $0xfc0] sm:$0xff] }
  0x9e   : > { %v673_v53 = vld [vmem:[%s2782_s6 + $0xcb0] sm:$0xff]  ;;  %1517 = vmatpush.msrb.mxu2 %v739_v51  ;;  %1536 = vmatpush.msrb.mxu3 %v773_v52  ;;  %v671_v57 = vld [vmem:[%s2782_s6 + $0xca0] sm:$0xff] }
  0x9f   : > { %v737_v55 = vld [vmem:[%s2782_s6 + $0xeb0] sm:$0xff]  ;;  %1478 = vmatpush.msrb.mxu0 %v673_v53  ;;  %1497 = vmatpush.msrb.mxu1 %v707_v54  ;;  %v735_v59 = vld [vmem:[%s2782_s6 + $0xea0] sm:$0xff] }
  0xa0   : > { %v705_v58 = vld [vmem:[%s2782_s6 + $0xdb0] sm:$0xff]  ;;  %1518 = vmatpush.msrb.mxu2 %v737_v55  ;;  %1537 = vmatpush.msrb.mxu3 %v771_v56  ;;  %v703_v2 = vld [vmem:[%s2782_s6 + $0xda0] sm:$0xff] }
  0xa1   : > { %v769_v60 = vld [vmem:[%s2782_s6 + $0xfb0] sm:$0xff]  ;;  %1479 = vmatpush.msrb.mxu0 %v671_v57  ;;  %1498 = vmatpush.msrb.mxu1 %v705_v58  ;;  %v767_v4 = vld [vmem:[%s2782_s6 + $0xfa0] sm:$0xff] }
  0xa2   : > { %v669_v1 = vld [vmem:[%s2782_s6 + $0xc90] sm:$0xff]  ;;  %1519 = vmatpush.msrb.mxu2 %v735_v59  ;;  %1538 = vmatpush.msrb.mxu3 %v769_v60  ;;  %v667_v5 = vld [vmem:[%s2782_s6 + $0xc80] sm:$0xff] }
  0xa3   : > { %v733_v3 = vld [vmem:[%s2782_s6 + $0xe90] sm:$0xff]  ;;  %1480 = vmatpush.msrb.mxu0 %v669_v1  ;;  %1499 = vmatpush.msrb.mxu1 %v703_v2  ;;  %v731_v7 = vld [vmem:[%s2782_s6 + $0xe80] sm:$0xff] }
  0xa4   : > { %v701_v6 = vld [vmem:[%s2782_s6 + $0xd90] sm:$0xff]  ;;  %1520 = vmatpush.msrb.mxu2 %v733_v3  ;;  %1539 = vmatpush.msrb.mxu3 %v767_v4  ;;  %v699_v10 = vld [vmem:[%s2782_s6 + $0xd80] sm:$0xff] }
  0xa5   : > { %v765_v8 = vld [vmem:[%s2782_s6 + $0xf90] sm:$0xff]  ;;  %1481 = vmatpush.msrb.mxu0 %v667_v5  ;;  %1500 = vmatpush.msrb.mxu1 %v701_v6  ;;  %v763_v12 = vld [vmem:[%s2782_s6 + $0xf80] sm:$0xff] }
  0xa6   : > { %v665_v9 = vld [vmem:[%s2782_s6 + $0xc70] sm:$0xff]  ;;  %1521 = vmatpush.msrb.mxu2 %v731_v7  ;;  %1540 = vmatpush.msrb.mxu3 %v765_v8  ;;  %v663_v13 = vld [vmem:[%s2782_s6 + $0xc60] sm:$0xff] }
  0xa7   : > { %v729_v11 = vld [vmem:[%s2782_s6 + $0xe70] sm:$0xff]  ;;  %1482 = vmatpush.msrb.mxu0 %v665_v9  ;;  %1501 = vmatpush.msrb.mxu1 %v699_v10  ;;  %v727_v15 = vld [vmem:[%s2782_s6 + $0xe60] sm:$0xff] }
  0xa8   : > { %v697_v14 = vld [vmem:[%s2782_s6 + $0xd70] sm:$0xff]  ;;  %1522 = vmatpush.msrb.mxu2 %v729_v11  ;;  %1541 = vmatpush.msrb.mxu3 %v763_v12  ;;  %v695_v18 = vld [vmem:[%s2782_s6 + $0xd60] sm:$0xff] }
  0xa9   : > { %v761_v16 = vld [vmem:[%s2782_s6 + $0xf70] sm:$0xff]  ;;  %1483 = vmatpush.msrb.mxu0 %v663_v13  ;;  %1502 = vmatpush.msrb.mxu1 %v697_v14  ;;  %v759_v20 = vld [vmem:[%s2782_s6 + $0xf60] sm:$0xff] }
  0xaa   : > { %v661_v17 = vld [vmem:[%s2782_s6 + $0xc50] sm:$0xff]  ;;  %1523 = vmatpush.msrb.mxu2 %v727_v15  ;;  %1542 = vmatpush.msrb.mxu3 %v761_v16  ;;  %v659_v21 = vld [vmem:[%s2782_s6 + $0xc40] sm:$0xff] }
  0xab   : > { %v725_v19 = vld [vmem:[%s2782_s6 + $0xe50] sm:$0xff]  ;;  %1484 = vmatpush.msrb.mxu0 %v661_v17  ;;  %1503 = vmatpush.msrb.mxu1 %v695_v18  ;;  %v723_v23 = vld [vmem:[%s2782_s6 + $0xe40] sm:$0xff] }
  0xac   : > { %v693_v22 = vld [vmem:[%s2782_s6 + $0xd50] sm:$0xff]  ;;  %1524 = vmatpush.msrb.mxu2 %v725_v19  ;;  %1543 = vmatpush.msrb.mxu3 %v759_v20  ;;  %v691_v29 = vld [vmem:[%s2782_s6 + $0xd40] sm:$0xff] }
  0xad   : > { %v757_v24 = vld [vmem:[%s2782_s6 + $0xf50] sm:$0xff]  ;;  %1485 = vmatpush.msrb.mxu0 %v659_v21  ;;  %1504 = vmatpush.msrb.mxu1 %v693_v22  ;;  %v755_v32 = vld [vmem:[%s2782_s6 + $0xf40] sm:$0xff] }
  0xae   : > { %v657_v25 = vld [vmem:[%s2782_s6 + $0xc30] sm:$0xff]  ;;  %1525 = vmatpush.msrb.mxu2 %v723_v23  ;;  %1544 = vmatpush.msrb.mxu3 %v757_v24  ;;  %v655_v33 = vld [vmem:[%s2782_s6 + $0xc20] sm:$0xff] }
  0xaf   : > { %v721_v30 = vld [vmem:[%s2782_s6 + $0xe30] sm:$0xff]  ;;  %1486 = vmatpush.msrb.mxu0 %v657_v25  ;;  %1505 = vmatpush.msrb.mxu1 %v691_v29  ;;  %v719_v35 = vld [vmem:[%s2782_s6 + $0xe20] sm:$0xff] }
  0xb0   : > { %v689_v34 = vld [vmem:[%s2782_s6 + $0xd30] sm:$0xff]  ;;  %1526 = vmatpush.msrb.mxu2 %v721_v30  ;;  %1545 = vmatpush.msrb.mxu3 %v755_v32  ;;  %v687_v38 = vld [vmem:[%s2782_s6 + $0xd20] sm:$0xff] }
  0xb1   : > { %v753_v36 = vld [vmem:[%s2782_s6 + $0xf30] sm:$0xff]  ;;  %1487 = vmatpush.msrb.mxu0 %v655_v33  ;;  %1506 = vmatpush.msrb.mxu1 %v689_v34  ;;  %v751_v40 = vld [vmem:[%s2782_s6 + $0xf20] sm:$0xff] }
  0xb2   : > { %v653_v37 = vld [vmem:[%s2782_s6 + $0xc10] sm:$0xff]  ;;  %1527 = vmatpush.msrb.mxu2 %v719_v35  ;;  %1546 = vmatpush.msrb.mxu3 %v753_v36  ;;  %v651_v44 = vld [vmem:[%s2782_s6 + $0xc00] sm:$0xff] }
  0xb3   : > { %v717_v39 = vld [vmem:[%s2782_s6 + $0xe10] sm:$0xff]  ;;  %1488 = vmatpush.msrb.mxu0 %v653_v37  ;;  %1507 = vmatpush.msrb.mxu1 %v687_v38  ;;  %v715_v51 = vld [vmem:[%s2782_s6 + $0xe00] sm:$0xff] }
  0xb4   : > { %v685_v49 = vld [vmem:[%s2782_s6 + $0xd10] sm:$0xff]  ;;  %1528 = vmatpush.msrb.mxu2 %v717_v39  ;;  %1547 = vmatpush.msrb.mxu3 %v751_v40  ;;  %v683_v55 = vld [vmem:[%s2782_s6 + $0xd00] sm:$0xff] }
  0xb5   : > { %v749_v52 = vld [vmem:[%s2782_s6 + $0xf10] sm:$0xff]  ;;  %1489 = vmatpush.msrb.mxu0 %v651_v44  ;;  %1508 = vmatpush.msrb.mxu1 %v685_v49  ;;  %v747_v56 = vld [vmem:[%s2782_s6 + $0xf00] sm:$0xff] }
  0xb6   : > { %v809_v53 = vld [vmem:[%s2782_s6 + $0x10f0] sm:$0xff]  ;;  %1529 = vmatpush.msrb.mxu2 %v715_v51  ;;  %1548 = vmatpush.msrb.mxu3 %v749_v52  ;;  %v807_v57 = vld [vmem:[%s2782_s6 + $0x10e0] sm:$0xff] }
  0xb7   : > { %v873_v54 = vld [vmem:[%s2782_s6 + $0x12f0] sm:$0xff]  ;;  %1490 = vmatmul.f32.vlgmr.msrb.gmra.mxu0 %v3052_v41  ;;  %1530 = vmatmul.f32.vlgmr.msrb.gmra.mxu2 %v3054_v42  ;;  %v871_v59 = vld [vmem:[%s2782_s6 + $0x12e0] sm:$0xff] }
  0xb8   : > { %1554 = vmatpush.msra.mxu0 %v809_v53  ;;  %1594 = vmatpush.msra.mxu2 %v873_v54  ;;  %v841_v58 = vld [vmem:[%s2782_s6 + $0x11f0] sm:$0xff]  ;;  %v839_v2 = vld [vmem:[%s2782_s6 + $0x11e0] sm:$0xff] }
  0xb9   : > { %1509 = vmatpush.msrb.mxu1 %v683_v55  ;;  %1549 = vmatpush.msrb.mxu3 %v747_v56  ;;  %v905_v60 = vld [vmem:[%s2782_s6 + $0x13f0] sm:$0xff]  ;;  %v903_v4 = vld [vmem:[%s2782_s6 + $0x13e0] sm:$0xff] }
  0xba   : > { %1510 = vmatmul.f32.vlgmr.msrb.gmra.mxu1 %v3056_v43  ;;  %1550 = vmatmul.f32.vlgmr.msrb.gmra.mxu3 %v3060_v50  ;;  %v805_v1 = vld [vmem:[%s2782_s6 + $0x10d0] sm:$0xff]  ;;  %v803_v5 = vld [vmem:[%s2782_s6 + $0x10c0] sm:$0xff] }
  0xbb   : > { %1555 = vmatpush.msra.mxu0 %v807_v57  ;;  %1574 = vmatpush.msra.mxu1 %v841_v58  ;;  %v869_v3 = vld [vmem:[%s2782_s6 + $0x12d0] sm:$0xff]  ;;  %v867_v7 = vld [vmem:[%s2782_s6 + $0x12c0] sm:$0xff] }
  0xbc   : > { %1595 = vmatpush.msra.mxu2 %v871_v59  ;;  %1614 = vmatpush.msra.mxu3 %v905_v60  ;;  %v837_v6 = vld [vmem:[%s2782_s6 + $0x11d0] sm:$0xff]  ;;  %v835_v10 = vld [vmem:[%s2782_s6 + $0x11c0] sm:$0xff] }
  0xbd   : > { %1556 = vmatpush.msra.mxu0 %v805_v1  ;;  %1575 = vmatpush.msra.mxu1 %v839_v2  ;;  %v901_v8 = vld [vmem:[%s2782_s6 + $0x13d0] sm:$0xff]  ;;  %v899_v12 = vld [vmem:[%s2782_s6 + $0x13c0] sm:$0xff] }
  0xbe   : > { %1596 = vmatpush.msra.mxu2 %v869_v3  ;;  %1615 = vmatpush.msra.mxu3 %v903_v4  ;;  %v801_v9 = vld [vmem:[%s2782_s6 + $0x10b0] sm:$0xff]  ;;  %v799_v13 = vld [vmem:[%s2782_s6 + $0x10a0] sm:$0xff] }
  0xbf   : > { %1557 = vmatpush.msra.mxu0 %v803_v5  ;;  %1576 = vmatpush.msra.mxu1 %v837_v6  ;;  %v865_v11 = vld [vmem:[%s2782_s6 + $0x12b0] sm:$0xff]  ;;  %v863_v15 = vld [vmem:[%s2782_s6 + $0x12a0] sm:$0xff] }
  0xc0   : > { %1597 = vmatpush.msra.mxu2 %v867_v7  ;;  %1616 = vmatpush.msra.mxu3 %v901_v8  ;;  %v833_v14 = vld [vmem:[%s2782_s6 + $0x11b0] sm:$0xff]  ;;  %v831_v18 = vld [vmem:[%s2782_s6 + $0x11a0] sm:$0xff] }
  0xc1   : > { %1558 = vmatpush.msra.mxu0 %v801_v9  ;;  %1577 = vmatpush.msra.mxu1 %v835_v10  ;;  %v897_v16 = vld [vmem:[%s2782_s6 + $0x13b0] sm:$0xff]  ;;  %v895_v20 = vld [vmem:[%s2782_s6 + $0x13a0] sm:$0xff] }
  0xc2   : > { %1598 = vmatpush.msra.mxu2 %v865_v11  ;;  %1617 = vmatpush.msra.mxu3 %v899_v12  ;;  %v797_v17 = vld [vmem:[%s2782_s6 + $0x1090] sm:$0xff]  ;;  %v795_v21 = vld [vmem:[%s2782_s6 + $0x1080] sm:$0xff] }
  0xc3   : > { %1559 = vmatpush.msra.mxu0 %v799_v13  ;;  %1578 = vmatpush.msra.mxu1 %v833_v14  ;;  %v861_v19 = vld [vmem:[%s2782_s6 + $0x1290] sm:$0xff]  ;;  %v859_v23 = vld [vmem:[%s2782_s6 + $0x1280] sm:$0xff] }
  0xc4   : > { %1599 = vmatpush.msra.mxu2 %v863_v15  ;;  %1618 = vmatpush.msra.mxu3 %v897_v16  ;;  %v829_v22 = vld [vmem:[%s2782_s6 + $0x1190] sm:$0xff]  ;;  %v827_v29 = vld [vmem:[%s2782_s6 + $0x1180] sm:$0xff] }
  0xc5   : > { %1560 = vmatpush.msra.mxu0 %v797_v17  ;;  %1579 = vmatpush.msra.mxu1 %v831_v18  ;;  %v893_v24 = vld [vmem:[%s2782_s6 + $0x1390] sm:$0xff]  ;;  %v891_v32 = vld [vmem:[%s2782_s6 + $0x1380] sm:$0xff] }
  0xc6   : > { %1600 = vmatpush.msra.mxu2 %v861_v19  ;;  %1619 = vmatpush.msra.mxu3 %v895_v20  ;;  %v793_v25 = vld [vmem:[%s2782_s6 + $0x1070] sm:$0xff]  ;;  %v791_v33 = vld [vmem:[%s2782_s6 + $0x1060] sm:$0xff] }
  0xc7   : > { %1561 = vmatpush.msra.mxu0 %v795_v21  ;;  %1580 = vmatpush.msra.mxu1 %v829_v22  ;;  %v857_v30 = vld [vmem:[%s2782_s6 + $0x1270] sm:$0xff]  ;;  %v855_v35 = vld [vmem:[%s2782_s6 + $0x1260] sm:$0xff] }
  0xc8   : > { %1601 = vmatpush.msra.mxu2 %v859_v23  ;;  %1620 = vmatpush.msra.mxu3 %v893_v24  ;;  %v825_v34 = vld [vmem:[%s2782_s6 + $0x1170] sm:$0xff]  ;;  %v823_v38 = vld [vmem:[%s2782_s6 + $0x1160] sm:$0xff] }
  0xc9   : > { %1562 = vmatpush.msra.mxu0 %v793_v25  ;;  %1581 = vmatpush.msra.mxu1 %v827_v29  ;;  %v889_v36 = vld [vmem:[%s2782_s6 + $0x1370] sm:$0xff]  ;;  %v887_v40 = vld [vmem:[%s2782_s6 + $0x1360] sm:$0xff] }
  0xca   : > { %1602 = vmatpush.msra.mxu2 %v857_v30  ;;  %1621 = vmatpush.msra.mxu3 %v891_v32  ;;  %v789_v37 = vld [vmem:[%s2782_s6 + $0x1050] sm:$0xff]  ;;  %v787_v44 = vld [vmem:[%s2782_s6 + $0x1040] sm:$0xff] }
  0xcb   : > { %1563 = vmatpush.msra.mxu0 %v791_v33  ;;  %1582 = vmatpush.msra.mxu1 %v825_v34  ;;  %v853_v39 = vld [vmem:[%s2782_s6 + $0x1250] sm:$0xff]  ;;  %v851_v51 = vld [vmem:[%s2782_s6 + $0x1240] sm:$0xff] }
  0xcc   : > { %1603 = vmatpush.msra.mxu2 %v855_v35  ;;  %1622 = vmatpush.msra.mxu3 %v889_v36  ;;  %v821_v49 = vld [vmem:[%s2782_s6 + $0x1150] sm:$0xff]  ;;  %v819_v54 = vld [vmem:[%s2782_s6 + $0x1140] sm:$0xff] }
  0xcd   : > { %1564 = vmatpush.msra.mxu0 %v789_v37  ;;  %1583 = vmatpush.msra.mxu1 %v823_v38  ;;  %v885_v52 = vld [vmem:[%s2782_s6 + $0x1350] sm:$0xff]  ;;  %v883_v56 = vld [vmem:[%s2782_s6 + $0x1340] sm:$0xff] }
  0xce   : > { %1604 = vmatpush.msra.mxu2 %v853_v39  ;;  %1623 = vmatpush.msra.mxu3 %v887_v40  ;;  %v785_v53 = vld [vmem:[%s2782_s6 + $0x1030] sm:$0xff]  ;;  %v783_v57 = vld [vmem:[%s2782_s6 + $0x1020] sm:$0xff] }
  0xcf   : > { %1565 = vmatpush.msra.mxu0 %v787_v44  ;;  %1584 = vmatpush.msra.mxu1 %v821_v49  ;;  %v849_v55 = vld [vmem:[%s2782_s6 + $0x1230] sm:$0xff]  ;;  %v847_v59 = vld [vmem:[%s2782_s6 + $0x1220] sm:$0xff] }
  0xd0   : > { %1605 = vmatpush.msra.mxu2 %v851_v51  ;;  %1624 = vmatpush.msra.mxu3 %v885_v52  ;;  %v817_v58 = vld [vmem:[%s2782_s6 + $0x1130] sm:$0xff]  ;;  %v815_v2 = vld [vmem:[%s2782_s6 + $0x1120] sm:$0xff] }
  0xd1   : > { %1566 = vmatpush.msra.mxu0 %v785_v53  ;;  %1585 = vmatpush.msra.mxu1 %v819_v54  ;;  %v881_v60 = vld [vmem:[%s2782_s6 + $0x1330] sm:$0xff]  ;;  %v879_v4 = vld [vmem:[%s2782_s6 + $0x1320] sm:$0xff] }
  0xd2   : > { %1606 = vmatpush.msra.mxu2 %v849_v55  ;;  %1625 = vmatpush.msra.mxu3 %v883_v56  ;;  %v781_v1 = vld [vmem:[%s2782_s6 + $0x1010] sm:$0xff]  ;;  %v779_v5 = vld [vmem:[%s2782_s6 + $0x1000] sm:$0xff] }
  0xd3   : > { %1567 = vmatpush.msra.mxu0 %v783_v57  ;;  %1586 = vmatpush.msra.mxu1 %v817_v58  ;;  %v845_v3 = vld [vmem:[%s2782_s6 + $0x1210] sm:$0xff]  ;;  %v843_v7 = vld [vmem:[%s2782_s6 + $0x1200] sm:$0xff] }
  0xd4   : > { %1607 = vmatpush.msra.mxu2 %v847_v59  ;;  %1626 = vmatpush.msra.mxu3 %v881_v60  ;;  %v813_v6 = vld [vmem:[%s2782_s6 + $0x1110] sm:$0xff]  ;;  %v3182_v10 = vld.sshfl [vmem:[#allocation1 + $0x10] sm:$0xff pattern:$0x73625140] }
  0xd5   : > { %1568 = vmatpush.msra.mxu0 %v781_v1  ;;  %1587 = vmatpush.msra.mxu1 %v815_v2  ;;  %v877_v8 = vld [vmem:[%s2782_s6 + $0x1310] sm:$0xff]  ;;  %v811_v13 = vld [vmem:[%s2782_s6 + $0x1100] sm:$0xff] }
  0xd6   : > { %1608 = vmatpush.msra.mxu2 %v845_v3  ;;  %1627 = vmatpush.msra.mxu3 %v879_v4  ;;  %v3180_v9 = vld.sshfl [vmem:[#allocation1] sm:$0xff pattern:$0x73625140]  ;;  %v875_v14 = vld [vmem:[%s2782_s6 + $0x1300] sm:$0xff] }
  0xd7   : > { %1569 = vmatpush.msra.mxu0 %v779_v5  ;;  %1588 = vmatpush.msra.mxu1 %v813_v6  ;;  %v937_v11 = vld [vmem:[%s2782_s6 + $0x14f0] sm:$0xff]  ;;  %v3190_v15 = vld.sshfl [vmem:[#allocation1 + $0x8] sm:$0xff pattern:$0x73625140] }
  0xd8   : > { %v1001_v12 = vld [vmem:[%s2782_s6 + $0x16f0] sm:$0xff]  ;;  %1609 = vmatpush.msra.mxu2 %v843_v7  ;;  %1628 = vmatpush.msra.mxu3 %v877_v8  ;;  %v935_v17 = vld [vmem:[%s2782_s6 + $0x14e0] sm:$0xff] }
  0xd9   : > { %1570 = vmatmul.f32.vlgmr.msra.gmra.mxu0 %v3180_v9  ;;  %1610 = vmatmul.f32.vlgmr.msra.gmra.mxu2 %v3182_v10  ;;  %v3192_v16 = vld.sshfl [vmem:[#allocation1 + $0x18] sm:$0xff pattern:$0x73625140]  ;;  %v999_v19 = vld [vmem:[%s2782_s6 + $0x16e0] sm:$0xff] }
  0xda   : > { %1634 = vmatpush.msrb.mxu0 %v937_v11  ;;  %1674 = vmatpush.msrb.mxu2 %v1001_v12  ;;  %v969_v18 = vld [vmem:[%s2782_s6 + $0x15f0] sm:$0xff]  ;;  %v967_v22 = vld [vmem:[%s2782_s6 + $0x15e0] sm:$0xff] }
  0xdb   : > { %1589 = vmatpush.msra.mxu1 %v811_v13  ;;  %1629 = vmatpush.msra.mxu3 %v875_v14  ;;  %v1033_v20 = vld [vmem:[%s2782_s6 + $0x17f0] sm:$0xff]  ;;  %v1031_v24 = vld [vmem:[%s2782_s6 + $0x17e0] sm:$0xff] }
  0xdc   : > { %1590 = vmatmul.f32.vlgmr.msra.gmra.mxu1 %v3190_v15  ;;  %1630 = vmatmul.f32.vlgmr.msra.gmra.mxu3 %v3192_v16  ;;  %v933_v21 = vld [vmem:[%s2782_s6 + $0x14d0] sm:$0xff]  ;;  %v931_v25 = vld [vmem:[%s2782_s6 + $0x14c0] sm:$0xff] }
  0xdd   : > { %1635 = vmatpush.msrb.mxu0 %v935_v17  ;;  %1654 = vmatpush.msrb.mxu1 %v969_v18  ;;  %v997_v23 = vld [vmem:[%s2782_s6 + $0x16d0] sm:$0xff]  ;;  %v995_v30 = vld [vmem:[%s2782_s6 + $0x16c0] sm:$0xff] }
  0xde   : > { %1675 = vmatpush.msrb.mxu2 %v999_v19  ;;  %1694 = vmatpush.msrb.mxu3 %v1033_v20  ;;  %v965_v29 = vld [vmem:[%s2782_s6 + $0x15d0] sm:$0xff]  ;;  %v963_v34 = vld [vmem:[%s2782_s6 + $0x15c0] sm:$0xff] }
  0xdf   : > { %1636 = vmatpush.msrb.mxu0 %v933_v21  ;;  %1655 = vmatpush.msrb.mxu1 %v967_v22  ;;  %v1029_v32 = vld [vmem:[%s2782_s6 + $0x17d0] sm:$0xff]  ;;  %v1027_v36 = vld [vmem:[%s2782_s6 + $0x17c0] sm:$0xff] }
  0xe0   : > { %1676 = vmatpush.msrb.mxu2 %v997_v23  ;;  %1695 = vmatpush.msrb.mxu3 %v1031_v24  ;;  %v929_v33 = vld [vmem:[%s2782_s6 + $0x14b0] sm:$0xff]  ;;  %v927_v37 = vld [vmem:[%s2782_s6 + $0x14a0] sm:$0xff] }
  0xe1   : > { %1637 = vmatpush.msrb.mxu0 %v931_v25  ;;  %1656 = vmatpush.msrb.mxu1 %v965_v29  ;;  %v993_v35 = vld [vmem:[%s2782_s6 + $0x16b0] sm:$0xff]  ;;  %v991_v39 = vld [vmem:[%s2782_s6 + $0x16a0] sm:$0xff] }
  0xe2   : > { %1677 = vmatpush.msrb.mxu2 %v995_v30  ;;  %1696 = vmatpush.msrb.mxu3 %v1029_v32  ;;  %v961_v38 = vld [vmem:[%s2782_s6 + $0x15b0] sm:$0xff]  ;;  %v959_v49 = vld [vmem:[%s2782_s6 + $0x15a0] sm:$0xff] }
  0xe3   : > { %1638 = vmatpush.msrb.mxu0 %v929_v33  ;;  %1657 = vmatpush.msrb.mxu1 %v963_v34  ;;  %v1025_v40 = vld [vmem:[%s2782_s6 + $0x17b0] sm:$0xff]  ;;  %v1023_v52 = vld [vmem:[%s2782_s6 + $0x17a0] sm:$0xff] }
  0xe4   : > { %1678 = vmatpush.msrb.mxu2 %v993_v35  ;;  %1697 = vmatpush.msrb.mxu3 %v1027_v36  ;;  %v925_v44 = vld [vmem:[%s2782_s6 + $0x1490] sm:$0xff]  ;;  %v923_v53 = vld [vmem:[%s2782_s6 + $0x1480] sm:$0xff] }
  0xe5   : > { %1639 = vmatpush.msrb.mxu0 %v927_v37  ;;  %1658 = vmatpush.msrb.mxu1 %v961_v38  ;;  %v989_v51 = vld [vmem:[%s2782_s6 + $0x1690] sm:$0xff]  ;;  %v987_v55 = vld [vmem:[%s2782_s6 + $0x1680] sm:$0xff] }
  0xe6   : > { %1679 = vmatpush.msrb.mxu2 %v991_v39  ;;  %1698 = vmatpush.msrb.mxu3 %v1025_v40  ;;  %v957_v54 = vld [vmem:[%s2782_s6 + $0x1590] sm:$0xff]  ;;  %v955_v58 = vld [vmem:[%s2782_s6 + $0x1580] sm:$0xff] }
  0xe7   : > { %1640 = vmatpush.msrb.mxu0 %v925_v44  ;;  %1659 = vmatpush.msrb.mxu1 %v959_v49  ;;  %v1021_v56 = vld [vmem:[%s2782_s6 + $0x1790] sm:$0xff]  ;;  %v1019_v60 = vld [vmem:[%s2782_s6 + $0x1780] sm:$0xff] }
  0xe8   : > { %1680 = vmatpush.msrb.mxu2 %v989_v51  ;;  %1699 = vmatpush.msrb.mxu3 %v1023_v52  ;;  %v921_v57 = vld [vmem:[%s2782_s6 + $0x1470] sm:$0xff]  ;;  %v919_v1 = vld [vmem:[%s2782_s6 + $0x1460] sm:$0xff] }
  0xe9   : > { %1641 = vmatpush.msrb.mxu0 %v923_v53  ;;  %1660 = vmatpush.msrb.mxu1 %v957_v54  ;;  %v985_v59 = vld [vmem:[%s2782_s6 + $0x1670] sm:$0xff]  ;;  %v983_v3 = vld [vmem:[%s2782_s6 + $0x1660] sm:$0xff] }
  0xea   : > { %1681 = vmatpush.msrb.mxu2 %v987_v55  ;;  %1700 = vmatpush.msrb.mxu3 %v1021_v56  ;;  %v953_v2 = vld [vmem:[%s2782_s6 + $0x1570] sm:$0xff]  ;;  %v951_v6 = vld [vmem:[%s2782_s6 + $0x1560] sm:$0xff] }
  0xeb   : > { %1642 = vmatpush.msrb.mxu0 %v921_v57  ;;  %1661 = vmatpush.msrb.mxu1 %v955_v58  ;;  %v1017_v4 = vld [vmem:[%s2782_s6 + $0x1770] sm:$0xff]  ;;  %v1015_v8 = vld [vmem:[%s2782_s6 + $0x1760] sm:$0xff] }
  0xec   : > { %1682 = vmatpush.msrb.mxu2 %v985_v59  ;;  %1701 = vmatpush.msrb.mxu3 %v1019_v60  ;;  %v917_v5 = vld [vmem:[%s2782_s6 + $0x1450] sm:$0xff]  ;;  %v915_v11 = vld [vmem:[%s2782_s6 + $0x1440] sm:$0xff] }
  0xed   : > { %1643 = vmatpush.msrb.mxu0 %v919_v1  ;;  %1662 = vmatpush.msrb.mxu1 %v953_v2  ;;  %v981_v7 = vld [vmem:[%s2782_s6 + $0x1650] sm:$0xff]  ;;  %v979_v13 = vld [vmem:[%s2782_s6 + $0x1640] sm:$0xff] }
  0xee   : > { %1683 = vmatpush.msrb.mxu2 %v983_v3  ;;  %1702 = vmatpush.msrb.mxu3 %v1017_v4  ;;  %v949_v12 = vld [vmem:[%s2782_s6 + $0x1550] sm:$0xff]  ;;  %v947_v18 = vld [vmem:[%s2782_s6 + $0x1540] sm:$0xff] }
  0xef   : > { %1644 = vmatpush.msrb.mxu0 %v917_v5  ;;  %1663 = vmatpush.msrb.mxu1 %v951_v6  ;;  %v1013_v14 = vld [vmem:[%s2782_s6 + $0x1750] sm:$0xff]  ;;  %v1011_v20 = vld [vmem:[%s2782_s6 + $0x1740] sm:$0xff] }
  0xf0   : > { %1684 = vmatpush.msrb.mxu2 %v981_v7  ;;  %1703 = vmatpush.msrb.mxu3 %v1015_v8  ;;  %v913_v17 = vld [vmem:[%s2782_s6 + $0x1430] sm:$0xff]  ;;  %v911_v21 = vld [vmem:[%s2782_s6 + $0x1420] sm:$0xff] }
  0xf1   : > { %1645 = vmatpush.msrb.mxu0 %v915_v11  ;;  %1664 = vmatpush.msrb.mxu1 %v949_v12  ;;  %v977_v19 = vld [vmem:[%s2782_s6 + $0x1630] sm:$0xff]  ;;  %v975_v23 = vld [vmem:[%s2782_s6 + $0x1620] sm:$0xff] }
  0xf2   : > { %1685 = vmatpush.msrb.mxu2 %v979_v13  ;;  %1704 = vmatpush.msrb.mxu3 %v1013_v14  ;;  %v945_v22 = vld [vmem:[%s2782_s6 + $0x1530] sm:$0xff]  ;;  %v943_v29 = vld [vmem:[%s2782_s6 + $0x1520] sm:$0xff] }
  0xf3   : > { %1646 = vmatpush.msrb.mxu0 %v913_v17  ;;  %1665 = vmatpush.msrb.mxu1 %v947_v18  ;;  %v1009_v24 = vld [vmem:[%s2782_s6 + $0x1730] sm:$0xff]  ;;  %v266_v30 = vld [vmem:[%s2805_s27 + $0x30] sm:$0xff]  ;;  %v1198_v52 = vld.sshfl [vmem:[#allocation1 + $0x28] sm:$0xff pattern:$0x73625140] }
  0xf4   : > { %1686 = vmatpush.msrb.mxu2 %v977_v19  ;;  %1705 = vmatpush.msrb.mxu3 %v1011_v20  ;;  %v909_v25 = vld [vmem:[%s2782_s6 + $0x1410] sm:$0xff]  ;;  %v1007_v33 = vld [vmem:[%s2782_s6 + $0x1720] sm:$0xff]  ;;  %1201 = vst [vmem:[#allocation1] ss:$4 sm:$0xff] %v266_v30 }
  0xf5   : > { %1647 = vmatpush.msrb.mxu0 %v911_v21  ;;  %1666 = vmatpush.msrb.mxu1 %v945_v22  ;;  %v973_v32 = vld [vmem:[%s2782_s6 + $0x1610] sm:$0xff]  ;;  %v907_v34 = vld [vmem:[%s2782_s6 + $0x1400] sm:$0xff] }
  0xf6   : > { %1687 = vmatpush.msrb.mxu2 %v975_v23  ;;  %1706 = vmatpush.msrb.mxu3 %v1009_v24  ;;  %v941_v35 = vld [vmem:[%s2782_s6 + $0x1510] sm:$0xff]  ;;  %v971_v36 = vld [vmem:[%s2782_s6 + $0x1600] sm:$0xff] }
  0xf7   : > { %1648 = vmatpush.msrb.mxu0 %v909_v25  ;;  %1667 = vmatpush.msrb.mxu1 %v943_v29  ;;  %v1005_v37 = vld [vmem:[%s2782_s6 + $0x1710] sm:$0xff]  ;;  %v1199_v39 = vld.sshfl [vmem:[#allocation1 + $0x30] sm:$0xff pattern:$0x73625140] }
  0xf8   : > { %1688 = vmatpush.msrb.mxu2 %v973_v32  ;;  %1707 = vmatpush.msrb.mxu3 %v1007_v33  ;;  %v1197_v38 = vld.sshfl [vmem:[#allocation1 + $0x20] sm:$0xff pattern:$0x73625140]  ;;  %v939_v49 = vld [vmem:[%s2782_s6 + $0x1500] sm:$0xff] }
  0xf9   : > { %1649 = vmatpush.msrb.mxu0 %v907_v34  ;;  %1668 = vmatpush.msrb.mxu1 %v941_v35  ;;  %v1065_v40 = vld [vmem:[%s2782_s6 + $0x18f0] sm:$0xff]  ;;  %v1003_v51 = vld [vmem:[%s2782_s6 + $0x1700] sm:$0xff] }
  0xfa   : > { %v1129_v44 = vld [vmem:[%s2782_s6 + $0x1af0] sm:$0xff]  ;;  %1689 = vmatpush.msrb.mxu2 %v971_v36  ;;  %1708 = vmatpush.msrb.mxu3 %v1005_v37  ;;  %v1063_v54 = vld [vmem:[%s2782_s6 + $0x18e0] sm:$0xff] }
  0xfb   : > { %1650 = vmatmul.f32.vlgmr.msrb.gmra.mxu0 %v1197_v38  ;;  %1690 = vmatmul.f32.vlgmr.msrb.gmra.mxu2 %v1199_v39  ;;  %v1200_v53 = vld.sshfl [vmem:[#allocation1 + $0x38] sm:$0xff pattern:$0x73625140]  ;;  %v1127_v56 = vld [vmem:[%s2782_s6 + $0x1ae0] sm:$0xff] }
  0xfc   : > { %1714 = vmatpush.msra.mxu0 %v1065_v40  ;;  %1754 = vmatpush.msra.mxu2 %v1129_v44  ;;  %v1097_v55 = vld [vmem:[%s2782_s6 + $0x19f0] sm:$0xff]  ;;  %v1095_v59 = vld [vmem:[%s2782_s6 + $0x19e0] sm:$0xff] }
  0xfd   : > { %1669 = vmatpush.msrb.mxu1 %v939_v49  ;;  %1709 = vmatpush.msrb.mxu3 %v1003_v51  ;;  %v1161_v57 = vld [vmem:[%s2782_s6 + $0x1bf0] sm:$0xff]  ;;  %v1159_v1 = vld [vmem:[%s2782_s6 + $0x1be0] sm:$0xff] }
  0xfe   : > { %1670 = vmatmul.f32.vlgmr.msrb.gmra.mxu1 %v1198_v52  ;;  %1710 = vmatmul.f32.vlgmr.msrb.gmra.mxu3 %v1200_v53  ;;  %v1061_v58 = vld [vmem:[%s2782_s6 + $0x18d0] sm:$0xff]  ;;  %v1059_v2 = vld [vmem:[%s2782_s6 + $0x18c0] sm:$0xff] }
  0xff   : > { %1715 = vmatpush.msra.mxu0 %v1063_v54  ;;  %1734 = vmatpush.msra.mxu1 %v1097_v55  ;;  %v1125_v60 = vld [vmem:[%s2782_s6 + $0x1ad0] sm:$0xff]  ;;  %v1123_v4 = vld [vmem:[%s2782_s6 + $0x1ac0] sm:$0xff] }
 0x100   : > { %1755 = vmatpush.msra.mxu2 %v1127_v56  ;;  %1774 = vmatpush.msra.mxu3 %v1161_v57  ;;  %v1093_v3 = vld [vmem:[%s2782_s6 + $0x19d0] sm:$0xff]  ;;  %v1091_v7 = vld [vmem:[%s2782_s6 + $0x19c0] sm:$0xff] }
 0x101   : > { %1716 = vmatpush.msra.mxu0 %v1061_v58  ;;  %1735 = vmatpush.msra.mxu1 %v1095_v59  ;;  %v1157_v5 = vld [vmem:[%s2782_s6 + $0x1bd0] sm:$0xff]  ;;  %v1155_v11 = vld [vmem:[%s2782_s6 + $0x1bc0] sm:$0xff] }
 0x102   : > { %1756 = vmatpush.msra.mxu2 %v1125_v60  ;;  %1775 = vmatpush.msra.mxu3 %v1159_v1  ;;  %v1057_v6 = vld [vmem:[%s2782_s6 + $0x18b0] sm:$0xff]  ;;  %v1055_v12 = vld [vmem:[%s2782_s6 + $0x18a0] sm:$0xff] }
 0x103   : > { %1717 = vmatpush.msra.mxu0 %v1059_v2  ;;  %1736 = vmatpush.msra.mxu1 %v1093_v3  ;;  %v1121_v8 = vld [vmem:[%s2782_s6 + $0x1ab0] sm:$0xff]  ;;  %v1119_v14 = vld [vmem:[%s2782_s6 + $0x1aa0] sm:$0xff] }
 0x104   : > { %1757 = vmatpush.msra.mxu2 %v1123_v4  ;;  %1776 = vmatpush.msra.mxu3 %v1157_v5  ;;  %v1089_v13 = vld [vmem:[%s2782_s6 + $0x19b0] sm:$0xff]  ;;  %v1087_v19 = vld [vmem:[%s2782_s6 + $0x19a0] sm:$0xff] }
 0x105   : > { %1718 = vmatpush.msra.mxu0 %v1057_v6  ;;  %1737 = vmatpush.msra.mxu1 %v1091_v7  ;;  %v1153_v17 = vld [vmem:[%s2782_s6 + $0x1bb0] sm:$0xff]  ;;  %v1151_v21 = vld [vmem:[%s2782_s6 + $0x1ba0] sm:$0xff] }
 0x106   : > { %1758 = vmatpush.msra.mxu2 %v1121_v8  ;;  %1777 = vmatpush.msra.mxu3 %v1155_v11  ;;  %v1053_v18 = vld [vmem:[%s2782_s6 + $0x1890] sm:$0xff]  ;;  %v1051_v22 = vld [vmem:[%s2782_s6 + $0x1880] sm:$0xff] }
 0x107   : > { %1719 = vmatpush.msra.mxu0 %v1055_v12  ;;  %1738 = vmatpush.msra.mxu1 %v1089_v13  ;;  %v1117_v20 = vld [vmem:[%s2782_s6 + $0x1a90] sm:$0xff]  ;;  %v1115_v24 = vld [vmem:[%s2782_s6 + $0x1a80] sm:$0xff] }
 0x108   : > { %1759 = vmatpush.msra.mxu2 %v1119_v14  ;;  %1778 = vmatpush.msra.mxu3 %v1153_v17  ;;  %v1085_v23 = vld [vmem:[%s2782_s6 + $0x1990] sm:$0xff]  ;;  %v1083_v30 = vld [vmem:[%s2782_s6 + $0x1980] sm:$0xff]  ;;  %v298_v14 = vld [vmem:[%s2782_s6 + $0xf8] sm:$0xff] }
 0x109   : > { %1720 = vmatpush.msra.mxu0 %v1053_v18  ;;  %1739 = vmatpush.msra.mxu1 %v1087_v19  ;;  %v1149_v25 = vld [vmem:[%s2782_s6 + $0x1b90] sm:$0xff]  ;;  %v1147_v33 = vld [vmem:[%s2782_s6 + $0x1b80] sm:$0xff]  ;;  %v362_v17 = vld [vmem:[%s2782_s6 + $0x2f8] sm:$0xff] }
 0x10a   : > { %1760 = vmatpush.msra.mxu2 %v1117_v20  ;;  %1779 = vmatpush.msra.mxu3 %v1151_v21  ;;  %v1049_v29 = vld [vmem:[%s2782_s6 + $0x1870] sm:$0xff]  ;;  %v1047_v34 = vld [vmem:[%s2782_s6 + $0x1860] sm:$0xff] }
 0x10b   : > { %1721 = vmatpush.msra.mxu0 %v1051_v22  ;;  %1740 = vmatpush.msra.mxu1 %v1085_v23  ;;  %v1113_v32 = vld [vmem:[%s2782_s6 + $0x1a70] sm:$0xff]  ;;  %v1111_v36 = vld [vmem:[%s2782_s6 + $0x1a60] sm:$0xff]  ;;  %v296_v22 = vld [vmem:[%s2782_s6 + $0xe8] sm:$0xff] }
 0x10c   : > { %1761 = vmatpush.msra.mxu2 %v1115_v24  ;;  %1780 = vmatpush.msra.mxu3 %v1149_v25  ;;  %v1081_v35 = vld [vmem:[%s2782_s6 + $0x1970] sm:$0xff]  ;;  %v1079_v39 = vld [vmem:[%s2782_s6 + $0x1960] sm:$0xff]  ;;  %v330_v23 = vld [vmem:[%s2782_s6 + $0x1f8] sm:$0xff] }
 0x10d   : > { %1722 = vmatpush.msra.mxu0 %v1049_v29  ;;  %1741 = vmatpush.msra.mxu1 %v1083_v30  ;;  %v1145_v37 = vld [vmem:[%s2782_s6 + $0x1b70] sm:$0xff]  ;;  %v1143_v44 = vld [vmem:[%s2782_s6 + $0x1b60] sm:$0xff]  ;;  %v360_v24 = vld [vmem:[%s2782_s6 + $0x2e8] sm:$0xff] }
 0x10e   : > { %1762 = vmatpush.msra.mxu2 %v1113_v32  ;;  %1781 = vmatpush.msra.mxu3 %v1147_v33  ;;  %v1045_v38 = vld [vmem:[%s2782_s6 + $0x1850] sm:$0xff]  ;;  %v1043_v49 = vld [vmem:[%s2782_s6 + $0x1840] sm:$0xff]  ;;  %v394_v25 = vld [vmem:[%s2782_s6 + $0x3f8] sm:$0xff] }
 0x10f   : > { %1723 = vmatpush.msra.mxu0 %v1047_v34  ;;  %1742 = vmatpush.msra.mxu1 %v1081_v35  ;;  %v1109_v40 = vld [vmem:[%s2782_s6 + $0x1a50] sm:$0xff]  ;;  %v1107_v52 = vld [vmem:[%s2782_s6 + $0x1a40] sm:$0xff]  ;;  %v294_v29 = vld [vmem:[%s2782_s6 + $0xd8] sm:$0xff] }
 0x110   : > { %1763 = vmatpush.msra.mxu2 %v1111_v36  ;;  %1782 = vmatpush.msra.mxu3 %v1145_v37  ;;  %v1077_v51 = vld [vmem:[%s2782_s6 + $0x1950] sm:$0xff]  ;;  %v1075_v55 = vld [vmem:[%s2782_s6 + $0x1940] sm:$0xff]  ;;  %v328_v30 = vld [vmem:[%s2782_s6 + $0x1e8] sm:$0xff] }
 0x111   : > { %1724 = vmatpush.msra.mxu0 %v1045_v38  ;;  %1743 = vmatpush.msra.mxu1 %v1079_v39  ;;  %v1141_v53 = vld [vmem:[%s2782_s6 + $0x1b50] sm:$0xff]  ;;  %v1139_v57 = vld [vmem:[%s2782_s6 + $0x1b40] sm:$0xff]  ;;  %v358_v32 = vld [vmem:[%s2782_s6 + $0x2d8] sm:$0xff] }
 0x112   : > { %1764 = vmatpush.msra.mxu2 %v1109_v40  ;;  %1783 = vmatpush.msra.mxu3 %v1143_v44  ;;  %v1041_v54 = vld [vmem:[%s2782_s6 + $0x1830] sm:$0xff]  ;;  %v1039_v58 = vld [vmem:[%s2782_s6 + $0x1820] sm:$0xff]  ;;  %v392_v33 = vld [vmem:[%s2782_s6 + $0x3e8] sm:$0xff] }
 0x113   : > { %1725 = vmatpush.msra.mxu0 %v1043_v49  ;;  %1744 = vmatpush.msra.mxu1 %v1077_v51  ;;  %v1105_v56 = vld [vmem:[%s2782_s6 + $0x1a30] sm:$0xff]  ;;  %v1103_v60 = vld [vmem:[%s2782_s6 + $0x1a20] sm:$0xff]  ;;  %v292_v34 = vld [vmem:[%s2782_s6 + $0xc8] sm:$0xff] }
 0x114   : > { %1765 = vmatpush.msra.mxu2 %v1107_v52  ;;  %1784 = vmatpush.msra.mxu3 %v1141_v53  ;;  %v1073_v59 = vld [vmem:[%s2782_s6 + $0x1930] sm:$0xff]  ;;  %v1071_v3 = vld [vmem:[%s2782_s6 + $0x1920] sm:$0xff]  ;;  %v326_v35 = vld [vmem:[%s2782_s6 + $0x1d8] sm:$0xff] }
 0x115   : > { %1726 = vmatpush.msra.mxu0 %v1041_v54  ;;  %1745 = vmatpush.msra.mxu1 %v1075_v55  ;;  %v1137_v1 = vld [vmem:[%s2782_s6 + $0x1b30] sm:$0xff]  ;;  %v1135_v5 = vld [vmem:[%s2782_s6 + $0x1b20] sm:$0xff]  ;;  %v356_v36 = vld [vmem:[%s2782_s6 + $0x2c8] sm:$0xff] }
 0x116   : > { %1766 = vmatpush.msra.mxu2 %v1105_v56  ;;  %1785 = vmatpush.msra.mxu3 %v1139_v57  ;;  %v1037_v2 = vld [vmem:[%s2782_s6 + $0x1810] sm:$0xff]  ;;  %v1035_v6 = vld [vmem:[%s2782_s6 + $0x1800] sm:$0xff]  ;;  %v390_v37 = vld [vmem:[%s2782_s6 + $0x3d8] sm:$0xff] }
 0x117   : > { %1727 = vmatpush.msra.mxu0 %v1039_v58  ;;  %1746 = vmatpush.msra.mxu1 %v1073_v59  ;;  %v1101_v4 = vld [vmem:[%s2782_s6 + $0x1a10] sm:$0xff]  ;;  %v1099_v8 = vld [vmem:[%s2782_s6 + $0x1a00] sm:$0xff]  ;;  %v290_v38 = vld [vmem:[%s2782_s6 + $0xb8] sm:$0xff] }
 0x118   : > { %1767 = vmatpush.msra.mxu2 %v1103_v60  ;;  %1786 = vmatpush.msra.mxu3 %v1137_v1  ;;  %v1069_v7 = vld [vmem:[%s2782_s6 + $0x1910] sm:$0xff]  ;;  %v1204_v13 = vld.sshfl [vmem:[#allocation1 + $0x10] sm:$0xff pattern:$0x73625140]  ;;  %v354_v40 = vld [vmem:[%s2782_s6 + $0x2b8] sm:$0xff] }
 0x119   : > { %1728 = vmatpush.msra.mxu0 %v1037_v2  ;;  %1747 = vmatpush.msra.mxu1 %v1071_v3  ;;  %v1133_v11 = vld [vmem:[%s2782_s6 + $0x1b10] sm:$0xff]  ;;  %v1067_v18 = vld [vmem:[%s2782_s6 + $0x1900] sm:$0xff]  ;;  %v324_v39 = vld [vmem:[%s2782_s6 + $0x1c8] sm:$0xff] }
 0x11a   : > { %1768 = vmatpush.msra.mxu2 %v1101_v4  ;;  %1787 = vmatpush.msra.mxu3 %v1135_v5  ;;  %v1202_v12 = vld.sshfl [vmem:[#allocation1] sm:$0xff pattern:$0x73625140]  ;;  %v1131_v19 = vld [vmem:[%s2782_s6 + $0x1b00] sm:$0xff]  ;;  %v388_v44 = vld [vmem:[%s2782_s6 + $0x3c8] sm:$0xff] }
 0x11b   : > { %1729 = vmatpush.msra.mxu0 %v1035_v6  ;;  %1748 = vmatpush.msra.mxu1 %v1069_v7  ;;  %v1203_v20 = vld.sshfl [vmem:[#allocation1 + $0x8] sm:$0xff pattern:$0x73625140]  ;;  %v1205_v21 = vld.sshfl [vmem:[#allocation1 + $0x18] sm:$0xff pattern:$0x73625140] }
 0x11c   : > { %1769 = vmatpush.msra.mxu2 %v1099_v8  ;;  %1788 = vmatpush.msra.mxu3 %v1133_v11  ;;  %v288_v49 = vld [vmem:[%s2782_s6 + $0xa8] sm:$0xff]  ;;  %v322_v51 = vld [vmem:[%s2782_s6 + $0x1b8] sm:$0xff] }
 0x11d   : > { %1730 = vmatmul.f32.vlgmr.msra.gmra.mxu0 %v1202_v12  ;;  %1770 = vmatmul.f32.vlgmr.msra.gmra.mxu2 %v1204_v13  ;;  %v352_v52 = vld [vmem:[%s2782_s6 + $0x2a8] sm:$0xff]  ;;  %v386_v53 = vld [vmem:[%s2782_s6 + $0x3b8] sm:$0xff] }
 0x11e   : > { %1794 = vmatpush.msrb.mxu0 %v298_v14  ;;  %1834 = vmatpush.msrb.mxu2 %v362_v17  ;;  %v286_v54 = vld [vmem:[%s2782_s6 + $0x98] sm:$0xff]  ;;  %v320_v55 = vld [vmem:[%s2782_s6 + $0x1a8] sm:$0xff] }
 0x11f   : > { %1749 = vmatpush.msra.mxu1 %v1067_v18  ;;  %1789 = vmatpush.msra.mxu3 %v1131_v19  ;;  %v350_v56 = vld [vmem:[%s2782_s6 + $0x298] sm:$0xff]  ;;  %v384_v57 = vld [vmem:[%s2782_s6 + $0x3a8] sm:$0xff] }
 0x120   : > { %1750 = vmatmul.f32.vlgmr.msra.gmra.mxu1 %v1203_v20  ;;  %1790 = vmatmul.f32.vlgmr.msra.gmra.mxu3 %v1205_v21  ;;  %v284_v58 = vld [vmem:[%s2782_s6 + $0x88] sm:$0xff]  ;;  %v318_v59 = vld [vmem:[%s2782_s6 + $0x198] sm:$0xff] }
 0x121   : > { %1795 = vmatpush.msrb.mxu0 %v296_v22  ;;  %1814 = vmatpush.msrb.mxu1 %v330_v23  ;;  %v348_v60 = vld [vmem:[%s2782_s6 + $0x288] sm:$0xff]  ;;  %v382_v1 = vld [vmem:[%s2782_s6 + $0x398] sm:$0xff] }
 0x122   : > { %1835 = vmatpush.msrb.mxu2 %v360_v24  ;;  %1854 = vmatpush.msrb.mxu3 %v394_v25  ;;  %v282_v2 = vld [vmem:[%s2782_s6 + $0x78] sm:$0xff]  ;;  %v316_v3 = vld [vmem:[%s2782_s6 + $0x188] sm:$0xff] }
 0x123   : > { %1796 = vmatpush.msrb.mxu0 %v294_v29  ;;  %1815 = vmatpush.msrb.mxu1 %v328_v30  ;;  %v346_v4 = vld [vmem:[%s2782_s6 + $0x278] sm:$0xff]  ;;  %v380_v5 = vld [vmem:[%s2782_s6 + $0x388] sm:$0xff] }
 0x124   : > { %1836 = vmatpush.msrb.mxu2 %v358_v32  ;;  %1855 = vmatpush.msrb.mxu3 %v392_v33  ;;  %v280_v6 = vld [vmem:[%s2782_s6 + $0x68] sm:$0xff]  ;;  %v314_v7 = vld [vmem:[%s2782_s6 + $0x178] sm:$0xff] }
 0x125   : > { %1797 = vmatpush.msrb.mxu0 %v292_v34  ;;  %1816 = vmatpush.msrb.mxu1 %v326_v35  ;;  %v344_v8 = vld [vmem:[%s2782_s6 + $0x268] sm:$0xff]  ;;  %v378_v11 = vld [vmem:[%s2782_s6 + $0x378] sm:$0xff] }
 0x126   : > { %1837 = vmatpush.msrb.mxu2 %v356_v36  ;;  %1856 = vmatpush.msrb.mxu3 %v390_v37  ;;  %v278_v12 = vld [vmem:[%s2782_s6 + $0x58] sm:$0xff]  ;;  %v312_v13 = vld [vmem:[%s2782_s6 + $0x168] sm:$0xff] }
 0x127   : > { %1798 = vmatpush.msrb.mxu0 %v290_v38  ;;  %1817 = vmatpush.msrb.mxu1 %v324_v39  ;;  %v342_v14 = vld [vmem:[%s2782_s6 + $0x258] sm:$0xff]  ;;  %v376_v17 = vld [vmem:[%s2782_s6 + $0x368] sm:$0xff] }
 0x128   : > { %1838 = vmatpush.msrb.mxu2 %v354_v40  ;;  %1857 = vmatpush.msrb.mxu3 %v388_v44  ;;  %v276_v18 = vld [vmem:[%s2782_s6 + $0x48] sm:$0xff]  ;;  %v310_v19 = vld [vmem:[%s2782_s6 + $0x158] sm:$0xff] }
 0x129   : > { %1799 = vmatpush.msrb.mxu0 %v288_v49  ;;  %1818 = vmatpush.msrb.mxu1 %v322_v51  ;;  %v340_v20 = vld [vmem:[%s2782_s6 + $0x248] sm:$0xff]  ;;  %v374_v21 = vld [vmem:[%s2782_s6 + $0x358] sm:$0xff] }
 0x12a   : > { %1839 = vmatpush.msrb.mxu2 %v352_v52  ;;  %1858 = vmatpush.msrb.mxu3 %v386_v53  ;;  %v274_v22 = vld [vmem:[%s2782_s6 + $0x38] sm:$0xff]  ;;  %v308_v23 = vld [vmem:[%s2782_s6 + $0x148] sm:$0xff] }
 0x12b   : > { %1800 = vmatpush.msrb.mxu0 %v286_v54  ;;  %1819 = vmatpush.msrb.mxu1 %v320_v55  ;;  %v338_v24 = vld [vmem:[%s2782_s6 + $0x238] sm:$0xff]  ;;  %v372_v25 = vld [vmem:[%s2782_s6 + $0x348] sm:$0xff] }
 0x12c   : > { %1840 = vmatpush.msrb.mxu2 %v350_v56  ;;  %1859 = vmatpush.msrb.mxu3 %v384_v57  ;;  %v272_v29 = vld [vmem:[%s2782_s6 + $0x28] sm:$0xff]  ;;  %v306_v30 = vld [vmem:[%s2782_s6 + $0x138] sm:$0xff] }
 0x12d   : > { %1801 = vmatpush.msrb.mxu0 %v284_v58  ;;  %1820 = vmatpush.msrb.mxu1 %v318_v59  ;;  %v336_v32 = vld [vmem:[%s2782_s6 + $0x228] sm:$0xff]  ;;  %v370_v33 = vld [vmem:[%s2782_s6 + $0x338] sm:$0xff] }
 0x12e   : > { %1841 = vmatpush.msrb.mxu2 %v348_v60  ;;  %1860 = vmatpush.msrb.mxu3 %v382_v1  ;;  %v270_v34 = vld [vmem:[%s2782_s6 + $0x18] sm:$0xff]  ;;  %v304_v35 = vld [vmem:[%s2782_s6 + $0x128] sm:$0xff] }
 0x12f   : > { %1802 = vmatpush.msrb.mxu0 %v282_v2  ;;  %1821 = vmatpush.msrb.mxu1 %v316_v3  ;;  %v334_v36 = vld [vmem:[%s2782_s6 + $0x218] sm:$0xff]  ;;  %v368_v37 = vld [vmem:[%s2782_s6 + $0x328] sm:$0xff] }
 0x130   : > { %1842 = vmatpush.msrb.mxu2 %v346_v4  ;;  %1861 = vmatpush.msrb.mxu3 %v380_v5  ;;  %v268_v38 = vld [vmem:[%s2782_s6 + $0x8] sm:$0xff]  ;;  %v302_v39 = vld [vmem:[%s2782_s6 + $0x118] sm:$0xff] }
 0x131   : > { %1803 = vmatpush.msrb.mxu0 %v280_v6  ;;  %1822 = vmatpush.msrb.mxu1 %v314_v7  ;;  %v332_v40 = vld [vmem:[%s2782_s6 + $0x208] sm:$0xff]  ;;  %v366_v44 = vld [vmem:[%s2782_s6 + $0x318] sm:$0xff] }
 0x132   : > { %1843 = vmatpush.msrb.mxu2 %v344_v8  ;;  %1862 = vmatpush.msrb.mxu3 %v378_v11  ;;  %v426_v49 = vld [vmem:[%s2782_s6 + $0x4f8] sm:$0xff]  ;;  %v300_v52 = vld [vmem:[%s2782_s6 + $0x108] sm:$0xff] }
 0x133   : > { %1804 = vmatpush.msrb.mxu0 %v278_v12  ;;  %1823 = vmatpush.msrb.mxu1 %v312_v13  ;;  %v490_v51 = vld [vmem:[%s2782_s6 + $0x6f8] sm:$0xff]  ;;  %v364_v53 = vld [vmem:[%s2782_s6 + $0x308] sm:$0xff] }
 0x134   : > { %1844 = vmatpush.msrb.mxu2 %v342_v14  ;;  %1863 = vmatpush.msrb.mxu3 %v376_v17  ;;  %v424_v54 = vld [vmem:[%s2782_s6 + $0x4e8] sm:$0xff]  ;;  %v458_v55 = vld [vmem:[%s2782_s6 + $0x5f8] sm:$0xff] }
 0x135   : > { %1805 = vmatpush.msrb.mxu0 %v276_v18  ;;  %1824 = vmatpush.msrb.mxu1 %v310_v19  ;;  %v488_v56 = vld [vmem:[%s2782_s6 + $0x6e8] sm:$0xff]  ;;  %v522_v57 = vld [vmem:[%s2782_s6 + $0x7f8] sm:$0xff] }
 0x136   : > { %1845 = vmatpush.msrb.mxu2 %v340_v20  ;;  %1864 = vmatpush.msrb.mxu3 %v374_v21  ;;  %v422_v58 = vld [vmem:[%s2782_s6 + $0x4d8] sm:$0xff]  ;;  %v456_v59 = vld [vmem:[%s2782_s6 + $0x5e8] sm:$0xff] }
 0x137   : > { %1806 = vmatpush.msrb.mxu0 %v274_v22  ;;  %1825 = vmatpush.msrb.mxu1 %v308_v23  ;;  %v486_v60 = vld [vmem:[%s2782_s6 + $0x6d8] sm:$0xff]  ;;  %v520_v1 = vld [vmem:[%s2782_s6 + $0x7e8] sm:$0xff] }
 0x138   : > { %1846 = vmatpush.msrb.mxu2 %v338_v24  ;;  %1865 = vmatpush.msrb.mxu3 %v372_v25  ;;  %v420_v2 = vld [vmem:[%s2782_s6 + $0x4c8] sm:$0xff]  ;;  %v454_v3 = vld [vmem:[%s2782_s6 + $0x5d8] sm:$0xff] }
 0x139   : > { %1807 = vmatpush.msrb.mxu0 %v272_v29  ;;  %1826 = vmatpush.msrb.mxu1 %v306_v30  ;;  %v484_v4 = vld [vmem:[%s2782_s6 + $0x6c8] sm:$0xff]  ;;  %v518_v5 = vld [vmem:[%s2782_s6 + $0x7d8] sm:$0xff] }
 0x13a   : > { %1847 = vmatpush.msrb.mxu2 %v336_v32  ;;  %1866 = vmatpush.msrb.mxu3 %v370_v33  ;;  %v418_v6 = vld [vmem:[%s2782_s6 + $0x4b8] sm:$0xff]  ;;  %v452_v7 = vld [vmem:[%s2782_s6 + $0x5c8] sm:$0xff] }
 0x13b   : > { %1808 = vmatpush.msrb.mxu0 %v270_v34  ;;  %1827 = vmatpush.msrb.mxu1 %v304_v35  ;;  %v482_v8 = vld [vmem:[%s2782_s6 + $0x6b8] sm:$0xff]  ;;  %v516_v11 = vld [vmem:[%s2782_s6 + $0x7c8] sm:$0xff] }
 0x13c   : > { %1848 = vmatpush.msrb.mxu2 %v334_v36  ;;  %1867 = vmatpush.msrb.mxu3 %v368_v37  ;;  %v416_v12 = vld [vmem:[%s2782_s6 + $0x4a8] sm:$0xff]  ;;  %v450_v13 = vld [vmem:[%s2782_s6 + $0x5b8] sm:$0xff] }
 0x13d   : > { %1809 = vmatpush.msrb.mxu0 %v268_v38  ;;  %1828 = vmatpush.msrb.mxu1 %v302_v39  ;;  %v480_v14 = vld [vmem:[%s2782_s6 + $0x6a8] sm:$0xff]  ;;  %v514_v17 = vld [vmem:[%s2782_s6 + $0x7b8] sm:$0xff] }
 0x13e   : > { %1849 = vmatpush.msrb.mxu2 %v332_v40  ;;  %1868 = vmatpush.msrb.mxu3 %v366_v44  ;;  %v414_v18 = vld [vmem:[%s2782_s6 + $0x498] sm:$0xff]  ;;  %v448_v19 = vld [vmem:[%s2782_s6 + $0x5a8] sm:$0xff] }
 0x13f   : > { %1874 = vmatpush.msra.mxu0 %v426_v49  ;;  %1829 = vmatpush.msrb.mxu1 %v300_v52  ;;  %v478_v20 = vld [vmem:[%s2782_s6 + $0x698] sm:$0xff]  ;;  %v512_v21 = vld [vmem:[%s2782_s6 + $0x7a8] sm:$0xff] }
 0x140   : > { %1914 = vmatpush.msra.mxu2 %v490_v51  ;;  %1869 = vmatpush.msrb.mxu3 %v364_v53  ;;  %v412_v22 = vld [vmem:[%s2782_s6 + $0x488] sm:$0xff]  ;;  %v446_v23 = vld [vmem:[%s2782_s6 + $0x598] sm:$0xff] }
 0x141   : > { %1875 = vmatpush.msra.mxu0 %v424_v54  ;;  %1894 = vmatpush.msra.mxu1 %v458_v55  ;;  %v476_v24 = vld [vmem:[%s2782_s6 + $0x688] sm:$0xff]  ;;  %v510_v25 = vld [vmem:[%s2782_s6 + $0x798] sm:$0xff] }
 0x142   : > { %1915 = vmatpush.msra.mxu2 %v488_v56  ;;  %1934 = vmatpush.msra.mxu3 %v522_v57  ;;  %v410_v29 = vld [vmem:[%s2782_s6 + $0x478] sm:$0xff]  ;;  %v444_v30 = vld [vmem:[%s2782_s6 + $0x588] sm:$0xff] }
 0x143   : > { %1876 = vmatpush.msra.mxu0 %v422_v58  ;;  %1895 = vmatpush.msra.mxu1 %v456_v59  ;;  %v474_v32 = vld [vmem:[%s2782_s6 + $0x678] sm:$0xff]  ;;  %v508_v33 = vld [vmem:[%s2782_s6 + $0x788] sm:$0xff] }
 0x144   : > { %1916 = vmatpush.msra.mxu2 %v486_v60  ;;  %1935 = vmatpush.msra.mxu3 %v520_v1  ;;  %v408_v34 = vld [vmem:[%s2782_s6 + $0x468] sm:$0xff]  ;;  %v442_v35 = vld [vmem:[%s2782_s6 + $0x578] sm:$0xff] }
 0x145   : > { %1877 = vmatpush.msra.mxu0 %v420_v2  ;;  %1896 = vmatpush.msra.mxu1 %v454_v3  ;;  %v472_v36 = vld [vmem:[%s2782_s6 + $0x668] sm:$0xff]  ;;  %v506_v37 = vld [vmem:[%s2782_s6 + $0x778] sm:$0xff] }
 0x146   : > { %1917 = vmatpush.msra.mxu2 %v484_v4  ;;  %1936 = vmatpush.msra.mxu3 %v518_v5  ;;  %v406_v38 = vld [vmem:[%s2782_s6 + $0x458] sm:$0xff]  ;;  %v440_v39 = vld [vmem:[%s2782_s6 + $0x568] sm:$0xff] }
 0x147   : > { %1878 = vmatpush.msra.mxu0 %v418_v6  ;;  %1897 = vmatpush.msra.mxu1 %v452_v7  ;;  %v470_v40 = vld [vmem:[%s2782_s6 + $0x658] sm:$0xff]  ;;  %v504_v44 = vld [vmem:[%s2782_s6 + $0x768] sm:$0xff] }
 0x148   : > { %1918 = vmatpush.msra.mxu2 %v482_v8  ;;  %1937 = vmatpush.msra.mxu3 %v516_v11  ;;  %v404_v49 = vld [vmem:[%s2782_s6 + $0x448] sm:$0xff]  ;;  %v438_v51 = vld [vmem:[%s2782_s6 + $0x558] sm:$0xff] }
 0x149   : > { %1879 = vmatpush.msra.mxu0 %v416_v12  ;;  %1898 = vmatpush.msra.mxu1 %v450_v13  ;;  %v468_v52 = vld [vmem:[%s2782_s6 + $0x648] sm:$0xff]  ;;  %v502_v53 = vld [vmem:[%s2782_s6 + $0x758] sm:$0xff] }
 0x14a   : > { %1919 = vmatpush.msra.mxu2 %v480_v14  ;;  %1938 = vmatpush.msra.mxu3 %v514_v17  ;;  %v402_v54 = vld [vmem:[%s2782_s6 + $0x438] sm:$0xff]  ;;  %v436_v55 = vld [vmem:[%s2782_s6 + $0x548] sm:$0xff] }
 0x14b   : > { %1880 = vmatpush.msra.mxu0 %v414_v18  ;;  %1899 = vmatpush.msra.mxu1 %v448_v19  ;;  %v466_v56 = vld [vmem:[%s2782_s6 + $0x638] sm:$0xff]  ;;  %v500_v57 = vld [vmem:[%s2782_s6 + $0x748] sm:$0xff] }
 0x14c   : > { %1920 = vmatpush.msra.mxu2 %v478_v20  ;;  %1939 = vmatpush.msra.mxu3 %v512_v21  ;;  %v400_v58 = vld [vmem:[%s2782_s6 + $0x428] sm:$0xff]  ;;  %v434_v59 = vld [vmem:[%s2782_s6 + $0x538] sm:$0xff] }
 0x14d   : > { %1881 = vmatpush.msra.mxu0 %v412_v22  ;;  %1900 = vmatpush.msra.mxu1 %v446_v23  ;;  %v464_v60 = vld [vmem:[%s2782_s6 + $0x628] sm:$0xff]  ;;  %v498_v1 = vld [vmem:[%s2782_s6 + $0x738] sm:$0xff] }
 0x14e   : > { %1921 = vmatpush.msra.mxu2 %v476_v24  ;;  %1940 = vmatpush.msra.mxu3 %v510_v25  ;;  %v398_v2 = vld [vmem:[%s2782_s6 + $0x418] sm:$0xff]  ;;  %v432_v3 = vld [vmem:[%s2782_s6 + $0x528] sm:$0xff] }
 0x14f   : > { %1882 = vmatpush.msra.mxu0 %v410_v29  ;;  %1901 = vmatpush.msra.mxu1 %v444_v30  ;;  %v462_v4 = vld [vmem:[%s2782_s6 + $0x618] sm:$0xff]  ;;  %v496_v5 = vld [vmem:[%s2782_s6 + $0x728] sm:$0xff] }
 0x150   : > { %1922 = vmatpush.msra.mxu2 %v474_v32  ;;  %1941 = vmatpush.msra.mxu3 %v508_v33  ;;  %v396_v6 = vld [vmem:[%s2782_s6 + $0x408] sm:$0xff]  ;;  %v430_v7 = vld [vmem:[%s2782_s6 + $0x518] sm:$0xff] }
 0x151   : > { %1883 = vmatpush.msra.mxu0 %v408_v34  ;;  %1902 = vmatpush.msra.mxu1 %v442_v35  ;;  %v460_v8 = vld [vmem:[%s2782_s6 + $0x608] sm:$0xff]  ;;  %v494_v11 = vld [vmem:[%s2782_s6 + $0x718] sm:$0xff] }
 0x152   : > { %1923 = vmatpush.msra.mxu2 %v472_v36  ;;  %1942 = vmatpush.msra.mxu3 %v506_v37  ;;  %v554_v12 = vld [vmem:[%s2782_s6 + $0x8f8] sm:$0xff]  ;;  %v428_v14 = vld [vmem:[%s2782_s6 + $0x508] sm:$0xff] }
 0x153   : > { %1884 = vmatpush.msra.mxu0 %v406_v38  ;;  %1903 = vmatpush.msra.mxu1 %v440_v39  ;;  %v618_v13 = vld [vmem:[%s2782_s6 + $0xaf8] sm:$0xff]  ;;  %v492_v17 = vld [vmem:[%s2782_s6 + $0x708] sm:$0xff] }
 0x154   : > { %1924 = vmatpush.msra.mxu2 %v470_v40  ;;  %1943 = vmatpush.msra.mxu3 %v504_v44  ;;  %v586_v18 = vld [vmem:[%s2782_s6 + $0x9f8] sm:$0xff]  ;;  %v616_v19 = vld [vmem:[%s2782_s6 + $0xae8] sm:$0xff] }
 0x155   : > { %1885 = vmatpush.msra.mxu0 %v404_v49  ;;  %1904 = vmatpush.msra.mxu1 %v438_v51  ;;  %v650_v20 = vld [vmem:[%s2782_s6 + $0xbf8] sm:$0xff]  ;;  %v584_v21 = vld [vmem:[%s2782_s6 + $0x9e8] sm:$0xff] }
 0x156   : > { %1925 = vmatpush.msra.mxu2 %v468_v52  ;;  %1944 = vmatpush.msra.mxu3 %v502_v53  ;;  %v648_v22 = vld [vmem:[%s2782_s6 + $0xbe8] sm:$0xff]  ;;  %v582_v24 = vld [vmem:[%s2782_s6 + $0x9d8] sm:$0xff] }
 0x157   : > { %1886 = vmatpush.msra.mxu0 %v402_v54  ;;  %1905 = vmatpush.msra.mxu1 %v436_v55  ;;  %v548_v23 = vld [vmem:[%s2782_s6 + $0x8c8] sm:$0xff]  ;;  %v546_v29 = vld [vmem:[%s2782_s6 + $0x8b8] sm:$0xff] }
 0x158   : > { %1926 = vmatpush.msra.mxu2 %v466_v56  ;;  %1945 = vmatpush.msra.mxu3 %v500_v57  ;;  %v612_v25 = vld [vmem:[%s2782_s6 + $0xac8] sm:$0xff]  ;;  %v610_v32 = vld [vmem:[%s2782_s6 + $0xab8] sm:$0xff] }
 0x159   : > { %1887 = vmatpush.msra.mxu0 %v400_v58  ;;  %1906 = vmatpush.msra.mxu1 %v434_v59  ;;  %v580_v30 = vld [vmem:[%s2782_s6 + $0x9c8] sm:$0xff]  ;;  %v578_v34 = vld [vmem:[%s2782_s6 + $0x9b8] sm:$0xff] }
 0x15a   : > { %1927 = vmatpush.msra.mxu2 %v464_v60  ;;  %1946 = vmatpush.msra.mxu3 %v498_v1  ;;  %v644_v33 = vld [vmem:[%s2782_s6 + $0xbc8] sm:$0xff]  ;;  %v642_v36 = vld [vmem:[%s2782_s6 + $0xbb8] sm:$0xff] }
 0x15b   : > { %1888 = vmatpush.msra.mxu0 %v398_v2  ;;  %1907 = vmatpush.msra.mxu1 %v432_v3  ;;  %v608_v35 = vld [vmem:[%s2782_s6 + $0xaa8] sm:$0xff]  ;;  %v574_v40 = vld [vmem:[%s2782_s6 + $0x998] sm:$0xff] }
 0x15c   : > { %1928 = vmatpush.msra.mxu2 %v462_v4  ;;  %1947 = vmatpush.msra.mxu3 %v496_v5  ;;  %v576_v37 = vld [vmem:[%s2782_s6 + $0x9a8] sm:$0xff]  ;;  %v538_v49 = vld [vmem:[%s2782_s6 + $0x878] sm:$0xff] }
 0x15d   : > { %1850 = vmatmul.f32.vlgmr.msrb.gmra.mxu2 %v2916_v45  ;;  %1889 = vmatpush.msra.mxu0 %v396_v6  ;;  %v552_v45 = vld [vmem:[%s2782_s6 + $0x8e8] sm:$0xff]  ;;  %v602_v52 = vld [vmem:[%s2782_s6 + $0xa78] sm:$0xff] }
 0x15e   : > { %1908 = vmatpush.msra.mxu1 %v430_v7  ;;  %1929 = vmatpush.msra.mxu2 %v460_v8  ;;  %v640_v38 = vld [vmem:[%s2782_s6 + $0xba8] sm:$0xff]  ;;  %v570_v55 = vld [vmem:[%s2782_s6 + $0x978] sm:$0xff] }
 0x15f   : > { %1948 = vmatpush.msra.mxu3 %v494_v11  ;;  %1810 = vmatmul.f32.vlgmr.msrb.gmra.mxu0 %v2918_v46  ;;  %v550_v46 = vld [vmem:[%s2782_s6 + $0x8d8] sm:$0xff]  ;;  %v540_v39 = vld [vmem:[%s2782_s6 + $0x888] sm:$0xff] }
 0x160   : > { %1870 = vmatmul.f32.vlgmr.msrb.gmra.mxu3 %v2920_v47  ;;  %1954 = vmatpush.msrb.mxu0 %v554_v12  ;;  %v614_v47 = vld [vmem:[%s2782_s6 + $0xad8] sm:$0xff]  ;;  %v604_v44 = vld [vmem:[%s2782_s6 + $0xa88] sm:$0xff] }
 0x161   : > { %1994 = vmatpush.msrb.mxu2 %v618_v13  ;;  %1909 = vmatpush.msra.mxu1 %v428_v14  ;;  %v572_v51 = vld [vmem:[%s2782_s6 + $0x988] sm:$0xff]  ;;  %v634_v57 = vld [vmem:[%s2782_s6 + $0xb78] sm:$0xff] }
 0x162   : > { %1949 = vmatpush.msra.mxu3 %v492_v17  ;;  %1830 = vmatmul.f32.vlgmr.msrb.gmra.mxu1 %v2922_v48  ;;  %v646_v48 = vld [vmem:[%s2782_s6 + $0xbd8] sm:$0xff]  ;;  %v636_v53 = vld [vmem:[%s2782_s6 + $0xb88] sm:$0xff] }
 0x163   : > { %1955 = vmatpush.msrb.mxu0 %v552_v45  ;;  %1974 = vmatpush.msrb.mxu1 %v586_v18  ;;  %v536_v54 = vld [vmem:[%s2782_s6 + $0x868] sm:$0xff]  ;;  %v534_v58 = vld [vmem:[%s2782_s6 + $0x858] sm:$0xff] }
 0x164   : > { %1995 = vmatpush.msrb.mxu2 %v616_v19  ;;  %2014 = vmatpush.msrb.mxu3 %v650_v20  ;;  %v600_v56 = vld [vmem:[%s2782_s6 + $0xa68] sm:$0xff]  ;;  %v598_v60 = vld [vmem:[%s2782_s6 + $0xa58] sm:$0xff] }
 0x165   : > { %1956 = vmatpush.msrb.mxu0 %v550_v46  ;;  %1975 = vmatpush.msrb.mxu1 %v584_v21  ;;  %v568_v59 = vld [vmem:[%s2782_s6 + $0x968] sm:$0xff]  ;;  %v566_v3 = vld [vmem:[%s2782_s6 + $0x958] sm:$0xff] }
 0x166   : > { %1996 = vmatpush.msrb.mxu2 %v614_v47  ;;  %2015 = vmatpush.msrb.mxu3 %v648_v22  ;;  %v632_v1 = vld [vmem:[%s2782_s6 + $0xb68] sm:$0xff]  ;;  %v630_v5 = vld [vmem:[%s2782_s6 + $0xb58] sm:$0xff] }
 0x167   : > { %1930 = vmatmul.f32.vlgmr.msra.gmra.mxu2 %v2936_v61  ;;  %1957 = vmatpush.msrb.mxu0 %v548_v23  ;;  %v544_v61 = vld [vmem:[%s2782_s6 + $0x8a8] sm:$0xff]  ;;  %v530_v6 = vld [vmem:[%s2782_s6 + $0x838] sm:$0xff] }
 0x168   : > { %1976 = vmatpush.msrb.mxu1 %v582_v24  ;;  %1997 = vmatpush.msrb.mxu2 %v612_v25  ;;  %v532_v2 = vld [vmem:[%s2782_s6 + $0x848] sm:$0xff]  ;;  %v594_v8 = vld [vmem:[%s2782_s6 + $0xa38] sm:$0xff] }
 0x169   : > { %2016 = vmatpush.msrb.mxu3 %v646_v48  ;;  %1890 = vmatmul.f32.vlgmr.msra.gmra.mxu0 %v2938_v62  ;;  %v542_v62 = vld [vmem:[%s2782_s6 + $0x898] sm:$0xff]  ;;  %v596_v4 = vld [vmem:[%s2782_s6 + $0xa48] sm:$0xff] }
 0x16a   : > { %1950 = vmatmul.f32.vlgmr.msra.gmra.mxu3 %v2940_v63  ;;  %1958 = vmatpush.msrb.mxu0 %v546_v29  ;;  %v606_v63 = vld [vmem:[%s2782_s6 + $0xa98] sm:$0xff]  ;;  %v564_v7 = vld [vmem:[%s2782_s6 + $0x948] sm:$0xff] }
 0x16b   : > { %1977 = vmatpush.msrb.mxu1 %v580_v30  ;;  %1998 = vmatpush.msrb.mxu2 %v610_v32  ;;  %v628_v11 = vld [vmem:[%s2782_s6 + $0xb48] sm:$0xff]  ;;  %v562_v13 = vld [vmem:[%s2782_s6 + $0x938] sm:$0xff] }
 0x16c   : > { %2017 = vmatpush.msrb.mxu3 %v644_v33  ;;  %1910 = vmatmul.f32.vlgmr.msra.gmra.mxu1 %v2942_v0  ;;  %v638_v0 = vld [vmem:[%s2782_s6 + $0xb98] sm:$0xff]  ;;  %v528_v12 = vld [vmem:[%s2782_s6 + $0x828] sm:$0xff] }
 0x16d   : > { %1959 = vmatpush.msrb.mxu0 %v544_v61  ;;  %1978 = vmatpush.msrb.mxu1 %v578_v34  ;;  %v592_v14 = vld [vmem:[%s2782_s6 + $0xa28] sm:$0xff]  ;;  %v626_v17 = vld [vmem:[%s2782_s6 + $0xb38] sm:$0xff] }
 0x16e   : > { %1999 = vmatpush.msrb.mxu2 %v608_v35  ;;  %2018 = vmatpush.msrb.mxu3 %v642_v36  ;;  %v526_v45 = vld [vmem:[%s2782_s6 + $0x818] sm:$0xff]  ;;  %v560_v18 = vld [vmem:[%s2782_s6 + $0x928] sm:$0xff] }
 0x16f   : > { %1960 = vmatpush.msrb.mxu0 %v542_v62  ;;  %1979 = vmatpush.msrb.mxu1 %v576_v37  ;;  %v590_v19 = vld [vmem:[%s2782_s6 + $0xa18] sm:$0xff]  ;;  %v624_v20 = vld [vmem:[%s2782_s6 + $0xb28] sm:$0xff] }
 0x170   : > { %2000 = vmatpush.msrb.mxu2 %v606_v63  ;;  %2019 = vmatpush.msrb.mxu3 %v640_v38  ;;  %v524_v46 = vld [vmem:[%s2782_s6 + $0x808] sm:$0xff]  ;;  %v558_v21 = vld [vmem:[%s2782_s6 + $0x918] sm:$0xff] }
 0x171   : > { %1961 = vmatpush.msrb.mxu0 %v540_v39  ;;  %1980 = vmatpush.msrb.mxu1 %v574_v40  ;;  %v588_v47 = vld [vmem:[%s2782_s6 + $0xa08] sm:$0xff]  ;;  %v622_v22 = vld [vmem:[%s2782_s6 + $0xb18] sm:$0xff] }
 0x172   : > { %2001 = vmatpush.msrb.mxu2 %v604_v44  ;;  %2020 = vmatpush.msrb.mxu3 %v638_v0  ;;  %v682_v23 = vld [vmem:[%s2782_s6 + $0xcf8] sm:$0xff]  ;;  %v556_v25 = vld [vmem:[%s2782_s6 + $0x908] sm:$0xff] }
 0x173   : > { %1962 = vmatpush.msrb.mxu0 %v538_v49  ;;  %1981 = vmatpush.msrb.mxu1 %v572_v51  ;;  %v746_v24 = vld [vmem:[%s2782_s6 + $0xef8] sm:$0xff]  ;;  %v620_v48 = vld [vmem:[%s2782_s6 + $0xb08] sm:$0xff] }
 0x174   : > { %2002 = vmatpush.msrb.mxu2 %v602_v52  ;;  %2021 = vmatpush.msrb.mxu3 %v636_v53  ;;  %v680_v29 = vld [vmem:[%s2782_s6 + $0xce8] sm:$0xff]  ;;  %v714_v30 = vld [vmem:[%s2782_s6 + $0xdf8] sm:$0xff] }
 0x175   : > { %1963 = vmatpush.msrb.mxu0 %v536_v54  ;;  %1982 = vmatpush.msrb.mxu1 %v570_v55  ;;  %v744_v32 = vld [vmem:[%s2782_s6 + $0xee8] sm:$0xff]  ;;  %v778_v33 = vld [vmem:[%s2782_s6 + $0xff8] sm:$0xff] }
 0x176   : > { %2003 = vmatpush.msrb.mxu2 %v600_v56  ;;  %2022 = vmatpush.msrb.mxu3 %v634_v57  ;;  %v742_v61 = vld [vmem:[%s2782_s6 + $0xed8] sm:$0xff]  ;;  %v776_v34 = vld [vmem:[%s2782_s6 + $0xfe8] sm:$0xff] }
 0x177   : > { %1964 = vmatpush.msrb.mxu0 %v534_v58  ;;  %1983 = vmatpush.msrb.mxu1 %v568_v59  ;;  %v676_v35 = vld [vmem:[%s2782_s6 + $0xcc8] sm:$0xff]  ;;  %v710_v36 = vld [vmem:[%s2782_s6 + $0xdd8] sm:$0xff] }
 0x178   : > { %2004 = vmatpush.msrb.mxu2 %v598_v60  ;;  %2023 = vmatpush.msrb.mxu3 %v632_v1  ;;  %v674_v62 = vld [vmem:[%s2782_s6 + $0xcb8] sm:$0xff]  ;;  %v708_v37 = vld [vmem:[%s2782_s6 + $0xdc8] sm:$0xff] }
 0x179   : > { %1965 = vmatpush.msrb.mxu0 %v532_v2  ;;  %1984 = vmatpush.msrb.mxu1 %v566_v3  ;;  %v738_v63 = vld [vmem:[%s2782_s6 + $0xeb8] sm:$0xff]  ;;  %v772_v38 = vld [vmem:[%s2782_s6 + $0xfc8] sm:$0xff] }
 0x17a   : > { %2005 = vmatpush.msrb.mxu2 %v596_v4  ;;  %2024 = vmatpush.msrb.mxu3 %v630_v5  ;;  %v672_v39 = vld [vmem:[%s2782_s6 + $0xca8] sm:$0xff]  ;;  %v706_v40 = vld [vmem:[%s2782_s6 + $0xdb8] sm:$0xff] }
 0x17b   : > { %1966 = vmatpush.msrb.mxu0 %v530_v6  ;;  %1985 = vmatpush.msrb.mxu1 %v564_v7  ;;  %v736_v44 = vld [vmem:[%s2782_s6 + $0xea8] sm:$0xff]  ;;  %v770_v0 = vld [vmem:[%s2782_s6 + $0xfb8] sm:$0xff] }
 0x17c   : > { %2006 = vmatpush.msrb.mxu2 %v594_v8  ;;  %2025 = vmatpush.msrb.mxu3 %v628_v11  ;;  %v670_v49 = vld [vmem:[%s2782_s6 + $0xc98] sm:$0xff]  ;;  %v704_v51 = vld [vmem:[%s2782_s6 + $0xda8] sm:$0xff] }
 0x17d   : > { %1967 = vmatpush.msrb.mxu0 %v528_v12  ;;  %1986 = vmatpush.msrb.mxu1 %v562_v13  ;;  %v734_v52 = vld [vmem:[%s2782_s6 + $0xe98] sm:$0xff]  ;;  %v768_v53 = vld [vmem:[%s2782_s6 + $0xfa8] sm:$0xff] }
 0x17e   : > { %2007 = vmatpush.msrb.mxu2 %v592_v14  ;;  %2026 = vmatpush.msrb.mxu3 %v626_v17  ;;  %v668_v54 = vld [vmem:[%s2782_s6 + $0xc88] sm:$0xff]  ;;  %v702_v55 = vld [vmem:[%s2782_s6 + $0xd98] sm:$0xff] }
 0x17f   : > { %1968 = vmatpush.msrb.mxu0 %v526_v45  ;;  %1987 = vmatpush.msrb.mxu1 %v560_v18  ;;  %v732_v56 = vld [vmem:[%s2782_s6 + $0xe88] sm:$0xff]  ;;  %v766_v57 = vld [vmem:[%s2782_s6 + $0xf98] sm:$0xff] }
 0x180   : > { %2008 = vmatpush.msrb.mxu2 %v590_v19  ;;  %2027 = vmatpush.msrb.mxu3 %v624_v20  ;;  %v666_v58 = vld [vmem:[%s2782_s6 + $0xc78] sm:$0xff]  ;;  %v700_v59 = vld [vmem:[%s2782_s6 + $0xd88] sm:$0xff] }
 0x181   : > { %1969 = vmatpush.msrb.mxu0 %v524_v46  ;;  %1988 = vmatpush.msrb.mxu1 %v558_v21  ;;  %v730_v60 = vld [vmem:[%s2782_s6 + $0xe78] sm:$0xff]  ;;  %v764_v1 = vld [vmem:[%s2782_s6 + $0xf88] sm:$0xff] }
 0x182   : > { %2009 = vmatpush.msrb.mxu2 %v588_v47  ;;  %2028 = vmatpush.msrb.mxu3 %v622_v22  ;;  %v664_v2 = vld [vmem:[%s2782_s6 + $0xc68] sm:$0xff]  ;;  %v698_v3 = vld [vmem:[%s2782_s6 + $0xd78] sm:$0xff] }
 0x183   : > { %1970 = vmatmul.f32.vlgmr.msrb.gmra.mxu0 %v2973_v26  ;;  %2010 = vmatmul.f32.vlgmr.msrb.gmra.mxu2 %v2975_v27  ;;  %v678_v26 = vld [vmem:[%s2782_s6 + $0xcd8] sm:$0xff]  ;;  %v712_v27 = vld [vmem:[%s2782_s6 + $0xde8] sm:$0xff] }
 0x184   : > { %2034 = vmatpush.msra.mxu0 %v682_v23  ;;  %2074 = vmatpush.msra.mxu2 %v746_v24  ;;  %v728_v4 = vld [vmem:[%s2782_s6 + $0xe68] sm:$0xff]  ;;  %v762_v5 = vld [vmem:[%s2782_s6 + $0xf78] sm:$0xff] }
 0x185   : > { %1989 = vmatpush.msrb.mxu1 %v556_v25  ;;  %2029 = vmatpush.msrb.mxu3 %v620_v48  ;;  %v662_v6 = vld [vmem:[%s2782_s6 + $0xc58] sm:$0xff]  ;;  %v696_v7 = vld [vmem:[%s2782_s6 + $0xd68] sm:$0xff] }
 0x186   : > { %1990 = vmatmul.f32.vlgmr.msrb.gmra.mxu1 %v2977_v28  ;;  %2030 = vmatmul.f32.vlgmr.msrb.gmra.mxu3 %v2981_v31  ;;  %v740_v28 = vld [vmem:[%s2782_s6 + $0xec8] sm:$0xff]  ;;  %v774_v31 = vld [vmem:[%s2782_s6 + $0xfd8] sm:$0xff] }
 0x187   : > { %2035 = vmatpush.msra.mxu0 %v680_v29  ;;  %2054 = vmatpush.msra.mxu1 %v714_v30  ;;  %v726_v8 = vld [vmem:[%s2782_s6 + $0xe58] sm:$0xff]  ;;  %v760_v11 = vld [vmem:[%s2782_s6 + $0xf68] sm:$0xff] }
 0x188   : > { %2075 = vmatpush.msra.mxu2 %v744_v32  ;;  %2094 = vmatpush.msra.mxu3 %v778_v33  ;;  %v660_v12 = vld [vmem:[%s2782_s6 + $0xc48] sm:$0xff]  ;;  %v694_v13 = vld [vmem:[%s2782_s6 + $0xd58] sm:$0xff] }
 0x189   : > { %2036 = vmatpush.msra.mxu0 %v678_v26  ;;  %2055 = vmatpush.msra.mxu1 %v712_v27  ;;  %v724_v14 = vld [vmem:[%s2782_s6 + $0xe48] sm:$0xff]  ;;  %v758_v17 = vld [vmem:[%s2782_s6 + $0xf58] sm:$0xff] }
 0x18a   : > { %2076 = vmatpush.msra.mxu2 %v742_v61  ;;  %2095 = vmatpush.msra.mxu3 %v776_v34  ;;  %v658_v45 = vld [vmem:[%s2782_s6 + $0xc38] sm:$0xff]  ;;  %v692_v18 = vld [vmem:[%s2782_s6 + $0xd48] sm:$0xff] }
 0x18b   : > { %2037 = vmatpush.msra.mxu0 %v676_v35  ;;  %2056 = vmatpush.msra.mxu1 %v710_v36  ;;  %v722_v19 = vld [vmem:[%s2782_s6 + $0xe38] sm:$0xff]  ;;  %v756_v20 = vld [vmem:[%s2782_s6 + $0xf48] sm:$0xff] }
 0x18c   : > { %2077 = vmatpush.msra.mxu2 %v740_v28  ;;  %2096 = vmatpush.msra.mxu3 %v774_v31  ;;  %v656_v46 = vld [vmem:[%s2782_s6 + $0xc28] sm:$0xff]  ;;  %v690_v21 = vld [vmem:[%s2782_s6 + $0xd38] sm:$0xff] }
 0x18d   : > { %2038 = vmatpush.msra.mxu0 %v674_v62  ;;  %2057 = vmatpush.msra.mxu1 %v708_v37  ;;  %v720_v47 = vld [vmem:[%s2782_s6 + $0xe28] sm:$0xff]  ;;  %v754_v22 = vld [vmem:[%s2782_s6 + $0xf38] sm:$0xff] }
 0x18e   : > { %2078 = vmatpush.msra.mxu2 %v738_v63  ;;  %2097 = vmatpush.msra.mxu3 %v772_v38  ;;  %v654_v23 = vld [vmem:[%s2782_s6 + $0xc18] sm:$0xff]  ;;  %v688_v24 = vld [vmem:[%s2782_s6 + $0xd28] sm:$0xff] }
 0x18f   : > { %2039 = vmatpush.msra.mxu0 %v672_v39  ;;  %2058 = vmatpush.msra.mxu1 %v706_v40  ;;  %v718_v25 = vld [vmem:[%s2782_s6 + $0xe18] sm:$0xff]  ;;  %v752_v48 = vld [vmem:[%s2782_s6 + $0xf28] sm:$0xff] }
 0x190   : > { %2079 = vmatpush.msra.mxu2 %v736_v44  ;;  %2098 = vmatpush.msra.mxu3 %v770_v0  ;;  %v652_v29 = vld [vmem:[%s2782_s6 + $0xc08] sm:$0xff]  ;;  %v686_v30 = vld [vmem:[%s2782_s6 + $0xd18] sm:$0xff] }
 0x191   : > { %2040 = vmatpush.msra.mxu0 %v670_v49  ;;  %2059 = vmatpush.msra.mxu1 %v704_v51  ;;  %v716_v32 = vld [vmem:[%s2782_s6 + $0xe08] sm:$0xff]  ;;  %v750_v33 = vld [vmem:[%s2782_s6 + $0xf18] sm:$0xff] }
 0x192   : > { %2080 = vmatpush.msra.mxu2 %v734_v52  ;;  %2099 = vmatpush.msra.mxu3 %v768_v53  ;;  %v810_v26 = vld [vmem:[%s2782_s6 + $0x10f8] sm:$0xff]  ;;  %v684_v61 = vld [vmem:[%s2782_s6 + $0xd08] sm:$0xff] }
 0x193   : > { %2041 = vmatpush.msra.mxu0 %v668_v54  ;;  %2060 = vmatpush.msra.mxu1 %v702_v55  ;;  %v874_v27 = vld [vmem:[%s2782_s6 + $0x12f8] sm:$0xff]  ;;  %v748_v34 = vld [vmem:[%s2782_s6 + $0xf08] sm:$0xff] }
 0x194   : > { %2081 = vmatpush.msra.mxu2 %v732_v56  ;;  %2100 = vmatpush.msra.mxu3 %v766_v57  ;;  %v808_v35 = vld [vmem:[%s2782_s6 + $0x10e8] sm:$0xff]  ;;  %v842_v36 = vld [vmem:[%s2782_s6 + $0x11f8] sm:$0xff] }
 0x195   : > { %2042 = vmatpush.msra.mxu0 %v666_v58  ;;  %2061 = vmatpush.msra.mxu1 %v700_v59  ;;  %v872_v28 = vld [vmem:[%s2782_s6 + $0x12e8] sm:$0xff]  ;;  %v906_v31 = vld [vmem:[%s2782_s6 + $0x13f8] sm:$0xff] }
 0x196   : > { %2082 = vmatpush.msra.mxu2 %v730_v60  ;;  %2101 = vmatpush.msra.mxu3 %v764_v1  ;;  %v870_v62 = vld [vmem:[%s2782_s6 + $0x12d8] sm:$0xff]  ;;  %v904_v37 = vld [vmem:[%s2782_s6 + $0x13e8] sm:$0xff] }
 0x197   : > { %2043 = vmatpush.msra.mxu0 %v664_v2  ;;  %2062 = vmatpush.msra.mxu1 %v698_v3  ;;  %v804_v63 = vld [vmem:[%s2782_s6 + $0x10c8] sm:$0xff]  ;;  %v838_v38 = vld [vmem:[%s2782_s6 + $0x11d8] sm:$0xff] }
 0x198   : > { %2083 = vmatpush.msra.mxu2 %v728_v4  ;;  %2102 = vmatpush.msra.mxu3 %v762_v5  ;;  %v802_v39 = vld [vmem:[%s2782_s6 + $0x10b8] sm:$0xff]  ;;  %v836_v40 = vld [vmem:[%s2782_s6 + $0x11c8] sm:$0xff] }
 0x199   : > { %2044 = vmatpush.msra.mxu0 %v662_v6  ;;  %2063 = vmatpush.msra.mxu1 %v696_v7  ;;  %v866_v44 = vld [vmem:[%s2782_s6 + $0x12b8] sm:$0xff]  ;;  %v900_v0 = vld [vmem:[%s2782_s6 + $0x13c8] sm:$0xff] }
 0x19a   : > { %2084 = vmatpush.msra.mxu2 %v726_v8  ;;  %2103 = vmatpush.msra.mxu3 %v760_v11  ;;  %v800_v49 = vld [vmem:[%s2782_s6 + $0x10a8] sm:$0xff]  ;;  %v834_v51 = vld [vmem:[%s2782_s6 + $0x11b8] sm:$0xff] }
 0x19b   : > { %2045 = vmatpush.msra.mxu0 %v660_v12  ;;  %2064 = vmatpush.msra.mxu1 %v694_v13  ;;  %v864_v52 = vld [vmem:[%s2782_s6 + $0x12a8] sm:$0xff]  ;;  %v898_v53 = vld [vmem:[%s2782_s6 + $0x13b8] sm:$0xff] }
 0x19c   : > { %2085 = vmatpush.msra.mxu2 %v724_v14  ;;  %2104 = vmatpush.msra.mxu3 %v758_v17  ;;  %v798_v54 = vld [vmem:[%s2782_s6 + $0x1098] sm:$0xff]  ;;  %v832_v55 = vld [vmem:[%s2782_s6 + $0x11a8] sm:$0xff] }
 0x19d   : > { %2046 = vmatpush.msra.mxu0 %v658_v45  ;;  %2065 = vmatpush.msra.mxu1 %v692_v18  ;;  %v862_v56 = vld [vmem:[%s2782_s6 + $0x1298] sm:$0xff]  ;;  %v896_v57 = vld [vmem:[%s2782_s6 + $0x13a8] sm:$0xff] }
 0x19e   : > { %2086 = vmatpush.msra.mxu2 %v722_v19  ;;  %2105 = vmatpush.msra.mxu3 %v756_v20  ;;  %v796_v58 = vld [vmem:[%s2782_s6 + $0x1088] sm:$0xff]  ;;  %v830_v59 = vld [vmem:[%s2782_s6 + $0x1198] sm:$0xff] }
 0x19f   : > { %2047 = vmatpush.msra.mxu0 %v656_v46  ;;  %2066 = vmatpush.msra.mxu1 %v690_v21  ;;  %v860_v60 = vld [vmem:[%s2782_s6 + $0x1288] sm:$0xff]  ;;  %v894_v1 = vld [vmem:[%s2782_s6 + $0x1398] sm:$0xff] }
 0x1a0   : > { %2087 = vmatpush.msra.mxu2 %v720_v47  ;;  %2106 = vmatpush.msra.mxu3 %v754_v22  ;;  %v794_v2 = vld [vmem:[%s2782_s6 + $0x1078] sm:$0xff]  ;;  %v828_v3 = vld [vmem:[%s2782_s6 + $0x1188] sm:$0xff] }
 0x1a1   : > { %2048 = vmatpush.msra.mxu0 %v654_v23  ;;  %2067 = vmatpush.msra.mxu1 %v688_v24  ;;  %v858_v4 = vld [vmem:[%s2782_s6 + $0x1278] sm:$0xff]  ;;  %v892_v5 = vld [vmem:[%s2782_s6 + $0x1388] sm:$0xff] }
 0x1a2   : > { %2088 = vmatpush.msra.mxu2 %v718_v25  ;;  %2107 = vmatpush.msra.mxu3 %v752_v48  ;;  %v792_v6 = vld [vmem:[%s2782_s6 + $0x1068] sm:$0xff]  ;;  %v826_v7 = vld [vmem:[%s2782_s6 + $0x1178] sm:$0xff] }
 0x1a3   : > { %2049 = vmatpush.msra.mxu0 %v652_v29  ;;  %2068 = vmatpush.msra.mxu1 %v686_v30  ;;  %v856_v8 = vld [vmem:[%s2782_s6 + $0x1268] sm:$0xff]  ;;  %v890_v11 = vld [vmem:[%s2782_s6 + $0x1378] sm:$0xff] }
 0x1a4   : > { %2089 = vmatpush.msra.mxu2 %v716_v32  ;;  %2108 = vmatpush.msra.mxu3 %v750_v33  ;;  %v790_v12 = vld [vmem:[%s2782_s6 + $0x1058] sm:$0xff]  ;;  %v824_v13 = vld [vmem:[%s2782_s6 + $0x1168] sm:$0xff] }
 0x1a5   : > { %2050 = vmatmul.f32.vlgmr.msra.gmra.mxu0 %v3052_v41  ;;  %2090 = vmatmul.f32.vlgmr.msra.gmra.mxu2 %v3054_v42  ;;  %v806_v41 = vld [vmem:[%s2782_s6 + $0x10d8] sm:$0xff]  ;;  %v840_v42 = vld [vmem:[%s2782_s6 + $0x11e8] sm:$0xff] }
 0x1a6   : > { %2114 = vmatpush.msrb.mxu0 %v810_v26  ;;  %2154 = vmatpush.msrb.mxu2 %v874_v27  ;;  %v854_v14 = vld [vmem:[%s2782_s6 + $0x1258] sm:$0xff]  ;;  %v888_v17 = vld [vmem:[%s2782_s6 + $0x1368] sm:$0xff] }
 0x1a7   : > { %2069 = vmatpush.msra.mxu1 %v684_v61  ;;  %2109 = vmatpush.msra.mxu3 %v748_v34  ;;  %v788_v45 = vld [vmem:[%s2782_s6 + $0x1048] sm:$0xff]  ;;  %v822_v18 = vld [vmem:[%s2782_s6 + $0x1158] sm:$0xff] }
 0x1a8   : > { %2070 = vmatmul.f32.vlgmr.msra.gmra.mxu1 %v3056_v43  ;;  %2110 = vmatmul.f32.vlgmr.msra.gmra.mxu3 %v3060_v50  ;;  %v868_v43 = vld [vmem:[%s2782_s6 + $0x12c8] sm:$0xff]  ;;  %v902_v50 = vld [vmem:[%s2782_s6 + $0x13d8] sm:$0xff] }
 0x1a9   : > { %2115 = vmatpush.msrb.mxu0 %v808_v35  ;;  %2134 = vmatpush.msrb.mxu1 %v842_v36  ;;  %v852_v19 = vld [vmem:[%s2782_s6 + $0x1248] sm:$0xff]  ;;  %v886_v20 = vld [vmem:[%s2782_s6 + $0x1358] sm:$0xff] }
 0x1aa   : > { %2155 = vmatpush.msrb.mxu2 %v872_v28  ;;  %2174 = vmatpush.msrb.mxu3 %v906_v31  ;;  %v786_v46 = vld [vmem:[%s2782_s6 + $0x1038] sm:$0xff]  ;;  %v820_v21 = vld [vmem:[%s2782_s6 + $0x1148] sm:$0xff] }
 0x1ab   : > { %2116 = vmatpush.msrb.mxu0 %v806_v41  ;;  %2135 = vmatpush.msrb.mxu1 %v840_v42  ;;  %v850_v47 = vld [vmem:[%s2782_s6 + $0x1238] sm:$0xff]  ;;  %v884_v22 = vld [vmem:[%s2782_s6 + $0x1348] sm:$0xff] }
 0x1ac   : > { %2156 = vmatpush.msrb.mxu2 %v870_v62  ;;  %2175 = vmatpush.msrb.mxu3 %v904_v37  ;;  %v784_v23 = vld [vmem:[%s2782_s6 + $0x1028] sm:$0xff]  ;;  %v818_v24 = vld [vmem:[%s2782_s6 + $0x1138] sm:$0xff] }
 0x1ad   : > { %2117 = vmatpush.msrb.mxu0 %v804_v63  ;;  %2136 = vmatpush.msrb.mxu1 %v838_v38  ;;  %v848_v25 = vld [vmem:[%s2782_s6 + $0x1228] sm:$0xff]  ;;  %v882_v48 = vld [vmem:[%s2782_s6 + $0x1338] sm:$0xff] }
 0x1ae   : > { %2157 = vmatpush.msrb.mxu2 %v868_v43  ;;  %2176 = vmatpush.msrb.mxu3 %v902_v50  ;;  %v782_v29 = vld [vmem:[%s2782_s6 + $0x1018] sm:$0xff]  ;;  %v816_v30 = vld [vmem:[%s2782_s6 + $0x1128] sm:$0xff] }
 0x1af   : > { %2118 = vmatpush.msrb.mxu0 %v802_v39  ;;  %2137 = vmatpush.msrb.mxu1 %v836_v40  ;;  %v846_v32 = vld [vmem:[%s2782_s6 + $0x1218] sm:$0xff]  ;;  %v880_v33 = vld [vmem:[%s2782_s6 + $0x1328] sm:$0xff] }
 0x1b0   : > { %2158 = vmatpush.msrb.mxu2 %v866_v44  ;;  %2177 = vmatpush.msrb.mxu3 %v900_v0  ;;  %v780_v26 = vld [vmem:[%s2782_s6 + $0x1008] sm:$0xff]  ;;  %v814_v27 = vld [vmem:[%s2782_s6 + $0x1118] sm:$0xff] }
 0x1b1   : > { %2119 = vmatpush.msrb.mxu0 %v800_v49  ;;  %2138 = vmatpush.msrb.mxu1 %v834_v51  ;;  %v844_v61 = vld [vmem:[%s2782_s6 + $0x1208] sm:$0xff]  ;;  %v878_v34 = vld [vmem:[%s2782_s6 + $0x1318] sm:$0xff] }
 0x1b2   : > { %2159 = vmatpush.msrb.mxu2 %v864_v52  ;;  %2178 = vmatpush.msrb.mxu3 %v898_v53  ;;  %v938_v35 = vld [vmem:[%s2782_s6 + $0x14f8] sm:$0xff]  ;;  %v812_v28 = vld [vmem:[%s2782_s6 + $0x1108] sm:$0xff] }
 0x1b3   : > { %2120 = vmatpush.msrb.mxu0 %v798_v54  ;;  %2139 = vmatpush.msrb.mxu1 %v832_v55  ;;  %v1002_v36 = vld [vmem:[%s2782_s6 + $0x16f8] sm:$0xff]  ;;  %v876_v31 = vld [vmem:[%s2782_s6 + $0x1308] sm:$0xff] }
 0x1b4   : > { %2160 = vmatpush.msrb.mxu2 %v862_v56  ;;  %2179 = vmatpush.msrb.mxu3 %v896_v57  ;;  %v936_v41 = vld [vmem:[%s2782_s6 + $0x14e8] sm:$0xff]  ;;  %v970_v42 = vld [vmem:[%s2782_s6 + $0x15f8] sm:$0xff] }
 0x1b5   : > { %2121 = vmatpush.msrb.mxu0 %v796_v58  ;;  %2140 = vmatpush.msrb.mxu1 %v830_v59  ;;  %v1000_v62 = vld [vmem:[%s2782_s6 + $0x16e8] sm:$0xff]  ;;  %v1034_v37 = vld [vmem:[%s2782_s6 + $0x17f8] sm:$0xff] }
 0x1b6   : > { %2161 = vmatpush.msrb.mxu2 %v860_v60  ;;  %2180 = vmatpush.msrb.mxu3 %v894_v1  ;;  %v998_v63 = vld [vmem:[%s2782_s6 + $0x16d8] sm:$0xff]  ;;  %v1032_v38 = vld [vmem:[%s2782_s6 + $0x17e8] sm:$0xff] }
 0x1b7   : > { %2122 = vmatpush.msrb.mxu0 %v794_v2  ;;  %2141 = vmatpush.msrb.mxu1 %v828_v3  ;;  %v932_v43 = vld [vmem:[%s2782_s6 + $0x14c8] sm:$0xff]  ;;  %v966_v50 = vld [vmem:[%s2782_s6 + $0x15d8] sm:$0xff] }
 0x1b8   : > { %2162 = vmatpush.msrb.mxu2 %v858_v4  ;;  %2181 = vmatpush.msrb.mxu3 %v892_v5  ;;  %v930_v39 = vld [vmem:[%s2782_s6 + $0x14b8] sm:$0xff]  ;;  %v964_v40 = vld [vmem:[%s2782_s6 + $0x15c8] sm:$0xff] }
 0x1b9   : > { %2123 = vmatpush.msrb.mxu0 %v792_v6  ;;  %2142 = vmatpush.msrb.mxu1 %v826_v7  ;;  %v994_v44 = vld [vmem:[%s2782_s6 + $0x16b8] sm:$0xff]  ;;  %v1028_v0 = vld [vmem:[%s2782_s6 + $0x17c8] sm:$0xff] }
 0x1ba   : > { %2163 = vmatpush.msrb.mxu2 %v856_v8  ;;  %2182 = vmatpush.msrb.mxu3 %v890_v11  ;;  %v928_v49 = vld [vmem:[%s2782_s6 + $0x14a8] sm:$0xff]  ;;  %v962_v51 = vld [vmem:[%s2782_s6 + $0x15b8] sm:$0xff] }
 0x1bb   : > { %2124 = vmatpush.msrb.mxu0 %v790_v12  ;;  %2143 = vmatpush.msrb.mxu1 %v824_v13  ;;  %v992_v52 = vld [vmem:[%s2782_s6 + $0x16a8] sm:$0xff]  ;;  %v1026_v53 = vld [vmem:[%s2782_s6 + $0x17b8] sm:$0xff] }
 0x1bc   : > { %2164 = vmatpush.msrb.mxu2 %v854_v14  ;;  %2183 = vmatpush.msrb.mxu3 %v888_v17  ;;  %v926_v54 = vld [vmem:[%s2782_s6 + $0x1498] sm:$0xff]  ;;  %v960_v55 = vld [vmem:[%s2782_s6 + $0x15a8] sm:$0xff] }
 0x1bd   : > { %2125 = vmatpush.msrb.mxu0 %v788_v45  ;;  %2144 = vmatpush.msrb.mxu1 %v822_v18  ;;  %v990_v56 = vld [vmem:[%s2782_s6 + $0x1698] sm:$0xff]  ;;  %v1024_v57 = vld [vmem:[%s2782_s6 + $0x17a8] sm:$0xff] }
 0x1be   : > { %2165 = vmatpush.msrb.mxu2 %v852_v19  ;;  %2184 = vmatpush.msrb.mxu3 %v886_v20  ;;  %v924_v58 = vld [vmem:[%s2782_s6 + $0x1488] sm:$0xff]  ;;  %v958_v59 = vld [vmem:[%s2782_s6 + $0x1598] sm:$0xff] }
 0x1bf   : > { %2126 = vmatpush.msrb.mxu0 %v786_v46  ;;  %2145 = vmatpush.msrb.mxu1 %v820_v21  ;;  %v988_v60 = vld [vmem:[%s2782_s6 + $0x1688] sm:$0xff]  ;;  %v1022_v1 = vld [vmem:[%s2782_s6 + $0x1798] sm:$0xff] }
 0x1c0   : > { %2166 = vmatpush.msrb.mxu2 %v850_v47  ;;  %2185 = vmatpush.msrb.mxu3 %v884_v22  ;;  %v922_v2 = vld [vmem:[%s2782_s6 + $0x1478] sm:$0xff]  ;;  %v956_v3 = vld [vmem:[%s2782_s6 + $0x1588] sm:$0xff] }
 0x1c1   : > { %2127 = vmatpush.msrb.mxu0 %v784_v23  ;;  %2146 = vmatpush.msrb.mxu1 %v818_v24  ;;  %v986_v4 = vld [vmem:[%s2782_s6 + $0x1678] sm:$0xff]  ;;  %v1020_v5 = vld [vmem:[%s2782_s6 + $0x1788] sm:$0xff] }
 0x1c2   : > { %2167 = vmatpush.msrb.mxu2 %v848_v25  ;;  %2186 = vmatpush.msrb.mxu3 %v882_v48  ;;  %v920_v6 = vld [vmem:[%s2782_s6 + $0x1468] sm:$0xff]  ;;  %v954_v7 = vld [vmem:[%s2782_s6 + $0x1578] sm:$0xff] }
 0x1c3   : > { %2128 = vmatpush.msrb.mxu0 %v782_v29  ;;  %2147 = vmatpush.msrb.mxu1 %v816_v30  ;;  %v984_v8 = vld [vmem:[%s2782_s6 + $0x1668] sm:$0xff]  ;;  %v1018_v11 = vld [vmem:[%s2782_s6 + $0x1778] sm:$0xff] }
 0x1c4   : > { %2168 = vmatpush.msrb.mxu2 %v846_v32  ;;  %2187 = vmatpush.msrb.mxu3 %v880_v33  ;;  %v918_v12 = vld [vmem:[%s2782_s6 + $0x1458] sm:$0xff]  ;;  %v952_v13 = vld [vmem:[%s2782_s6 + $0x1568] sm:$0xff] }
 0x1c5   : > { %2129 = vmatpush.msrb.mxu0 %v780_v26  ;;  %2148 = vmatpush.msrb.mxu1 %v814_v27  ;;  %v982_v14 = vld [vmem:[%s2782_s6 + $0x1658] sm:$0xff]  ;;  %v1016_v17 = vld [vmem:[%s2782_s6 + $0x1768] sm:$0xff] }
 0x1c6   : > { %2169 = vmatpush.msrb.mxu2 %v844_v61  ;;  %2188 = vmatpush.msrb.mxu3 %v878_v34  ;;  %v916_v45 = vld [vmem:[%s2782_s6 + $0x1448] sm:$0xff]  ;;  %v950_v18 = vld [vmem:[%s2782_s6 + $0x1558] sm:$0xff] }
 0x1c7   : > { %2130 = vmatmul.f32.vlgmr.msrb.gmra.mxu0 %v3180_v9  ;;  %2170 = vmatmul.f32.vlgmr.msrb.gmra.mxu2 %v3182_v10  ;;  %v934_v9 = vld [vmem:[%s2782_s6 + $0x14d8] sm:$0xff]  ;;  %v968_v10 = vld [vmem:[%s2782_s6 + $0x15e8] sm:$0xff] }
 0x1c8   : > { %2194 = vmatpush.msra.mxu0 %v938_v35  ;;  %2234 = vmatpush.msra.mxu2 %v1002_v36  ;;  %v980_v19 = vld [vmem:[%s2782_s6 + $0x1648] sm:$0xff]  ;;  %v1014_v20 = vld [vmem:[%s2782_s6 + $0x1758] sm:$0xff] }
 0x1c9   : > { %2149 = vmatpush.msrb.mxu1 %v812_v28  ;;  %2189 = vmatpush.msrb.mxu3 %v876_v31  ;;  %v914_v46 = vld [vmem:[%s2782_s6 + $0x1438] sm:$0xff]  ;;  %v948_v21 = vld [vmem:[%s2782_s6 + $0x1548] sm:$0xff] }
 0x1ca   : > { %2150 = vmatmul.f32.vlgmr.msrb.gmra.mxu1 %v3190_v15  ;;  %2190 = vmatmul.f32.vlgmr.msrb.gmra.mxu3 %v3192_v16  ;;  %v996_v15 = vld [vmem:[%s2782_s6 + $0x16c8] sm:$0xff]  ;;  %v1030_v16 = vld [vmem:[%s2782_s6 + $0x17d8] sm:$0xff] }
 0x1cb   : > { %2195 = vmatpush.msra.mxu0 %v936_v41  ;;  %2214 = vmatpush.msra.mxu1 %v970_v42  ;;  %v978_v47 = vld [vmem:[%s2782_s6 + $0x1638] sm:$0xff]  ;;  %v1012_v22 = vld [vmem:[%s2782_s6 + $0x1748] sm:$0xff] }
 0x1cc   : > { %2235 = vmatpush.msra.mxu2 %v1000_v62  ;;  %2254 = vmatpush.msra.mxu3 %v1034_v37  ;;  %v912_v23 = vld [vmem:[%s2782_s6 + $0x1428] sm:$0xff]  ;;  %v946_v24 = vld [vmem:[%s2782_s6 + $0x1538] sm:$0xff] }
 0x1cd   : > { %2196 = vmatpush.msra.mxu0 %v934_v9  ;;  %2215 = vmatpush.msra.mxu1 %v968_v10  ;;  %v976_v25 = vld [vmem:[%s2782_s6 + $0x1628] sm:$0xff]  ;;  %v1010_v48 = vld [vmem:[%s2782_s6 + $0x1738] sm:$0xff] }
 0x1ce   : > { %2236 = vmatpush.msra.mxu2 %v998_v63  ;;  %2255 = vmatpush.msra.mxu3 %v1032_v38  ;;  %v910_v29 = vld [vmem:[%s2782_s6 + $0x1418] sm:$0xff]  ;;  %v944_v30 = vld [vmem:[%s2782_s6 + $0x1528] sm:$0xff] }
 0x1cf   : > { %2197 = vmatpush.msra.mxu0 %v932_v43  ;;  %2216 = vmatpush.msra.mxu1 %v966_v50  ;;  %v974_v32 = vld [vmem:[%s2782_s6 + $0x1618] sm:$0xff]  ;;  %v1008_v33 = vld [vmem:[%s2782_s6 + $0x1728] sm:$0xff] }
 0x1d0   : > { %2237 = vmatpush.msra.mxu2 %v996_v15  ;;  %2256 = vmatpush.msra.mxu3 %v1030_v16  ;;  %v908_v26 = vld [vmem:[%s2782_s6 + $0x1408] sm:$0xff]  ;;  %v942_v27 = vld [vmem:[%s2782_s6 + $0x1518] sm:$0xff] }
 0x1d1   : > { %2198 = vmatpush.msra.mxu0 %v930_v39  ;;  %2217 = vmatpush.msra.mxu1 %v964_v40  ;;  %v972_v61 = vld [vmem:[%s2782_s6 + $0x1608] sm:$0xff]  ;;  %v1006_v34 = vld [vmem:[%s2782_s6 + $0x1718] sm:$0xff] }
 0x1d2   : > { %2238 = vmatpush.msra.mxu2 %v994_v44  ;;  %2257 = vmatpush.msra.mxu3 %v1028_v0  ;;  %v1066_v35 = vld [vmem:[%s2782_s6 + $0x18f8] sm:$0xff]  ;;  %v940_v28 = vld [vmem:[%s2782_s6 + $0x1508] sm:$0xff] }
 0x1d3   : > { %2199 = vmatpush.msra.mxu0 %v928_v49  ;;  %2218 = vmatpush.msra.mxu1 %v962_v51  ;;  %v1130_v36 = vld [vmem:[%s2782_s6 + $0x1af8] sm:$0xff]  ;;  %v1004_v31 = vld [vmem:[%s2782_s6 + $0x1708] sm:$0xff] }
 0x1d4   : > { %2239 = vmatpush.msra.mxu2 %v992_v52  ;;  %2258 = vmatpush.msra.mxu3 %v1026_v53  ;;  %v2574_v41 = vld.sshfl [vmem:[#allocation1 + $0x20] sm:$0xff pattern:$0x73625140]  ;;  %v2575_v42 = vld.sshfl [vmem:[#allocation1 + $0x30] sm:$0xff pattern:$0x73625140] }
 0x1d5   : > { %2200 = vmatpush.msra.mxu0 %v926_v54  ;;  %2219 = vmatpush.msra.mxu1 %v960_v55  ;;  %v1064_v62 = vld [vmem:[%s2782_s6 + $0x18e8] sm:$0xff]  ;;  %v1098_v37 = vld [vmem:[%s2782_s6 + $0x19f8] sm:$0xff] }
 0x1d6   : > { %2240 = vmatpush.msra.mxu2 %v990_v56  ;;  %2259 = vmatpush.msra.mxu3 %v1024_v57  ;;  %v1128_v9 = vld [vmem:[%s2782_s6 + $0x1ae8] sm:$0xff]  ;;  %v1162_v10 = vld [vmem:[%s2782_s6 + $0x1bf8] sm:$0xff] }
 0x1d7   : > { %2201 = vmatpush.msra.mxu0 %v924_v58  ;;  %2220 = vmatpush.msra.mxu1 %v958_v59  ;;  %v2576_v63 = vld.sshfl [vmem:[#allocation1 + $0x28] sm:$0xff pattern:$0x73625140]  ;;  %v2577_v38 = vld.sshfl [vmem:[#allocation1 + $0x38] sm:$0xff pattern:$0x73625140] }
 0x1d8   : > { %2241 = vmatpush.msra.mxu2 %v988_v60  ;;  %2260 = vmatpush.msra.mxu3 %v1022_v1  ;;  %v1062_v43 = vld [vmem:[%s2782_s6 + $0x18d8] sm:$0xff]  ;;  %v1096_v50 = vld [vmem:[%s2782_s6 + $0x19e8] sm:$0xff] }
 0x1d9   : > { %2202 = vmatpush.msra.mxu0 %v922_v2  ;;  %2221 = vmatpush.msra.mxu1 %v956_v3  ;;  %v1126_v15 = vld [vmem:[%s2782_s6 + $0x1ad8] sm:$0xff]  ;;  %v1160_v16 = vld [vmem:[%s2782_s6 + $0x1be8] sm:$0xff] }
 0x1da   : > { %2242 = vmatpush.msra.mxu2 %v986_v4  ;;  %2261 = vmatpush.msra.mxu3 %v1020_v5  ;;  %v1060_v39 = vld [vmem:[%s2782_s6 + $0x18c8] sm:$0xff]  ;;  %v1094_v40 = vld [vmem:[%s2782_s6 + $0x19d8] sm:$0xff] }
 0x1db   : > { %2203 = vmatpush.msra.mxu0 %v920_v6  ;;  %2222 = vmatpush.msra.mxu1 %v954_v7  ;;  %v1124_v44 = vld [vmem:[%s2782_s6 + $0x1ac8] sm:$0xff]  ;;  %v1158_v0 = vld [vmem:[%s2782_s6 + $0x1bd8] sm:$0xff] }
 0x1dc   : > { %2243 = vmatpush.msra.mxu2 %v984_v8  ;;  %2262 = vmatpush.msra.mxu3 %v1018_v11  ;;  %v1058_v49 = vld [vmem:[%s2782_s6 + $0x18b8] sm:$0xff]  ;;  %v1092_v51 = vld [vmem:[%s2782_s6 + $0x19c8] sm:$0xff] }
 0x1dd   : > { %2204 = vmatpush.msra.mxu0 %v918_v12  ;;  %2223 = vmatpush.msra.mxu1 %v952_v13  ;;  %v1122_v52 = vld [vmem:[%s2782_s6 + $0x1ab8] sm:$0xff]  ;;  %v1156_v53 = vld [vmem:[%s2782_s6 + $0x1bc8] sm:$0xff] }
 0x1de   : > { %2244 = vmatpush.msra.mxu2 %v982_v14  ;;  %2263 = vmatpush.msra.mxu3 %v1016_v17  ;;  %v1056_v54 = vld [vmem:[%s2782_s6 + $0x18a8] sm:$0xff]  ;;  %v1090_v55 = vld [vmem:[%s2782_s6 + $0x19b8] sm:$0xff] }
 0x1df   : > { %2205 = vmatpush.msra.mxu0 %v916_v45  ;;  %2224 = vmatpush.msra.mxu1 %v950_v18  ;;  %v1120_v56 = vld [vmem:[%s2782_s6 + $0x1aa8] sm:$0xff]  ;;  %v1154_v57 = vld [vmem:[%s2782_s6 + $0x1bb8] sm:$0xff] }
 0x1e0   : > { %2245 = vmatpush.msra.mxu2 %v980_v19  ;;  %2264 = vmatpush.msra.mxu3 %v1014_v20  ;;  %v1054_v58 = vld [vmem:[%s2782_s6 + $0x1898] sm:$0xff]  ;;  %v1088_v59 = vld [vmem:[%s2782_s6 + $0x19a8] sm:$0xff] }
 0x1e1   : > { %2206 = vmatpush.msra.mxu0 %v914_v46  ;;  %2225 = vmatpush.msra.mxu1 %v948_v21  ;;  %v1118_v60 = vld [vmem:[%s2782_s6 + $0x1a98] sm:$0xff]  ;;  %v1152_v1 = vld [vmem:[%s2782_s6 + $0x1ba8] sm:$0xff] }
 0x1e2   : > { %2246 = vmatpush.msra.mxu2 %v978_v47  ;;  %2265 = vmatpush.msra.mxu3 %v1012_v22  ;;  %v1052_v2 = vld [vmem:[%s2782_s6 + $0x1888] sm:$0xff]  ;;  %v1086_v3 = vld [vmem:[%s2782_s6 + $0x1998] sm:$0xff] }
 0x1e3   : > { %2207 = vmatpush.msra.mxu0 %v912_v23  ;;  %2226 = vmatpush.msra.mxu1 %v946_v24  ;;  %v1116_v4 = vld [vmem:[%s2782_s6 + $0x1a88] sm:$0xff]  ;;  %v1150_v5 = vld [vmem:[%s2782_s6 + $0x1b98] sm:$0xff] }
 0x1e4   : > { %2247 = vmatpush.msra.mxu2 %v976_v25  ;;  %2266 = vmatpush.msra.mxu3 %v1010_v48  ;;  %v1050_v6 = vld [vmem:[%s2782_s6 + $0x1878] sm:$0xff]  ;;  %v1084_v7 = vld [vmem:[%s2782_s6 + $0x1988] sm:$0xff] }
 0x1e5   : > { %2208 = vmatpush.msra.mxu0 %v910_v29  ;;  %2227 = vmatpush.msra.mxu1 %v944_v30  ;;  %v1114_v8 = vld [vmem:[%s2782_s6 + $0x1a78] sm:$0xff]  ;;  %v1148_v11 = vld [vmem:[%s2782_s6 + $0x1b88] sm:$0xff]  ;;  %v3777_v29 = vpop.f32.mrf.mxu1 }
 0x1e6   : > { %2248 = vmatpush.msra.mxu2 %v974_v32  ;;  %2267 = vmatpush.msra.mxu3 %v1008_v33  ;;  %v1048_v12 = vld [vmem:[%s2782_s6 + $0x1868] sm:$0xff]  ;;  %v1082_v13 = vld [vmem:[%s2782_s6 + $0x1978] sm:$0xff] }
 0x1e7   : > { %2209 = vmatpush.msra.mxu0 %v908_v26  ;;  %2228 = vmatpush.msra.mxu1 %v942_v27  ;;  %v1112_v14 = vld [vmem:[%s2782_s6 + $0x1a68] sm:$0xff]  ;;  %v1146_v17 = vld [vmem:[%s2782_s6 + $0x1b78] sm:$0xff]  ;;  %v3783_v27 = vpop.f32.mrf.mxu0 }
 0x1e8   : > { %2249 = vmatpush.msra.mxu2 %v972_v61  ;;  %2268 = vmatpush.msra.mxu3 %v1006_v34  ;;  %v1046_v45 = vld [vmem:[%s2782_s6 + $0x1858] sm:$0xff]  ;;  %v1080_v18 = vld [vmem:[%s2782_s6 + $0x1968] sm:$0xff] }
 0x1e9   : > { %2210 = vmatmul.f32.vlgmr.msra.gmra.mxu0 %v2574_v41  ;;  %2250 = vmatmul.f32.vlgmr.msra.gmra.mxu2 %v2575_v42  ;;  %v1110_v19 = vld [vmem:[%s2782_s6 + $0x1a58] sm:$0xff]  ;;  %v1144_v20 = vld [vmem:[%s2782_s6 + $0x1b68] sm:$0xff] }
 0x1ea   : > { %2274 = vmatpush.msrb.mxu0 %v1066_v35  ;;  %2314 = vmatpush.msrb.mxu2 %v1130_v36  ;;  %v1044_v46 = vld [vmem:[%s2782_s6 + $0x1848] sm:$0xff]  ;;  %v1078_v21 = vld [vmem:[%s2782_s6 + $0x1958] sm:$0xff] }
 0x1eb   : > { %2229 = vmatpush.msra.mxu1 %v940_v28  ;;  %2269 = vmatpush.msra.mxu3 %v1004_v31  ;;  %v1108_v47 = vld [vmem:[%s2782_s6 + $0x1a48] sm:$0xff]  ;;  %v1142_v22 = vld [vmem:[%s2782_s6 + $0x1b58] sm:$0xff]  ;;  %v1291_v28 = vpop.f32.mrf.mxu2 }
 0x1ec   : > { %2230 = vmatmul.f32.vlgmr.msra.gmra.mxu1 %v2576_v63  ;;  %2270 = vmatmul.f32.vlgmr.msra.gmra.mxu3 %v2577_v38  ;;  %v1042_v23 = vld [vmem:[%s2782_s6 + $0x1838] sm:$0xff]  ;;  %v1076_v24 = vld [vmem:[%s2782_s6 + $0x1948] sm:$0xff] }
 0x1ed   : > { %2275 = vmatpush.msrb.mxu0 %v1064_v62  ;;  %2294 = vmatpush.msrb.mxu1 %v1098_v37  ;;  %v1106_v25 = vld [vmem:[%s2782_s6 + $0x1a38] sm:$0xff]  ;;  %v1140_v48 = vld [vmem:[%s2782_s6 + $0x1b48] sm:$0xff] }
 0x1ee   : > { %2315 = vmatpush.msrb.mxu2 %v1128_v9  ;;  %2334 = vmatpush.msrb.mxu3 %v1162_v10  ;;  %v1040_v30 = vld [vmem:[%s2782_s6 + $0x1828] sm:$0xff]  ;;  %v1074_v32 = vld [vmem:[%s2782_s6 + $0x1938] sm:$0xff]  ;;  %v1311_v10 = vpop.f32.mrf.mxu3 }
 0x1ef   : > { %2276 = vmatpush.msrb.mxu0 %v1062_v43  ;;  %2295 = vmatpush.msrb.mxu1 %v1096_v50  ;;  %v1104_v33 = vld [vmem:[%s2782_s6 + $0x1a28] sm:$0xff]  ;;  %v1138_v26 = vld [vmem:[%s2782_s6 + $0x1b38] sm:$0xff]  ;;  %v1351_v43 = vpop.f32.mrf.mxu1 }
 0x1f0   : > { %2316 = vmatpush.msrb.mxu2 %v1126_v15  ;;  %2335 = vmatpush.msrb.mxu3 %v1160_v16  ;;  %v1038_v61 = vld [vmem:[%s2782_s6 + $0x1818] sm:$0xff]  ;;  %v1072_v34 = vld [vmem:[%s2782_s6 + $0x1928] sm:$0xff]  ;;  %v1331_v16 = vpop.f32.mrf.mxu0 }
 0x1f1   : > { %2277 = vmatpush.msrb.mxu0 %v1060_v39  ;;  %2296 = vmatpush.msrb.mxu1 %v1094_v40  ;;  %v1102_v35 = vld [vmem:[%s2782_s6 + $0x1a18] sm:$0xff]  ;;  %v1136_v36 = vld [vmem:[%s2782_s6 + $0x1b28] sm:$0xff] }
 0x1f2   : > { %2317 = vmatpush.msrb.mxu2 %v1124_v44  ;;  %2336 = vmatpush.msrb.mxu3 %v1158_v0  ;;  %v1036_v31 = vld [vmem:[%s2782_s6 + $0x1808] sm:$0xff]  ;;  %v1070_v41 = vld [vmem:[%s2782_s6 + $0x1918] sm:$0xff] }
 0x1f3   : > { %2278 = vmatpush.msrb.mxu0 %v1058_v49  ;;  %2297 = vmatpush.msrb.mxu1 %v1092_v51  ;;  %v1100_v42 = vld [vmem:[%s2782_s6 + $0x1a08] sm:$0xff]  ;;  %v1134_v62 = vld [vmem:[%s2782_s6 + $0x1b18] sm:$0xff]  ;;  %v1371_v39 = vpop.f32.mrf.mxu2 }
 0x1f4   : > { %2318 = vmatpush.msrb.mxu2 %v1122_v52  ;;  %2337 = vmatpush.msrb.mxu3 %v1156_v53  ;;  %v1068_v37 = vld [vmem:[%s2782_s6 + $0x1908] sm:$0xff]  ;;  %v2578_v63 = vld.sshfl [vmem:[#allocation1] sm:$0xff pattern:$0x73625140] }
 0x1f5   : > { %2279 = vmatpush.msrb.mxu0 %v1056_v54  ;;  %2298 = vmatpush.msrb.mxu1 %v1090_v55  ;;  %v1132_v9 = vld [vmem:[%s2782_s6 + $0x1b08] sm:$0xff]  ;;  %v2580_v50 = vld.sshfl [vmem:[#allocation1 + $0x8] sm:$0xff pattern:$0x73625140] }
 0x1f6   : > { %2319 = vmatpush.msrb.mxu2 %v1120_v56  ;;  %2338 = vmatpush.msrb.mxu3 %v1154_v57  ;;  %v2579_v38 = vld.sshfl [vmem:[#allocation1 + $0x10] sm:$0xff pattern:$0x73625140]  ;;  %v2581_v15 = vld.sshfl [vmem:[#allocation1 + $0x18] sm:$0xff pattern:$0x73625140]  ;;  %v1391_v40 = vpop.f32.mrf.mxu3 }
 0x1f7   : > { %2280 = vmatpush.msrb.mxu0 %v1054_v58  ;;  %2299 = vmatpush.msrb.mxu1 %v1088_v59  ;;  %v1431_v44 = vpop.f32.mrf.mxu1 }
 0x1f8   : > { %2320 = vmatpush.msrb.mxu2 %v1118_v60  ;;  %2339 = vmatpush.msrb.mxu3 %v1152_v1  ;;  %v1411_v0 = vpop.f32.mrf.mxu0 }
 0x1f9   : > { %2281 = vmatpush.msrb.mxu0 %v1052_v2  ;;  %2300 = vmatpush.msrb.mxu1 %v1086_v3 }
 0x1fa   : > { %2321 = vmatpush.msrb.mxu2 %v1116_v4  ;;  %2340 = vmatpush.msrb.mxu3 %v1150_v5 }
 0x1fb   : > { %2282 = vmatpush.msrb.mxu0 %v1050_v6  ;;  %2301 = vmatpush.msrb.mxu1 %v1084_v7  ;;  %v1451_v49 = vpop.f32.mrf.mxu2 }
 0x1fc   : > { %2322 = vmatpush.msrb.mxu2 %v1114_v8  ;;  %2341 = vmatpush.msrb.mxu3 %v1148_v11 }
 0x1fd   : > { %2283 = vmatpush.msrb.mxu0 %v1048_v12  ;;  %2302 = vmatpush.msrb.mxu1 %v1082_v13  ;;  %v1272_v12 = vadd.f32 %v3777_v29, %v3783_v27 }
 0x1fe   : > { %2323 = vmatpush.msrb.mxu2 %v1112_v14  ;;  %2342 = vmatpush.msrb.mxu3 %v1146_v17  ;;  %v1471_v51 = vpop.f32.mrf.mxu3 }
 0x1ff   : > { %2284 = vmatpush.msrb.mxu0 %v1046_v45  ;;  %2303 = vmatpush.msrb.mxu1 %v1080_v18  ;;  %v1511_v52 = vpop.f32.mrf.mxu1  ;;  %v1292_v17 = vadd.f32 %v1291_v28, %v1272_v12 }
 0x200   : > { %2324 = vmatpush.msrb.mxu2 %v1110_v19  ;;  %2343 = vmatpush.msrb.mxu3 %v1144_v20  ;;  %v1491_v53 = vpop.f32.mrf.mxu0 }
 0x201   : > { %2285 = vmatpush.msrb.mxu0 %v1044_v46  ;;  %2304 = vmatpush.msrb.mxu1 %v1078_v21  ;;  %v1312_v19 = vadd.f32 %v1311_v10, %v1292_v17 }
 0x202   : > { %2325 = vmatpush.msrb.mxu2 %v1108_v47  ;;  %2344 = vmatpush.msrb.mxu3 %v1142_v22 }
 0x203   : > { %2286 = vmatpush.msrb.mxu0 %v1042_v23  ;;  %2305 = vmatpush.msrb.mxu1 %v1076_v24  ;;  %v1531_v54 = vpop.f32.mrf.mxu2  ;;  %v1332_v21 = vadd.f32 %v1331_v16, %v1312_v19 }
 0x204   : > { %2326 = vmatpush.msrb.mxu2 %v1106_v25  ;;  %2345 = vmatpush.msrb.mxu3 %v1140_v48 }
 0x205   : > { %2287 = vmatpush.msrb.mxu0 %v1040_v30  ;;  %2306 = vmatpush.msrb.mxu1 %v1074_v32  ;;  %v1352_v23 = vadd.f32 %v1351_v43, %v1332_v21 }
 0x206   : > { %2327 = vmatpush.msrb.mxu2 %v1104_v33  ;;  %2346 = vmatpush.msrb.mxu3 %v1138_v26  ;;  %v1551_v55 = vpop.f32.mrf.mxu3 }
 0x207   : > { %2288 = vmatpush.msrb.mxu0 %v1038_v61  ;;  %2307 = vmatpush.msrb.mxu1 %v1072_v34  ;;  %v3795_v56 = vpop.f32.mrf.mxu1  ;;  %v1372_v48 = vadd.f32 %v1371_v39, %v1352_v23 }
 0x208   : > { %2328 = vmatpush.msrb.mxu2 %v1102_v35  ;;  %2347 = vmatpush.msrb.mxu3 %v1136_v36  ;;  %v1571_v57 = vpop.f32.mrf.mxu0 }
 0x209   : > { %2289 = vmatpush.msrb.mxu0 %v1036_v31  ;;  %2308 = vmatpush.msrb.mxu1 %v1070_v41  ;;  %v1392_v26 = vadd.f32 %v1391_v40, %v1372_v48 }
 0x20a   : > { %2329 = vmatpush.msrb.mxu2 %v1100_v42  ;;  %2348 = vmatpush.msrb.mxu3 %v1134_v62 }
 0x20b   : > { %2290 = vmatmul.f32.vlgmr.msrb.gmra.mxu0 %v2578_v63  ;;  %2330 = vmatmul.f32.vlgmr.msrb.gmra.mxu2 %v2579_v38  ;;  %v3797_v58 = vpop.f32.mrf.mxu2  ;;  %v1412_v27 = vadd.f32 %v1411_v0, %v1392_v26 }
 0x20c   : > { %2309 = vmatpush.msrb.mxu1 %v1068_v37  ;;  %2349 = vmatpush.msrb.mxu3 %v1132_v9 }
 0x20d   : > { %2310 = vmatmul.f32.vlgmr.msrb.gmra.mxu1 %v2580_v50  ;;  %2350 = vmatmul.f32.vlgmr.msrb.gmra.mxu3 %v2581_v15  ;;  %v1432_v36 = vadd.f32 %v1431_v44, %v1412_v27  ;;  %v259_v27 = vld [vmem:[#allocation2] sm:$0xf] }
 0x20e   : > { %v3799_v59 = vpop.f32.mrf.mxu3 }
 0x20f   : > { %v3801_v60 = vpop.f32.mrf.mxu1  ;;  %v1452_v31 = vadd.f32 %v1451_v49, %v1432_v36 }
 0x210   : > { %v3803_v1 = vpop.f32.mrf.mxu0 }
 0x211   : > { %v1472_v37 = vadd.f32 %v1471_v51, %v1452_v31 }
 0x213   : > { %v3805_v2 = vpop.f32.mrf.mxu2  ;;  %v1492_v10 = vadd.f32 %v1491_v53, %v1472_v37 }
 0x215   : > { %v1512_v50 = vadd.f32 %v1511_v52, %v1492_v10 }
 0x216   : > { %v3807_v3 = vpop.f32.mrf.mxu3 }
 0x217   : > { %v3809_v4 = vpop.f32.mrf.mxu1  ;;  %v1532_v16 = vadd.f32 %v1531_v54, %v1512_v50 }
 0x218   : > { %v3811_v5 = vpop.f32.mrf.mxu0 }
 0x21b   : > { %v3813_v6 = vpop.f32.mrf.mxu2 }
 0x21e   : > { %v3815_v7 = vpop.f32.mrf.mxu3 }
 0x21f   : > { %v1831_v8 = vpop.f32.mrf.mxu1 }
 0x220   : > { %v1811_v11 = vpop.f32.mrf.mxu0 }
 0x221   : > { %v1832_v13 = vadd.f32 %v1831_v8, %v1811_v11  ;;  %v1552_v8 = vadd.f32 %v1551_v55, %v1532_v16 }
 0x223   : > { %v1851_v14 = vpop.f32.mrf.mxu2  ;;  %v1572_v44 = vadd.f32 %v1571_v57, %v1552_v8 }
 0x224   : > { %v1852_v45 = vadd.f32 %v1851_v14, %v1832_v13 }
 0x225   : > { %v1592_v14 = vadd.f32 %v3795_v56, %v1572_v44 }
 0x226   : > { %v1871_v18 = vpop.f32.mrf.mxu3 }
 0x227   : > { %v1872_v20 = vadd.f32 %v1871_v18, %v1852_v45  ;;  %v1911_v22 = vpop.f32.mrf.mxu1  ;;  %v1612_v53 = vadd.f32 %v3797_v58, %v1592_v14 }
 0x228   : > { %v1891_v46 = vpop.f32.mrf.mxu0 }
 0x229   : > { %v1892_v47 = vadd.f32 %v1891_v46, %v1872_v20  ;;  %v1632_v52 = vadd.f32 %v3799_v59, %v1612_v53 }
 0x22b   : > { %v1912_v24 = vadd.f32 %v1911_v22, %v1892_v47  ;;  %v1931_v25 = vpop.f32.mrf.mxu2  ;;  %v1652_v19 = vadd.f32 %v3803_v1, %v1632_v52 }
 0x22d   : > { %v1932_v30 = vadd.f32 %v1931_v25, %v1912_v24  ;;  %v1672_v57 = vadd.f32 %v3801_v60, %v1652_v19 }
 0x22e   : > { %v1951_v32 = vpop.f32.mrf.mxu3 }
 0x22f   : > { %v1952_v29 = vadd.f32 %v1951_v32, %v1932_v30  ;;  %v1991_v34 = vpop.f32.mrf.mxu1  ;;  %v1692_v47 = vadd.f32 %v3805_v2, %v1672_v57 }
 0x230   : > { %v1971_v33 = vpop.f32.mrf.mxu0 }
 0x231   : > { %v1972_v61 = vadd.f32 %v1971_v33, %v1952_v29  ;;  %v1712_v58 = vadd.f32 %v3807_v3, %v1692_v47 }
 0x233   : > { %v2011_v35 = vpop.f32.mrf.mxu2  ;;  %v1992_v28 = vadd.f32 %v1991_v34, %v1972_v61  ;;  %v1732_v25 = vadd.f32 %v3811_v5, %v1712_v58 }
 0x235   : > { %v2012_v41 = vadd.f32 %v2011_v35, %v1992_v28  ;;  %v1752_v1 = vadd.f32 %v3809_v4, %v1732_v25 }
 0x236   : > { %v2031_v42 = vpop.f32.mrf.mxu3 }
 0x237   : > { %v2032_v9 = vadd.f32 %v2031_v42, %v2012_v41  ;;  %v2071_v38 = vpop.f32.mrf.mxu1  ;;  %v1772_v33 = vadd.f32 %v3813_v6, %v1752_v1 }
 0x238   : > { %v2051_v62 = vpop.f32.mrf.mxu0 }
 0x239   : > { %v2052_v63 = vadd.f32 %v2051_v62, %v2032_v9  ;;  %v1792_v2 = vadd.f32 %v3815_v7, %v1772_v33 }
 0x23b   : > { %v2091_v43 = vpop.f32.mrf.mxu2  ;;  %v2072_v15 = vadd.f32 %v2071_v38, %v2052_v63 }
 0x23d   : > { %v2092_v39 = vadd.f32 %v2091_v43, %v2072_v15 }
 0x23e   : > { %v2111_v40 = vpop.f32.mrf.mxu3 }
 0x23f   : > { %v2112_v11 = vadd.f32 %v2111_v40, %v2092_v39 }
 0x244   : > { %v2131_v0 = vpop.f32.mrf.mxu0 }
 0x245   : > { %v2132_v12 = vadd.f32 %v2131_v0, %v2112_v11 }
 0x247   : > { %v2151_v49 = vpop.f32.mrf.mxu1 }
 0x248   : > { %v2152_v51 = vadd.f32 %v2151_v49, %v2132_v12 }
 0x24a   : > { %v2171_v13 = vpop.f32.mrf.mxu2 }
 0x24b   : > { %v2172_v17 = vadd.f32 %v2171_v13, %v2152_v51 }
 0x24d   : > { %v2191_v45 = vpop.f32.mrf.mxu3 }
 0x24e   : > { %v2192_v54 = vadd.f32 %v2191_v45, %v2172_v17 }
 0x266   : > { %v2211_v18 = vpop.f32.mrf.mxu0 }
 0x267   : > { %v2212_v20 = vadd.f32 %v2211_v18, %v2192_v54 }
 0x269   : > { %v2231_v55 = vpop.f32.mrf.mxu1 }
 0x26a   : > { %v2232_v21 = vadd.f32 %v2231_v55, %v2212_v20 }
 0x26c   : > { %v2251_v46 = vpop.f32.mrf.mxu2 }
 0x26d   : > { %v2252_v56 = vadd.f32 %v2251_v46, %v2232_v21 }
 0x26f   : > { %v2271_v22 = vpop.f32.mrf.mxu3 }
 0x270   : > { %v2272_v23 = vadd.f32 %v2271_v22, %v2252_v56 }
 0x288   : > { %v2291_v24 = vpop.f32.mrf.mxu0 }
 0x289   : > { %v2292_v59 = vadd.f32 %v2291_v24, %v2272_v23 }
 0x28a   : > { %v2311_v48 = vpop.f32.mrf.mxu1 }
 0x28b   : > { %v2312_v30 = vadd.f32 %v2311_v48, %v2292_v59 }
 0x28e   : > { %v2331_v32 = vpop.f32.mrf.mxu2 }
 0x28f   : > { %v2332_v60 = vadd.f32 %v2331_v32, %v2312_v30 }
 0x290   : > { %v2351_v26 = vpop.f32.mrf.mxu3 }
 0x291   : > { %v2352_v29 = vadd.f32 %v2351_v26, %v2332_v60 }
 0x293   : > { %v2356_v3 = vrot.slane %v2352_v29, 6 }
 0x294   : > { %2365 = sbr.rel (%p2493_p3) target bundleno = 677 (0x2a5), region = 44 }
 0x295   : > { %v2358_v61 = vsel %vm2357_vm0, %v1792_v2, %v2356_v3 }
 0x296   : > { %v2360_v34 = vadd.f32 %v2358_v61, %v259_v27 }
 0x298   : > { %2361 = vst [vmem:[#allocation2] sm:$0xf] %v2360_v34 }
 0x299   : > { %v2367_v4 = vld [vmem:[%s246_s9] sm:$0x3] }
 0x29a   : > { %v2369_v5 = vperm.slane %v2367_v4, 0  ;;  %v2370_v6 = vperm.slane %v2367_v4, 1 }
 0x29c   : > { %v2371_v36 = vrot.slane %v2370_v6, 6 }
 0x29e   : > { %v2372_v7 = vsel %vm2357_vm0, %v2369_v5, %v2371_v36 }
 0x29f   : > { %v2366_v35 = vld [vmem:[#allocation2] sm:$0xf] }
 0x2a0   : > { %v2374_v28 = vadd.f32 %v2372_v7, %v2366_v35 }
 0x2a2   : > { %v2375_v31 = vmax.f32 %v2374_v28, 0.0 }
 0x2a4   : > { %2376 = vst [vmem:[%s2800_s20] sm:$0xf] %v2375_v31 }
 0x2a5 PF: > { %s16_s19 = sadd.s32 1, %s2678_s19   ;;  %s3869_s25 = sld [smem:[#allocation6_spill]] }
 0x2a6   : > { %p13_p4 = scmp.ge.s32.totalorder %s16_s19, 58   ;;  %s3870_s12 = smov %s2654_s13 }
 0x2a7   : > { %s3871_s13 = smov %s2658_s14  ;;  %s3872_s14 = smov %s2771_s5 }
 0x2a8   : > { %s3873_s15 = smov %s2670_s17  ;;  %s3874_s16 = smov %s2674_s18 }
 0x2a9   : > { %s3875_s17 = smov %s3878_s21  ;;  %15 = sbr.rel (!%p13_p4) target bundleno = 5 (0x5), region = 87 }
 0x2ab   : > { %s3876_s18 = smov %s3869_s25 }
 0x2ae   :  { %2399 = vsyncpa [#allocation4], 1 }
 0x2af   :  { %2401 = vsyncpa [#allocation4 + $0x1], 1 }

// kernel: cnn_forward.9
= control target key start
LH: loop header
LB: loop body
LE: loop exit
PB: predicated region body
PF: predicated region fallthrough
CT: control target
= control target key end

     0   :  { %s461_s0 = inlined_call_operand.vmem [shape: f32[2,512], index: 0, kind: input, shape index: {}]   ;;  %s462_s1 = inlined_call_operand.vmem [shape: f32[512,10], index: 1, kind: input, shape index: {}]   ;;  %s463_s2 = inlined_call_operand.vmem [shape: f32[1,10], index: 2, kind: input, shape index: {}]   ;;  %s464_s3 = inlined_call_operand.hbm [shape: f32[2,10], index: 3, kind: output, shape index: {}]  }
   0x1   :  { %v70_v0 = vld [vmem:[%s462_s1 + $0x178] sm:$0xff]  ;;  %v69_v1 = vld [vmem:[%s462_s1 + $0x170] sm:$0xff]  ;;  %v68_v5 = vld [vmem:[%s462_s1 + $0x168] sm:$0xff] }
   0x2   :  { %v86_v2 = vld [vmem:[%s462_s1 + $0x1f8] sm:$0xff]  ;;  %137 = vmatpush.msra.mxu2 %v70_v0  ;;  %v85_v6 = vld [vmem:[%s462_s1 + $0x1f0] sm:$0xff]  ;;  %v84_v9 = vld [vmem:[%s462_s1 + $0x1e8] sm:$0xff] }
   0x3   :  { %157 = vmatpush.msra.mxu3 %v86_v2  ;;  %v38_v3 = vld [vmem:[%s462_s1 + $0x78] sm:$0xff]  ;;  %v37_v7 = vld [vmem:[%s462_s1 + $0x70] sm:$0xff]  ;;  %v36_v10 = vld [vmem:[%s462_s1 + $0x68] sm:$0xff] }
   0x4   :  { %v54_v4 = vld [vmem:[%s462_s1 + $0xf8] sm:$0xff]  ;;  %97 = vmatpush.msra.mxu0 %v38_v3  ;;  %v53_v8 = vld [vmem:[%s462_s1 + $0xf0] sm:$0xff]  ;;  %138 = vmatpush.msra.mxu2 %v69_v1  ;;  %v67_v11 = vld [vmem:[%s462_s1 + $0x160] sm:$0xff] }
   0x5   :  { %117 = vmatpush.msra.mxu1 %v54_v4  ;;  %158 = vmatpush.msra.mxu3 %v85_v6  ;;  %v52_v12 = vld [vmem:[%s462_s1 + $0xe8] sm:$0xff]  ;;  %v83_v13 = vld [vmem:[%s462_s1 + $0x1e0] sm:$0xff]  ;;  %v66_v16 = vld [vmem:[%s462_s1 + $0x158] sm:$0xff] }
   0x6   :  { %98 = vmatpush.msra.mxu0 %v37_v7  ;;  %139 = vmatpush.msra.mxu2 %v68_v5  ;;  %v35_v14 = vld [vmem:[%s462_s1 + $0x60] sm:$0xff]  ;;  %v82_v17 = vld [vmem:[%s462_s1 + $0x1d8] sm:$0xff]  ;;  %v65_v20 = vld [vmem:[%s462_s1 + $0x150] sm:$0xff] }
   0x7   :  { %118 = vmatpush.msra.mxu1 %v53_v8  ;;  %159 = vmatpush.msra.mxu3 %v84_v9  ;;  %v51_v15 = vld [vmem:[%s462_s1 + $0xe0] sm:$0xff]  ;;  %v34_v18 = vld [vmem:[%s462_s1 + $0x58] sm:$0xff]  ;;  %v81_v21 = vld [vmem:[%s462_s1 + $0x1d0] sm:$0xff] }
   0x8   :  { %99 = vmatpush.msra.mxu0 %v36_v10  ;;  %140 = vmatpush.msra.mxu2 %v67_v11  ;;  %v50_v19 = vld [vmem:[%s462_s1 + $0xd8] sm:$0xff]  ;;  %v33_v22 = vld [vmem:[%s462_s1 + $0x50] sm:$0xff]  ;;  %v64_v24 = vld [vmem:[%s462_s1 + $0x148] sm:$0xff] }
   0x9   :  { %119 = vmatpush.msra.mxu1 %v52_v12  ;;  %160 = vmatpush.msra.mxu3 %v83_v13  ;;  %v49_v23 = vld [vmem:[%s462_s1 + $0xd0] sm:$0xff]  ;;  %v80_v25 = vld [vmem:[%s462_s1 + $0x1c8] sm:$0xff]  ;;  %v63_v28 = vld [vmem:[%s462_s1 + $0x140] sm:$0xff] }
   0xa   :  { %100 = vmatpush.msra.mxu0 %v35_v14  ;;  %141 = vmatpush.msra.mxu2 %v66_v16  ;;  %v32_v26 = vld [vmem:[%s462_s1 + $0x48] sm:$0xff]  ;;  %v79_v29 = vld [vmem:[%s462_s1 + $0x1c0] sm:$0xff]  ;;  %v62_v32 = vld [vmem:[%s462_s1 + $0x138] sm:$0xff] }
   0xb   :  { %120 = vmatpush.msra.mxu1 %v51_v15  ;;  %161 = vmatpush.msra.mxu3 %v82_v17  ;;  %v48_v27 = vld [vmem:[%s462_s1 + $0xc8] sm:$0xff]  ;;  %v31_v30 = vld [vmem:[%s462_s1 + $0x40] sm:$0xff]  ;;  %v78_v33 = vld [vmem:[%s462_s1 + $0x1b8] sm:$0xff] }
   0xc   :  { %101 = vmatpush.msra.mxu0 %v34_v18  ;;  %142 = vmatpush.msra.mxu2 %v65_v20  ;;  %v47_v31 = vld [vmem:[%s462_s1 + $0xc0] sm:$0xff]  ;;  %v30_v34 = vld [vmem:[%s462_s1 + $0x38] sm:$0xff]  ;;  %v61_v36 = vld [vmem:[%s462_s1 + $0x130] sm:$0xff] }
   0xd   :  { %121 = vmatpush.msra.mxu1 %v50_v19  ;;  %162 = vmatpush.msra.mxu3 %v81_v21  ;;  %v46_v35 = vld [vmem:[%s462_s1 + $0xb8] sm:$0xff]  ;;  %v77_v37 = vld [vmem:[%s462_s1 + $0x1b0] sm:$0xff]  ;;  %v60_v40 = vld [vmem:[%s462_s1 + $0x128] sm:$0xff] }
   0xe   :  { %102 = vmatpush.msra.mxu0 %v33_v22  ;;  %143 = vmatpush.msra.mxu2 %v64_v24  ;;  %v29_v38 = vld [vmem:[%s462_s1 + $0x30] sm:$0xff]  ;;  %v76_v41 = vld [vmem:[%s462_s1 + $0x1a8] sm:$0xff]  ;;  %v22_v44 = vld [vmem:[%s461_s0] sm:$0xff] }
   0xf   :  { %122 = vmatpush.msra.mxu1 %v49_v23  ;;  %163 = vmatpush.msra.mxu3 %v80_v25  ;;  %v45_v39 = vld [vmem:[%s462_s1 + $0xb0] sm:$0xff]  ;;  %v28_v42 = vld [vmem:[%s462_s1 + $0x28] sm:$0xff]  ;;  %v59_v45 = vld [vmem:[%s462_s1 + $0x120] sm:$0xff]  ;;  %88 = vst [vmem:[#allocation1] ss:$4 sm:$0xff] %v22_v44 }
  0x10   :  { %103 = vmatpush.msra.mxu0 %v32_v26  ;;  %144 = vmatpush.msra.mxu2 %v63_v28  ;;  %v44_v43 = vld [vmem:[%s462_s1 + $0xa8] sm:$0xff]  ;;  %v75_v46 = vld [vmem:[%s462_s1 + $0x1a0] sm:$0xff] }
  0x11   :  { %123 = vmatpush.msra.mxu1 %v48_v27  ;;  %164 = vmatpush.msra.mxu3 %v79_v29  ;;  %v27_v47 = vld [vmem:[%s462_s1 + $0x20] sm:$0xff] }
  0x12   :  { %104 = vmatpush.msra.mxu0 %v31_v30  ;;  %145 = vmatpush.msra.mxu2 %v62_v32  ;;  %v43_v48 = vld [vmem:[%s462_s1 + $0xa0] sm:$0xff] }
  0x13   :  { %124 = vmatpush.msra.mxu1 %v47_v31  ;;  %165 = vmatpush.msra.mxu3 %v78_v33 }
  0x14   :  { %105 = vmatpush.msra.mxu0 %v30_v34  ;;  %146 = vmatpush.msra.mxu2 %v61_v36 }
  0x15   :  { %125 = vmatpush.msra.mxu1 %v46_v35  ;;  %166 = vmatpush.msra.mxu3 %v77_v37 }
  0x16   :  { %106 = vmatpush.msra.mxu0 %v29_v38  ;;  %147 = vmatpush.msra.mxu2 %v60_v40 }
  0x17   :  { %126 = vmatpush.msra.mxu1 %v45_v39  ;;  %167 = vmatpush.msra.mxu3 %v76_v41 }
  0x18   :  { %8 = vsyncpa [#allocation4], 0  ;;  %107 = vmatpush.msra.mxu0 %v28_v42  ;;  %v58_v49 = vld [vmem:[%s462_s1 + $0x118] sm:$0xff]  ;;  %148 = vmatpush.msra.mxu2 %v59_v45  ;;  %v57_v53 = vld [vmem:[%s462_s1 + $0x110] sm:$0xff]  ;;  %vm19_vm0 = vcmask 74752   ;;  %v235_v5 = vmov 0.0  }
  0x19   :  { %127 = vmatpush.msra.mxu1 %v44_v43  ;;  %v74_v50 = vld [vmem:[%s462_s1 + $0x198] sm:$0xff]  ;;  %168 = vmatpush.msra.mxu3 %v75_v46  ;;  %v73_v54 = vld [vmem:[%s462_s1 + $0x190] sm:$0xff]  ;;  %v56_v57 = vld [vmem:[%s462_s1 + $0x108] sm:$0xff]  ;;  %20 = vst.msk [vmem:[#allocation2] sm:$0x3] %vm19_vm0, %v235_v5  ;;  %s236_s6 = smov [#allocation3]  }
  0x1a   :  { %v26_v51 = vld [vmem:[%s462_s1 + $0x18] sm:$0xff]  ;;  %108 = vmatpush.msra.mxu0 %v27_v47  ;;  %149 = vmatpush.msra.mxu2 %v58_v49  ;;  %v25_v55 = vld [vmem:[%s462_s1 + $0x10] sm:$0xff]  ;;  %v72_v58 = vld [vmem:[%s462_s1 + $0x188] sm:$0xff]  ;;  %s195_s7 = sshll.u32 %s236_s6, 4  ;;  %s197_s10 = sshll.u32 %s464_s3, 4  ;;  %s196_s7 = int_to_ptr.vmem [resolvable:$true] %s195_s7  ;;  %s198_s10 = int_to_ptr.hbm [resolvable:$true] %s197_s10 }
  0x1b   :  { %v42_v52 = vld [vmem:[%s462_s1 + $0x98] sm:$0xff]  ;;  %128 = vmatpush.msra.mxu1 %v43_v48  ;;  %169 = vmatpush.msra.mxu3 %v74_v50  ;;  %v41_v56 = vld [vmem:[%s462_s1 + $0x90] sm:$0xff]  ;;  %v24_v59 = vld [vmem:[%s462_s1 + $0x8] sm:$0xff] }
  0x1c   :  { %109 = vmatpush.msra.mxu0 %v26_v51  ;;  %150 = vmatpush.msra.mxu2 %v57_v53  ;;  %v40_v60 = vld [vmem:[%s462_s1 + $0x88] sm:$0xff]  ;;  %v55_v61 = vld [vmem:[%s462_s1 + $0x100] sm:$0xff]  ;;  %v91_v63 = vld.sshfl [vmem:[#allocation1 + $0x10] sm:$0xff pattern:$0x73625140] }
  0x1d   :  { %129 = vmatpush.msra.mxu1 %v42_v52  ;;  %170 = vmatpush.msra.mxu3 %v73_v54  ;;  %v71_v62 = vld [vmem:[%s462_s1 + $0x180] sm:$0xff]  ;;  %v92_v0 = vld.sshfl [vmem:[#allocation1 + $0x18] sm:$0xff pattern:$0x73625140] }
  0x1e   :  { %110 = vmatpush.msra.mxu0 %v25_v55  ;;  %151 = vmatpush.msra.mxu2 %v56_v57  ;;  %v23_v1 = vld [vmem:[%s462_s1] sm:$0xff]  ;;  %v90_v4 = vld.sshfl [vmem:[#allocation1 + $0x8] sm:$0xff pattern:$0x73625140] }
  0x1f   :  { %130 = vmatpush.msra.mxu1 %v41_v56  ;;  %171 = vmatpush.msra.mxu3 %v72_v58  ;;  %v39_v2 = vld [vmem:[%s462_s1 + $0x80] sm:$0xff] }
  0x20   :  { %111 = vmatpush.msra.mxu0 %v24_v59  ;;  %152 = vmatpush.msra.mxu2 %v55_v61  ;;  %v89_v3 = vld.sshfl [vmem:[#allocation1] sm:$0xff pattern:$0x73625140]  ;;  %v21_v12 = vld [vmem:[#allocation2] sm:$0x3] }
  0x21   :  { %131 = vmatpush.msra.mxu1 %v40_v60  ;;  %172 = vmatpush.msra.mxu3 %v71_v62  ;;  %v208_v15 = vld [vmem:[%s463_s2] ss:$0 sm:$0xff] }
  0x22   :  { %153 = vmatmul.f32.vlgmr.msra.gmra.mxu2 %v91_v63  ;;  %173 = vmatmul.f32.vlgmr.msra.gmra.mxu3 %v92_v0 }
  0x23   :  { %112 = vmatpush.msra.mxu0 %v23_v1  ;;  %132 = vmatpush.msra.mxu1 %v39_v2 }
  0x24   :  { %113 = vmatmul.f32.vlgmr.msra.gmra.mxu0 %v89_v3  ;;  %133 = vmatmul.f32.vlgmr.msra.gmra.mxu1 %v90_v4 }
  0xa1   :  { %v114_v6 = vpop.f32.mrf.mxu0  ;;  %v134_v7 = vpop.f32.mrf.mxu1 }
  0xa2   :  { %v135_v8 = vadd.f32 %v134_v7, %v114_v6 }
  0xa5   :  { %v154_v9 = vpop.f32.mrf.mxu2  ;;  %v174_v10 = vpop.f32.mrf.mxu3 }
  0xa6   :  { %v155_v11 = vadd.f32 %v154_v9, %v135_v8 }
  0xa8   :  { %v175_v13 = vadd.f32 %v174_v10, %v155_v11 }
  0xaa   :  { %v177_v14 = vadd.f32 %v175_v13, %v21_v12 }
  0xac   :  { %179 = vst.msk [vmem:[#allocation2] sm:$0x3] %vm19_vm0, %v177_v14 }
  0xb3   :  { %v183_v16 = vld [vmem:[#allocation2] sm:$0x3] }
  0xb4   :  { %v188_v17 = vadd.f32 %v208_v15, %v183_v16 }
  0xb6   :  { %189 = vst.msk [vmem:[#allocation3] sm:$0x3] %vm19_vm0, %v188_v17 }
  0xb7   :  { %200 = dma.vmem_to_hbm [thread:$0]  %s196_s7, 32, %s198_s10, [#allocation4]  }
  0xb8   :  { %233 = dma.done.wait [#allocation4], 32  }
  0xb9   :  { %234 = vsyncadd [#allocation4], 4294967264 }
  0xba   :  { %205 = vsyncpa [#allocation4], 1 }

</bundles_post_ra>
